<compile_context>
chip_gen: v7x
topology: tpu7x:2x2x1
jax: 0.10.0
libtpu: 0.0.40
codegen_flags: <defaults>
</compile_context>

<pallas_src>
import functools

import jax
import jax.numpy as jnp
import numpy as np
from jax import lax
from jax.experimental import pallas as pl
from jax.experimental.pallas import tpu as pltpu


# ---------------------------------------------------------------------------
# Fused BiRNN Pallas kernel
# ---------------------------------------------------------------------------
def _make_birnn_kernel(num_layers, T, B, E, H):
    """Builds a kernel: emb (T,B,E) + all LSTM/decoder weights -> logits (B,2)."""

    def kernel(*refs):
        emb_ref = refs[0]
        lstm_refs = refs[1:1 + 6 * num_layers]          # per (layer, dir): wih_t, whh_stack, bias
        decw_ref = refs[1 + 6 * num_layers]             # (4H, 2)
        decb_ref = refs[2 + 6 * num_layers]             # (1, 2)
        out_ref = refs[3 + 6 * num_layers]              # (B, 2)

        def run_direction(x2d, wih_ref, whh_ref, b_ref, reverse):
            # Hoisted input projection for ALL timesteps: one tall matmul.
            xproj = (
                jnp.dot(x2d, wih_ref[...], preferred_element_type=jnp.float32)
                + b_ref[...]
            )                                            # (T*B, 4H)
            # Split once into per-gate (T, B, H) slabs -> no per-step lane slicing.
            xp = [xproj[:, g * H:(g + 1) * H].reshape(T, B, H) for g in range(4)]
            # Per-gate recurrent weights via leading-dim select (free).
            whh = [whh_ref[g] for g in range(4)]         # each (H, H)

            h = jnp.zeros((B, H), jnp.float32)
            c = jnp.zeros((B, H), jnp.float32)
            hs = [None] * T
            # Statically unrolled time loop; reversal is index math, not a data copy.
            # TODO(synk): for long sequences switch to lax.fori_loop over a VMEM
            # scratch instead of full unrolling.
            order = range(T - 1, -1, -1) if reverse else range(T)
            for t in order:
                i_g = jax.nn.sigmoid(
                    xp[0][t] + jnp.dot(h, whh[0], preferred_element_type=jnp.float32))
                f_g = jax.nn.sigmoid(
                    xp[1][t] + jnp.dot(h, whh[1], preferred_element_type=jnp.float32))
                g_g = jnp.tanh(
                    xp[2][t] + jnp.dot(h, whh[2], preferred_element_type=jnp.float32))
                o_g = jax.nn.sigmoid(
                    xp[3][t] + jnp.dot(h, whh[3], preferred_element_type=jnp.float32))
                c = f_g * c + i_g * g_g
                h = o_g * jnp.tanh(c)
                hs[t] = h
            return hs

        # Layer 0 input: embedded tokens, flattened to (T*B, E).
        x2d = emb_ref[...].reshape(T * B, E)

        hs_f = hs_b = None
        for l in range(num_layers):
            base = 6 * l
            wih_f, whh_f, b_f = lstm_refs[base + 0], lstm_refs[base + 1], lstm_refs[base + 2]
            wih_b, whh_b, b_b = lstm_refs[base + 3], lstm_refs[base + 4], lstm_refs[base + 5]

            hs_f = run_direction(x2d, wih_f, whh_f, b_f, reverse=False)
            hs_b = run_direction(x2d, wih_b, whh_b, b_b, reverse=True)

            if l + 1 < num_layers:
                fwd_seq = jnp.concatenate([h[None] for h in hs_f], axis=0)   # (T, B, H)
                bwd_seq = jnp.concatenate([h[None] for h in hs_b], axis=0)   # (T, B, H)
                x2d = jnp.concatenate([fwd_seq, bwd_seq], axis=-1).reshape(T * B, 2 * H)

        # encoding = cat(outputs[0], outputs[-1]) = [hf[0], hb[0], hf[T-1], hb[T-1]]
        encoding = jnp.concatenate(
            [hs_f[0], hs_b[0], hs_f[T - 1], hs_b[T - 1]], axis=-1)           # (B, 4H)
        out = (
            jnp.dot(encoding, decw_ref[...], preferred_element_type=jnp.float32)
            + decb_ref[...]
        )
        out_ref[...] = out.astype(out_ref.dtype)

    return kernel


def _full_block(shape):
    """Whole-array block for a grid=(1,) pallas_call."""
    zeros = (0,) * len(shape)
    return pl.BlockSpec(shape, lambda i, _z=zeros: _z)


# ---------------------------------------------------------------------------
# Weight preparation (done ONCE, outside the per-call jitted forward)
# ---------------------------------------------------------------------------
def prepare_kernel_params(params, num_layers, num_hiddens):
    """Pre-transpose / pre-combine weights into the layout the kernel expects."""
    H = num_hiddens
    kp = {"emb_table": params["embedding"]}
    flat = []
    for l in range(num_layers):
        for suffix in ("", "_rev"):
            w_ih = params[f"w_ih_l{l}{suffix}"]          # (4H, I)
            w_hh = params[f"w_hh_l{l}{suffix}"]          # (4H, H)
            bias = params[f"b_ih_l{l}{suffix}"] + params[f"b_hh_l{l}{suffix}"]
            flat.append(jnp.transpose(w_ih))                                  # (I, 4H)
            flat.append(jnp.transpose(w_hh.reshape(4, H, H), (0, 2, 1)))      # (4, H, H)
            flat.append(bias.reshape(1, 4 * H))                               # (1, 4H)
    kp["lstm"] = tuple(flat)
    kp["dec_w_t"] = jnp.transpose(params["dec_w"])       # (4H, 2)
    kp["dec_b"] = params["dec_b"].reshape(1, 2)          # (1, 2)
    return kp


# ---------------------------------------------------------------------------
# Forward pass: XLA does only the embedding gather; one fused Pallas call.
# ---------------------------------------------------------------------------
def birnn_forward(kparams, inputs, num_layers, num_hiddens):
    emb = kparams["emb_table"][inputs]                   # (B, T, E)  -- gather glue
    x = jnp.transpose(emb, (1, 0, 2)).astype(jnp.float32)  # (T, B, E)
    T, B, E = x.shape
    H = num_hiddens

    args = (x,) + kparams["lstm"] + (kparams["dec_w_t"], kparams["dec_b"])
    in_specs = [_full_block(a.shape) for a in args]

    kernel = _make_birnn_kernel(num_layers, T, B, E, H)
    out = pl.pallas_call(
        kernel,
        out_shape=jax.ShapeDtypeStruct((B, 2), jnp.float32),
        grid_spec=pltpu.PrefetchScalarGridSpec(
            num_scalar_prefetch=0,
            grid=(1,),
            in_specs=in_specs,
            out_specs=_full_block((B, 2)),
        ),
        compiler_params=pltpu.CompilerParams(
            dimension_semantics=("arbitrary",),
        ),
    )(*args)
    return out


# ---------------------------------------------------------------------------
# Pure-JAX reference (for correctness check)
# ---------------------------------------------------------------------------
def _lstm_layer_ref(x, w_ih, w_hh, b_ih, b_hh):
    T, B, _ = x.shape
    H = w_hh.shape[1]

    def step(carry, x_t):
        h, c = carry
        gates = x_t @ w_ih.T + b_ih + h @ w_hh.T + b_hh
        i, f, g, o = jnp.split(gates, 4, axis=-1)
        i = jax.nn.sigmoid(i)
        f = jax.nn.sigmoid(f)
        g = jnp.tanh(g)
        o = jax.nn.sigmoid(o)
        c = f * c + i * g
        h = o * jnp.tanh(c)
        return (h, c), h

    init = (jnp.zeros((B, H), jnp.float32), jnp.zeros((B, H), jnp.float32))
    _, ys = lax.scan(step, init, x)
    return ys


def birnn_forward_ref(params, inputs, num_layers):
    emb = params["embedding"][inputs]
    x = jnp.transpose(emb, (1, 0, 2))
    for l in range(num_layers):
        fwd = _lstm_layer_ref(
            x, params[f"w_ih_l{l}"], params[f"w_hh_l{l}"],
            params[f"b_ih_l{l}"], params[f"b_hh_l{l}"])
        bwd = _lstm_layer_ref(
            x[::-1], params[f"w_ih_l{l}_rev"], params[f"w_hh_l{l}_rev"],
            params[f"b_ih_l{l}_rev"], params[f"b_hh_l{l}_rev"])[::-1]
        x = jnp.concatenate([fwd, bwd], axis=-1)
    encoding = jnp.concatenate([x[0], x[-1]], axis=-1)
    return encoding @ params["dec_w"].T + params["dec_b"]


# ---------------------------------------------------------------------------
# Deterministic parameter init (shapes mirror the nn.Module __init__)
# ---------------------------------------------------------------------------
def init_params(key, vocab_size, embed_size, num_hiddens, num_layers):
    params = {}
    keys = iter(jax.random.split(key, 64))

    # nn.Embedding default: N(0, 1)
    params["embedding"] = jax.random.normal(
        next(keys), (vocab_size, embed_size), jnp.float32)

    k = 1.0 / np.sqrt(num_hiddens)
    for l in range(num_layers):
        in_size = embed_size if l == 0 else 2 * num_hiddens
        for suffix in ("", "_rev"):
            params[f"w_ih_l{l}{suffix}"] = jax.random.uniform(
                next(keys), (4 * num_hiddens, in_size), jnp.float32, -k, k)
            params[f"w_hh_l{l}{suffix}"] = jax.random.uniform(
                next(keys), (4 * num_hiddens, num_hiddens), jnp.float32, -k, k)
            params[f"b_ih_l{l}{suffix}"] = jax.random.uniform(
                next(keys), (4 * num_hiddens,), jnp.float32, -k, k)
            params[f"b_hh_l{l}{suffix}"] = jax.random.uniform(
                next(keys), (4 * num_hiddens,), jnp.float32, -k, k)

    kd = 1.0 / np.sqrt(4 * num_hiddens)
    params["dec_w"] = jax.random.uniform(
        next(keys), (2, 4 * num_hiddens), jnp.float32, -kd, kd)
    params["dec_b"] = jax.random.uniform(
        next(keys), (2,), jnp.float32, -kd, kd)
    return params


if __name__ == "__main__":
    # small shapes consistent with the module's forward
    batch, seq_len = 2, 8
    vocab_size, embed_size, num_hiddens, num_layers = 50, 32, 32, 2

    key = jax.random.PRNGKey(0)
    pkey, ikey = jax.random.split(key)
    params = init_params(pkey, vocab_size, embed_size, num_hiddens, num_layers)

    inputs = jax.random.randint(ikey, (batch, seq_len), 0, vocab_size, jnp.int32)

    # One-time weight layout prep (outside the jitted per-call path).
    kparams = prepare_kernel_params(params, num_layers, num_hiddens)

    fwd = jax.jit(functools.partial(
        birnn_forward, num_layers=num_layers, num_hiddens=num_hiddens))
    out = fwd(kparams, inputs)
    out = jax.block_until_ready(out)

    ref = birnn_forward_ref(params, inputs, num_layers)
    np.testing.assert_allclose(np.asarray(out), np.asarray(ref),
                               rtol=1e-3, atol=1e-3)
    assert out.shape == (batch, 2)

    print("KERNEL_OK")
</pallas_src>

<mosaic_0001>
module attributes {stable_mosaic.version = 11 : i64} {
  func.func @kernel(%arg0: i32, %arg1: memref<8x2x32xf32, #tpu.memory_space<vmem>>, %arg2: memref<32x128xf32, #tpu.memory_space<vmem>>, %arg3: memref<4x32x32xf32, #tpu.memory_space<vmem>>, %arg4: memref<1x128xf32, #tpu.memory_space<vmem>>, %arg5: memref<32x128xf32, #tpu.memory_space<vmem>>, %arg6: memref<4x32x32xf32, #tpu.memory_space<vmem>>, %arg7: memref<1x128xf32, #tpu.memory_space<vmem>>, %arg8: memref<64x128xf32, #tpu.memory_space<vmem>>, %arg9: memref<4x32x32xf32, #tpu.memory_space<vmem>>, %arg10: memref<1x128xf32, #tpu.memory_space<vmem>>, %arg11: memref<64x128xf32, #tpu.memory_space<vmem>>, %arg12: memref<4x32x32xf32, #tpu.memory_space<vmem>>, %arg13: memref<1x128xf32, #tpu.memory_space<vmem>>, %arg14: memref<128x2xf32, #tpu.memory_space<vmem>>, %arg15: memref<1x2xf32, #tpu.memory_space<vmem>>, %arg16: memref<2x2xf32, #tpu.memory_space<vmem>>) attributes {dimension_semantics = [#tpu.dimension_semantics<arbitrary>], iteration_bounds = array<i64: 1>, scalar_prefetch = 0 : i64, scratch_operands = 0 : i64, tpu.core_type = #tpu.core_type<tc>, window_params = [{pipeline_mode = #tpu.pipeline_mode<synchronous>, transform_indices = @transform_0, window_bounds = array<i64: 8, 2, 32>}, {pipeline_mode = #tpu.pipeline_mode<synchronous>, transform_indices = @transform_1, window_bounds = array<i64: 32, 128>}, {pipeline_mode = #tpu.pipeline_mode<synchronous>, transform_indices = @transform_2, window_bounds = array<i64: 4, 32, 32>}, {pipeline_mode = #tpu.pipeline_mode<synchronous>, transform_indices = @transform_3, window_bounds = array<i64: 1, 128>}, {pipeline_mode = #tpu.pipeline_mode<synchronous>, transform_indices = @transform_4, window_bounds = array<i64: 32, 128>}, {pipeline_mode = #tpu.pipeline_mode<synchronous>, transform_indices = @transform_5, window_bounds = array<i64: 4, 32, 32>}, {pipeline_mode = #tpu.pipeline_mode<synchronous>, transform_indices = @transform_6, window_bounds = array<i64: 1, 128>}, {pipeline_mode = #tpu.pipeline_mode<synchronous>, transform_indices = @transform_7, window_bounds = array<i64: 64, 128>}, {pipeline_mode = #tpu.pipeline_mode<synchronous>, transform_indices = @transform_8, window_bounds = array<i64: 4, 32, 32>}, {pipeline_mode = #tpu.pipeline_mode<synchronous>, transform_indices = @transform_9, window_bounds = array<i64: 1, 128>}, {pipeline_mode = #tpu.pipeline_mode<synchronous>, transform_indices = @transform_10, window_bounds = array<i64: 64, 128>}, {pipeline_mode = #tpu.pipeline_mode<synchronous>, transform_indices = @transform_11, window_bounds = array<i64: 4, 32, 32>}, {pipeline_mode = #tpu.pipeline_mode<synchronous>, transform_indices = @transform_12, window_bounds = array<i64: 1, 128>}, {pipeline_mode = #tpu.pipeline_mode<synchronous>, transform_indices = @transform_13, window_bounds = array<i64: 128, 2>}, {pipeline_mode = #tpu.pipeline_mode<synchronous>, transform_indices = @transform_14, window_bounds = array<i64: 1, 2>}, {pipeline_mode = #tpu.pipeline_mode<synchronous>, transform_indices = @transform_15, window_bounds = array<i64: 2, 2>}]} {
    %c0 = arith.constant 0 : index
    %c0_0 = arith.constant 0 : index
    %c0_1 = arith.constant 0 : index
    %0 = vector.load %arg1[%c0, %c0_0, %c0_1] : memref<8x2x32xf32, #tpu.memory_space<vmem>>, vector<8x2x32xf32>
    %1 = vector.shape_cast %0 : vector<8x2x32xf32> to vector<16x32xf32>
    %c0_2 = arith.constant 0 : index
    %c0_3 = arith.constant 0 : index
    %2 = vector.load %arg2[%c0_2, %c0_3] : memref<32x128xf32, #tpu.memory_space<vmem>>, vector<32x128xf32>
    %cst = arith.constant dense<0.000000e+00> : vector<16x128xf32>
    %3 = tpu.matmul %1, %2, %cst {dimension_numbers = #tpu.dot_dimension_numbers<[1], [0], [0], [1], [0, 0, 1, 1], [], []>} : vector<16x32xf32>, vector<32x128xf32>, vector<16x128xf32> -> vector<16x128xf32>
    %c0_4 = arith.constant 0 : index
    %c0_5 = arith.constant 0 : index
    %4 = vector.load %arg4[%c0_4, %c0_5] : memref<1x128xf32, #tpu.memory_space<vmem>>, vector<1x128xf32>
    %5 = vector.broadcast %4 : vector<1x128xf32> to vector<16x128xf32>
    %6 = arith.addf %3, %5 : vector<16x128xf32>
    %7 = vector.extract_strided_slice %6 {offsets = [0, 0], sizes = [16, 32], strides = [1, 1]} : vector<16x128xf32> to vector<16x32xf32>
    %8 = vector.shape_cast %7 : vector<16x32xf32> to vector<8x2x32xf32>
    %9 = vector.extract_strided_slice %6 {offsets = [0, 32], sizes = [16, 32], strides = [1, 1]} : vector<16x128xf32> to vector<16x32xf32>
    %10 = vector.shape_cast %9 : vector<16x32xf32> to vector<8x2x32xf32>
    %11 = vector.extract_strided_slice %6 {offsets = [0, 64], sizes = [16, 32], strides = [1, 1]} : vector<16x128xf32> to vector<16x32xf32>
    %12 = vector.shape_cast %11 : vector<16x32xf32> to vector<8x2x32xf32>
    %13 = vector.extract_strided_slice %6 {offsets = [0, 96], sizes = [16, 32], strides = [1, 1]} : vector<16x128xf32> to vector<16x32xf32>
    %14 = vector.shape_cast %13 : vector<16x32xf32> to vector<8x2x32xf32>
    %c0_6 = arith.constant 0 : index
    %c0_7 = arith.constant 0 : index
    %c0_8 = arith.constant 0 : index
    %15 = vector.load %arg3[%c0_6, %c0_7, %c0_8] : memref<4x32x32xf32, #tpu.memory_space<vmem>>, vector<1x32x32xf32>
    %16 = vector.shape_cast %15 : vector<1x32x32xf32> to vector<32x32xf32>
    %c1 = arith.constant 1 : index
    %c0_9 = arith.constant 0 : index
    %c0_10 = arith.constant 0 : index
    %17 = vector.load %arg3[%c1, %c0_9, %c0_10] : memref<4x32x32xf32, #tpu.memory_space<vmem>>, vector<1x32x32xf32>
    %18 = vector.shape_cast %17 : vector<1x32x32xf32> to vector<32x32xf32>
    %c2 = arith.constant 2 : index
    %c0_11 = arith.constant 0 : index
    %c0_12 = arith.constant 0 : index
    %19 = vector.load %arg3[%c2, %c0_11, %c0_12] : memref<4x32x32xf32, #tpu.memory_space<vmem>>, vector<1x32x32xf32>
    %20 = vector.shape_cast %19 : vector<1x32x32xf32> to vector<32x32xf32>
    %c3 = arith.constant 3 : index
    %c0_13 = arith.constant 0 : index
    %c0_14 = arith.constant 0 : index
    %21 = vector.load %arg3[%c3, %c0_13, %c0_14] : memref<4x32x32xf32, #tpu.memory_space<vmem>>, vector<1x32x32xf32>
    %22 = vector.shape_cast %21 : vector<1x32x32xf32> to vector<32x32xf32>
    %cst_15 = arith.constant 0.000000e+00 : f32
    %23 = vector.broadcast %cst_15 : f32 to vector<2x32xf32>
    %cst_16 = arith.constant 0.000000e+00 : f32
    %24 = vector.broadcast %cst_16 : f32 to vector<2x32xf32>
    %25 = vector.extract_strided_slice %8 {offsets = [0, 0, 0], sizes = [1, 2, 32], strides = [1, 1, 1]} : vector<8x2x32xf32> to vector<1x2x32xf32>
    %26 = vector.shape_cast %25 : vector<1x2x32xf32> to vector<2x32xf32>
    %cst_17 = arith.constant dense<0.000000e+00> : vector<2x32xf32>
    %27 = tpu.matmul %23, %16, %cst_17 {dimension_numbers = #tpu.dot_dimension_numbers<[1], [0], [0], [1], [0, 0, 1, 1], [], []>} : vector<2x32xf32>, vector<32x32xf32>, vector<2x32xf32> -> vector<2x32xf32>
    %28 = arith.addf %26, %27 : vector<2x32xf32>
    %29 = arith.negf %28 : vector<2x32xf32>
    %30 = math.exp %29 : vector<2x32xf32>
    %cst_18 = arith.constant 1.000000e+00 : f32
    %31 = vector.broadcast %cst_18 : f32 to vector<2x32xf32>
    %32 = arith.addf %31, %30 : vector<2x32xf32>
    %33 = arith.divf %31, %32 : vector<2x32xf32>
    %34 = vector.extract_strided_slice %10 {offsets = [0, 0, 0], sizes = [1, 2, 32], strides = [1, 1, 1]} : vector<8x2x32xf32> to vector<1x2x32xf32>
    %35 = vector.shape_cast %34 : vector<1x2x32xf32> to vector<2x32xf32>
    %cst_19 = arith.constant dense<0.000000e+00> : vector<2x32xf32>
    %36 = tpu.matmul %23, %18, %cst_19 {dimension_numbers = #tpu.dot_dimension_numbers<[1], [0], [0], [1], [0, 0, 1, 1], [], []>} : vector<2x32xf32>, vector<32x32xf32>, vector<2x32xf32> -> vector<2x32xf32>
    %37 = arith.addf %35, %36 : vector<2x32xf32>
    %38 = arith.negf %37 : vector<2x32xf32>
    %39 = math.exp %38 : vector<2x32xf32>
    %cst_20 = arith.constant 1.000000e+00 : f32
    %40 = vector.broadcast %cst_20 : f32 to vector<2x32xf32>
    %41 = arith.addf %40, %39 : vector<2x32xf32>
    %42 = arith.divf %40, %41 : vector<2x32xf32>
    %43 = vector.extract_strided_slice %12 {offsets = [0, 0, 0], sizes = [1, 2, 32], strides = [1, 1, 1]} : vector<8x2x32xf32> to vector<1x2x32xf32>
    %44 = vector.shape_cast %43 : vector<1x2x32xf32> to vector<2x32xf32>
    %cst_21 = arith.constant dense<0.000000e+00> : vector<2x32xf32>
    %45 = tpu.matmul %23, %20, %cst_21 {dimension_numbers = #tpu.dot_dimension_numbers<[1], [0], [0], [1], [0, 0, 1, 1], [], []>} : vector<2x32xf32>, vector<32x32xf32>, vector<2x32xf32> -> vector<2x32xf32>
    %46 = arith.addf %44, %45 : vector<2x32xf32>
    %47 = math.tanh %46 : vector<2x32xf32>
    %48 = vector.extract_strided_slice %14 {offsets = [0, 0, 0], sizes = [1, 2, 32], strides = [1, 1, 1]} : vector<8x2x32xf32> to vector<1x2x32xf32>
    %49 = vector.shape_cast %48 : vector<1x2x32xf32> to vector<2x32xf32>
    %cst_22 = arith.constant dense<0.000000e+00> : vector<2x32xf32>
    %50 = tpu.matmul %23, %22, %cst_22 {dimension_numbers = #tpu.dot_dimension_numbers<[1], [0], [0], [1], [0, 0, 1, 1], [], []>} : vector<2x32xf32>, vector<32x32xf32>, vector<2x32xf32> -> vector<2x32xf32>
    %51 = arith.addf %49, %50 : vector<2x32xf32>
    %52 = arith.negf %51 : vector<2x32xf32>
    %53 = math.exp %52 : vector<2x32xf32>
    %cst_23 = arith.constant 1.000000e+00 : f32
    %54 = vector.broadcast %cst_23 : f32 to vector<2x32xf32>
    %55 = arith.addf %54, %53 : vector<2x32xf32>
    %56 = arith.divf %54, %55 : vector<2x32xf32>
    %57 = arith.mulf %42, %24 : vector<2x32xf32>
    %58 = arith.mulf %33, %47 : vector<2x32xf32>
    %59 = arith.addf %57, %58 : vector<2x32xf32>
    %60 = math.tanh %59 : vector<2x32xf32>
    %61 = arith.mulf %56, %60 : vector<2x32xf32>
    %62 = vector.extract_strided_slice %8 {offsets = [1, 0, 0], sizes = [1, 2, 32], strides = [1, 1, 1]} : vector<8x2x32xf32> to vector<1x2x32xf32>
    %63 = vector.shape_cast %62 : vector<1x2x32xf32> to vector<2x32xf32>
    %cst_24 = arith.constant dense<0.000000e+00> : vector<2x32xf32>
    %64 = tpu.matmul %61, %16, %cst_24 {dimension_numbers = #tpu.dot_dimension_numbers<[1], [0], [0], [1], [0, 0, 1, 1], [], []>} : vector<2x32xf32>, vector<32x32xf32>, vector<2x32xf32> -> vector<2x32xf32>
    %65 = arith.addf %63, %64 : vector<2x32xf32>
    %66 = arith.negf %65 : vector<2x32xf32>
    %67 = math.exp %66 : vector<2x32xf32>
    %cst_25 = arith.constant 1.000000e+00 : f32
    %68 = vector.broadcast %cst_25 : f32 to vector<2x32xf32>
    %69 = arith.addf %68, %67 : vector<2x32xf32>
    %70 = arith.divf %68, %69 : vector<2x32xf32>
    %71 = vector.extract_strided_slice %10 {offsets = [1, 0, 0], sizes = [1, 2, 32], strides = [1, 1, 1]} : vector<8x2x32xf32> to vector<1x2x32xf32>
    %72 = vector.shape_cast %71 : vector<1x2x32xf32> to vector<2x32xf32>
    %cst_26 = arith.constant dense<0.000000e+00> : vector<2x32xf32>
    %73 = tpu.matmul %61, %18, %cst_26 {dimension_numbers = #tpu.dot_dimension_numbers<[1], [0], [0], [1], [0, 0, 1, 1], [], []>} : vector<2x32xf32>, vector<32x32xf32>, vector<2x32xf32> -> vector<2x32xf32>
    %74 = arith.addf %72, %73 : vector<2x32xf32>
    %75 = arith.negf %74 : vector<2x32xf32>
    %76 = math.exp %75 : vector<2x32xf32>
    %cst_27 = arith.constant 1.000000e+00 : f32
    %77 = vector.broadcast %cst_27 : f32 to vector<2x32xf32>
    %78 = arith.addf %77, %76 : vector<2x32xf32>
    %79 = arith.divf %77, %78 : vector<2x32xf32>
    %80 = vector.extract_strided_slice %12 {offsets = [1, 0, 0], sizes = [1, 2, 32], strides = [1, 1, 1]} : vector<8x2x32xf32> to vector<1x2x32xf32>
    %81 = vector.shape_cast %80 : vector<1x2x32xf32> to vector<2x32xf32>
    %cst_28 = arith.constant dense<0.000000e+00> : vector<2x32xf32>
    %82 = tpu.matmul %61, %20, %cst_28 {dimension_numbers = #tpu.dot_dimension_numbers<[1], [0], [0], [1], [0, 0, 1, 1], [], []>} : vector<2x32xf32>, vector<32x32xf32>, vector<2x32xf32> -> vector<2x32xf32>
    %83 = arith.addf %81, %82 : vector<2x32xf32>
    %84 = math.tanh %83 : vector<2x32xf32>
    %85 = vector.extract_strided_slice %14 {offsets = [1, 0, 0], sizes = [1, 2, 32], strides = [1, 1, 1]} : vector<8x2x32xf32> to vector<1x2x32xf32>
    %86 = vector.shape_cast %85 : vector<1x2x32xf32> to vector<2x32xf32>
    %cst_29 = arith.constant dense<0.000000e+00> : vector<2x32xf32>
    %87 = tpu.matmul %61, %22, %cst_29 {dimension_numbers = #tpu.dot_dimension_numbers<[1], [0], [0], [1], [0, 0, 1, 1], [], []>} : vector<2x32xf32>, vector<32x32xf32>, vector<2x32xf32> -> vector<2x32xf32>
    %88 = arith.addf %86, %87 : vector<2x32xf32>
    %89 = arith.negf %88 : vector<2x32xf32>
    %90 = math.exp %89 : vector<2x32xf32>
    %cst_30 = arith.constant 1.000000e+00 : f32
    %91 = vector.broadcast %cst_30 : f32 to vector<2x32xf32>
    %92 = arith.addf %91, %90 : vector<2x32xf32>
    %93 = arith.divf %91, %92 : vector<2x32xf32>
    %94 = arith.mulf %79, %59 : vector<2x32xf32>
    %95 = arith.mulf %70, %84 : vector<2x32xf32>
    %96 = arith.addf %94, %95 : vector<2x32xf32>
    %97 = math.tanh %96 : vector<2x32xf32>
    %98 = arith.mulf %93, %97 : vector<2x32xf32>
    %99 = vector.extract_strided_slice %8 {offsets = [2, 0, 0], sizes = [1, 2, 32], strides = [1, 1, 1]} : vector<8x2x32xf32> to vector<1x2x32xf32>
    %100 = vector.shape_cast %99 : vector<1x2x32xf32> to vector<2x32xf32>
    %cst_31 = arith.constant dense<0.000000e+00> : vector<2x32xf32>
    %101 = tpu.matmul %98, %16, %cst_31 {dimension_numbers = #tpu.dot_dimension_numbers<[1], [0], [0], [1], [0, 0, 1, 1], [], []>} : vector<2x32xf32>, vector<32x32xf32>, vector<2x32xf32> -> vector<2x32xf32>
    %102 = arith.addf %100, %101 : vector<2x32xf32>
    %103 = arith.negf %102 : vector<2x32xf32>
    %104 = math.exp %103 : vector<2x32xf32>
    %cst_32 = arith.constant 1.000000e+00 : f32
    %105 = vector.broadcast %cst_32 : f32 to vector<2x32xf32>
    %106 = arith.addf %105, %104 : vector<2x32xf32>
    %107 = arith.divf %105, %106 : vector<2x32xf32>
    %108 = vector.extract_strided_slice %10 {offsets = [2, 0, 0], sizes = [1, 2, 32], strides = [1, 1, 1]} : vector<8x2x32xf32> to vector<1x2x32xf32>
    %109 = vector.shape_cast %108 : vector<1x2x32xf32> to vector<2x32xf32>
    %cst_33 = arith.constant dense<0.000000e+00> : vector<2x32xf32>
    %110 = tpu.matmul %98, %18, %cst_33 {dimension_numbers = #tpu.dot_dimension_numbers<[1], [0], [0], [1], [0, 0, 1, 1], [], []>} : vector<2x32xf32>, vector<32x32xf32>, vector<2x32xf32> -> vector<2x32xf32>
    %111 = arith.addf %109, %110 : vector<2x32xf32>
    %112 = arith.negf %111 : vector<2x32xf32>
    %113 = math.exp %112 : vector<2x32xf32>
    %cst_34 = arith.constant 1.000000e+00 : f32
    %114 = vector.broadcast %cst_34 : f32 to vector<2x32xf32>
    %115 = arith.addf %114, %113 : vector<2x32xf32>
    %116 = arith.divf %114, %115 : vector<2x32xf32>
    %117 = vector.extract_strided_slice %12 {offsets = [2, 0, 0], sizes = [1, 2, 32], strides = [1, 1, 1]} : vector<8x2x32xf32> to vector<1x2x32xf32>
    %118 = vector.shape_cast %117 : vector<1x2x32xf32> to vector<2x32xf32>
    %cst_35 = arith.constant dense<0.000000e+00> : vector<2x32xf32>
    %119 = tpu.matmul %98, %20, %cst_35 {dimension_numbers = #tpu.dot_dimension_numbers<[1], [0], [0], [1], [0, 0, 1, 1], [], []>} : vector<2x32xf32>, vector<32x32xf32>, vector<2x32xf32> -> vector<2x32xf32>
    %120 = arith.addf %118, %119 : vector<2x32xf32>
    %121 = math.tanh %120 : vector<2x32xf32>
    %122 = vector.extract_strided_slice %14 {offsets = [2, 0, 0], sizes = [1, 2, 32], strides = [1, 1, 1]} : vector<8x2x32xf32> to vector<1x2x32xf32>
    %123 = vector.shape_cast %122 : vector<1x2x32xf32> to vector<2x32xf32>
    %cst_36 = arith.constant dense<0.000000e+00> : vector<2x32xf32>
    %124 = tpu.matmul %98, %22, %cst_36 {dimension_numbers = #tpu.dot_dimension_numbers<[1], [0], [0], [1], [0, 0, 1, 1], [], []>} : vector<2x32xf32>, vector<32x32xf32>, vector<2x32xf32> -> vector<2x32xf32>
    %125 = arith.addf %123, %124 : vector<2x32xf32>
    %126 = arith.negf %125 : vector<2x32xf32>
    %127 = math.exp %126 : vector<2x32xf32>
    %cst_37 = arith.constant 1.000000e+00 : f32
    %128 = vector.broadcast %cst_37 : f32 to vector<2x32xf32>
    %129 = arith.addf %128, %127 : vector<2x32xf32>
    %130 = arith.divf %128, %129 : vector<2x32xf32>
    %131 = arith.mulf %116, %96 : vector<2x32xf32>
    %132 = arith.mulf %107, %121 : vector<2x32xf32>
    %133 = arith.addf %131, %132 : vector<2x32xf32>
    %134 = math.tanh %133 : vector<2x32xf32>
    %135 = arith.mulf %130, %134 : vector<2x32xf32>
    %136 = vector.extract_strided_slice %8 {offsets = [3, 0, 0], sizes = [1, 2, 32], strides = [1, 1, 1]} : vector<8x2x32xf32> to vector<1x2x32xf32>
    %137 = vector.shape_cast %136 : vector<1x2x32xf32> to vector<2x32xf32>
    %cst_38 = arith.constant dense<0.000000e+00> : vector<2x32xf32>
    %138 = tpu.matmul %135, %16, %cst_38 {dimension_numbers = #tpu.dot_dimension_numbers<[1], [0], [0], [1], [0, 0, 1, 1], [], []>} : vector<2x32xf32>, vector<32x32xf32>, vector<2x32xf32> -> vector<2x32xf32>
    %139 = arith.addf %137, %138 : vector<2x32xf32>
    %140 = arith.negf %139 : vector<2x32xf32>
    %141 = math.exp %140 : vector<2x32xf32>
    %cst_39 = arith.constant 1.000000e+00 : f32
    %142 = vector.broadcast %cst_39 : f32 to vector<2x32xf32>
    %143 = arith.addf %142, %141 : vector<2x32xf32>
    %144 = arith.divf %142, %143 : vector<2x32xf32>
    %145 = vector.extract_strided_slice %10 {offsets = [3, 0, 0], sizes = [1, 2, 32], strides = [1, 1, 1]} : vector<8x2x32xf32> to vector<1x2x32xf32>
    %146 = vector.shape_cast %145 : vector<1x2x32xf32> to vector<2x32xf32>
    %cst_40 = arith.constant dense<0.000000e+00> : vector<2x32xf32>
    %147 = tpu.matmul %135, %18, %cst_40 {dimension_numbers = #tpu.dot_dimension_numbers<[1], [0], [0], [1], [0, 0, 1, 1], [], []>} : vector<2x32xf32>, vector<32x32xf32>, vector<2x32xf32> -> vector<2x32xf32>
    %148 = arith.addf %146, %147 : vector<2x32xf32>
    %149 = arith.negf %148 : vector<2x32xf32>
    %150 = math.exp %149 : vector<2x32xf32>
    %cst_41 = arith.constant 1.000000e+00 : f32
    %151 = vector.broadcast %cst_41 : f32 to vector<2x32xf32>
    %152 = arith.addf %151, %150 : vector<2x32xf32>
    %153 = arith.divf %151, %152 : vector<2x32xf32>
    %154 = vector.extract_strided_slice %12 {offsets = [3, 0, 0], sizes = [1, 2, 32], strides = [1, 1, 1]} : vector<8x2x32xf32> to vector<1x2x32xf32>
    %155 = vector.shape_cast %154 : vector<1x2x32xf32> to vector<2x32xf32>
    %cst_42 = arith.constant dense<0.000000e+00> : vector<2x32xf32>
    %156 = tpu.matmul %135, %20, %cst_42 {dimension_numbers = #tpu.dot_dimension_numbers<[1], [0], [0], [1], [0, 0, 1, 1], [], []>} : vector<2x32xf32>, vector<32x32xf32>, vector<2x32xf32> -> vector<2x32xf32>
    %157 = arith.addf %155, %156 : vector<2x32xf32>
    %158 = math.tanh %157 : vector<2x32xf32>
    %159 = vector.extract_strided_slice %14 {offsets = [3, 0, 0], sizes = [1, 2, 32], strides = [1, 1, 1]} : vector<8x2x32xf32> to vector<1x2x32xf32>
    %160 = vector.shape_cast %159 : vector<1x2x32xf32> to vector<2x32xf32>
    %cst_43 = arith.constant dense<0.000000e+00> : vector<2x32xf32>
    %161 = tpu.matmul %135, %22, %cst_43 {dimension_numbers = #tpu.dot_dimension_numbers<[1], [0], [0], [1], [0, 0, 1, 1], [], []>} : vector<2x32xf32>, vector<32x32xf32>, vector<2x32xf32> -> vector<2x32xf32>
    %162 = arith.addf %160, %161 : vector<2x32xf32>
    %163 = arith.negf %162 : vector<2x32xf32>
    %164 = math.exp %163 : vector<2x32xf32>
    %cst_44 = arith.constant 1.000000e+00 : f32
    %165 = vector.broadcast %cst_44 : f32 to vector<2x32xf32>
    %166 = arith.addf %165, %164 : vector<2x32xf32>
    %167 = arith.divf %165, %166 : vector<2x32xf32>
    %168 = arith.mulf %153, %133 : vector<2x32xf32>
    %169 = arith.mulf %144, %158 : vector<2x32xf32>
    %170 = arith.addf %168, %169 : vector<2x32xf32>
    %171 = math.tanh %170 : vector<2x32xf32>
    %172 = arith.mulf %167, %171 : vector<2x32xf32>
    %173 = vector.extract_strided_slice %8 {offsets = [4, 0, 0], sizes = [1, 2, 32], strides = [1, 1, 1]} : vector<8x2x32xf32> to vector<1x2x32xf32>
    %174 = vector.shape_cast %173 : vector<1x2x32xf32> to vector<2x32xf32>
    %cst_45 = arith.constant dense<0.000000e+00> : vector<2x32xf32>
    %175 = tpu.matmul %172, %16, %cst_45 {dimension_numbers = #tpu.dot_dimension_numbers<[1], [0], [0], [1], [0, 0, 1, 1], [], []>} : vector<2x32xf32>, vector<32x32xf32>, vector<2x32xf32> -> vector<2x32xf32>
    %176 = arith.addf %174, %175 : vector<2x32xf32>
    %177 = arith.negf %176 : vector<2x32xf32>
    %178 = math.exp %177 : vector<2x32xf32>
    %cst_46 = arith.constant 1.000000e+00 : f32
    %179 = vector.broadcast %cst_46 : f32 to vector<2x32xf32>
    %180 = arith.addf %179, %178 : vector<2x32xf32>
    %181 = arith.divf %179, %180 : vector<2x32xf32>
    %182 = vector.extract_strided_slice %10 {offsets = [4, 0, 0], sizes = [1, 2, 32], strides = [1, 1, 1]} : vector<8x2x32xf32> to vector<1x2x32xf32>
    %183 = vector.shape_cast %182 : vector<1x2x32xf32> to vector<2x32xf32>
    %cst_47 = arith.constant dense<0.000000e+00> : vector<2x32xf32>
    %184 = tpu.matmul %172, %18, %cst_47 {dimension_numbers = #tpu.dot_dimension_numbers<[1], [0], [0], [1], [0, 0, 1, 1], [], []>} : vector<2x32xf32>, vector<32x32xf32>, vector<2x32xf32> -> vector<2x32xf32>
    %185 = arith.addf %183, %184 : vector<2x32xf32>
    %186 = arith.negf %185 : vector<2x32xf32>
    %187 = math.exp %186 : vector<2x32xf32>
    %cst_48 = arith.constant 1.000000e+00 : f32
    %188 = vector.broadcast %cst_48 : f32 to vector<2x32xf32>
    %189 = arith.addf %188, %187 : vector<2x32xf32>
    %190 = arith.divf %188, %189 : vector<2x32xf32>
    %191 = vector.extract_strided_slice %12 {offsets = [4, 0, 0], sizes = [1, 2, 32], strides = [1, 1, 1]} : vector<8x2x32xf32> to vector<1x2x32xf32>
    %192 = vector.shape_cast %191 : vector<1x2x32xf32> to vector<2x32xf32>
    %cst_49 = arith.constant dense<0.000000e+00> : vector<2x32xf32>
    %193 = tpu.matmul %172, %20, %cst_49 {dimension_numbers = #tpu.dot_dimension_numbers<[1], [0], [0], [1], [0, 0, 1, 1], [], []>} : vector<2x32xf32>, vector<32x32xf32>, vector<2x32xf32> -> vector<2x32xf32>
    %194 = arith.addf %192, %193 : vector<2x32xf32>
    %195 = math.tanh %194 : vector<2x32xf32>
    %196 = vector.extract_strided_slice %14 {offsets = [4, 0, 0], sizes = [1, 2, 32], strides = [1, 1, 1]} : vector<8x2x32xf32> to vector<1x2x32xf32>
    %197 = vector.shape_cast %196 : vector<1x2x32xf32> to vector<2x32xf32>
    %cst_50 = arith.constant dense<0.000000e+00> : vector<2x32xf32>
    %198 = tpu.matmul %172, %22, %cst_50 {dimension_numbers = #tpu.dot_dimension_numbers<[1], [0], [0], [1], [0, 0, 1, 1], [], []>} : vector<2x32xf32>, vector<32x32xf32>, vector<2x32xf32> -> vector<2x32xf32>
    %199 = arith.addf %197, %198 : vector<2x32xf32>
    %200 = arith.negf %199 : vector<2x32xf32>
    %201 = math.exp %200 : vector<2x32xf32>
    %cst_51 = arith.constant 1.000000e+00 : f32
    %202 = vector.broadcast %cst_51 : f32 to vector<2x32xf32>
    %203 = arith.addf %202, %201 : vector<2x32xf32>
    %204 = arith.divf %202, %203 : vector<2x32xf32>
    %205 = arith.mulf %190, %170 : vector<2x32xf32>
    %206 = arith.mulf %181, %195 : vector<2x32xf32>
    %207 = arith.addf %205, %206 : vector<2x32xf32>
    %208 = math.tanh %207 : vector<2x32xf32>
    %209 = arith.mulf %204, %208 : vector<2x32xf32>
    %210 = vector.extract_strided_slice %8 {offsets = [5, 0, 0], sizes = [1, 2, 32], strides = [1, 1, 1]} : vector<8x2x32xf32> to vector<1x2x32xf32>
    %211 = vector.shape_cast %210 : vector<1x2x32xf32> to vector<2x32xf32>
    %cst_52 = arith.constant dense<0.000000e+00> : vector<2x32xf32>
    %212 = tpu.matmul %209, %16, %cst_52 {dimension_numbers = #tpu.dot_dimension_numbers<[1], [0], [0], [1], [0, 0, 1, 1], [], []>} : vector<2x32xf32>, vector<32x32xf32>, vector<2x32xf32> -> vector<2x32xf32>
    %213 = arith.addf %211, %212 : vector<2x32xf32>
    %214 = arith.negf %213 : vector<2x32xf32>
    %215 = math.exp %214 : vector<2x32xf32>
    %cst_53 = arith.constant 1.000000e+00 : f32
    %216 = vector.broadcast %cst_53 : f32 to vector<2x32xf32>
    %217 = arith.addf %216, %215 : vector<2x32xf32>
    %218 = arith.divf %216, %217 : vector<2x32xf32>
    %219 = vector.extract_strided_slice %10 {offsets = [5, 0, 0], sizes = [1, 2, 32], strides = [1, 1, 1]} : vector<8x2x32xf32> to vector<1x2x32xf32>
    %220 = vector.shape_cast %219 : vector<1x2x32xf32> to vector<2x32xf32>
    %cst_54 = arith.constant dense<0.000000e+00> : vector<2x32xf32>
    %221 = tpu.matmul %209, %18, %cst_54 {dimension_numbers = #tpu.dot_dimension_numbers<[1], [0], [0], [1], [0, 0, 1, 1], [], []>} : vector<2x32xf32>, vector<32x32xf32>, vector<2x32xf32> -> vector<2x32xf32>
    %222 = arith.addf %220, %221 : vector<2x32xf32>
    %223 = arith.negf %222 : vector<2x32xf32>
    %224 = math.exp %223 : vector<2x32xf32>
    %cst_55 = arith.constant 1.000000e+00 : f32
    %225 = vector.broadcast %cst_55 : f32 to vector<2x32xf32>
    %226 = arith.addf %225, %224 : vector<2x32xf32>
    %227 = arith.divf %225, %226 : vector<2x32xf32>
    %228 = vector.extract_strided_slice %12 {offsets = [5, 0, 0], sizes = [1, 2, 32], strides = [1, 1, 1]} : vector<8x2x32xf32> to vector<1x2x32xf32>
    %229 = vector.shape_cast %228 : vector<1x2x32xf32> to vector<2x32xf32>
    %cst_56 = arith.constant dense<0.000000e+00> : vector<2x32xf32>
    %230 = tpu.matmul %209, %20, %cst_56 {dimension_numbers = #tpu.dot_dimension_numbers<[1], [0], [0], [1], [0, 0, 1, 1], [], []>} : vector<2x32xf32>, vector<32x32xf32>, vector<2x32xf32> -> vector<2x32xf32>
    %231 = arith.addf %229, %230 : vector<2x32xf32>
    %232 = math.tanh %231 : vector<2x32xf32>
    %233 = vector.extract_strided_slice %14 {offsets = [5, 0, 0], sizes = [1, 2, 32], strides = [1, 1, 1]} : vector<8x2x32xf32> to vector<1x2x32xf32>
    %234 = vector.shape_cast %233 : vector<1x2x32xf32> to vector<2x32xf32>
    %cst_57 = arith.constant dense<0.000000e+00> : vector<2x32xf32>
    %235 = tpu.matmul %209, %22, %cst_57 {dimension_numbers = #tpu.dot_dimension_numbers<[1], [0], [0], [1], [0, 0, 1, 1], [], []>} : vector<2x32xf32>, vector<32x32xf32>, vector<2x32xf32> -> vector<2x32xf32>
    %236 = arith.addf %234, %235 : vector<2x32xf32>
    %237 = arith.negf %236 : vector<2x32xf32>
    %238 = math.exp %237 : vector<2x32xf32>
    %cst_58 = arith.constant 1.000000e+00 : f32
    %239 = vector.broadcast %cst_58 : f32 to vector<2x32xf32>
    %240 = arith.addf %239, %238 : vector<2x32xf32>
    %241 = arith.divf %239, %240 : vector<2x32xf32>
    %242 = arith.mulf %227, %207 : vector<2x32xf32>
    %243 = arith.mulf %218, %232 : vector<2x32xf32>
    %244 = arith.addf %242, %243 : vector<2x32xf32>
    %245 = math.tanh %244 : vector<2x32xf32>
    %246 = arith.mulf %241, %245 : vector<2x32xf32>
    %247 = vector.extract_strided_slice %8 {offsets = [6, 0, 0], sizes = [1, 2, 32], strides = [1, 1, 1]} : vector<8x2x32xf32> to vector<1x2x32xf32>
    %248 = vector.shape_cast %247 : vector<1x2x32xf32> to vector<2x32xf32>
    %cst_59 = arith.constant dense<0.000000e+00> : vector<2x32xf32>
    %249 = tpu.matmul %246, %16, %cst_59 {dimension_numbers = #tpu.dot_dimension_numbers<[1], [0], [0], [1], [0, 0, 1, 1], [], []>} : vector<2x32xf32>, vector<32x32xf32>, vector<2x32xf32> -> vector<2x32xf32>
    %250 = arith.addf %248, %249 : vector<2x32xf32>
    %251 = arith.negf %250 : vector<2x32xf32>
    %252 = math.exp %251 : vector<2x32xf32>
    %cst_60 = arith.constant 1.000000e+00 : f32
    %253 = vector.broadcast %cst_60 : f32 to vector<2x32xf32>
    %254 = arith.addf %253, %252 : vector<2x32xf32>
    %255 = arith.divf %253, %254 : vector<2x32xf32>
    %256 = vector.extract_strided_slice %10 {offsets = [6, 0, 0], sizes = [1, 2, 32], strides = [1, 1, 1]} : vector<8x2x32xf32> to vector<1x2x32xf32>
    %257 = vector.shape_cast %256 : vector<1x2x32xf32> to vector<2x32xf32>
    %cst_61 = arith.constant dense<0.000000e+00> : vector<2x32xf32>
    %258 = tpu.matmul %246, %18, %cst_61 {dimension_numbers = #tpu.dot_dimension_numbers<[1], [0], [0], [1], [0, 0, 1, 1], [], []>} : vector<2x32xf32>, vector<32x32xf32>, vector<2x32xf32> -> vector<2x32xf32>
    %259 = arith.addf %257, %258 : vector<2x32xf32>
    %260 = arith.negf %259 : vector<2x32xf32>
    %261 = math.exp %260 : vector<2x32xf32>
    %cst_62 = arith.constant 1.000000e+00 : f32
    %262 = vector.broadcast %cst_62 : f32 to vector<2x32xf32>
    %263 = arith.addf %262, %261 : vector<2x32xf32>
    %264 = arith.divf %262, %263 : vector<2x32xf32>
    %265 = vector.extract_strided_slice %12 {offsets = [6, 0, 0], sizes = [1, 2, 32], strides = [1, 1, 1]} : vector<8x2x32xf32> to vector<1x2x32xf32>
    %266 = vector.shape_cast %265 : vector<1x2x32xf32> to vector<2x32xf32>
    %cst_63 = arith.constant dense<0.000000e+00> : vector<2x32xf32>
    %267 = tpu.matmul %246, %20, %cst_63 {dimension_numbers = #tpu.dot_dimension_numbers<[1], [0], [0], [1], [0, 0, 1, 1], [], []>} : vector<2x32xf32>, vector<32x32xf32>, vector<2x32xf32> -> vector<2x32xf32>
    %268 = arith.addf %266, %267 : vector<2x32xf32>
    %269 = math.tanh %268 : vector<2x32xf32>
    %270 = vector.extract_strided_slice %14 {offsets = [6, 0, 0], sizes = [1, 2, 32], strides = [1, 1, 1]} : vector<8x2x32xf32> to vector<1x2x32xf32>
    %271 = vector.shape_cast %270 : vector<1x2x32xf32> to vector<2x32xf32>
    %cst_64 = arith.constant dense<0.000000e+00> : vector<2x32xf32>
    %272 = tpu.matmul %246, %22, %cst_64 {dimension_numbers = #tpu.dot_dimension_numbers<[1], [0], [0], [1], [0, 0, 1, 1], [], []>} : vector<2x32xf32>, vector<32x32xf32>, vector<2x32xf32> -> vector<2x32xf32>
    %273 = arith.addf %271, %272 : vector<2x32xf32>
    %274 = arith.negf %273 : vector<2x32xf32>
    %275 = math.exp %274 : vector<2x32xf32>
    %cst_65 = arith.constant 1.000000e+00 : f32
    %276 = vector.broadcast %cst_65 : f32 to vector<2x32xf32>
    %277 = arith.addf %276, %275 : vector<2x32xf32>
    %278 = arith.divf %276, %277 : vector<2x32xf32>
    %279 = arith.mulf %264, %244 : vector<2x32xf32>
    %280 = arith.mulf %255, %269 : vector<2x32xf32>
    %281 = arith.addf %279, %280 : vector<2x32xf32>
    %282 = math.tanh %281 : vector<2x32xf32>
    %283 = arith.mulf %278, %282 : vector<2x32xf32>
    %284 = vector.extract_strided_slice %8 {offsets = [7, 0, 0], sizes = [1, 2, 32], strides = [1, 1, 1]} : vector<8x2x32xf32> to vector<1x2x32xf32>
    %285 = vector.shape_cast %284 : vector<1x2x32xf32> to vector<2x32xf32>
    %cst_66 = arith.constant dense<0.000000e+00> : vector<2x32xf32>
    %286 = tpu.matmul %283, %16, %cst_66 {dimension_numbers = #tpu.dot_dimension_numbers<[1], [0], [0], [1], [0, 0, 1, 1], [], []>} : vector<2x32xf32>, vector<32x32xf32>, vector<2x32xf32> -> vector<2x32xf32>
    %287 = arith.addf %285, %286 : vector<2x32xf32>
    %288 = arith.negf %287 : vector<2x32xf32>
    %289 = math.exp %288 : vector<2x32xf32>
    %cst_67 = arith.constant 1.000000e+00 : f32
    %290 = vector.broadcast %cst_67 : f32 to vector<2x32xf32>
    %291 = arith.addf %290, %289 : vector<2x32xf32>
    %292 = arith.divf %290, %291 : vector<2x32xf32>
    %293 = vector.extract_strided_slice %10 {offsets = [7, 0, 0], sizes = [1, 2, 32], strides = [1, 1, 1]} : vector<8x2x32xf32> to vector<1x2x32xf32>
    %294 = vector.shape_cast %293 : vector<1x2x32xf32> to vector<2x32xf32>
    %cst_68 = arith.constant dense<0.000000e+00> : vector<2x32xf32>
    %295 = tpu.matmul %283, %18, %cst_68 {dimension_numbers = #tpu.dot_dimension_numbers<[1], [0], [0], [1], [0, 0, 1, 1], [], []>} : vector<2x32xf32>, vector<32x32xf32>, vector<2x32xf32> -> vector<2x32xf32>
    %296 = arith.addf %294, %295 : vector<2x32xf32>
    %297 = arith.negf %296 : vector<2x32xf32>
    %298 = math.exp %297 : vector<2x32xf32>
    %cst_69 = arith.constant 1.000000e+00 : f32
    %299 = vector.broadcast %cst_69 : f32 to vector<2x32xf32>
    %300 = arith.addf %299, %298 : vector<2x32xf32>
    %301 = arith.divf %299, %300 : vector<2x32xf32>
    %302 = vector.extract_strided_slice %12 {offsets = [7, 0, 0], sizes = [1, 2, 32], strides = [1, 1, 1]} : vector<8x2x32xf32> to vector<1x2x32xf32>
    %303 = vector.shape_cast %302 : vector<1x2x32xf32> to vector<2x32xf32>
    %cst_70 = arith.constant dense<0.000000e+00> : vector<2x32xf32>
    %304 = tpu.matmul %283, %20, %cst_70 {dimension_numbers = #tpu.dot_dimension_numbers<[1], [0], [0], [1], [0, 0, 1, 1], [], []>} : vector<2x32xf32>, vector<32x32xf32>, vector<2x32xf32> -> vector<2x32xf32>
    %305 = arith.addf %303, %304 : vector<2x32xf32>
    %306 = math.tanh %305 : vector<2x32xf32>
    %307 = vector.extract_strided_slice %14 {offsets = [7, 0, 0], sizes = [1, 2, 32], strides = [1, 1, 1]} : vector<8x2x32xf32> to vector<1x2x32xf32>
    %308 = vector.shape_cast %307 : vector<1x2x32xf32> to vector<2x32xf32>
    %cst_71 = arith.constant dense<0.000000e+00> : vector<2x32xf32>
    %309 = tpu.matmul %283, %22, %cst_71 {dimension_numbers = #tpu.dot_dimension_numbers<[1], [0], [0], [1], [0, 0, 1, 1], [], []>} : vector<2x32xf32>, vector<32x32xf32>, vector<2x32xf32> -> vector<2x32xf32>
    %310 = arith.addf %308, %309 : vector<2x32xf32>
    %311 = arith.negf %310 : vector<2x32xf32>
    %312 = math.exp %311 : vector<2x32xf32>
    %cst_72 = arith.constant 1.000000e+00 : f32
    %313 = vector.broadcast %cst_72 : f32 to vector<2x32xf32>
    %314 = arith.addf %313, %312 : vector<2x32xf32>
    %315 = arith.divf %313, %314 : vector<2x32xf32>
    %316 = arith.mulf %301, %281 : vector<2x32xf32>
    %317 = arith.mulf %292, %306 : vector<2x32xf32>
    %318 = arith.addf %316, %317 : vector<2x32xf32>
    %319 = math.tanh %318 : vector<2x32xf32>
    %320 = arith.mulf %315, %319 : vector<2x32xf32>
    %c0_73 = arith.constant 0 : index
    %c0_74 = arith.constant 0 : index
    %321 = vector.load %arg5[%c0_73, %c0_74] : memref<32x128xf32, #tpu.memory_space<vmem>>, vector<32x128xf32>
    %cst_75 = arith.constant dense<0.000000e+00> : vector<16x128xf32>
    %322 = tpu.matmul %1, %321, %cst_75 {dimension_numbers = #tpu.dot_dimension_numbers<[1], [0], [0], [1], [0, 0, 1, 1], [], []>} : vector<16x32xf32>, vector<32x128xf32>, vector<16x128xf32> -> vector<16x128xf32>
    %c0_76 = arith.constant 0 : index
    %c0_77 = arith.constant 0 : index
    %323 = vector.load %arg7[%c0_76, %c0_77] : memref<1x128xf32, #tpu.memory_space<vmem>>, vector<1x128xf32>
    %324 = vector.broadcast %323 : vector<1x128xf32> to vector<16x128xf32>
    %325 = arith.addf %322, %324 : vector<16x128xf32>
    %326 = vector.extract_strided_slice %325 {offsets = [0, 0], sizes = [16, 32], strides = [1, 1]} : vector<16x128xf32> to vector<16x32xf32>
    %327 = vector.shape_cast %326 : vector<16x32xf32> to vector<8x2x32xf32>
    %328 = vector.extract_strided_slice %325 {offsets = [0, 32], sizes = [16, 32], strides = [1, 1]} : vector<16x128xf32> to vector<16x32xf32>
    %329 = vector.shape_cast %328 : vector<16x32xf32> to vector<8x2x32xf32>
    %330 = vector.extract_strided_slice %325 {offsets = [0, 64], sizes = [16, 32], strides = [1, 1]} : vector<16x128xf32> to vector<16x32xf32>
    %331 = vector.shape_cast %330 : vector<16x32xf32> to vector<8x2x32xf32>
    %332 = vector.extract_strided_slice %325 {offsets = [0, 96], sizes = [16, 32], strides = [1, 1]} : vector<16x128xf32> to vector<16x32xf32>
    %333 = vector.shape_cast %332 : vector<16x32xf32> to vector<8x2x32xf32>
    %c0_78 = arith.constant 0 : index
    %c0_79 = arith.constant 0 : index
    %c0_80 = arith.constant 0 : index
    %334 = vector.load %arg6[%c0_78, %c0_79, %c0_80] : memref<4x32x32xf32, #tpu.memory_space<vmem>>, vector<1x32x32xf32>
    %335 = vector.shape_cast %334 : vector<1x32x32xf32> to vector<32x32xf32>
    %c1_81 = arith.constant 1 : index
    %c0_82 = arith.constant 0 : index
    %c0_83 = arith.constant 0 : index
    %336 = vector.load %arg6[%c1_81, %c0_82, %c0_83] : memref<4x32x32xf32, #tpu.memory_space<vmem>>, vector<1x32x32xf32>
    %337 = vector.shape_cast %336 : vector<1x32x32xf32> to vector<32x32xf32>
    %c2_84 = arith.constant 2 : index
    %c0_85 = arith.constant 0 : index
    %c0_86 = arith.constant 0 : index
    %338 = vector.load %arg6[%c2_84, %c0_85, %c0_86] : memref<4x32x32xf32, #tpu.memory_space<vmem>>, vector<1x32x32xf32>
    %339 = vector.shape_cast %338 : vector<1x32x32xf32> to vector<32x32xf32>
    %c3_87 = arith.constant 3 : index
    %c0_88 = arith.constant 0 : index
    %c0_89 = arith.constant 0 : index
    %340 = vector.load %arg6[%c3_87, %c0_88, %c0_89] : memref<4x32x32xf32, #tpu.memory_space<vmem>>, vector<1x32x32xf32>
    %341 = vector.shape_cast %340 : vector<1x32x32xf32> to vector<32x32xf32>
    %cst_90 = arith.constant 0.000000e+00 : f32
    %342 = vector.broadcast %cst_90 : f32 to vector<2x32xf32>
    %cst_91 = arith.constant 0.000000e+00 : f32
    %343 = vector.broadcast %cst_91 : f32 to vector<2x32xf32>
    %344 = vector.extract_strided_slice %327 {offsets = [7, 0, 0], sizes = [1, 2, 32], strides = [1, 1, 1]} : vector<8x2x32xf32> to vector<1x2x32xf32>
    %345 = vector.shape_cast %344 : vector<1x2x32xf32> to vector<2x32xf32>
    %cst_92 = arith.constant dense<0.000000e+00> : vector<2x32xf32>
    %346 = tpu.matmul %342, %335, %cst_92 {dimension_numbers = #tpu.dot_dimension_numbers<[1], [0], [0], [1], [0, 0, 1, 1], [], []>} : vector<2x32xf32>, vector<32x32xf32>, vector<2x32xf32> -> vector<2x32xf32>
    %347 = arith.addf %345, %346 : vector<2x32xf32>
    %348 = arith.negf %347 : vector<2x32xf32>
    %349 = math.exp %348 : vector<2x32xf32>
    %cst_93 = arith.constant 1.000000e+00 : f32
    %350 = vector.broadcast %cst_93 : f32 to vector<2x32xf32>
    %351 = arith.addf %350, %349 : vector<2x32xf32>
    %352 = arith.divf %350, %351 : vector<2x32xf32>
    %353 = vector.extract_strided_slice %329 {offsets = [7, 0, 0], sizes = [1, 2, 32], strides = [1, 1, 1]} : vector<8x2x32xf32> to vector<1x2x32xf32>
    %354 = vector.shape_cast %353 : vector<1x2x32xf32> to vector<2x32xf32>
    %cst_94 = arith.constant dense<0.000000e+00> : vector<2x32xf32>
    %355 = tpu.matmul %342, %337, %cst_94 {dimension_numbers = #tpu.dot_dimension_numbers<[1], [0], [0], [1], [0, 0, 1, 1], [], []>} : vector<2x32xf32>, vector<32x32xf32>, vector<2x32xf32> -> vector<2x32xf32>
    %356 = arith.addf %354, %355 : vector<2x32xf32>
    %357 = arith.negf %356 : vector<2x32xf32>
    %358 = math.exp %357 : vector<2x32xf32>
    %cst_95 = arith.constant 1.000000e+00 : f32
    %359 = vector.broadcast %cst_95 : f32 to vector<2x32xf32>
    %360 = arith.addf %359, %358 : vector<2x32xf32>
    %361 = arith.divf %359, %360 : vector<2x32xf32>
    %362 = vector.extract_strided_slice %331 {offsets = [7, 0, 0], sizes = [1, 2, 32], strides = [1, 1, 1]} : vector<8x2x32xf32> to vector<1x2x32xf32>
    %363 = vector.shape_cast %362 : vector<1x2x32xf32> to vector<2x32xf32>
    %cst_96 = arith.constant dense<0.000000e+00> : vector<2x32xf32>
    %364 = tpu.matmul %342, %339, %cst_96 {dimension_numbers = #tpu.dot_dimension_numbers<[1], [0], [0], [1], [0, 0, 1, 1], [], []>} : vector<2x32xf32>, vector<32x32xf32>, vector<2x32xf32> -> vector<2x32xf32>
    %365 = arith.addf %363, %364 : vector<2x32xf32>
    %366 = math.tanh %365 : vector<2x32xf32>
    %367 = vector.extract_strided_slice %333 {offsets = [7, 0, 0], sizes = [1, 2, 32], strides = [1, 1, 1]} : vector<8x2x32xf32> to vector<1x2x32xf32>
    %368 = vector.shape_cast %367 : vector<1x2x32xf32> to vector<2x32xf32>
    %cst_97 = arith.constant dense<0.000000e+00> : vector<2x32xf32>
    %369 = tpu.matmul %342, %341, %cst_97 {dimension_numbers = #tpu.dot_dimension_numbers<[1], [0], [0], [1], [0, 0, 1, 1], [], []>} : vector<2x32xf32>, vector<32x32xf32>, vector<2x32xf32> -> vector<2x32xf32>
    %370 = arith.addf %368, %369 : vector<2x32xf32>
    %371 = arith.negf %370 : vector<2x32xf32>
    %372 = math.exp %371 : vector<2x32xf32>
    %cst_98 = arith.constant 1.000000e+00 : f32
    %373 = vector.broadcast %cst_98 : f32 to vector<2x32xf32>
    %374 = arith.addf %373, %372 : vector<2x32xf32>
    %375 = arith.divf %373, %374 : vector<2x32xf32>
    %376 = arith.mulf %361, %343 : vector<2x32xf32>
    %377 = arith.mulf %352, %366 : vector<2x32xf32>
    %378 = arith.addf %376, %377 : vector<2x32xf32>
    %379 = math.tanh %378 : vector<2x32xf32>
    %380 = arith.mulf %375, %379 : vector<2x32xf32>
    %381 = vector.extract_strided_slice %327 {offsets = [6, 0, 0], sizes = [1, 2, 32], strides = [1, 1, 1]} : vector<8x2x32xf32> to vector<1x2x32xf32>
    %382 = vector.shape_cast %381 : vector<1x2x32xf32> to vector<2x32xf32>
    %cst_99 = arith.constant dense<0.000000e+00> : vector<2x32xf32>
    %383 = tpu.matmul %380, %335, %cst_99 {dimension_numbers = #tpu.dot_dimension_numbers<[1], [0], [0], [1], [0, 0, 1, 1], [], []>} : vector<2x32xf32>, vector<32x32xf32>, vector<2x32xf32> -> vector<2x32xf32>
    %384 = arith.addf %382, %383 : vector<2x32xf32>
    %385 = arith.negf %384 : vector<2x32xf32>
    %386 = math.exp %385 : vector<2x32xf32>
    %cst_100 = arith.constant 1.000000e+00 : f32
    %387 = vector.broadcast %cst_100 : f32 to vector<2x32xf32>
    %388 = arith.addf %387, %386 : vector<2x32xf32>
    %389 = arith.divf %387, %388 : vector<2x32xf32>
    %390 = vector.extract_strided_slice %329 {offsets = [6, 0, 0], sizes = [1, 2, 32], strides = [1, 1, 1]} : vector<8x2x32xf32> to vector<1x2x32xf32>
    %391 = vector.shape_cast %390 : vector<1x2x32xf32> to vector<2x32xf32>
    %cst_101 = arith.constant dense<0.000000e+00> : vector<2x32xf32>
    %392 = tpu.matmul %380, %337, %cst_101 {dimension_numbers = #tpu.dot_dimension_numbers<[1], [0], [0], [1], [0, 0, 1, 1], [], []>} : vector<2x32xf32>, vector<32x32xf32>, vector<2x32xf32> -> vector<2x32xf32>
    %393 = arith.addf %391, %392 : vector<2x32xf32>
    %394 = arith.negf %393 : vector<2x32xf32>
    %395 = math.exp %394 : vector<2x32xf32>
    %cst_102 = arith.constant 1.000000e+00 : f32
    %396 = vector.broadcast %cst_102 : f32 to vector<2x32xf32>
    %397 = arith.addf %396, %395 : vector<2x32xf32>
    %398 = arith.divf %396, %397 : vector<2x32xf32>
    %399 = vector.extract_strided_slice %331 {offsets = [6, 0, 0], sizes = [1, 2, 32], strides = [1, 1, 1]} : vector<8x2x32xf32> to vector<1x2x32xf32>
    %400 = vector.shape_cast %399 : vector<1x2x32xf32> to vector<2x32xf32>
    %cst_103 = arith.constant dense<0.000000e+00> : vector<2x32xf32>
    %401 = tpu.matmul %380, %339, %cst_103 {dimension_numbers = #tpu.dot_dimension_numbers<[1], [0], [0], [1], [0, 0, 1, 1], [], []>} : vector<2x32xf32>, vector<32x32xf32>, vector<2x32xf32> -> vector<2x32xf32>
    %402 = arith.addf %400, %401 : vector<2x32xf32>
    %403 = math.tanh %402 : vector<2x32xf32>
    %404 = vector.extract_strided_slice %333 {offsets = [6, 0, 0], sizes = [1, 2, 32], strides = [1, 1, 1]} : vector<8x2x32xf32> to vector<1x2x32xf32>
    %405 = vector.shape_cast %404 : vector<1x2x32xf32> to vector<2x32xf32>
    %cst_104 = arith.constant dense<0.000000e+00> : vector<2x32xf32>
    %406 = tpu.matmul %380, %341, %cst_104 {dimension_numbers = #tpu.dot_dimension_numbers<[1], [0], [0], [1], [0, 0, 1, 1], [], []>} : vector<2x32xf32>, vector<32x32xf32>, vector<2x32xf32> -> vector<2x32xf32>
    %407 = arith.addf %405, %406 : vector<2x32xf32>
    %408 = arith.negf %407 : vector<2x32xf32>
    %409 = math.exp %408 : vector<2x32xf32>
    %cst_105 = arith.constant 1.000000e+00 : f32
    %410 = vector.broadcast %cst_105 : f32 to vector<2x32xf32>
    %411 = arith.addf %410, %409 : vector<2x32xf32>
    %412 = arith.divf %410, %411 : vector<2x32xf32>
    %413 = arith.mulf %398, %378 : vector<2x32xf32>
    %414 = arith.mulf %389, %403 : vector<2x32xf32>
    %415 = arith.addf %413, %414 : vector<2x32xf32>
    %416 = math.tanh %415 : vector<2x32xf32>
    %417 = arith.mulf %412, %416 : vector<2x32xf32>
    %418 = vector.extract_strided_slice %327 {offsets = [5, 0, 0], sizes = [1, 2, 32], strides = [1, 1, 1]} : vector<8x2x32xf32> to vector<1x2x32xf32>
    %419 = vector.shape_cast %418 : vector<1x2x32xf32> to vector<2x32xf32>
    %cst_106 = arith.constant dense<0.000000e+00> : vector<2x32xf32>
    %420 = tpu.matmul %417, %335, %cst_106 {dimension_numbers = #tpu.dot_dimension_numbers<[1], [0], [0], [1], [0, 0, 1, 1], [], []>} : vector<2x32xf32>, vector<32x32xf32>, vector<2x32xf32> -> vector<2x32xf32>
    %421 = arith.addf %419, %420 : vector<2x32xf32>
    %422 = arith.negf %421 : vector<2x32xf32>
    %423 = math.exp %422 : vector<2x32xf32>
    %cst_107 = arith.constant 1.000000e+00 : f32
    %424 = vector.broadcast %cst_107 : f32 to vector<2x32xf32>
    %425 = arith.addf %424, %423 : vector<2x32xf32>
    %426 = arith.divf %424, %425 : vector<2x32xf32>
    %427 = vector.extract_strided_slice %329 {offsets = [5, 0, 0], sizes = [1, 2, 32], strides = [1, 1, 1]} : vector<8x2x32xf32> to vector<1x2x32xf32>
    %428 = vector.shape_cast %427 : vector<1x2x32xf32> to vector<2x32xf32>
    %cst_108 = arith.constant dense<0.000000e+00> : vector<2x32xf32>
    %429 = tpu.matmul %417, %337, %cst_108 {dimension_numbers = #tpu.dot_dimension_numbers<[1], [0], [0], [1], [0, 0, 1, 1], [], []>} : vector<2x32xf32>, vector<32x32xf32>, vector<2x32xf32> -> vector<2x32xf32>
    %430 = arith.addf %428, %429 : vector<2x32xf32>
    %431 = arith.negf %430 : vector<2x32xf32>
    %432 = math.exp %431 : vector<2x32xf32>
    %cst_109 = arith.constant 1.000000e+00 : f32
    %433 = vector.broadcast %cst_109 : f32 to vector<2x32xf32>
    %434 = arith.addf %433, %432 : vector<2x32xf32>
    %435 = arith.divf %433, %434 : vector<2x32xf32>
    %436 = vector.extract_strided_slice %331 {offsets = [5, 0, 0], sizes = [1, 2, 32], strides = [1, 1, 1]} : vector<8x2x32xf32> to vector<1x2x32xf32>
    %437 = vector.shape_cast %436 : vector<1x2x32xf32> to vector<2x32xf32>
    %cst_110 = arith.constant dense<0.000000e+00> : vector<2x32xf32>
    %438 = tpu.matmul %417, %339, %cst_110 {dimension_numbers = #tpu.dot_dimension_numbers<[1], [0], [0], [1], [0, 0, 1, 1], [], []>} : vector<2x32xf32>, vector<32x32xf32>, vector<2x32xf32> -> vector<2x32xf32>
    %439 = arith.addf %437, %438 : vector<2x32xf32>
    %440 = math.tanh %439 : vector<2x32xf32>
    %441 = vector.extract_strided_slice %333 {offsets = [5, 0, 0], sizes = [1, 2, 32], strides = [1, 1, 1]} : vector<8x2x32xf32> to vector<1x2x32xf32>
    %442 = vector.shape_cast %441 : vector<1x2x32xf32> to vector<2x32xf32>
    %cst_111 = arith.constant dense<0.000000e+00> : vector<2x32xf32>
    %443 = tpu.matmul %417, %341, %cst_111 {dimension_numbers = #tpu.dot_dimension_numbers<[1], [0], [0], [1], [0, 0, 1, 1], [], []>} : vector<2x32xf32>, vector<32x32xf32>, vector<2x32xf32> -> vector<2x32xf32>
    %444 = arith.addf %442, %443 : vector<2x32xf32>
    %445 = arith.negf %444 : vector<2x32xf32>
    %446 = math.exp %445 : vector<2x32xf32>
    %cst_112 = arith.constant 1.000000e+00 : f32
    %447 = vector.broadcast %cst_112 : f32 to vector<2x32xf32>
    %448 = arith.addf %447, %446 : vector<2x32xf32>
    %449 = arith.divf %447, %448 : vector<2x32xf32>
    %450 = arith.mulf %435, %415 : vector<2x32xf32>
    %451 = arith.mulf %426, %440 : vector<2x32xf32>
    %452 = arith.addf %450, %451 : vector<2x32xf32>
    %453 = math.tanh %452 : vector<2x32xf32>
    %454 = arith.mulf %449, %453 : vector<2x32xf32>
    %455 = vector.extract_strided_slice %327 {offsets = [4, 0, 0], sizes = [1, 2, 32], strides = [1, 1, 1]} : vector<8x2x32xf32> to vector<1x2x32xf32>
    %456 = vector.shape_cast %455 : vector<1x2x32xf32> to vector<2x32xf32>
    %cst_113 = arith.constant dense<0.000000e+00> : vector<2x32xf32>
    %457 = tpu.matmul %454, %335, %cst_113 {dimension_numbers = #tpu.dot_dimension_numbers<[1], [0], [0], [1], [0, 0, 1, 1], [], []>} : vector<2x32xf32>, vector<32x32xf32>, vector<2x32xf32> -> vector<2x32xf32>
    %458 = arith.addf %456, %457 : vector<2x32xf32>
    %459 = arith.negf %458 : vector<2x32xf32>
    %460 = math.exp %459 : vector<2x32xf32>
    %cst_114 = arith.constant 1.000000e+00 : f32
    %461 = vector.broadcast %cst_114 : f32 to vector<2x32xf32>
    %462 = arith.addf %461, %460 : vector<2x32xf32>
    %463 = arith.divf %461, %462 : vector<2x32xf32>
    %464 = vector.extract_strided_slice %329 {offsets = [4, 0, 0], sizes = [1, 2, 32], strides = [1, 1, 1]} : vector<8x2x32xf32> to vector<1x2x32xf32>
    %465 = vector.shape_cast %464 : vector<1x2x32xf32> to vector<2x32xf32>
    %cst_115 = arith.constant dense<0.000000e+00> : vector<2x32xf32>
    %466 = tpu.matmul %454, %337, %cst_115 {dimension_numbers = #tpu.dot_dimension_numbers<[1], [0], [0], [1], [0, 0, 1, 1], [], []>} : vector<2x32xf32>, vector<32x32xf32>, vector<2x32xf32> -> vector<2x32xf32>
    %467 = arith.addf %465, %466 : vector<2x32xf32>
    %468 = arith.negf %467 : vector<2x32xf32>
    %469 = math.exp %468 : vector<2x32xf32>
    %cst_116 = arith.constant 1.000000e+00 : f32
    %470 = vector.broadcast %cst_116 : f32 to vector<2x32xf32>
    %471 = arith.addf %470, %469 : vector<2x32xf32>
    %472 = arith.divf %470, %471 : vector<2x32xf32>
    %473 = vector.extract_strided_slice %331 {offsets = [4, 0, 0], sizes = [1, 2, 32], strides = [1, 1, 1]} : vector<8x2x32xf32> to vector<1x2x32xf32>
    %474 = vector.shape_cast %473 : vector<1x2x32xf32> to vector<2x32xf32>
    %cst_117 = arith.constant dense<0.000000e+00> : vector<2x32xf32>
    %475 = tpu.matmul %454, %339, %cst_117 {dimension_numbers = #tpu.dot_dimension_numbers<[1], [0], [0], [1], [0, 0, 1, 1], [], []>} : vector<2x32xf32>, vector<32x32xf32>, vector<2x32xf32> -> vector<2x32xf32>
    %476 = arith.addf %474, %475 : vector<2x32xf32>
    %477 = math.tanh %476 : vector<2x32xf32>
    %478 = vector.extract_strided_slice %333 {offsets = [4, 0, 0], sizes = [1, 2, 32], strides = [1, 1, 1]} : vector<8x2x32xf32> to vector<1x2x32xf32>
    %479 = vector.shape_cast %478 : vector<1x2x32xf32> to vector<2x32xf32>
    %cst_118 = arith.constant dense<0.000000e+00> : vector<2x32xf32>
    %480 = tpu.matmul %454, %341, %cst_118 {dimension_numbers = #tpu.dot_dimension_numbers<[1], [0], [0], [1], [0, 0, 1, 1], [], []>} : vector<2x32xf32>, vector<32x32xf32>, vector<2x32xf32> -> vector<2x32xf32>
    %481 = arith.addf %479, %480 : vector<2x32xf32>
    %482 = arith.negf %481 : vector<2x32xf32>
    %483 = math.exp %482 : vector<2x32xf32>
    %cst_119 = arith.constant 1.000000e+00 : f32
    %484 = vector.broadcast %cst_119 : f32 to vector<2x32xf32>
    %485 = arith.addf %484, %483 : vector<2x32xf32>
    %486 = arith.divf %484, %485 : vector<2x32xf32>
    %487 = arith.mulf %472, %452 : vector<2x32xf32>
    %488 = arith.mulf %463, %477 : vector<2x32xf32>
    %489 = arith.addf %487, %488 : vector<2x32xf32>
    %490 = math.tanh %489 : vector<2x32xf32>
    %491 = arith.mulf %486, %490 : vector<2x32xf32>
    %492 = vector.extract_strided_slice %327 {offsets = [3, 0, 0], sizes = [1, 2, 32], strides = [1, 1, 1]} : vector<8x2x32xf32> to vector<1x2x32xf32>
    %493 = vector.shape_cast %492 : vector<1x2x32xf32> to vector<2x32xf32>
    %cst_120 = arith.constant dense<0.000000e+00> : vector<2x32xf32>
    %494 = tpu.matmul %491, %335, %cst_120 {dimension_numbers = #tpu.dot_dimension_numbers<[1], [0], [0], [1], [0, 0, 1, 1], [], []>} : vector<2x32xf32>, vector<32x32xf32>, vector<2x32xf32> -> vector<2x32xf32>
    %495 = arith.addf %493, %494 : vector<2x32xf32>
    %496 = arith.negf %495 : vector<2x32xf32>
    %497 = math.exp %496 : vector<2x32xf32>
    %cst_121 = arith.constant 1.000000e+00 : f32
    %498 = vector.broadcast %cst_121 : f32 to vector<2x32xf32>
    %499 = arith.addf %498, %497 : vector<2x32xf32>
    %500 = arith.divf %498, %499 : vector<2x32xf32>
    %501 = vector.extract_strided_slice %329 {offsets = [3, 0, 0], sizes = [1, 2, 32], strides = [1, 1, 1]} : vector<8x2x32xf32> to vector<1x2x32xf32>
    %502 = vector.shape_cast %501 : vector<1x2x32xf32> to vector<2x32xf32>
    %cst_122 = arith.constant dense<0.000000e+00> : vector<2x32xf32>
    %503 = tpu.matmul %491, %337, %cst_122 {dimension_numbers = #tpu.dot_dimension_numbers<[1], [0], [0], [1], [0, 0, 1, 1], [], []>} : vector<2x32xf32>, vector<32x32xf32>, vector<2x32xf32> -> vector<2x32xf32>
    %504 = arith.addf %502, %503 : vector<2x32xf32>
    %505 = arith.negf %504 : vector<2x32xf32>
    %506 = math.exp %505 : vector<2x32xf32>
    %cst_123 = arith.constant 1.000000e+00 : f32
    %507 = vector.broadcast %cst_123 : f32 to vector<2x32xf32>
    %508 = arith.addf %507, %506 : vector<2x32xf32>
    %509 = arith.divf %507, %508 : vector<2x32xf32>
    %510 = vector.extract_strided_slice %331 {offsets = [3, 0, 0], sizes = [1, 2, 32], strides = [1, 1, 1]} : vector<8x2x32xf32> to vector<1x2x32xf32>
    %511 = vector.shape_cast %510 : vector<1x2x32xf32> to vector<2x32xf32>
    %cst_124 = arith.constant dense<0.000000e+00> : vector<2x32xf32>
    %512 = tpu.matmul %491, %339, %cst_124 {dimension_numbers = #tpu.dot_dimension_numbers<[1], [0], [0], [1], [0, 0, 1, 1], [], []>} : vector<2x32xf32>, vector<32x32xf32>, vector<2x32xf32> -> vector<2x32xf32>
    %513 = arith.addf %511, %512 : vector<2x32xf32>
    %514 = math.tanh %513 : vector<2x32xf32>
    %515 = vector.extract_strided_slice %333 {offsets = [3, 0, 0], sizes = [1, 2, 32], strides = [1, 1, 1]} : vector<8x2x32xf32> to vector<1x2x32xf32>
    %516 = vector.shape_cast %515 : vector<1x2x32xf32> to vector<2x32xf32>
    %cst_125 = arith.constant dense<0.000000e+00> : vector<2x32xf32>
    %517 = tpu.matmul %491, %341, %cst_125 {dimension_numbers = #tpu.dot_dimension_numbers<[1], [0], [0], [1], [0, 0, 1, 1], [], []>} : vector<2x32xf32>, vector<32x32xf32>, vector<2x32xf32> -> vector<2x32xf32>
    %518 = arith.addf %516, %517 : vector<2x32xf32>
    %519 = arith.negf %518 : vector<2x32xf32>
    %520 = math.exp %519 : vector<2x32xf32>
    %cst_126 = arith.constant 1.000000e+00 : f32
    %521 = vector.broadcast %cst_126 : f32 to vector<2x32xf32>
    %522 = arith.addf %521, %520 : vector<2x32xf32>
    %523 = arith.divf %521, %522 : vector<2x32xf32>
    %524 = arith.mulf %509, %489 : vector<2x32xf32>
    %525 = arith.mulf %500, %514 : vector<2x32xf32>
    %526 = arith.addf %524, %525 : vector<2x32xf32>
    %527 = math.tanh %526 : vector<2x32xf32>
    %528 = arith.mulf %523, %527 : vector<2x32xf32>
    %529 = vector.extract_strided_slice %327 {offsets = [2, 0, 0], sizes = [1, 2, 32], strides = [1, 1, 1]} : vector<8x2x32xf32> to vector<1x2x32xf32>
    %530 = vector.shape_cast %529 : vector<1x2x32xf32> to vector<2x32xf32>
    %cst_127 = arith.constant dense<0.000000e+00> : vector<2x32xf32>
    %531 = tpu.matmul %528, %335, %cst_127 {dimension_numbers = #tpu.dot_dimension_numbers<[1], [0], [0], [1], [0, 0, 1, 1], [], []>} : vector<2x32xf32>, vector<32x32xf32>, vector<2x32xf32> -> vector<2x32xf32>
    %532 = arith.addf %530, %531 : vector<2x32xf32>
    %533 = arith.negf %532 : vector<2x32xf32>
    %534 = math.exp %533 : vector<2x32xf32>
    %cst_128 = arith.constant 1.000000e+00 : f32
    %535 = vector.broadcast %cst_128 : f32 to vector<2x32xf32>
    %536 = arith.addf %535, %534 : vector<2x32xf32>
    %537 = arith.divf %535, %536 : vector<2x32xf32>
    %538 = vector.extract_strided_slice %329 {offsets = [2, 0, 0], sizes = [1, 2, 32], strides = [1, 1, 1]} : vector<8x2x32xf32> to vector<1x2x32xf32>
    %539 = vector.shape_cast %538 : vector<1x2x32xf32> to vector<2x32xf32>
    %cst_129 = arith.constant dense<0.000000e+00> : vector<2x32xf32>
    %540 = tpu.matmul %528, %337, %cst_129 {dimension_numbers = #tpu.dot_dimension_numbers<[1], [0], [0], [1], [0, 0, 1, 1], [], []>} : vector<2x32xf32>, vector<32x32xf32>, vector<2x32xf32> -> vector<2x32xf32>
    %541 = arith.addf %539, %540 : vector<2x32xf32>
    %542 = arith.negf %541 : vector<2x32xf32>
    %543 = math.exp %542 : vector<2x32xf32>
    %cst_130 = arith.constant 1.000000e+00 : f32
    %544 = vector.broadcast %cst_130 : f32 to vector<2x32xf32>
    %545 = arith.addf %544, %543 : vector<2x32xf32>
    %546 = arith.divf %544, %545 : vector<2x32xf32>
    %547 = vector.extract_strided_slice %331 {offsets = [2, 0, 0], sizes = [1, 2, 32], strides = [1, 1, 1]} : vector<8x2x32xf32> to vector<1x2x32xf32>
    %548 = vector.shape_cast %547 : vector<1x2x32xf32> to vector<2x32xf32>
    %cst_131 = arith.constant dense<0.000000e+00> : vector<2x32xf32>
    %549 = tpu.matmul %528, %339, %cst_131 {dimension_numbers = #tpu.dot_dimension_numbers<[1], [0], [0], [1], [0, 0, 1, 1], [], []>} : vector<2x32xf32>, vector<32x32xf32>, vector<2x32xf32> -> vector<2x32xf32>
    %550 = arith.addf %548, %549 : vector<2x32xf32>
    %551 = math.tanh %550 : vector<2x32xf32>
    %552 = vector.extract_strided_slice %333 {offsets = [2, 0, 0], sizes = [1, 2, 32], strides = [1, 1, 1]} : vector<8x2x32xf32> to vector<1x2x32xf32>
    %553 = vector.shape_cast %552 : vector<1x2x32xf32> to vector<2x32xf32>
    %cst_132 = arith.constant dense<0.000000e+00> : vector<2x32xf32>
    %554 = tpu.matmul %528, %341, %cst_132 {dimension_numbers = #tpu.dot_dimension_numbers<[1], [0], [0], [1], [0, 0, 1, 1], [], []>} : vector<2x32xf32>, vector<32x32xf32>, vector<2x32xf32> -> vector<2x32xf32>
    %555 = arith.addf %553, %554 : vector<2x32xf32>
    %556 = arith.negf %555 : vector<2x32xf32>
    %557 = math.exp %556 : vector<2x32xf32>
    %cst_133 = arith.constant 1.000000e+00 : f32
    %558 = vector.broadcast %cst_133 : f32 to vector<2x32xf32>
    %559 = arith.addf %558, %557 : vector<2x32xf32>
    %560 = arith.divf %558, %559 : vector<2x32xf32>
    %561 = arith.mulf %546, %526 : vector<2x32xf32>
    %562 = arith.mulf %537, %551 : vector<2x32xf32>
    %563 = arith.addf %561, %562 : vector<2x32xf32>
    %564 = math.tanh %563 : vector<2x32xf32>
    %565 = arith.mulf %560, %564 : vector<2x32xf32>
    %566 = vector.extract_strided_slice %327 {offsets = [1, 0, 0], sizes = [1, 2, 32], strides = [1, 1, 1]} : vector<8x2x32xf32> to vector<1x2x32xf32>
    %567 = vector.shape_cast %566 : vector<1x2x32xf32> to vector<2x32xf32>
    %cst_134 = arith.constant dense<0.000000e+00> : vector<2x32xf32>
    %568 = tpu.matmul %565, %335, %cst_134 {dimension_numbers = #tpu.dot_dimension_numbers<[1], [0], [0], [1], [0, 0, 1, 1], [], []>} : vector<2x32xf32>, vector<32x32xf32>, vector<2x32xf32> -> vector<2x32xf32>
    %569 = arith.addf %567, %568 : vector<2x32xf32>
    %570 = arith.negf %569 : vector<2x32xf32>
    %571 = math.exp %570 : vector<2x32xf32>
    %cst_135 = arith.constant 1.000000e+00 : f32
    %572 = vector.broadcast %cst_135 : f32 to vector<2x32xf32>
    %573 = arith.addf %572, %571 : vector<2x32xf32>
    %574 = arith.divf %572, %573 : vector<2x32xf32>
    %575 = vector.extract_strided_slice %329 {offsets = [1, 0, 0], sizes = [1, 2, 32], strides = [1, 1, 1]} : vector<8x2x32xf32> to vector<1x2x32xf32>
    %576 = vector.shape_cast %575 : vector<1x2x32xf32> to vector<2x32xf32>
    %cst_136 = arith.constant dense<0.000000e+00> : vector<2x32xf32>
    %577 = tpu.matmul %565, %337, %cst_136 {dimension_numbers = #tpu.dot_dimension_numbers<[1], [0], [0], [1], [0, 0, 1, 1], [], []>} : vector<2x32xf32>, vector<32x32xf32>, vector<2x32xf32> -> vector<2x32xf32>
    %578 = arith.addf %576, %577 : vector<2x32xf32>
    %579 = arith.negf %578 : vector<2x32xf32>
    %580 = math.exp %579 : vector<2x32xf32>
    %cst_137 = arith.constant 1.000000e+00 : f32
    %581 = vector.broadcast %cst_137 : f32 to vector<2x32xf32>
    %582 = arith.addf %581, %580 : vector<2x32xf32>
    %583 = arith.divf %581, %582 : vector<2x32xf32>
    %584 = vector.extract_strided_slice %331 {offsets = [1, 0, 0], sizes = [1, 2, 32], strides = [1, 1, 1]} : vector<8x2x32xf32> to vector<1x2x32xf32>
    %585 = vector.shape_cast %584 : vector<1x2x32xf32> to vector<2x32xf32>
    %cst_138 = arith.constant dense<0.000000e+00> : vector<2x32xf32>
    %586 = tpu.matmul %565, %339, %cst_138 {dimension_numbers = #tpu.dot_dimension_numbers<[1], [0], [0], [1], [0, 0, 1, 1], [], []>} : vector<2x32xf32>, vector<32x32xf32>, vector<2x32xf32> -> vector<2x32xf32>
    %587 = arith.addf %585, %586 : vector<2x32xf32>
    %588 = math.tanh %587 : vector<2x32xf32>
    %589 = vector.extract_strided_slice %333 {offsets = [1, 0, 0], sizes = [1, 2, 32], strides = [1, 1, 1]} : vector<8x2x32xf32> to vector<1x2x32xf32>
    %590 = vector.shape_cast %589 : vector<1x2x32xf32> to vector<2x32xf32>
    %cst_139 = arith.constant dense<0.000000e+00> : vector<2x32xf32>
    %591 = tpu.matmul %565, %341, %cst_139 {dimension_numbers = #tpu.dot_dimension_numbers<[1], [0], [0], [1], [0, 0, 1, 1], [], []>} : vector<2x32xf32>, vector<32x32xf32>, vector<2x32xf32> -> vector<2x32xf32>
    %592 = arith.addf %590, %591 : vector<2x32xf32>
    %593 = arith.negf %592 : vector<2x32xf32>
    %594 = math.exp %593 : vector<2x32xf32>
    %cst_140 = arith.constant 1.000000e+00 : f32
    %595 = vector.broadcast %cst_140 : f32 to vector<2x32xf32>
    %596 = arith.addf %595, %594 : vector<2x32xf32>
    %597 = arith.divf %595, %596 : vector<2x32xf32>
    %598 = arith.mulf %583, %563 : vector<2x32xf32>
    %599 = arith.mulf %574, %588 : vector<2x32xf32>
    %600 = arith.addf %598, %599 : vector<2x32xf32>
    %601 = math.tanh %600 : vector<2x32xf32>
    %602 = arith.mulf %597, %601 : vector<2x32xf32>
    %603 = vector.extract_strided_slice %327 {offsets = [0, 0, 0], sizes = [1, 2, 32], strides = [1, 1, 1]} : vector<8x2x32xf32> to vector<1x2x32xf32>
    %604 = vector.shape_cast %603 : vector<1x2x32xf32> to vector<2x32xf32>
    %cst_141 = arith.constant dense<0.000000e+00> : vector<2x32xf32>
    %605 = tpu.matmul %602, %335, %cst_141 {dimension_numbers = #tpu.dot_dimension_numbers<[1], [0], [0], [1], [0, 0, 1, 1], [], []>} : vector<2x32xf32>, vector<32x32xf32>, vector<2x32xf32> -> vector<2x32xf32>
    %606 = arith.addf %604, %605 : vector<2x32xf32>
    %607 = arith.negf %606 : vector<2x32xf32>
    %608 = math.exp %607 : vector<2x32xf32>
    %cst_142 = arith.constant 1.000000e+00 : f32
    %609 = vector.broadcast %cst_142 : f32 to vector<2x32xf32>
    %610 = arith.addf %609, %608 : vector<2x32xf32>
    %611 = arith.divf %609, %610 : vector<2x32xf32>
    %612 = vector.extract_strided_slice %329 {offsets = [0, 0, 0], sizes = [1, 2, 32], strides = [1, 1, 1]} : vector<8x2x32xf32> to vector<1x2x32xf32>
    %613 = vector.shape_cast %612 : vector<1x2x32xf32> to vector<2x32xf32>
    %cst_143 = arith.constant dense<0.000000e+00> : vector<2x32xf32>
    %614 = tpu.matmul %602, %337, %cst_143 {dimension_numbers = #tpu.dot_dimension_numbers<[1], [0], [0], [1], [0, 0, 1, 1], [], []>} : vector<2x32xf32>, vector<32x32xf32>, vector<2x32xf32> -> vector<2x32xf32>
    %615 = arith.addf %613, %614 : vector<2x32xf32>
    %616 = arith.negf %615 : vector<2x32xf32>
    %617 = math.exp %616 : vector<2x32xf32>
    %cst_144 = arith.constant 1.000000e+00 : f32
    %618 = vector.broadcast %cst_144 : f32 to vector<2x32xf32>
    %619 = arith.addf %618, %617 : vector<2x32xf32>
    %620 = arith.divf %618, %619 : vector<2x32xf32>
    %621 = vector.extract_strided_slice %331 {offsets = [0, 0, 0], sizes = [1, 2, 32], strides = [1, 1, 1]} : vector<8x2x32xf32> to vector<1x2x32xf32>
    %622 = vector.shape_cast %621 : vector<1x2x32xf32> to vector<2x32xf32>
    %cst_145 = arith.constant dense<0.000000e+00> : vector<2x32xf32>
    %623 = tpu.matmul %602, %339, %cst_145 {dimension_numbers = #tpu.dot_dimension_numbers<[1], [0], [0], [1], [0, 0, 1, 1], [], []>} : vector<2x32xf32>, vector<32x32xf32>, vector<2x32xf32> -> vector<2x32xf32>
    %624 = arith.addf %622, %623 : vector<2x32xf32>
    %625 = math.tanh %624 : vector<2x32xf32>
    %626 = vector.extract_strided_slice %333 {offsets = [0, 0, 0], sizes = [1, 2, 32], strides = [1, 1, 1]} : vector<8x2x32xf32> to vector<1x2x32xf32>
    %627 = vector.shape_cast %626 : vector<1x2x32xf32> to vector<2x32xf32>
    %cst_146 = arith.constant dense<0.000000e+00> : vector<2x32xf32>
    %628 = tpu.matmul %602, %341, %cst_146 {dimension_numbers = #tpu.dot_dimension_numbers<[1], [0], [0], [1], [0, 0, 1, 1], [], []>} : vector<2x32xf32>, vector<32x32xf32>, vector<2x32xf32> -> vector<2x32xf32>
    %629 = arith.addf %627, %628 : vector<2x32xf32>
    %630 = arith.negf %629 : vector<2x32xf32>
    %631 = math.exp %630 : vector<2x32xf32>
    %cst_147 = arith.constant 1.000000e+00 : f32
    %632 = vector.broadcast %cst_147 : f32 to vector<2x32xf32>
    %633 = arith.addf %632, %631 : vector<2x32xf32>
    %634 = arith.divf %632, %633 : vector<2x32xf32>
    %635 = arith.mulf %620, %600 : vector<2x32xf32>
    %636 = arith.mulf %611, %625 : vector<2x32xf32>
    %637 = arith.addf %635, %636 : vector<2x32xf32>
    %638 = math.tanh %637 : vector<2x32xf32>
    %639 = arith.mulf %634, %638 : vector<2x32xf32>
    %640 = vector.shape_cast %61 : vector<2x32xf32> to vector<1x2x32xf32>
    %641 = vector.shape_cast %98 : vector<2x32xf32> to vector<1x2x32xf32>
    %642 = vector.shape_cast %135 : vector<2x32xf32> to vector<1x2x32xf32>
    %643 = vector.shape_cast %172 : vector<2x32xf32> to vector<1x2x32xf32>
    %644 = vector.shape_cast %209 : vector<2x32xf32> to vector<1x2x32xf32>
    %645 = vector.shape_cast %246 : vector<2x32xf32> to vector<1x2x32xf32>
    %646 = vector.shape_cast %283 : vector<2x32xf32> to vector<1x2x32xf32>
    %647 = vector.shape_cast %320 : vector<2x32xf32> to vector<1x2x32xf32>
    %648 = tpu.concatenate %640, %641, %642, %643, %644, %645, %646, %647 in 0 : vector<1x2x32xf32>, vector<1x2x32xf32>, vector<1x2x32xf32>, vector<1x2x32xf32>, vector<1x2x32xf32>, vector<1x2x32xf32>, vector<1x2x32xf32>, vector<1x2x32xf32> -> vector<8x2x32xf32>
    %649 = vector.shape_cast %639 : vector<2x32xf32> to vector<1x2x32xf32>
    %650 = vector.shape_cast %602 : vector<2x32xf32> to vector<1x2x32xf32>
    %651 = vector.shape_cast %565 : vector<2x32xf32> to vector<1x2x32xf32>
    %652 = vector.shape_cast %528 : vector<2x32xf32> to vector<1x2x32xf32>
    %653 = vector.shape_cast %491 : vector<2x32xf32> to vector<1x2x32xf32>
    %654 = vector.shape_cast %454 : vector<2x32xf32> to vector<1x2x32xf32>
    %655 = vector.shape_cast %417 : vector<2x32xf32> to vector<1x2x32xf32>
    %656 = vector.shape_cast %380 : vector<2x32xf32> to vector<1x2x32xf32>
    %657 = tpu.concatenate %649, %650, %651, %652, %653, %654, %655, %656 in 0 : vector<1x2x32xf32>, vector<1x2x32xf32>, vector<1x2x32xf32>, vector<1x2x32xf32>, vector<1x2x32xf32>, vector<1x2x32xf32>, vector<1x2x32xf32>, vector<1x2x32xf32> -> vector<8x2x32xf32>
    %658 = tpu.concatenate %648, %657 in 2 : vector<8x2x32xf32>, vector<8x2x32xf32> -> vector<8x2x64xf32>
    %659 = vector.shape_cast %658 : vector<8x2x64xf32> to vector<16x64xf32>
    %c0_148 = arith.constant 0 : index
    %c0_149 = arith.constant 0 : index
    %660 = vector.load %arg8[%c0_148, %c0_149] : memref<64x128xf32, #tpu.memory_space<vmem>>, vector<64x128xf32>
    %cst_150 = arith.constant dense<0.000000e+00> : vector<16x128xf32>
    %661 = tpu.matmul %659, %660, %cst_150 {dimension_numbers = #tpu.dot_dimension_numbers<[1], [0], [0], [1], [0, 0, 1, 1], [], []>} : vector<16x64xf32>, vector<64x128xf32>, vector<16x128xf32> -> vector<16x128xf32>
    %c0_151 = arith.constant 0 : index
    %c0_152 = arith.constant 0 : index
    %662 = vector.load %arg10[%c0_151, %c0_152] : memref<1x128xf32, #tpu.memory_space<vmem>>, vector<1x128xf32>
    %663 = vector.broadcast %662 : vector<1x128xf32> to vector<16x128xf32>
    %664 = arith.addf %661, %663 : vector<16x128xf32>
    %665 = vector.extract_strided_slice %664 {offsets = [0, 0], sizes = [16, 32], strides = [1, 1]} : vector<16x128xf32> to vector<16x32xf32>
    %666 = vector.shape_cast %665 : vector<16x32xf32> to vector<8x2x32xf32>
    %667 = vector.extract_strided_slice %664 {offsets = [0, 32], sizes = [16, 32], strides = [1, 1]} : vector<16x128xf32> to vector<16x32xf32>
    %668 = vector.shape_cast %667 : vector<16x32xf32> to vector<8x2x32xf32>
    %669 = vector.extract_strided_slice %664 {offsets = [0, 64], sizes = [16, 32], strides = [1, 1]} : vector<16x128xf32> to vector<16x32xf32>
    %670 = vector.shape_cast %669 : vector<16x32xf32> to vector<8x2x32xf32>
    %671 = vector.extract_strided_slice %664 {offsets = [0, 96], sizes = [16, 32], strides = [1, 1]} : vector<16x128xf32> to vector<16x32xf32>
    %672 = vector.shape_cast %671 : vector<16x32xf32> to vector<8x2x32xf32>
    %c0_153 = arith.constant 0 : index
    %c0_154 = arith.constant 0 : index
    %c0_155 = arith.constant 0 : index
    %673 = vector.load %arg9[%c0_153, %c0_154, %c0_155] : memref<4x32x32xf32, #tpu.memory_space<vmem>>, vector<1x32x32xf32>
    %674 = vector.shape_cast %673 : vector<1x32x32xf32> to vector<32x32xf32>
    %c1_156 = arith.constant 1 : index
    %c0_157 = arith.constant 0 : index
    %c0_158 = arith.constant 0 : index
    %675 = vector.load %arg9[%c1_156, %c0_157, %c0_158] : memref<4x32x32xf32, #tpu.memory_space<vmem>>, vector<1x32x32xf32>
    %676 = vector.shape_cast %675 : vector<1x32x32xf32> to vector<32x32xf32>
    %c2_159 = arith.constant 2 : index
    %c0_160 = arith.constant 0 : index
    %c0_161 = arith.constant 0 : index
    %677 = vector.load %arg9[%c2_159, %c0_160, %c0_161] : memref<4x32x32xf32, #tpu.memory_space<vmem>>, vector<1x32x32xf32>
    %678 = vector.shape_cast %677 : vector<1x32x32xf32> to vector<32x32xf32>
    %c3_162 = arith.constant 3 : index
    %c0_163 = arith.constant 0 : index
    %c0_164 = arith.constant 0 : index
    %679 = vector.load %arg9[%c3_162, %c0_163, %c0_164] : memref<4x32x32xf32, #tpu.memory_space<vmem>>, vector<1x32x32xf32>
    %680 = vector.shape_cast %679 : vector<1x32x32xf32> to vector<32x32xf32>
    %cst_165 = arith.constant 0.000000e+00 : f32
    %681 = vector.broadcast %cst_165 : f32 to vector<2x32xf32>
    %cst_166 = arith.constant 0.000000e+00 : f32
    %682 = vector.broadcast %cst_166 : f32 to vector<2x32xf32>
    %683 = vector.extract_strided_slice %666 {offsets = [0, 0, 0], sizes = [1, 2, 32], strides = [1, 1, 1]} : vector<8x2x32xf32> to vector<1x2x32xf32>
    %684 = vector.shape_cast %683 : vector<1x2x32xf32> to vector<2x32xf32>
    %cst_167 = arith.constant dense<0.000000e+00> : vector<2x32xf32>
    %685 = tpu.matmul %681, %674, %cst_167 {dimension_numbers = #tpu.dot_dimension_numbers<[1], [0], [0], [1], [0, 0, 1, 1], [], []>} : vector<2x32xf32>, vector<32x32xf32>, vector<2x32xf32> -> vector<2x32xf32>
    %686 = arith.addf %684, %685 : vector<2x32xf32>
    %687 = arith.negf %686 : vector<2x32xf32>
    %688 = math.exp %687 : vector<2x32xf32>
    %cst_168 = arith.constant 1.000000e+00 : f32
    %689 = vector.broadcast %cst_168 : f32 to vector<2x32xf32>
    %690 = arith.addf %689, %688 : vector<2x32xf32>
    %691 = arith.divf %689, %690 : vector<2x32xf32>
    %692 = vector.extract_strided_slice %668 {offsets = [0, 0, 0], sizes = [1, 2, 32], strides = [1, 1, 1]} : vector<8x2x32xf32> to vector<1x2x32xf32>
    %693 = vector.shape_cast %692 : vector<1x2x32xf32> to vector<2x32xf32>
    %cst_169 = arith.constant dense<0.000000e+00> : vector<2x32xf32>
    %694 = tpu.matmul %681, %676, %cst_169 {dimension_numbers = #tpu.dot_dimension_numbers<[1], [0], [0], [1], [0, 0, 1, 1], [], []>} : vector<2x32xf32>, vector<32x32xf32>, vector<2x32xf32> -> vector<2x32xf32>
    %695 = arith.addf %693, %694 : vector<2x32xf32>
    %696 = arith.negf %695 : vector<2x32xf32>
    %697 = math.exp %696 : vector<2x32xf32>
    %cst_170 = arith.constant 1.000000e+00 : f32
    %698 = vector.broadcast %cst_170 : f32 to vector<2x32xf32>
    %699 = arith.addf %698, %697 : vector<2x32xf32>
    %700 = arith.divf %698, %699 : vector<2x32xf32>
    %701 = vector.extract_strided_slice %670 {offsets = [0, 0, 0], sizes = [1, 2, 32], strides = [1, 1, 1]} : vector<8x2x32xf32> to vector<1x2x32xf32>
    %702 = vector.shape_cast %701 : vector<1x2x32xf32> to vector<2x32xf32>
    %cst_171 = arith.constant dense<0.000000e+00> : vector<2x32xf32>
    %703 = tpu.matmul %681, %678, %cst_171 {dimension_numbers = #tpu.dot_dimension_numbers<[1], [0], [0], [1], [0, 0, 1, 1], [], []>} : vector<2x32xf32>, vector<32x32xf32>, vector<2x32xf32> -> vector<2x32xf32>
    %704 = arith.addf %702, %703 : vector<2x32xf32>
    %705 = math.tanh %704 : vector<2x32xf32>
    %706 = vector.extract_strided_slice %672 {offsets = [0, 0, 0], sizes = [1, 2, 32], strides = [1, 1, 1]} : vector<8x2x32xf32> to vector<1x2x32xf32>
    %707 = vector.shape_cast %706 : vector<1x2x32xf32> to vector<2x32xf32>
    %cst_172 = arith.constant dense<0.000000e+00> : vector<2x32xf32>
    %708 = tpu.matmul %681, %680, %cst_172 {dimension_numbers = #tpu.dot_dimension_numbers<[1], [0], [0], [1], [0, 0, 1, 1], [], []>} : vector<2x32xf32>, vector<32x32xf32>, vector<2x32xf32> -> vector<2x32xf32>
    %709 = arith.addf %707, %708 : vector<2x32xf32>
    %710 = arith.negf %709 : vector<2x32xf32>
    %711 = math.exp %710 : vector<2x32xf32>
    %cst_173 = arith.constant 1.000000e+00 : f32
    %712 = vector.broadcast %cst_173 : f32 to vector<2x32xf32>
    %713 = arith.addf %712, %711 : vector<2x32xf32>
    %714 = arith.divf %712, %713 : vector<2x32xf32>
    %715 = arith.mulf %700, %682 : vector<2x32xf32>
    %716 = arith.mulf %691, %705 : vector<2x32xf32>
    %717 = arith.addf %715, %716 : vector<2x32xf32>
    %718 = math.tanh %717 : vector<2x32xf32>
    %719 = arith.mulf %714, %718 : vector<2x32xf32>
    %720 = vector.extract_strided_slice %666 {offsets = [1, 0, 0], sizes = [1, 2, 32], strides = [1, 1, 1]} : vector<8x2x32xf32> to vector<1x2x32xf32>
    %721 = vector.shape_cast %720 : vector<1x2x32xf32> to vector<2x32xf32>
    %cst_174 = arith.constant dense<0.000000e+00> : vector<2x32xf32>
    %722 = tpu.matmul %719, %674, %cst_174 {dimension_numbers = #tpu.dot_dimension_numbers<[1], [0], [0], [1], [0, 0, 1, 1], [], []>} : vector<2x32xf32>, vector<32x32xf32>, vector<2x32xf32> -> vector<2x32xf32>
    %723 = arith.addf %721, %722 : vector<2x32xf32>
    %724 = arith.negf %723 : vector<2x32xf32>
    %725 = math.exp %724 : vector<2x32xf32>
    %cst_175 = arith.constant 1.000000e+00 : f32
    %726 = vector.broadcast %cst_175 : f32 to vector<2x32xf32>
    %727 = arith.addf %726, %725 : vector<2x32xf32>
    %728 = arith.divf %726, %727 : vector<2x32xf32>
    %729 = vector.extract_strided_slice %668 {offsets = [1, 0, 0], sizes = [1, 2, 32], strides = [1, 1, 1]} : vector<8x2x32xf32> to vector<1x2x32xf32>
    %730 = vector.shape_cast %729 : vector<1x2x32xf32> to vector<2x32xf32>
    %cst_176 = arith.constant dense<0.000000e+00> : vector<2x32xf32>
    %731 = tpu.matmul %719, %676, %cst_176 {dimension_numbers = #tpu.dot_dimension_numbers<[1], [0], [0], [1], [0, 0, 1, 1], [], []>} : vector<2x32xf32>, vector<32x32xf32>, vector<2x32xf32> -> vector<2x32xf32>
    %732 = arith.addf %730, %731 : vector<2x32xf32>
    %733 = arith.negf %732 : vector<2x32xf32>
    %734 = math.exp %733 : vector<2x32xf32>
    %cst_177 = arith.constant 1.000000e+00 : f32
    %735 = vector.broadcast %cst_177 : f32 to vector<2x32xf32>
    %736 = arith.addf %735, %734 : vector<2x32xf32>
    %737 = arith.divf %735, %736 : vector<2x32xf32>
    %738 = vector.extract_strided_slice %670 {offsets = [1, 0, 0], sizes = [1, 2, 32], strides = [1, 1, 1]} : vector<8x2x32xf32> to vector<1x2x32xf32>
    %739 = vector.shape_cast %738 : vector<1x2x32xf32> to vector<2x32xf32>
    %cst_178 = arith.constant dense<0.000000e+00> : vector<2x32xf32>
    %740 = tpu.matmul %719, %678, %cst_178 {dimension_numbers = #tpu.dot_dimension_numbers<[1], [0], [0], [1], [0, 0, 1, 1], [], []>} : vector<2x32xf32>, vector<32x32xf32>, vector<2x32xf32> -> vector<2x32xf32>
    %741 = arith.addf %739, %740 : vector<2x32xf32>
    %742 = math.tanh %741 : vector<2x32xf32>
    %743 = vector.extract_strided_slice %672 {offsets = [1, 0, 0], sizes = [1, 2, 32], strides = [1, 1, 1]} : vector<8x2x32xf32> to vector<1x2x32xf32>
    %744 = vector.shape_cast %743 : vector<1x2x32xf32> to vector<2x32xf32>
    %cst_179 = arith.constant dense<0.000000e+00> : vector<2x32xf32>
    %745 = tpu.matmul %719, %680, %cst_179 {dimension_numbers = #tpu.dot_dimension_numbers<[1], [0], [0], [1], [0, 0, 1, 1], [], []>} : vector<2x32xf32>, vector<32x32xf32>, vector<2x32xf32> -> vector<2x32xf32>
    %746 = arith.addf %744, %745 : vector<2x32xf32>
    %747 = arith.negf %746 : vector<2x32xf32>
    %748 = math.exp %747 : vector<2x32xf32>
    %cst_180 = arith.constant 1.000000e+00 : f32
    %749 = vector.broadcast %cst_180 : f32 to vector<2x32xf32>
    %750 = arith.addf %749, %748 : vector<2x32xf32>
    %751 = arith.divf %749, %750 : vector<2x32xf32>
    %752 = arith.mulf %737, %717 : vector<2x32xf32>
    %753 = arith.mulf %728, %742 : vector<2x32xf32>
    %754 = arith.addf %752, %753 : vector<2x32xf32>
    %755 = math.tanh %754 : vector<2x32xf32>
    %756 = arith.mulf %751, %755 : vector<2x32xf32>
    %757 = vector.extract_strided_slice %666 {offsets = [2, 0, 0], sizes = [1, 2, 32], strides = [1, 1, 1]} : vector<8x2x32xf32> to vector<1x2x32xf32>
    %758 = vector.shape_cast %757 : vector<1x2x32xf32> to vector<2x32xf32>
    %cst_181 = arith.constant dense<0.000000e+00> : vector<2x32xf32>
    %759 = tpu.matmul %756, %674, %cst_181 {dimension_numbers = #tpu.dot_dimension_numbers<[1], [0], [0], [1], [0, 0, 1, 1], [], []>} : vector<2x32xf32>, vector<32x32xf32>, vector<2x32xf32> -> vector<2x32xf32>
    %760 = arith.addf %758, %759 : vector<2x32xf32>
    %761 = arith.negf %760 : vector<2x32xf32>
    %762 = math.exp %761 : vector<2x32xf32>
    %cst_182 = arith.constant 1.000000e+00 : f32
    %763 = vector.broadcast %cst_182 : f32 to vector<2x32xf32>
    %764 = arith.addf %763, %762 : vector<2x32xf32>
    %765 = arith.divf %763, %764 : vector<2x32xf32>
    %766 = vector.extract_strided_slice %668 {offsets = [2, 0, 0], sizes = [1, 2, 32], strides = [1, 1, 1]} : vector<8x2x32xf32> to vector<1x2x32xf32>
    %767 = vector.shape_cast %766 : vector<1x2x32xf32> to vector<2x32xf32>
    %cst_183 = arith.constant dense<0.000000e+00> : vector<2x32xf32>
    %768 = tpu.matmul %756, %676, %cst_183 {dimension_numbers = #tpu.dot_dimension_numbers<[1], [0], [0], [1], [0, 0, 1, 1], [], []>} : vector<2x32xf32>, vector<32x32xf32>, vector<2x32xf32> -> vector<2x32xf32>
    %769 = arith.addf %767, %768 : vector<2x32xf32>
    %770 = arith.negf %769 : vector<2x32xf32>
    %771 = math.exp %770 : vector<2x32xf32>
    %cst_184 = arith.constant 1.000000e+00 : f32
    %772 = vector.broadcast %cst_184 : f32 to vector<2x32xf32>
    %773 = arith.addf %772, %771 : vector<2x32xf32>
    %774 = arith.divf %772, %773 : vector<2x32xf32>
    %775 = vector.extract_strided_slice %670 {offsets = [2, 0, 0], sizes = [1, 2, 32], strides = [1, 1, 1]} : vector<8x2x32xf32> to vector<1x2x32xf32>
    %776 = vector.shape_cast %775 : vector<1x2x32xf32> to vector<2x32xf32>
    %cst_185 = arith.constant dense<0.000000e+00> : vector<2x32xf32>
    %777 = tpu.matmul %756, %678, %cst_185 {dimension_numbers = #tpu.dot_dimension_numbers<[1], [0], [0], [1], [0, 0, 1, 1], [], []>} : vector<2x32xf32>, vector<32x32xf32>, vector<2x32xf32> -> vector<2x32xf32>
    %778 = arith.addf %776, %777 : vector<2x32xf32>
    %779 = math.tanh %778 : vector<2x32xf32>
    %780 = vector.extract_strided_slice %672 {offsets = [2, 0, 0], sizes = [1, 2, 32], strides = [1, 1, 1]} : vector<8x2x32xf32> to vector<1x2x32xf32>
    %781 = vector.shape_cast %780 : vector<1x2x32xf32> to vector<2x32xf32>
    %cst_186 = arith.constant dense<0.000000e+00> : vector<2x32xf32>
    %782 = tpu.matmul %756, %680, %cst_186 {dimension_numbers = #tpu.dot_dimension_numbers<[1], [0], [0], [1], [0, 0, 1, 1], [], []>} : vector<2x32xf32>, vector<32x32xf32>, vector<2x32xf32> -> vector<2x32xf32>
    %783 = arith.addf %781, %782 : vector<2x32xf32>
    %784 = arith.negf %783 : vector<2x32xf32>
    %785 = math.exp %784 : vector<2x32xf32>
    %cst_187 = arith.constant 1.000000e+00 : f32
    %786 = vector.broadcast %cst_187 : f32 to vector<2x32xf32>
    %787 = arith.addf %786, %785 : vector<2x32xf32>
    %788 = arith.divf %786, %787 : vector<2x32xf32>
    %789 = arith.mulf %774, %754 : vector<2x32xf32>
    %790 = arith.mulf %765, %779 : vector<2x32xf32>
    %791 = arith.addf %789, %790 : vector<2x32xf32>
    %792 = math.tanh %791 : vector<2x32xf32>
    %793 = arith.mulf %788, %792 : vector<2x32xf32>
    %794 = vector.extract_strided_slice %666 {offsets = [3, 0, 0], sizes = [1, 2, 32], strides = [1, 1, 1]} : vector<8x2x32xf32> to vector<1x2x32xf32>
    %795 = vector.shape_cast %794 : vector<1x2x32xf32> to vector<2x32xf32>
    %cst_188 = arith.constant dense<0.000000e+00> : vector<2x32xf32>
    %796 = tpu.matmul %793, %674, %cst_188 {dimension_numbers = #tpu.dot_dimension_numbers<[1], [0], [0], [1], [0, 0, 1, 1], [], []>} : vector<2x32xf32>, vector<32x32xf32>, vector<2x32xf32> -> vector<2x32xf32>
    %797 = arith.addf %795, %796 : vector<2x32xf32>
    %798 = arith.negf %797 : vector<2x32xf32>
    %799 = math.exp %798 : vector<2x32xf32>
    %cst_189 = arith.constant 1.000000e+00 : f32
    %800 = vector.broadcast %cst_189 : f32 to vector<2x32xf32>
    %801 = arith.addf %800, %799 : vector<2x32xf32>
    %802 = arith.divf %800, %801 : vector<2x32xf32>
    %803 = vector.extract_strided_slice %668 {offsets = [3, 0, 0], sizes = [1, 2, 32], strides = [1, 1, 1]} : vector<8x2x32xf32> to vector<1x2x32xf32>
    %804 = vector.shape_cast %803 : vector<1x2x32xf32> to vector<2x32xf32>
    %cst_190 = arith.constant dense<0.000000e+00> : vector<2x32xf32>
    %805 = tpu.matmul %793, %676, %cst_190 {dimension_numbers = #tpu.dot_dimension_numbers<[1], [0], [0], [1], [0, 0, 1, 1], [], []>} : vector<2x32xf32>, vector<32x32xf32>, vector<2x32xf32> -> vector<2x32xf32>
    %806 = arith.addf %804, %805 : vector<2x32xf32>
    %807 = arith.negf %806 : vector<2x32xf32>
    %808 = math.exp %807 : vector<2x32xf32>
    %cst_191 = arith.constant 1.000000e+00 : f32
    %809 = vector.broadcast %cst_191 : f32 to vector<2x32xf32>
    %810 = arith.addf %809, %808 : vector<2x32xf32>
    %811 = arith.divf %809, %810 : vector<2x32xf32>
    %812 = vector.extract_strided_slice %670 {offsets = [3, 0, 0], sizes = [1, 2, 32], strides = [1, 1, 1]} : vector<8x2x32xf32> to vector<1x2x32xf32>
    %813 = vector.shape_cast %812 : vector<1x2x32xf32> to vector<2x32xf32>
    %cst_192 = arith.constant dense<0.000000e+00> : vector<2x32xf32>
    %814 = tpu.matmul %793, %678, %cst_192 {dimension_numbers = #tpu.dot_dimension_numbers<[1], [0], [0], [1], [0, 0, 1, 1], [], []>} : vector<2x32xf32>, vector<32x32xf32>, vector<2x32xf32> -> vector<2x32xf32>
    %815 = arith.addf %813, %814 : vector<2x32xf32>
    %816 = math.tanh %815 : vector<2x32xf32>
    %817 = vector.extract_strided_slice %672 {offsets = [3, 0, 0], sizes = [1, 2, 32], strides = [1, 1, 1]} : vector<8x2x32xf32> to vector<1x2x32xf32>
    %818 = vector.shape_cast %817 : vector<1x2x32xf32> to vector<2x32xf32>
    %cst_193 = arith.constant dense<0.000000e+00> : vector<2x32xf32>
    %819 = tpu.matmul %793, %680, %cst_193 {dimension_numbers = #tpu.dot_dimension_numbers<[1], [0], [0], [1], [0, 0, 1, 1], [], []>} : vector<2x32xf32>, vector<32x32xf32>, vector<2x32xf32> -> vector<2x32xf32>
    %820 = arith.addf %818, %819 : vector<2x32xf32>
    %821 = arith.negf %820 : vector<2x32xf32>
    %822 = math.exp %821 : vector<2x32xf32>
    %cst_194 = arith.constant 1.000000e+00 : f32
    %823 = vector.broadcast %cst_194 : f32 to vector<2x32xf32>
    %824 = arith.addf %823, %822 : vector<2x32xf32>
    %825 = arith.divf %823, %824 : vector<2x32xf32>
    %826 = arith.mulf %811, %791 : vector<2x32xf32>
    %827 = arith.mulf %802, %816 : vector<2x32xf32>
    %828 = arith.addf %826, %827 : vector<2x32xf32>
    %829 = math.tanh %828 : vector<2x32xf32>
    %830 = arith.mulf %825, %829 : vector<2x32xf32>
    %831 = vector.extract_strided_slice %666 {offsets = [4, 0, 0], sizes = [1, 2, 32], strides = [1, 1, 1]} : vector<8x2x32xf32> to vector<1x2x32xf32>
    %832 = vector.shape_cast %831 : vector<1x2x32xf32> to vector<2x32xf32>
    %cst_195 = arith.constant dense<0.000000e+00> : vector<2x32xf32>
    %833 = tpu.matmul %830, %674, %cst_195 {dimension_numbers = #tpu.dot_dimension_numbers<[1], [0], [0], [1], [0, 0, 1, 1], [], []>} : vector<2x32xf32>, vector<32x32xf32>, vector<2x32xf32> -> vector<2x32xf32>
    %834 = arith.addf %832, %833 : vector<2x32xf32>
    %835 = arith.negf %834 : vector<2x32xf32>
    %836 = math.exp %835 : vector<2x32xf32>
    %cst_196 = arith.constant 1.000000e+00 : f32
    %837 = vector.broadcast %cst_196 : f32 to vector<2x32xf32>
    %838 = arith.addf %837, %836 : vector<2x32xf32>
    %839 = arith.divf %837, %838 : vector<2x32xf32>
    %840 = vector.extract_strided_slice %668 {offsets = [4, 0, 0], sizes = [1, 2, 32], strides = [1, 1, 1]} : vector<8x2x32xf32> to vector<1x2x32xf32>
    %841 = vector.shape_cast %840 : vector<1x2x32xf32> to vector<2x32xf32>
    %cst_197 = arith.constant dense<0.000000e+00> : vector<2x32xf32>
    %842 = tpu.matmul %830, %676, %cst_197 {dimension_numbers = #tpu.dot_dimension_numbers<[1], [0], [0], [1], [0, 0, 1, 1], [], []>} : vector<2x32xf32>, vector<32x32xf32>, vector<2x32xf32> -> vector<2x32xf32>
    %843 = arith.addf %841, %842 : vector<2x32xf32>
    %844 = arith.negf %843 : vector<2x32xf32>
    %845 = math.exp %844 : vector<2x32xf32>
    %cst_198 = arith.constant 1.000000e+00 : f32
    %846 = vector.broadcast %cst_198 : f32 to vector<2x32xf32>
    %847 = arith.addf %846, %845 : vector<2x32xf32>
    %848 = arith.divf %846, %847 : vector<2x32xf32>
    %849 = vector.extract_strided_slice %670 {offsets = [4, 0, 0], sizes = [1, 2, 32], strides = [1, 1, 1]} : vector<8x2x32xf32> to vector<1x2x32xf32>
    %850 = vector.shape_cast %849 : vector<1x2x32xf32> to vector<2x32xf32>
    %cst_199 = arith.constant dense<0.000000e+00> : vector<2x32xf32>
    %851 = tpu.matmul %830, %678, %cst_199 {dimension_numbers = #tpu.dot_dimension_numbers<[1], [0], [0], [1], [0, 0, 1, 1], [], []>} : vector<2x32xf32>, vector<32x32xf32>, vector<2x32xf32> -> vector<2x32xf32>
    %852 = arith.addf %850, %851 : vector<2x32xf32>
    %853 = math.tanh %852 : vector<2x32xf32>
    %854 = vector.extract_strided_slice %672 {offsets = [4, 0, 0], sizes = [1, 2, 32], strides = [1, 1, 1]} : vector<8x2x32xf32> to vector<1x2x32xf32>
    %855 = vector.shape_cast %854 : vector<1x2x32xf32> to vector<2x32xf32>
    %cst_200 = arith.constant dense<0.000000e+00> : vector<2x32xf32>
    %856 = tpu.matmul %830, %680, %cst_200 {dimension_numbers = #tpu.dot_dimension_numbers<[1], [0], [0], [1], [0, 0, 1, 1], [], []>} : vector<2x32xf32>, vector<32x32xf32>, vector<2x32xf32> -> vector<2x32xf32>
    %857 = arith.addf %855, %856 : vector<2x32xf32>
    %858 = arith.negf %857 : vector<2x32xf32>
    %859 = math.exp %858 : vector<2x32xf32>
    %cst_201 = arith.constant 1.000000e+00 : f32
    %860 = vector.broadcast %cst_201 : f32 to vector<2x32xf32>
    %861 = arith.addf %860, %859 : vector<2x32xf32>
    %862 = arith.divf %860, %861 : vector<2x32xf32>
    %863 = arith.mulf %848, %828 : vector<2x32xf32>
    %864 = arith.mulf %839, %853 : vector<2x32xf32>
    %865 = arith.addf %863, %864 : vector<2x32xf32>
    %866 = math.tanh %865 : vector<2x32xf32>
    %867 = arith.mulf %862, %866 : vector<2x32xf32>
    %868 = vector.extract_strided_slice %666 {offsets = [5, 0, 0], sizes = [1, 2, 32], strides = [1, 1, 1]} : vector<8x2x32xf32> to vector<1x2x32xf32>
    %869 = vector.shape_cast %868 : vector<1x2x32xf32> to vector<2x32xf32>
    %cst_202 = arith.constant dense<0.000000e+00> : vector<2x32xf32>
    %870 = tpu.matmul %867, %674, %cst_202 {dimension_numbers = #tpu.dot_dimension_numbers<[1], [0], [0], [1], [0, 0, 1, 1], [], []>} : vector<2x32xf32>, vector<32x32xf32>, vector<2x32xf32> -> vector<2x32xf32>
    %871 = arith.addf %869, %870 : vector<2x32xf32>
    %872 = arith.negf %871 : vector<2x32xf32>
    %873 = math.exp %872 : vector<2x32xf32>
    %cst_203 = arith.constant 1.000000e+00 : f32
    %874 = vector.broadcast %cst_203 : f32 to vector<2x32xf32>
    %875 = arith.addf %874, %873 : vector<2x32xf32>
    %876 = arith.divf %874, %875 : vector<2x32xf32>
    %877 = vector.extract_strided_slice %668 {offsets = [5, 0, 0], sizes = [1, 2, 32], strides = [1, 1, 1]} : vector<8x2x32xf32> to vector<1x2x32xf32>
    %878 = vector.shape_cast %877 : vector<1x2x32xf32> to vector<2x32xf32>
    %cst_204 = arith.constant dense<0.000000e+00> : vector<2x32xf32>
    %879 = tpu.matmul %867, %676, %cst_204 {dimension_numbers = #tpu.dot_dimension_numbers<[1], [0], [0], [1], [0, 0, 1, 1], [], []>} : vector<2x32xf32>, vector<32x32xf32>, vector<2x32xf32> -> vector<2x32xf32>
    %880 = arith.addf %878, %879 : vector<2x32xf32>
    %881 = arith.negf %880 : vector<2x32xf32>
    %882 = math.exp %881 : vector<2x32xf32>
    %cst_205 = arith.constant 1.000000e+00 : f32
    %883 = vector.broadcast %cst_205 : f32 to vector<2x32xf32>
    %884 = arith.addf %883, %882 : vector<2x32xf32>
    %885 = arith.divf %883, %884 : vector<2x32xf32>
    %886 = vector.extract_strided_slice %670 {offsets = [5, 0, 0], sizes = [1, 2, 32], strides = [1, 1, 1]} : vector<8x2x32xf32> to vector<1x2x32xf32>
    %887 = vector.shape_cast %886 : vector<1x2x32xf32> to vector<2x32xf32>
    %cst_206 = arith.constant dense<0.000000e+00> : vector<2x32xf32>
    %888 = tpu.matmul %867, %678, %cst_206 {dimension_numbers = #tpu.dot_dimension_numbers<[1], [0], [0], [1], [0, 0, 1, 1], [], []>} : vector<2x32xf32>, vector<32x32xf32>, vector<2x32xf32> -> vector<2x32xf32>
    %889 = arith.addf %887, %888 : vector<2x32xf32>
    %890 = math.tanh %889 : vector<2x32xf32>
    %891 = vector.extract_strided_slice %672 {offsets = [5, 0, 0], sizes = [1, 2, 32], strides = [1, 1, 1]} : vector<8x2x32xf32> to vector<1x2x32xf32>
    %892 = vector.shape_cast %891 : vector<1x2x32xf32> to vector<2x32xf32>
    %cst_207 = arith.constant dense<0.000000e+00> : vector<2x32xf32>
    %893 = tpu.matmul %867, %680, %cst_207 {dimension_numbers = #tpu.dot_dimension_numbers<[1], [0], [0], [1], [0, 0, 1, 1], [], []>} : vector<2x32xf32>, vector<32x32xf32>, vector<2x32xf32> -> vector<2x32xf32>
    %894 = arith.addf %892, %893 : vector<2x32xf32>
    %895 = arith.negf %894 : vector<2x32xf32>
    %896 = math.exp %895 : vector<2x32xf32>
    %cst_208 = arith.constant 1.000000e+00 : f32
    %897 = vector.broadcast %cst_208 : f32 to vector<2x32xf32>
    %898 = arith.addf %897, %896 : vector<2x32xf32>
    %899 = arith.divf %897, %898 : vector<2x32xf32>
    %900 = arith.mulf %885, %865 : vector<2x32xf32>
    %901 = arith.mulf %876, %890 : vector<2x32xf32>
    %902 = arith.addf %900, %901 : vector<2x32xf32>
    %903 = math.tanh %902 : vector<2x32xf32>
    %904 = arith.mulf %899, %903 : vector<2x32xf32>
    %905 = vector.extract_strided_slice %666 {offsets = [6, 0, 0], sizes = [1, 2, 32], strides = [1, 1, 1]} : vector<8x2x32xf32> to vector<1x2x32xf32>
    %906 = vector.shape_cast %905 : vector<1x2x32xf32> to vector<2x32xf32>
    %cst_209 = arith.constant dense<0.000000e+00> : vector<2x32xf32>
    %907 = tpu.matmul %904, %674, %cst_209 {dimension_numbers = #tpu.dot_dimension_numbers<[1], [0], [0], [1], [0, 0, 1, 1], [], []>} : vector<2x32xf32>, vector<32x32xf32>, vector<2x32xf32> -> vector<2x32xf32>
    %908 = arith.addf %906, %907 : vector<2x32xf32>
    %909 = arith.negf %908 : vector<2x32xf32>
    %910 = math.exp %909 : vector<2x32xf32>
    %cst_210 = arith.constant 1.000000e+00 : f32
    %911 = vector.broadcast %cst_210 : f32 to vector<2x32xf32>
    %912 = arith.addf %911, %910 : vector<2x32xf32>
    %913 = arith.divf %911, %912 : vector<2x32xf32>
    %914 = vector.extract_strided_slice %668 {offsets = [6, 0, 0], sizes = [1, 2, 32], strides = [1, 1, 1]} : vector<8x2x32xf32> to vector<1x2x32xf32>
    %915 = vector.shape_cast %914 : vector<1x2x32xf32> to vector<2x32xf32>
    %cst_211 = arith.constant dense<0.000000e+00> : vector<2x32xf32>
    %916 = tpu.matmul %904, %676, %cst_211 {dimension_numbers = #tpu.dot_dimension_numbers<[1], [0], [0], [1], [0, 0, 1, 1], [], []>} : vector<2x32xf32>, vector<32x32xf32>, vector<2x32xf32> -> vector<2x32xf32>
    %917 = arith.addf %915, %916 : vector<2x32xf32>
    %918 = arith.negf %917 : vector<2x32xf32>
    %919 = math.exp %918 : vector<2x32xf32>
    %cst_212 = arith.constant 1.000000e+00 : f32
    %920 = vector.broadcast %cst_212 : f32 to vector<2x32xf32>
    %921 = arith.addf %920, %919 : vector<2x32xf32>
    %922 = arith.divf %920, %921 : vector<2x32xf32>
    %923 = vector.extract_strided_slice %670 {offsets = [6, 0, 0], sizes = [1, 2, 32], strides = [1, 1, 1]} : vector<8x2x32xf32> to vector<1x2x32xf32>
    %924 = vector.shape_cast %923 : vector<1x2x32xf32> to vector<2x32xf32>
    %cst_213 = arith.constant dense<0.000000e+00> : vector<2x32xf32>
    %925 = tpu.matmul %904, %678, %cst_213 {dimension_numbers = #tpu.dot_dimension_numbers<[1], [0], [0], [1], [0, 0, 1, 1], [], []>} : vector<2x32xf32>, vector<32x32xf32>, vector<2x32xf32> -> vector<2x32xf32>
    %926 = arith.addf %924, %925 : vector<2x32xf32>
    %927 = math.tanh %926 : vector<2x32xf32>
    %928 = vector.extract_strided_slice %672 {offsets = [6, 0, 0], sizes = [1, 2, 32], strides = [1, 1, 1]} : vector<8x2x32xf32> to vector<1x2x32xf32>
    %929 = vector.shape_cast %928 : vector<1x2x32xf32> to vector<2x32xf32>
    %cst_214 = arith.constant dense<0.000000e+00> : vector<2x32xf32>
    %930 = tpu.matmul %904, %680, %cst_214 {dimension_numbers = #tpu.dot_dimension_numbers<[1], [0], [0], [1], [0, 0, 1, 1], [], []>} : vector<2x32xf32>, vector<32x32xf32>, vector<2x32xf32> -> vector<2x32xf32>
    %931 = arith.addf %929, %930 : vector<2x32xf32>
    %932 = arith.negf %931 : vector<2x32xf32>
    %933 = math.exp %932 : vector<2x32xf32>
    %cst_215 = arith.constant 1.000000e+00 : f32
    %934 = vector.broadcast %cst_215 : f32 to vector<2x32xf32>
    %935 = arith.addf %934, %933 : vector<2x32xf32>
    %936 = arith.divf %934, %935 : vector<2x32xf32>
    %937 = arith.mulf %922, %902 : vector<2x32xf32>
    %938 = arith.mulf %913, %927 : vector<2x32xf32>
    %939 = arith.addf %937, %938 : vector<2x32xf32>
    %940 = math.tanh %939 : vector<2x32xf32>
    %941 = arith.mulf %936, %940 : vector<2x32xf32>
    %942 = vector.extract_strided_slice %666 {offsets = [7, 0, 0], sizes = [1, 2, 32], strides = [1, 1, 1]} : vector<8x2x32xf32> to vector<1x2x32xf32>
    %943 = vector.shape_cast %942 : vector<1x2x32xf32> to vector<2x32xf32>
    %cst_216 = arith.constant dense<0.000000e+00> : vector<2x32xf32>
    %944 = tpu.matmul %941, %674, %cst_216 {dimension_numbers = #tpu.dot_dimension_numbers<[1], [0], [0], [1], [0, 0, 1, 1], [], []>} : vector<2x32xf32>, vector<32x32xf32>, vector<2x32xf32> -> vector<2x32xf32>
    %945 = arith.addf %943, %944 : vector<2x32xf32>
    %946 = arith.negf %945 : vector<2x32xf32>
    %947 = math.exp %946 : vector<2x32xf32>
    %cst_217 = arith.constant 1.000000e+00 : f32
    %948 = vector.broadcast %cst_217 : f32 to vector<2x32xf32>
    %949 = arith.addf %948, %947 : vector<2x32xf32>
    %950 = arith.divf %948, %949 : vector<2x32xf32>
    %951 = vector.extract_strided_slice %668 {offsets = [7, 0, 0], sizes = [1, 2, 32], strides = [1, 1, 1]} : vector<8x2x32xf32> to vector<1x2x32xf32>
    %952 = vector.shape_cast %951 : vector<1x2x32xf32> to vector<2x32xf32>
    %cst_218 = arith.constant dense<0.000000e+00> : vector<2x32xf32>
    %953 = tpu.matmul %941, %676, %cst_218 {dimension_numbers = #tpu.dot_dimension_numbers<[1], [0], [0], [1], [0, 0, 1, 1], [], []>} : vector<2x32xf32>, vector<32x32xf32>, vector<2x32xf32> -> vector<2x32xf32>
    %954 = arith.addf %952, %953 : vector<2x32xf32>
    %955 = arith.negf %954 : vector<2x32xf32>
    %956 = math.exp %955 : vector<2x32xf32>
    %cst_219 = arith.constant 1.000000e+00 : f32
    %957 = vector.broadcast %cst_219 : f32 to vector<2x32xf32>
    %958 = arith.addf %957, %956 : vector<2x32xf32>
    %959 = arith.divf %957, %958 : vector<2x32xf32>
    %960 = vector.extract_strided_slice %670 {offsets = [7, 0, 0], sizes = [1, 2, 32], strides = [1, 1, 1]} : vector<8x2x32xf32> to vector<1x2x32xf32>
    %961 = vector.shape_cast %960 : vector<1x2x32xf32> to vector<2x32xf32>
    %cst_220 = arith.constant dense<0.000000e+00> : vector<2x32xf32>
    %962 = tpu.matmul %941, %678, %cst_220 {dimension_numbers = #tpu.dot_dimension_numbers<[1], [0], [0], [1], [0, 0, 1, 1], [], []>} : vector<2x32xf32>, vector<32x32xf32>, vector<2x32xf32> -> vector<2x32xf32>
    %963 = arith.addf %961, %962 : vector<2x32xf32>
    %964 = math.tanh %963 : vector<2x32xf32>
    %965 = vector.extract_strided_slice %672 {offsets = [7, 0, 0], sizes = [1, 2, 32], strides = [1, 1, 1]} : vector<8x2x32xf32> to vector<1x2x32xf32>
    %966 = vector.shape_cast %965 : vector<1x2x32xf32> to vector<2x32xf32>
    %cst_221 = arith.constant dense<0.000000e+00> : vector<2x32xf32>
    %967 = tpu.matmul %941, %680, %cst_221 {dimension_numbers = #tpu.dot_dimension_numbers<[1], [0], [0], [1], [0, 0, 1, 1], [], []>} : vector<2x32xf32>, vector<32x32xf32>, vector<2x32xf32> -> vector<2x32xf32>
    %968 = arith.addf %966, %967 : vector<2x32xf32>
    %969 = arith.negf %968 : vector<2x32xf32>
    %970 = math.exp %969 : vector<2x32xf32>
    %cst_222 = arith.constant 1.000000e+00 : f32
    %971 = vector.broadcast %cst_222 : f32 to vector<2x32xf32>
    %972 = arith.addf %971, %970 : vector<2x32xf32>
    %973 = arith.divf %971, %972 : vector<2x32xf32>
    %974 = arith.mulf %959, %939 : vector<2x32xf32>
    %975 = arith.mulf %950, %964 : vector<2x32xf32>
    %976 = arith.addf %974, %975 : vector<2x32xf32>
    %977 = math.tanh %976 : vector<2x32xf32>
    %978 = arith.mulf %973, %977 : vector<2x32xf32>
    %c0_223 = arith.constant 0 : index
    %c0_224 = arith.constant 0 : index
    %979 = vector.load %arg11[%c0_223, %c0_224] : memref<64x128xf32, #tpu.memory_space<vmem>>, vector<64x128xf32>
    %cst_225 = arith.constant dense<0.000000e+00> : vector<16x128xf32>
    %980 = tpu.matmul %659, %979, %cst_225 {dimension_numbers = #tpu.dot_dimension_numbers<[1], [0], [0], [1], [0, 0, 1, 1], [], []>} : vector<16x64xf32>, vector<64x128xf32>, vector<16x128xf32> -> vector<16x128xf32>
    %c0_226 = arith.constant 0 : index
    %c0_227 = arith.constant 0 : index
    %981 = vector.load %arg13[%c0_226, %c0_227] : memref<1x128xf32, #tpu.memory_space<vmem>>, vector<1x128xf32>
    %982 = vector.broadcast %981 : vector<1x128xf32> to vector<16x128xf32>
    %983 = arith.addf %980, %982 : vector<16x128xf32>
    %984 = vector.extract_strided_slice %983 {offsets = [0, 0], sizes = [16, 32], strides = [1, 1]} : vector<16x128xf32> to vector<16x32xf32>
    %985 = vector.shape_cast %984 : vector<16x32xf32> to vector<8x2x32xf32>
    %986 = vector.extract_strided_slice %983 {offsets = [0, 32], sizes = [16, 32], strides = [1, 1]} : vector<16x128xf32> to vector<16x32xf32>
    %987 = vector.shape_cast %986 : vector<16x32xf32> to vector<8x2x32xf32>
    %988 = vector.extract_strided_slice %983 {offsets = [0, 64], sizes = [16, 32], strides = [1, 1]} : vector<16x128xf32> to vector<16x32xf32>
    %989 = vector.shape_cast %988 : vector<16x32xf32> to vector<8x2x32xf32>
    %990 = vector.extract_strided_slice %983 {offsets = [0, 96], sizes = [16, 32], strides = [1, 1]} : vector<16x128xf32> to vector<16x32xf32>
    %991 = vector.shape_cast %990 : vector<16x32xf32> to vector<8x2x32xf32>
    %c0_228 = arith.constant 0 : index
    %c0_229 = arith.constant 0 : index
    %c0_230 = arith.constant 0 : index
    %992 = vector.load %arg12[%c0_228, %c0_229, %c0_230] : memref<4x32x32xf32, #tpu.memory_space<vmem>>, vector<1x32x32xf32>
    %993 = vector.shape_cast %992 : vector<1x32x32xf32> to vector<32x32xf32>
    %c1_231 = arith.constant 1 : index
    %c0_232 = arith.constant 0 : index
    %c0_233 = arith.constant 0 : index
    %994 = vector.load %arg12[%c1_231, %c0_232, %c0_233] : memref<4x32x32xf32, #tpu.memory_space<vmem>>, vector<1x32x32xf32>
    %995 = vector.shape_cast %994 : vector<1x32x32xf32> to vector<32x32xf32>
    %c2_234 = arith.constant 2 : index
    %c0_235 = arith.constant 0 : index
    %c0_236 = arith.constant 0 : index
    %996 = vector.load %arg12[%c2_234, %c0_235, %c0_236] : memref<4x32x32xf32, #tpu.memory_space<vmem>>, vector<1x32x32xf32>
    %997 = vector.shape_cast %996 : vector<1x32x32xf32> to vector<32x32xf32>
    %c3_237 = arith.constant 3 : index
    %c0_238 = arith.constant 0 : index
    %c0_239 = arith.constant 0 : index
    %998 = vector.load %arg12[%c3_237, %c0_238, %c0_239] : memref<4x32x32xf32, #tpu.memory_space<vmem>>, vector<1x32x32xf32>
    %999 = vector.shape_cast %998 : vector<1x32x32xf32> to vector<32x32xf32>
    %cst_240 = arith.constant 0.000000e+00 : f32
    %1000 = vector.broadcast %cst_240 : f32 to vector<2x32xf32>
    %cst_241 = arith.constant 0.000000e+00 : f32
    %1001 = vector.broadcast %cst_241 : f32 to vector<2x32xf32>
    %1002 = vector.extract_strided_slice %985 {offsets = [7, 0, 0], sizes = [1, 2, 32], strides = [1, 1, 1]} : vector<8x2x32xf32> to vector<1x2x32xf32>
    %1003 = vector.shape_cast %1002 : vector<1x2x32xf32> to vector<2x32xf32>
    %cst_242 = arith.constant dense<0.000000e+00> : vector<2x32xf32>
    %1004 = tpu.matmul %1000, %993, %cst_242 {dimension_numbers = #tpu.dot_dimension_numbers<[1], [0], [0], [1], [0, 0, 1, 1], [], []>} : vector<2x32xf32>, vector<32x32xf32>, vector<2x32xf32> -> vector<2x32xf32>
    %1005 = arith.addf %1003, %1004 : vector<2x32xf32>
    %1006 = arith.negf %1005 : vector<2x32xf32>
    %1007 = math.exp %1006 : vector<2x32xf32>
    %cst_243 = arith.constant 1.000000e+00 : f32
    %1008 = vector.broadcast %cst_243 : f32 to vector<2x32xf32>
    %1009 = arith.addf %1008, %1007 : vector<2x32xf32>
    %1010 = arith.divf %1008, %1009 : vector<2x32xf32>
    %1011 = vector.extract_strided_slice %987 {offsets = [7, 0, 0], sizes = [1, 2, 32], strides = [1, 1, 1]} : vector<8x2x32xf32> to vector<1x2x32xf32>
    %1012 = vector.shape_cast %1011 : vector<1x2x32xf32> to vector<2x32xf32>
    %cst_244 = arith.constant dense<0.000000e+00> : vector<2x32xf32>
    %1013 = tpu.matmul %1000, %995, %cst_244 {dimension_numbers = #tpu.dot_dimension_numbers<[1], [0], [0], [1], [0, 0, 1, 1], [], []>} : vector<2x32xf32>, vector<32x32xf32>, vector<2x32xf32> -> vector<2x32xf32>
    %1014 = arith.addf %1012, %1013 : vector<2x32xf32>
    %1015 = arith.negf %1014 : vector<2x32xf32>
    %1016 = math.exp %1015 : vector<2x32xf32>
    %cst_245 = arith.constant 1.000000e+00 : f32
    %1017 = vector.broadcast %cst_245 : f32 to vector<2x32xf32>
    %1018 = arith.addf %1017, %1016 : vector<2x32xf32>
    %1019 = arith.divf %1017, %1018 : vector<2x32xf32>
    %1020 = vector.extract_strided_slice %989 {offsets = [7, 0, 0], sizes = [1, 2, 32], strides = [1, 1, 1]} : vector<8x2x32xf32> to vector<1x2x32xf32>
    %1021 = vector.shape_cast %1020 : vector<1x2x32xf32> to vector<2x32xf32>
    %cst_246 = arith.constant dense<0.000000e+00> : vector<2x32xf32>
    %1022 = tpu.matmul %1000, %997, %cst_246 {dimension_numbers = #tpu.dot_dimension_numbers<[1], [0], [0], [1], [0, 0, 1, 1], [], []>} : vector<2x32xf32>, vector<32x32xf32>, vector<2x32xf32> -> vector<2x32xf32>
    %1023 = arith.addf %1021, %1022 : vector<2x32xf32>
    %1024 = math.tanh %1023 : vector<2x32xf32>
    %1025 = vector.extract_strided_slice %991 {offsets = [7, 0, 0], sizes = [1, 2, 32], strides = [1, 1, 1]} : vector<8x2x32xf32> to vector<1x2x32xf32>
    %1026 = vector.shape_cast %1025 : vector<1x2x32xf32> to vector<2x32xf32>
    %cst_247 = arith.constant dense<0.000000e+00> : vector<2x32xf32>
    %1027 = tpu.matmul %1000, %999, %cst_247 {dimension_numbers = #tpu.dot_dimension_numbers<[1], [0], [0], [1], [0, 0, 1, 1], [], []>} : vector<2x32xf32>, vector<32x32xf32>, vector<2x32xf32> -> vector<2x32xf32>
    %1028 = arith.addf %1026, %1027 : vector<2x32xf32>
    %1029 = arith.negf %1028 : vector<2x32xf32>
    %1030 = math.exp %1029 : vector<2x32xf32>
    %cst_248 = arith.constant 1.000000e+00 : f32
    %1031 = vector.broadcast %cst_248 : f32 to vector<2x32xf32>
    %1032 = arith.addf %1031, %1030 : vector<2x32xf32>
    %1033 = arith.divf %1031, %1032 : vector<2x32xf32>
    %1034 = arith.mulf %1019, %1001 : vector<2x32xf32>
    %1035 = arith.mulf %1010, %1024 : vector<2x32xf32>
    %1036 = arith.addf %1034, %1035 : vector<2x32xf32>
    %1037 = math.tanh %1036 : vector<2x32xf32>
    %1038 = arith.mulf %1033, %1037 : vector<2x32xf32>
    %1039 = vector.extract_strided_slice %985 {offsets = [6, 0, 0], sizes = [1, 2, 32], strides = [1, 1, 1]} : vector<8x2x32xf32> to vector<1x2x32xf32>
    %1040 = vector.shape_cast %1039 : vector<1x2x32xf32> to vector<2x32xf32>
    %cst_249 = arith.constant dense<0.000000e+00> : vector<2x32xf32>
    %1041 = tpu.matmul %1038, %993, %cst_249 {dimension_numbers = #tpu.dot_dimension_numbers<[1], [0], [0], [1], [0, 0, 1, 1], [], []>} : vector<2x32xf32>, vector<32x32xf32>, vector<2x32xf32> -> vector<2x32xf32>
    %1042 = arith.addf %1040, %1041 : vector<2x32xf32>
    %1043 = arith.negf %1042 : vector<2x32xf32>
    %1044 = math.exp %1043 : vector<2x32xf32>
    %cst_250 = arith.constant 1.000000e+00 : f32
    %1045 = vector.broadcast %cst_250 : f32 to vector<2x32xf32>
    %1046 = arith.addf %1045, %1044 : vector<2x32xf32>
    %1047 = arith.divf %1045, %1046 : vector<2x32xf32>
    %1048 = vector.extract_strided_slice %987 {offsets = [6, 0, 0], sizes = [1, 2, 32], strides = [1, 1, 1]} : vector<8x2x32xf32> to vector<1x2x32xf32>
    %1049 = vector.shape_cast %1048 : vector<1x2x32xf32> to vector<2x32xf32>
    %cst_251 = arith.constant dense<0.000000e+00> : vector<2x32xf32>
    %1050 = tpu.matmul %1038, %995, %cst_251 {dimension_numbers = #tpu.dot_dimension_numbers<[1], [0], [0], [1], [0, 0, 1, 1], [], []>} : vector<2x32xf32>, vector<32x32xf32>, vector<2x32xf32> -> vector<2x32xf32>
    %1051 = arith.addf %1049, %1050 : vector<2x32xf32>
    %1052 = arith.negf %1051 : vector<2x32xf32>
    %1053 = math.exp %1052 : vector<2x32xf32>
    %cst_252 = arith.constant 1.000000e+00 : f32
    %1054 = vector.broadcast %cst_252 : f32 to vector<2x32xf32>
    %1055 = arith.addf %1054, %1053 : vector<2x32xf32>
    %1056 = arith.divf %1054, %1055 : vector<2x32xf32>
    %1057 = vector.extract_strided_slice %989 {offsets = [6, 0, 0], sizes = [1, 2, 32], strides = [1, 1, 1]} : vector<8x2x32xf32> to vector<1x2x32xf32>
    %1058 = vector.shape_cast %1057 : vector<1x2x32xf32> to vector<2x32xf32>
    %cst_253 = arith.constant dense<0.000000e+00> : vector<2x32xf32>
    %1059 = tpu.matmul %1038, %997, %cst_253 {dimension_numbers = #tpu.dot_dimension_numbers<[1], [0], [0], [1], [0, 0, 1, 1], [], []>} : vector<2x32xf32>, vector<32x32xf32>, vector<2x32xf32> -> vector<2x32xf32>
    %1060 = arith.addf %1058, %1059 : vector<2x32xf32>
    %1061 = math.tanh %1060 : vector<2x32xf32>
    %1062 = vector.extract_strided_slice %991 {offsets = [6, 0, 0], sizes = [1, 2, 32], strides = [1, 1, 1]} : vector<8x2x32xf32> to vector<1x2x32xf32>
    %1063 = vector.shape_cast %1062 : vector<1x2x32xf32> to vector<2x32xf32>
    %cst_254 = arith.constant dense<0.000000e+00> : vector<2x32xf32>
    %1064 = tpu.matmul %1038, %999, %cst_254 {dimension_numbers = #tpu.dot_dimension_numbers<[1], [0], [0], [1], [0, 0, 1, 1], [], []>} : vector<2x32xf32>, vector<32x32xf32>, vector<2x32xf32> -> vector<2x32xf32>
    %1065 = arith.addf %1063, %1064 : vector<2x32xf32>
    %1066 = arith.negf %1065 : vector<2x32xf32>
    %1067 = math.exp %1066 : vector<2x32xf32>
    %cst_255 = arith.constant 1.000000e+00 : f32
    %1068 = vector.broadcast %cst_255 : f32 to vector<2x32xf32>
    %1069 = arith.addf %1068, %1067 : vector<2x32xf32>
    %1070 = arith.divf %1068, %1069 : vector<2x32xf32>
    %1071 = arith.mulf %1056, %1036 : vector<2x32xf32>
    %1072 = arith.mulf %1047, %1061 : vector<2x32xf32>
    %1073 = arith.addf %1071, %1072 : vector<2x32xf32>
    %1074 = math.tanh %1073 : vector<2x32xf32>
    %1075 = arith.mulf %1070, %1074 : vector<2x32xf32>
    %1076 = vector.extract_strided_slice %985 {offsets = [5, 0, 0], sizes = [1, 2, 32], strides = [1, 1, 1]} : vector<8x2x32xf32> to vector<1x2x32xf32>
    %1077 = vector.shape_cast %1076 : vector<1x2x32xf32> to vector<2x32xf32>
    %cst_256 = arith.constant dense<0.000000e+00> : vector<2x32xf32>
    %1078 = tpu.matmul %1075, %993, %cst_256 {dimension_numbers = #tpu.dot_dimension_numbers<[1], [0], [0], [1], [0, 0, 1, 1], [], []>} : vector<2x32xf32>, vector<32x32xf32>, vector<2x32xf32> -> vector<2x32xf32>
    %1079 = arith.addf %1077, %1078 : vector<2x32xf32>
    %1080 = arith.negf %1079 : vector<2x32xf32>
    %1081 = math.exp %1080 : vector<2x32xf32>
    %cst_257 = arith.constant 1.000000e+00 : f32
    %1082 = vector.broadcast %cst_257 : f32 to vector<2x32xf32>
    %1083 = arith.addf %1082, %1081 : vector<2x32xf32>
    %1084 = arith.divf %1082, %1083 : vector<2x32xf32>
    %1085 = vector.extract_strided_slice %987 {offsets = [5, 0, 0], sizes = [1, 2, 32], strides = [1, 1, 1]} : vector<8x2x32xf32> to vector<1x2x32xf32>
    %1086 = vector.shape_cast %1085 : vector<1x2x32xf32> to vector<2x32xf32>
    %cst_258 = arith.constant dense<0.000000e+00> : vector<2x32xf32>
    %1087 = tpu.matmul %1075, %995, %cst_258 {dimension_numbers = #tpu.dot_dimension_numbers<[1], [0], [0], [1], [0, 0, 1, 1], [], []>} : vector<2x32xf32>, vector<32x32xf32>, vector<2x32xf32> -> vector<2x32xf32>
    %1088 = arith.addf %1086, %1087 : vector<2x32xf32>
    %1089 = arith.negf %1088 : vector<2x32xf32>
    %1090 = math.exp %1089 : vector<2x32xf32>
    %cst_259 = arith.constant 1.000000e+00 : f32
    %1091 = vector.broadcast %cst_259 : f32 to vector<2x32xf32>
    %1092 = arith.addf %1091, %1090 : vector<2x32xf32>
    %1093 = arith.divf %1091, %1092 : vector<2x32xf32>
    %1094 = vector.extract_strided_slice %989 {offsets = [5, 0, 0], sizes = [1, 2, 32], strides = [1, 1, 1]} : vector<8x2x32xf32> to vector<1x2x32xf32>
    %1095 = vector.shape_cast %1094 : vector<1x2x32xf32> to vector<2x32xf32>
    %cst_260 = arith.constant dense<0.000000e+00> : vector<2x32xf32>
    %1096 = tpu.matmul %1075, %997, %cst_260 {dimension_numbers = #tpu.dot_dimension_numbers<[1], [0], [0], [1], [0, 0, 1, 1], [], []>} : vector<2x32xf32>, vector<32x32xf32>, vector<2x32xf32> -> vector<2x32xf32>
    %1097 = arith.addf %1095, %1096 : vector<2x32xf32>
    %1098 = math.tanh %1097 : vector<2x32xf32>
    %1099 = vector.extract_strided_slice %991 {offsets = [5, 0, 0], sizes = [1, 2, 32], strides = [1, 1, 1]} : vector<8x2x32xf32> to vector<1x2x32xf32>
    %1100 = vector.shape_cast %1099 : vector<1x2x32xf32> to vector<2x32xf32>
    %cst_261 = arith.constant dense<0.000000e+00> : vector<2x32xf32>
    %1101 = tpu.matmul %1075, %999, %cst_261 {dimension_numbers = #tpu.dot_dimension_numbers<[1], [0], [0], [1], [0, 0, 1, 1], [], []>} : vector<2x32xf32>, vector<32x32xf32>, vector<2x32xf32> -> vector<2x32xf32>
    %1102 = arith.addf %1100, %1101 : vector<2x32xf32>
    %1103 = arith.negf %1102 : vector<2x32xf32>
    %1104 = math.exp %1103 : vector<2x32xf32>
    %cst_262 = arith.constant 1.000000e+00 : f32
    %1105 = vector.broadcast %cst_262 : f32 to vector<2x32xf32>
    %1106 = arith.addf %1105, %1104 : vector<2x32xf32>
    %1107 = arith.divf %1105, %1106 : vector<2x32xf32>
    %1108 = arith.mulf %1093, %1073 : vector<2x32xf32>
    %1109 = arith.mulf %1084, %1098 : vector<2x32xf32>
    %1110 = arith.addf %1108, %1109 : vector<2x32xf32>
    %1111 = math.tanh %1110 : vector<2x32xf32>
    %1112 = arith.mulf %1107, %1111 : vector<2x32xf32>
    %1113 = vector.extract_strided_slice %985 {offsets = [4, 0, 0], sizes = [1, 2, 32], strides = [1, 1, 1]} : vector<8x2x32xf32> to vector<1x2x32xf32>
    %1114 = vector.shape_cast %1113 : vector<1x2x32xf32> to vector<2x32xf32>
    %cst_263 = arith.constant dense<0.000000e+00> : vector<2x32xf32>
    %1115 = tpu.matmul %1112, %993, %cst_263 {dimension_numbers = #tpu.dot_dimension_numbers<[1], [0], [0], [1], [0, 0, 1, 1], [], []>} : vector<2x32xf32>, vector<32x32xf32>, vector<2x32xf32> -> vector<2x32xf32>
    %1116 = arith.addf %1114, %1115 : vector<2x32xf32>
    %1117 = arith.negf %1116 : vector<2x32xf32>
    %1118 = math.exp %1117 : vector<2x32xf32>
    %cst_264 = arith.constant 1.000000e+00 : f32
    %1119 = vector.broadcast %cst_264 : f32 to vector<2x32xf32>
    %1120 = arith.addf %1119, %1118 : vector<2x32xf32>
    %1121 = arith.divf %1119, %1120 : vector<2x32xf32>
    %1122 = vector.extract_strided_slice %987 {offsets = [4, 0, 0], sizes = [1, 2, 32], strides = [1, 1, 1]} : vector<8x2x32xf32> to vector<1x2x32xf32>
    %1123 = vector.shape_cast %1122 : vector<1x2x32xf32> to vector<2x32xf32>
    %cst_265 = arith.constant dense<0.000000e+00> : vector<2x32xf32>
    %1124 = tpu.matmul %1112, %995, %cst_265 {dimension_numbers = #tpu.dot_dimension_numbers<[1], [0], [0], [1], [0, 0, 1, 1], [], []>} : vector<2x32xf32>, vector<32x32xf32>, vector<2x32xf32> -> vector<2x32xf32>
    %1125 = arith.addf %1123, %1124 : vector<2x32xf32>
    %1126 = arith.negf %1125 : vector<2x32xf32>
    %1127 = math.exp %1126 : vector<2x32xf32>
    %cst_266 = arith.constant 1.000000e+00 : f32
    %1128 = vector.broadcast %cst_266 : f32 to vector<2x32xf32>
    %1129 = arith.addf %1128, %1127 : vector<2x32xf32>
    %1130 = arith.divf %1128, %1129 : vector<2x32xf32>
    %1131 = vector.extract_strided_slice %989 {offsets = [4, 0, 0], sizes = [1, 2, 32], strides = [1, 1, 1]} : vector<8x2x32xf32> to vector<1x2x32xf32>
    %1132 = vector.shape_cast %1131 : vector<1x2x32xf32> to vector<2x32xf32>
    %cst_267 = arith.constant dense<0.000000e+00> : vector<2x32xf32>
    %1133 = tpu.matmul %1112, %997, %cst_267 {dimension_numbers = #tpu.dot_dimension_numbers<[1], [0], [0], [1], [0, 0, 1, 1], [], []>} : vector<2x32xf32>, vector<32x32xf32>, vector<2x32xf32> -> vector<2x32xf32>
    %1134 = arith.addf %1132, %1133 : vector<2x32xf32>
    %1135 = math.tanh %1134 : vector<2x32xf32>
    %1136 = vector.extract_strided_slice %991 {offsets = [4, 0, 0], sizes = [1, 2, 32], strides = [1, 1, 1]} : vector<8x2x32xf32> to vector<1x2x32xf32>
    %1137 = vector.shape_cast %1136 : vector<1x2x32xf32> to vector<2x32xf32>
    %cst_268 = arith.constant dense<0.000000e+00> : vector<2x32xf32>
    %1138 = tpu.matmul %1112, %999, %cst_268 {dimension_numbers = #tpu.dot_dimension_numbers<[1], [0], [0], [1], [0, 0, 1, 1], [], []>} : vector<2x32xf32>, vector<32x32xf32>, vector<2x32xf32> -> vector<2x32xf32>
    %1139 = arith.addf %1137, %1138 : vector<2x32xf32>
    %1140 = arith.negf %1139 : vector<2x32xf32>
    %1141 = math.exp %1140 : vector<2x32xf32>
    %cst_269 = arith.constant 1.000000e+00 : f32
    %1142 = vector.broadcast %cst_269 : f32 to vector<2x32xf32>
    %1143 = arith.addf %1142, %1141 : vector<2x32xf32>
    %1144 = arith.divf %1142, %1143 : vector<2x32xf32>
    %1145 = arith.mulf %1130, %1110 : vector<2x32xf32>
    %1146 = arith.mulf %1121, %1135 : vector<2x32xf32>
    %1147 = arith.addf %1145, %1146 : vector<2x32xf32>
    %1148 = math.tanh %1147 : vector<2x32xf32>
    %1149 = arith.mulf %1144, %1148 : vector<2x32xf32>
    %1150 = vector.extract_strided_slice %985 {offsets = [3, 0, 0], sizes = [1, 2, 32], strides = [1, 1, 1]} : vector<8x2x32xf32> to vector<1x2x32xf32>
    %1151 = vector.shape_cast %1150 : vector<1x2x32xf32> to vector<2x32xf32>
    %cst_270 = arith.constant dense<0.000000e+00> : vector<2x32xf32>
    %1152 = tpu.matmul %1149, %993, %cst_270 {dimension_numbers = #tpu.dot_dimension_numbers<[1], [0], [0], [1], [0, 0, 1, 1], [], []>} : vector<2x32xf32>, vector<32x32xf32>, vector<2x32xf32> -> vector<2x32xf32>
    %1153 = arith.addf %1151, %1152 : vector<2x32xf32>
    %1154 = arith.negf %1153 : vector<2x32xf32>
    %1155 = math.exp %1154 : vector<2x32xf32>
    %cst_271 = arith.constant 1.000000e+00 : f32
    %1156 = vector.broadcast %cst_271 : f32 to vector<2x32xf32>
    %1157 = arith.addf %1156, %1155 : vector<2x32xf32>
    %1158 = arith.divf %1156, %1157 : vector<2x32xf32>
    %1159 = vector.extract_strided_slice %987 {offsets = [3, 0, 0], sizes = [1, 2, 32], strides = [1, 1, 1]} : vector<8x2x32xf32> to vector<1x2x32xf32>
    %1160 = vector.shape_cast %1159 : vector<1x2x32xf32> to vector<2x32xf32>
    %cst_272 = arith.constant dense<0.000000e+00> : vector<2x32xf32>
    %1161 = tpu.matmul %1149, %995, %cst_272 {dimension_numbers = #tpu.dot_dimension_numbers<[1], [0], [0], [1], [0, 0, 1, 1], [], []>} : vector<2x32xf32>, vector<32x32xf32>, vector<2x32xf32> -> vector<2x32xf32>
    %1162 = arith.addf %1160, %1161 : vector<2x32xf32>
    %1163 = arith.negf %1162 : vector<2x32xf32>
    %1164 = math.exp %1163 : vector<2x32xf32>
    %cst_273 = arith.constant 1.000000e+00 : f32
    %1165 = vector.broadcast %cst_273 : f32 to vector<2x32xf32>
    %1166 = arith.addf %1165, %1164 : vector<2x32xf32>
    %1167 = arith.divf %1165, %1166 : vector<2x32xf32>
    %1168 = vector.extract_strided_slice %989 {offsets = [3, 0, 0], sizes = [1, 2, 32], strides = [1, 1, 1]} : vector<8x2x32xf32> to vector<1x2x32xf32>
    %1169 = vector.shape_cast %1168 : vector<1x2x32xf32> to vector<2x32xf32>
    %cst_274 = arith.constant dense<0.000000e+00> : vector<2x32xf32>
    %1170 = tpu.matmul %1149, %997, %cst_274 {dimension_numbers = #tpu.dot_dimension_numbers<[1], [0], [0], [1], [0, 0, 1, 1], [], []>} : vector<2x32xf32>, vector<32x32xf32>, vector<2x32xf32> -> vector<2x32xf32>
    %1171 = arith.addf %1169, %1170 : vector<2x32xf32>
    %1172 = math.tanh %1171 : vector<2x32xf32>
    %1173 = vector.extract_strided_slice %991 {offsets = [3, 0, 0], sizes = [1, 2, 32], strides = [1, 1, 1]} : vector<8x2x32xf32> to vector<1x2x32xf32>
    %1174 = vector.shape_cast %1173 : vector<1x2x32xf32> to vector<2x32xf32>
    %cst_275 = arith.constant dense<0.000000e+00> : vector<2x32xf32>
    %1175 = tpu.matmul %1149, %999, %cst_275 {dimension_numbers = #tpu.dot_dimension_numbers<[1], [0], [0], [1], [0, 0, 1, 1], [], []>} : vector<2x32xf32>, vector<32x32xf32>, vector<2x32xf32> -> vector<2x32xf32>
    %1176 = arith.addf %1174, %1175 : vector<2x32xf32>
    %1177 = arith.negf %1176 : vector<2x32xf32>
    %1178 = math.exp %1177 : vector<2x32xf32>
    %cst_276 = arith.constant 1.000000e+00 : f32
    %1179 = vector.broadcast %cst_276 : f32 to vector<2x32xf32>
    %1180 = arith.addf %1179, %1178 : vector<2x32xf32>
    %1181 = arith.divf %1179, %1180 : vector<2x32xf32>
    %1182 = arith.mulf %1167, %1147 : vector<2x32xf32>
    %1183 = arith.mulf %1158, %1172 : vector<2x32xf32>
    %1184 = arith.addf %1182, %1183 : vector<2x32xf32>
    %1185 = math.tanh %1184 : vector<2x32xf32>
    %1186 = arith.mulf %1181, %1185 : vector<2x32xf32>
    %1187 = vector.extract_strided_slice %985 {offsets = [2, 0, 0], sizes = [1, 2, 32], strides = [1, 1, 1]} : vector<8x2x32xf32> to vector<1x2x32xf32>
    %1188 = vector.shape_cast %1187 : vector<1x2x32xf32> to vector<2x32xf32>
    %cst_277 = arith.constant dense<0.000000e+00> : vector<2x32xf32>
    %1189 = tpu.matmul %1186, %993, %cst_277 {dimension_numbers = #tpu.dot_dimension_numbers<[1], [0], [0], [1], [0, 0, 1, 1], [], []>} : vector<2x32xf32>, vector<32x32xf32>, vector<2x32xf32> -> vector<2x32xf32>
    %1190 = arith.addf %1188, %1189 : vector<2x32xf32>
    %1191 = arith.negf %1190 : vector<2x32xf32>
    %1192 = math.exp %1191 : vector<2x32xf32>
    %cst_278 = arith.constant 1.000000e+00 : f32
    %1193 = vector.broadcast %cst_278 : f32 to vector<2x32xf32>
    %1194 = arith.addf %1193, %1192 : vector<2x32xf32>
    %1195 = arith.divf %1193, %1194 : vector<2x32xf32>
    %1196 = vector.extract_strided_slice %987 {offsets = [2, 0, 0], sizes = [1, 2, 32], strides = [1, 1, 1]} : vector<8x2x32xf32> to vector<1x2x32xf32>
    %1197 = vector.shape_cast %1196 : vector<1x2x32xf32> to vector<2x32xf32>
    %cst_279 = arith.constant dense<0.000000e+00> : vector<2x32xf32>
    %1198 = tpu.matmul %1186, %995, %cst_279 {dimension_numbers = #tpu.dot_dimension_numbers<[1], [0], [0], [1], [0, 0, 1, 1], [], []>} : vector<2x32xf32>, vector<32x32xf32>, vector<2x32xf32> -> vector<2x32xf32>
    %1199 = arith.addf %1197, %1198 : vector<2x32xf32>
    %1200 = arith.negf %1199 : vector<2x32xf32>
    %1201 = math.exp %1200 : vector<2x32xf32>
    %cst_280 = arith.constant 1.000000e+00 : f32
    %1202 = vector.broadcast %cst_280 : f32 to vector<2x32xf32>
    %1203 = arith.addf %1202, %1201 : vector<2x32xf32>
    %1204 = arith.divf %1202, %1203 : vector<2x32xf32>
    %1205 = vector.extract_strided_slice %989 {offsets = [2, 0, 0], sizes = [1, 2, 32], strides = [1, 1, 1]} : vector<8x2x32xf32> to vector<1x2x32xf32>
    %1206 = vector.shape_cast %1205 : vector<1x2x32xf32> to vector<2x32xf32>
    %cst_281 = arith.constant dense<0.000000e+00> : vector<2x32xf32>
    %1207 = tpu.matmul %1186, %997, %cst_281 {dimension_numbers = #tpu.dot_dimension_numbers<[1], [0], [0], [1], [0, 0, 1, 1], [], []>} : vector<2x32xf32>, vector<32x32xf32>, vector<2x32xf32> -> vector<2x32xf32>
    %1208 = arith.addf %1206, %1207 : vector<2x32xf32>
    %1209 = math.tanh %1208 : vector<2x32xf32>
    %1210 = vector.extract_strided_slice %991 {offsets = [2, 0, 0], sizes = [1, 2, 32], strides = [1, 1, 1]} : vector<8x2x32xf32> to vector<1x2x32xf32>
    %1211 = vector.shape_cast %1210 : vector<1x2x32xf32> to vector<2x32xf32>
    %cst_282 = arith.constant dense<0.000000e+00> : vector<2x32xf32>
    %1212 = tpu.matmul %1186, %999, %cst_282 {dimension_numbers = #tpu.dot_dimension_numbers<[1], [0], [0], [1], [0, 0, 1, 1], [], []>} : vector<2x32xf32>, vector<32x32xf32>, vector<2x32xf32> -> vector<2x32xf32>
    %1213 = arith.addf %1211, %1212 : vector<2x32xf32>
    %1214 = arith.negf %1213 : vector<2x32xf32>
    %1215 = math.exp %1214 : vector<2x32xf32>
    %cst_283 = arith.constant 1.000000e+00 : f32
    %1216 = vector.broadcast %cst_283 : f32 to vector<2x32xf32>
    %1217 = arith.addf %1216, %1215 : vector<2x32xf32>
    %1218 = arith.divf %1216, %1217 : vector<2x32xf32>
    %1219 = arith.mulf %1204, %1184 : vector<2x32xf32>
    %1220 = arith.mulf %1195, %1209 : vector<2x32xf32>
    %1221 = arith.addf %1219, %1220 : vector<2x32xf32>
    %1222 = math.tanh %1221 : vector<2x32xf32>
    %1223 = arith.mulf %1218, %1222 : vector<2x32xf32>
    %1224 = vector.extract_strided_slice %985 {offsets = [1, 0, 0], sizes = [1, 2, 32], strides = [1, 1, 1]} : vector<8x2x32xf32> to vector<1x2x32xf32>
    %1225 = vector.shape_cast %1224 : vector<1x2x32xf32> to vector<2x32xf32>
    %cst_284 = arith.constant dense<0.000000e+00> : vector<2x32xf32>
    %1226 = tpu.matmul %1223, %993, %cst_284 {dimension_numbers = #tpu.dot_dimension_numbers<[1], [0], [0], [1], [0, 0, 1, 1], [], []>} : vector<2x32xf32>, vector<32x32xf32>, vector<2x32xf32> -> vector<2x32xf32>
    %1227 = arith.addf %1225, %1226 : vector<2x32xf32>
    %1228 = arith.negf %1227 : vector<2x32xf32>
    %1229 = math.exp %1228 : vector<2x32xf32>
    %cst_285 = arith.constant 1.000000e+00 : f32
    %1230 = vector.broadcast %cst_285 : f32 to vector<2x32xf32>
    %1231 = arith.addf %1230, %1229 : vector<2x32xf32>
    %1232 = arith.divf %1230, %1231 : vector<2x32xf32>
    %1233 = vector.extract_strided_slice %987 {offsets = [1, 0, 0], sizes = [1, 2, 32], strides = [1, 1, 1]} : vector<8x2x32xf32> to vector<1x2x32xf32>
    %1234 = vector.shape_cast %1233 : vector<1x2x32xf32> to vector<2x32xf32>
    %cst_286 = arith.constant dense<0.000000e+00> : vector<2x32xf32>
    %1235 = tpu.matmul %1223, %995, %cst_286 {dimension_numbers = #tpu.dot_dimension_numbers<[1], [0], [0], [1], [0, 0, 1, 1], [], []>} : vector<2x32xf32>, vector<32x32xf32>, vector<2x32xf32> -> vector<2x32xf32>
    %1236 = arith.addf %1234, %1235 : vector<2x32xf32>
    %1237 = arith.negf %1236 : vector<2x32xf32>
    %1238 = math.exp %1237 : vector<2x32xf32>
    %cst_287 = arith.constant 1.000000e+00 : f32
    %1239 = vector.broadcast %cst_287 : f32 to vector<2x32xf32>
    %1240 = arith.addf %1239, %1238 : vector<2x32xf32>
    %1241 = arith.divf %1239, %1240 : vector<2x32xf32>
    %1242 = vector.extract_strided_slice %989 {offsets = [1, 0, 0], sizes = [1, 2, 32], strides = [1, 1, 1]} : vector<8x2x32xf32> to vector<1x2x32xf32>
    %1243 = vector.shape_cast %1242 : vector<1x2x32xf32> to vector<2x32xf32>
    %cst_288 = arith.constant dense<0.000000e+00> : vector<2x32xf32>
    %1244 = tpu.matmul %1223, %997, %cst_288 {dimension_numbers = #tpu.dot_dimension_numbers<[1], [0], [0], [1], [0, 0, 1, 1], [], []>} : vector<2x32xf32>, vector<32x32xf32>, vector<2x32xf32> -> vector<2x32xf32>
    %1245 = arith.addf %1243, %1244 : vector<2x32xf32>
    %1246 = math.tanh %1245 : vector<2x32xf32>
    %1247 = vector.extract_strided_slice %991 {offsets = [1, 0, 0], sizes = [1, 2, 32], strides = [1, 1, 1]} : vector<8x2x32xf32> to vector<1x2x32xf32>
    %1248 = vector.shape_cast %1247 : vector<1x2x32xf32> to vector<2x32xf32>
    %cst_289 = arith.constant dense<0.000000e+00> : vector<2x32xf32>
    %1249 = tpu.matmul %1223, %999, %cst_289 {dimension_numbers = #tpu.dot_dimension_numbers<[1], [0], [0], [1], [0, 0, 1, 1], [], []>} : vector<2x32xf32>, vector<32x32xf32>, vector<2x32xf32> -> vector<2x32xf32>
    %1250 = arith.addf %1248, %1249 : vector<2x32xf32>
    %1251 = arith.negf %1250 : vector<2x32xf32>
    %1252 = math.exp %1251 : vector<2x32xf32>
    %cst_290 = arith.constant 1.000000e+00 : f32
    %1253 = vector.broadcast %cst_290 : f32 to vector<2x32xf32>
    %1254 = arith.addf %1253, %1252 : vector<2x32xf32>
    %1255 = arith.divf %1253, %1254 : vector<2x32xf32>
    %1256 = arith.mulf %1241, %1221 : vector<2x32xf32>
    %1257 = arith.mulf %1232, %1246 : vector<2x32xf32>
    %1258 = arith.addf %1256, %1257 : vector<2x32xf32>
    %1259 = math.tanh %1258 : vector<2x32xf32>
    %1260 = arith.mulf %1255, %1259 : vector<2x32xf32>
    %1261 = vector.extract_strided_slice %985 {offsets = [0, 0, 0], sizes = [1, 2, 32], strides = [1, 1, 1]} : vector<8x2x32xf32> to vector<1x2x32xf32>
    %1262 = vector.shape_cast %1261 : vector<1x2x32xf32> to vector<2x32xf32>
    %cst_291 = arith.constant dense<0.000000e+00> : vector<2x32xf32>
    %1263 = tpu.matmul %1260, %993, %cst_291 {dimension_numbers = #tpu.dot_dimension_numbers<[1], [0], [0], [1], [0, 0, 1, 1], [], []>} : vector<2x32xf32>, vector<32x32xf32>, vector<2x32xf32> -> vector<2x32xf32>
    %1264 = arith.addf %1262, %1263 : vector<2x32xf32>
    %1265 = arith.negf %1264 : vector<2x32xf32>
    %1266 = math.exp %1265 : vector<2x32xf32>
    %cst_292 = arith.constant 1.000000e+00 : f32
    %1267 = vector.broadcast %cst_292 : f32 to vector<2x32xf32>
    %1268 = arith.addf %1267, %1266 : vector<2x32xf32>
    %1269 = arith.divf %1267, %1268 : vector<2x32xf32>
    %1270 = vector.extract_strided_slice %987 {offsets = [0, 0, 0], sizes = [1, 2, 32], strides = [1, 1, 1]} : vector<8x2x32xf32> to vector<1x2x32xf32>
    %1271 = vector.shape_cast %1270 : vector<1x2x32xf32> to vector<2x32xf32>
    %cst_293 = arith.constant dense<0.000000e+00> : vector<2x32xf32>
    %1272 = tpu.matmul %1260, %995, %cst_293 {dimension_numbers = #tpu.dot_dimension_numbers<[1], [0], [0], [1], [0, 0, 1, 1], [], []>} : vector<2x32xf32>, vector<32x32xf32>, vector<2x32xf32> -> vector<2x32xf32>
    %1273 = arith.addf %1271, %1272 : vector<2x32xf32>
    %1274 = arith.negf %1273 : vector<2x32xf32>
    %1275 = math.exp %1274 : vector<2x32xf32>
    %cst_294 = arith.constant 1.000000e+00 : f32
    %1276 = vector.broadcast %cst_294 : f32 to vector<2x32xf32>
    %1277 = arith.addf %1276, %1275 : vector<2x32xf32>
    %1278 = arith.divf %1276, %1277 : vector<2x32xf32>
    %1279 = vector.extract_strided_slice %989 {offsets = [0, 0, 0], sizes = [1, 2, 32], strides = [1, 1, 1]} : vector<8x2x32xf32> to vector<1x2x32xf32>
    %1280 = vector.shape_cast %1279 : vector<1x2x32xf32> to vector<2x32xf32>
    %cst_295 = arith.constant dense<0.000000e+00> : vector<2x32xf32>
    %1281 = tpu.matmul %1260, %997, %cst_295 {dimension_numbers = #tpu.dot_dimension_numbers<[1], [0], [0], [1], [0, 0, 1, 1], [], []>} : vector<2x32xf32>, vector<32x32xf32>, vector<2x32xf32> -> vector<2x32xf32>
    %1282 = arith.addf %1280, %1281 : vector<2x32xf32>
    %1283 = math.tanh %1282 : vector<2x32xf32>
    %1284 = vector.extract_strided_slice %991 {offsets = [0, 0, 0], sizes = [1, 2, 32], strides = [1, 1, 1]} : vector<8x2x32xf32> to vector<1x2x32xf32>
    %1285 = vector.shape_cast %1284 : vector<1x2x32xf32> to vector<2x32xf32>
    %cst_296 = arith.constant dense<0.000000e+00> : vector<2x32xf32>
    %1286 = tpu.matmul %1260, %999, %cst_296 {dimension_numbers = #tpu.dot_dimension_numbers<[1], [0], [0], [1], [0, 0, 1, 1], [], []>} : vector<2x32xf32>, vector<32x32xf32>, vector<2x32xf32> -> vector<2x32xf32>
    %1287 = arith.addf %1285, %1286 : vector<2x32xf32>
    %1288 = arith.negf %1287 : vector<2x32xf32>
    %1289 = math.exp %1288 : vector<2x32xf32>
    %cst_297 = arith.constant 1.000000e+00 : f32
    %1290 = vector.broadcast %cst_297 : f32 to vector<2x32xf32>
    %1291 = arith.addf %1290, %1289 : vector<2x32xf32>
    %1292 = arith.divf %1290, %1291 : vector<2x32xf32>
    %1293 = arith.mulf %1278, %1258 : vector<2x32xf32>
    %1294 = arith.mulf %1269, %1283 : vector<2x32xf32>
    %1295 = arith.addf %1293, %1294 : vector<2x32xf32>
    %1296 = math.tanh %1295 : vector<2x32xf32>
    %1297 = arith.mulf %1292, %1296 : vector<2x32xf32>
    %1298 = tpu.concatenate %719, %1297, %978, %1038 in 1 : vector<2x32xf32>, vector<2x32xf32>, vector<2x32xf32>, vector<2x32xf32> -> vector<2x128xf32>
    %c0_298 = arith.constant 0 : index
    %c0_299 = arith.constant 0 : index
    %1299 = vector.load %arg14[%c0_298, %c0_299] : memref<128x2xf32, #tpu.memory_space<vmem>>, vector<128x2xf32>
    %cst_300 = arith.constant dense<0.000000e+00> : vector<2x2xf32>
    %1300 = tpu.matmul %1298, %1299, %cst_300 {dimension_numbers = #tpu.dot_dimension_numbers<[1], [0], [0], [1], [0, 0, 1, 1], [], []>} : vector<2x128xf32>, vector<128x2xf32>, vector<2x2xf32> -> vector<2x2xf32>
    %c0_301 = arith.constant 0 : index
    %c0_302 = arith.constant 0 : index
    %1301 = vector.load %arg15[%c0_301, %c0_302] : memref<1x2xf32, #tpu.memory_space<vmem>>, vector<1x2xf32>
    %1302 = vector.broadcast %1301 : vector<1x2xf32> to vector<2x2xf32>
    %1303 = arith.addf %1300, %1302 : vector<2x2xf32>
    %c0_303 = arith.constant 0 : index
    %c0_304 = arith.constant 0 : index
    %1304 = vector.load %arg16[%c0_303, %c0_304] : memref<2x2xf32, #tpu.memory_space<vmem>>, vector<2x2xf32>
    tpu.vector_store %arg16[%c0_303, %c0_304], %1303 {strides = array<i32>} : memref<2x2xf32, #tpu.memory_space<vmem>>, vector<2x2xf32>,
    return
  }
  func.func @transform_0(%arg0: i32) -> (i32, i32, i32) {
    %c0_i32 = arith.constant 0 : i32
    %c0_i32_0 = arith.constant 0 : i32
    %c0_i32_1 = arith.constant 0 : i32
    %c0_i32_2 = arith.constant 0 : i32
    return %c0_i32, %c0_i32_0, %c0_i32_1 : i32, i32, i32
  }
  func.func @transform_1(%arg0: i32) -> (i32, i32) {
    %c0_i32 = arith.constant 0 : i32
    %c0_i32_0 = arith.constant 0 : i32
    %c0_i32_1 = arith.constant 0 : i32
    return %c0_i32, %c0_i32_0 : i32, i32
  }
  func.func @transform_2(%arg0: i32) -> (i32, i32, i32) {
    %c0_i32 = arith.constant 0 : i32
    %c0_i32_0 = arith.constant 0 : i32
    %c0_i32_1 = arith.constant 0 : i32
    %c0_i32_2 = arith.constant 0 : i32
    return %c0_i32, %c0_i32_0, %c0_i32_1 : i32, i32, i32
  }
  func.func @transform_3(%arg0: i32) -> (i32, i32) {
    %c0_i32 = arith.constant 0 : i32
    %c0_i32_0 = arith.constant 0 : i32
    %c0_i32_1 = arith.constant 0 : i32
    return %c0_i32, %c0_i32_0 : i32, i32
  }
  func.func @transform_4(%arg0: i32) -> (i32, i32) {
    %c0_i32 = arith.constant 0 : i32
    %c0_i32_0 = arith.constant 0 : i32
    %c0_i32_1 = arith.constant 0 : i32
    return %c0_i32, %c0_i32_0 : i32, i32
  }
  func.func @transform_5(%arg0: i32) -> (i32, i32, i32) {
    %c0_i32 = arith.constant 0 : i32
    %c0_i32_0 = arith.constant 0 : i32
    %c0_i32_1 = arith.constant 0 : i32
    %c0_i32_2 = arith.constant 0 : i32
    return %c0_i32, %c0_i32_0, %c0_i32_1 : i32, i32, i32
  }
  func.func @transform_6(%arg0: i32) -> (i32, i32) {
    %c0_i32 = arith.constant 0 : i32
    %c0_i32_0 = arith.constant 0 : i32
    %c0_i32_1 = arith.constant 0 : i32
    return %c0_i32, %c0_i32_0 : i32, i32
  }
  func.func @transform_7(%arg0: i32) -> (i32, i32) {
    %c0_i32 = arith.constant 0 : i32
    %c0_i32_0 = arith.constant 0 : i32
    %c0_i32_1 = arith.constant 0 : i32
    return %c0_i32, %c0_i32_0 : i32, i32
  }
  func.func @transform_8(%arg0: i32) -> (i32, i32, i32) {
    %c0_i32 = arith.constant 0 : i32
    %c0_i32_0 = arith.constant 0 : i32
    %c0_i32_1 = arith.constant 0 : i32
    %c0_i32_2 = arith.constant 0 : i32
    return %c0_i32, %c0_i32_0, %c0_i32_1 : i32, i32, i32
  }
  func.func @transform_9(%arg0: i32) -> (i32, i32) {
    %c0_i32 = arith.constant 0 : i32
    %c0_i32_0 = arith.constant 0 : i32
    %c0_i32_1 = arith.constant 0 : i32
    return %c0_i32, %c0_i32_0 : i32, i32
  }
  func.func @transform_10(%arg0: i32) -> (i32, i32) {
    %c0_i32 = arith.constant 0 : i32
    %c0_i32_0 = arith.constant 0 : i32
    %c0_i32_1 = arith.constant 0 : i32
    return %c0_i32, %c0_i32_0 : i32, i32
  }
  func.func @transform_11(%arg0: i32) -> (i32, i32, i32) {
    %c0_i32 = arith.constant 0 : i32
    %c0_i32_0 = arith.constant 0 : i32
    %c0_i32_1 = arith.constant 0 : i32
    %c0_i32_2 = arith.constant 0 : i32
    return %c0_i32, %c0_i32_0, %c0_i32_1 : i32, i32, i32
  }
  func.func @transform_12(%arg0: i32) -> (i32, i32) {
    %c0_i32 = arith.constant 0 : i32
    %c0_i32_0 = arith.constant 0 : i32
    %c0_i32_1 = arith.constant 0 : i32
    return %c0_i32, %c0_i32_0 : i32, i32
  }
  func.func @transform_13(%arg0: i32) -> (i32, i32) {
    %c0_i32 = arith.constant 0 : i32
    %c0_i32_0 = arith.constant 0 : i32
    %c0_i32_1 = arith.constant 0 : i32
    return %c0_i32, %c0_i32_0 : i32, i32
  }
  func.func @transform_14(%arg0: i32) -> (i32, i32) {
    %c0_i32 = arith.constant 0 : i32
    %c0_i32_0 = arith.constant 0 : i32
    %c0_i32_1 = arith.constant 0 : i32
    return %c0_i32, %c0_i32_0 : i32, i32
  }
  func.func @transform_15(%arg0: i32) -> (i32, i32) {
    %c0_i32 = arith.constant 0 : i32
    %c0_i32_0 = arith.constant 0 : i32
    %c0_i32_1 = arith.constant 0 : i32
    return %c0_i32, %c0_i32_0 : i32, i32
  }
}

</mosaic_0001>

<bundles_post_ra>
// kernel: birnn_forward.1
= control target key start
LH: loop header
LB: loop body
LE: loop exit
PB: predicated region body
PF: predicated region fallthrough
CT: control target
= control target key end

     0   :  { %20 = vsyncpa [#allocation3], 0  ;;  %s18839_s0 = inlined_call_operand.vmem [shape: f32[8,2,32], index: 0, kind: input, shape index: {}]   ;;  %s18840_s1 = inlined_call_operand.hbm [shape: f32[32,128], index: 1, kind: input, shape index: {}]   ;;  %s18841_s2 = inlined_call_operand.vmem [shape: f32[4,32,32], index: 2, kind: input, shape index: {}]   ;;  %s18842_s3 = inlined_call_operand.vmem [shape: f32[1,128], index: 3, kind: input, shape index: {}]   ;;  %s18843_s4 = inlined_call_operand.hbm [shape: f32[32,128], index: 4, kind: input, shape index: {}]   ;;  %s18844_s5 = inlined_call_operand.vmem [shape: f32[4,32,32], index: 5, kind: input, shape index: {}]   ;;  %s18845_s6 = inlined_call_operand.vmem [shape: f32[1,128], index: 6, kind: input, shape index: {}]   ;;  %s18846_s7 = inlined_call_operand.hbm [shape: f32[64,128], index: 7, kind: input, shape index: {}]   ;;  %s18847_s8 = inlined_call_operand.vmem [shape: f32[4,32,32], index: 8, kind: input, shape index: {}]   ;;  %s18848_s9 = inlined_call_operand.vmem [shape: f32[1,128], index: 9, kind: input, shape index: {}]   ;;  %s18849_s10 = inlined_call_operand.vmem [shape: f32[64,128], index: 10, kind: input, shape index: {}]   ;;  %s18850_s11 = inlined_call_operand.hbm [shape: f32[4,32,32], index: 11, kind: input, shape index: {}]   ;;  %s18851_s12 = inlined_call_operand.vmem [shape: f32[1,128], index: 12, kind: input, shape index: {}]   ;;  %s18852_s13 = inlined_call_operand.vmem [shape: f32[128,2], index: 13, kind: input, shape index: {}]   ;;  %s18853_s14 = inlined_call_operand.hbm [shape: f32[1,2], index: 14, kind: input, shape index: {}]   ;;  %s18854_s15 = inlined_call_operand.hbm [shape: f32[2,2], index: 15, kind: output, shape index: {}]  }
   0x1   :  { %21 = vsyncpa [#allocation6], 0 }
   0x2   :  { %22 = vsyncpa [#allocation9], 0 }
   0x3   :  { %23 = vsyncpa [#allocation4], 0  ;;  %s16611_s18 = smov [#allocation5]   ;;  %s16612_s20 = smov [#allocation8]  }
   0x4   :  { %s47_s19 = sshll.u32 %s16611_s18, 4  ;;  %s81_s21 = sshll.u32 %s16612_s20, 4  ;;  %s48_s19 = int_to_ptr.vmem [resolvable:$true] %s47_s19  ;;  %s16706_s21 = int_to_ptr.vmem [resolvable:$true] %s81_s21 }
   0x5   :  { %s16471_s24 = scalar_lea.hbm %s18843_s4, 512 }
   0x6   :  { %p16472_p0 = scmp.ne.s32.totalorder %s18843_s4, %s16471_s24  ;;  %p16475_p1 = scmp.lt.u32.totalorder %s16471_s24, %s18843_s4 }
   0x8   :  { %p16477_p2 = pnand %p16475_p1, %p16472_p0 }
   0xa   :  { %16480 = shalt.err (!%p16477_p2)
}
   0xb   :  { %s16481_s29 = scalar_lea.vmem %s48_s19, 512  ;;  %p16486_p4 = scmp.lt.s32.totalorder %s48_s19, %s48_s19 }
   0xc   :  { %p16482_p3 = scmp.ne.s32.totalorder %s48_s19, %s16481_s29  ;;  %p16487_p5 = scmp.lt.s32.totalorder %s16481_s29, %s16481_s29 }
   0xe   :  { %p16488_p6 = por %p16487_p5, %p16486_p4 }
  0x10   :  { %p16489_p7 = pnand %p16488_p6, %p16482_p3 }
  0x12   :  { %16492 = shalt.err (!%p16489_p7)
}
  0x13   :  { %s16613_s30 = smov 128   ;;  %s16614_s16 = smov 8  }
  0x14   :  { %53 = dma.hbm_to_vmem [thread:$0]  %s18843_s4, 512, %s48_s19, [#allocation6], %s16613_s30, %s16613_s30, %s16614_s16  }
  0x15   :  { %s16493_s23 = scalar_lea.hbm %s18850_s11, 2048 }
  0x16   :  { %p16494_p8 = scmp.ne.s32.totalorder %s18850_s11, %s16493_s23  ;;  %p16497_p9 = scmp.lt.u32.totalorder %s16493_s23, %s18850_s11 }
  0x18   :  { %p16499_p10 = pnand %p16497_p9, %p16494_p8 }
  0x1a   :  { %16502 = shalt.err (!%p16499_p10)
}
  0x1b   :  { %s16503_s28 = scalar_lea.vmem %s16706_s21, 2048  ;;  %p16508_p12 = scmp.lt.s32.totalorder %s16706_s21, %s16706_s21 }
  0x1c   :  { %p16504_p11 = scmp.ne.s32.totalorder %s16706_s21, %s16503_s28  ;;  %p16509_p13 = scmp.lt.s32.totalorder %s16503_s28, %s16503_s28 }
  0x1e   :  { %p16510_p0 = por %p16509_p13, %p16508_p12 }
  0x20   :  { %p16511_p1 = pnand %p16510_p0, %p16504_p11 }
  0x22   :  { %16514 = shalt.err (!%p16511_p1)
}
  0x23   :  { %87 = dma.hbm_to_vmem [thread:$0]  %s18850_s11, 2048, %s16706_s21, [#allocation9], %s16613_s30, %s16613_s30, %s16614_s16  }
  0x24   :  { %s16615_s29 = smov [#allocation2]   ;;  %s16616_s18 = smov [#allocation7]  }
  0x25   :  { %s31_s17 = sshll.u32 %s16615_s29, 4  ;;  %s63_s20 = sshll.u32 %s16616_s18, 4  ;;  %s32_s17 = int_to_ptr.vmem [resolvable:$true] %s31_s17  ;;  %s16743_s20 = int_to_ptr.vmem [resolvable:$true] %s63_s20 }
  0x26   :  { %s16515_s24 = scalar_lea.hbm %s18840_s1, 512 }
  0x27   :  { %p16516_p2 = scmp.ne.s32.totalorder %s18840_s1, %s16515_s24  ;;  %p16519_p3 = scmp.lt.u32.totalorder %s16515_s24, %s18840_s1 }
  0x29   :  { %p16521_p4 = pnand %p16519_p3, %p16516_p2 }
  0x2b   :  { %16524 = shalt.err (!%p16521_p4)
}
  0x2c   :  { %s16525_s11 = scalar_lea.vmem %s32_s17, 512  ;;  %p16530_p6 = scmp.lt.s32.totalorder %s32_s17, %s32_s17 }
  0x2d   :  { %p16526_p5 = scmp.ne.s32.totalorder %s32_s17, %s16525_s11  ;;  %p16531_p7 = scmp.lt.s32.totalorder %s16525_s11, %s16525_s11 }
  0x2f   :  { %p16532_p8 = por %p16531_p7, %p16530_p6 }
  0x31   :  { %p16533_p9 = pnand %p16532_p8, %p16526_p5 }
  0x33   :  { %16536 = shalt.err (!%p16533_p9)
}
  0x34   :  { %37 = dma.hbm_to_vmem [thread:$0]  %s18840_s1, 512, %s32_s17, [#allocation3], %s16613_s30, %s16613_s30, %s16614_s16  }
  0x35   :  { %s16537_s18 = scalar_lea.hbm %s18846_s7, 1024 }
  0x36   :  { %p16538_p10 = scmp.ne.s32.totalorder %s18846_s7, %s16537_s18  ;;  %p16541_p11 = scmp.lt.u32.totalorder %s16537_s18, %s18846_s7 }
  0x38   :  { %p16543_p12 = pnand %p16541_p11, %p16538_p10 }
  0x3a   :  { %16546 = shalt.err (!%p16543_p12)
}
  0x3b   :  { %s16547_s26 = scalar_lea.vmem %s16743_s20, 1024  ;;  %p16552_p0 = scmp.lt.s32.totalorder %s16743_s20, %s16743_s20 }
  0x3c   :  { %p16548_p13 = scmp.ne.s32.totalorder %s16743_s20, %s16547_s26  ;;  %p16553_p1 = scmp.lt.s32.totalorder %s16547_s26, %s16547_s26 }
  0x3e   :  { %p16554_p2 = por %p16553_p1, %p16552_p0 }
  0x40   :  { %p16555_p3 = pnand %p16554_p2, %p16548_p13 }
  0x42   :  { %16558 = shalt.err (!%p16555_p3)
}
  0x43   :  { %69 = dma.hbm_to_vmem [thread:$0]  %s18846_s7, 1024, %s16743_s20, [#allocation6], %s16613_s30, %s16613_s30, %s16614_s16  }
  0x44   :  { %s16617_s27 = smov [#allocation10]   ;;  %s16559_s4 = scalar_lea.hbm %s18853_s14, 16 }
  0x45   :  { %s98_s28 = sshll.u32 %s16617_s27, 4  ;;  %p16560_p4 = scmp.ne.s32.totalorder %s18853_s14, %s16559_s4  ;;  %s99_s28 = int_to_ptr.vmem [resolvable:$true] %s98_s28 }
  0x46   :  { %p16563_p5 = scmp.lt.u32.totalorder %s16559_s4, %s18853_s14 }
  0x48   :  { %p16565_p6 = pnand %p16563_p5, %p16560_p4 }
  0x4a   :  { %16568 = shalt.err (!%p16565_p6)
}
  0x4b   :  { %s16569_s23 = scalar_lea.vmem %s99_s28, 16  ;;  %s16573_s7 = scalar_lea.vmem %s99_s28, 32 }
  0x4c   :  { %p16570_p7 = scmp.ne.s32.totalorder %s99_s28, %s16569_s23  ;;  %p16574_p8 = scmp.lt.s32.totalorder %s99_s28, %s99_s28 }
  0x4d   :  { %p16575_p9 = scmp.lt.s32.totalorder %s16573_s7, %s16569_s23 }
  0x4f   :  { %p16576_p10 = por %p16575_p9, %p16574_p8 }
  0x51   :  { %p16577_p11 = pnand %p16576_p10, %p16570_p7 }
  0x53   :  { %16580 = shalt.err (!%p16577_p11)
}
  0x54   :  { %101 = dma.hbm_to_vmem [thread:$0]  %s18853_s14, 16, %s99_s28, [#allocation9]  }
  0x55   :  { %16603 = dma.done.wait [#allocation3], 512  }
  0x56   :  { %16604 = vsyncadd [#allocation3], 4294966784 }
  0x57   :  { %16605 = dma.done.wait [#allocation6], 1536  }
  0x58   :  { %16606 = vsyncadd [#allocation6], 4294965760 }
  0x59   :  { %16607 = dma.done.wait [#allocation9], 2064  }
  0x5a   :  { %16608 = vsyncadd [#allocation9], 4294965232  ;;  %v16618_v0 = vmov 0.0|0.0   ;;  %vm16619_vm0 = vmmov 0   ;;  %v16620_v1 = vmov 0.0   ;;  %v149_v2 = vlaneseq  ;;  %v125_v7 = vld [vmem:[#allocation2] sm:$0xff] }
  0x5b   :  { %15112 = vmatprep.subr.bf16.mxu1 %v16618_v0  ;;  %13620 = vmatprep.mubr.msk.f32.mxu1 %vm16619_vm0, %v16620_v1  ;;  %v16621_v3 = vmov 1983009808   ;;  %v126_v8 = vld [vmem:[#allocation2 + $0x8] sm:$0xff]  ;;  %v302_v9 = vld [vmem:[%s18841_s2] sm:$0xff]  ;;  %v127_v12 = vld [vmem:[#allocation2 + $0x10] sm:$0xff]  ;;  %vm178_vm1 = vcmask 261120  }
  0x5c   :  { %v147_v4 = vunpack.c.l.s4 %v16621_v3  ;;  %v150_v6 = vshrl.u32 %v149_v2, 7  ;;  %v15104_v10 = vpack.c.bf16 %v126_v8, %v125_v7  ;;  %v303_v11 = vld [vmem:[%s18841_s2 + $0x8] sm:$0xff]  ;;  %v128_v13 = vld [vmem:[#allocation2 + $0x18] sm:$0xff]  ;;  %v304_v16 = vld [vmem:[%s18841_s2 + $0x10] sm:$0xff]  ;;  %s16622_s28 = smov 64   ;;  %s16623_s11 = smov 32  }
  0x5d   :  { %v16801_v14 = vpack.c.bf16 %v303_v11, %v302_v9  ;;  %v15108_v15 = vpack.c.bf16 %v128_v13, %v127_v12  ;;  %v305_v17 = vld [vmem:[%s18841_s2 + $0x18] sm:$0xff]  ;;  %v117_v18 = vld [vmem:[%s18839_s0] sm:$0x3]  ;;  %v118_v20 = vld [vmem:[%s18839_s0 + $0x2] sm:$0x3]  ;;  %vm6404_vm2 = vcmask 523264  }
  0x5e   :  { %v148_v5 = vunpack.c.0.s8 %v147_v4  ;;  %15105 = vmatprep.subr.bf16.mxu0 %v15104_v10  ;;  %v119_v21 = vld [vmem:[%s18839_s0 + $0x4] sm:$0x3]  ;;  %v120_v22 = vld [vmem:[%s18839_s0 + $0x6] sm:$0x3]  ;;  %v16824_v23 = vpack.c.bf16 %v305_v17, %v304_v16  ;;  %v144_v24 = vcombine.low %v117_v18, %v118_v20  ;;  %v121_v26 = vld [vmem:[%s18839_s0 + $0x8] sm:$0x3] }
  0x5f   :  { %15114 = vmatpush3.bf16.msra.mxu1 %v16801_v14  ;;  %15107 = vmatpush3.bf16.msra.mxu0 %v15104_v10  ;;  %v145_v25 = vcombine.low %v119_v21, %v120_v22  ;;  %v122_v27 = vld [vmem:[%s18839_s0 + $0xa] sm:$0x3]  ;;  %v123_v28 = vld [vmem:[%s18839_s0 + $0xc] sm:$0x3]  ;;  %v124_v29 = vld [vmem:[%s18839_s0 + $0xe] sm:$0x3] }
  0x60   :  { %v16812_v19 = vsub.s32 %v148_v5, %v150_v6  ;;  %15115 = vmatprep.subr.bf16.mxu1 %v16618_v0  ;;  %15109 = vmatprep.subr.bf16.mxu0 %v15108_v15  ;;  %v161_v30 = vcombine.low %v121_v26, %v122_v27  ;;  %v12662_v31 = vld [vmem:[%s18841_s2 + $0x40] sm:$0xff]  ;;  %v12663_v32 = vld [vmem:[%s18841_s2 + $0x48] sm:$0xff]  ;;  %v162_v35 = vcombine.low %v123_v28, %v124_v29  ;;  %v12664_v43 = vld [vmem:[%s18841_s2 + $0x50] sm:$0xff]  ;;  %vm12541_vm3 = vcmask 785408  }
  0x61   :  { %v12658_v36 = vld [vmem:[%s18841_s2 + $0x20] sm:$0xff]  ;;  %v12659_v37 = vld [vmem:[%s18841_s2 + $0x28] sm:$0xff]  ;;  %v16858_v41 = vpack.c.bf16 %v12663_v32, %v12662_v31  ;;  %v12665_v44 = vld [vmem:[%s18841_s2 + $0x58] sm:$0xff]  ;;  %vm12636_vm4 = vcmask 9216  }
  0x62   :  { %v152_v33 = vrot.slane %v144_v24, %v16812_v19  ;;  %v159_v34 = vrot.slane %v145_v25, %v16812_v19  ;;  %v169_v38 = vrot.slane %v161_v30, %v16812_v19  ;;  %v176_v40 = vrot.slane %v162_v35, %v16812_v19  ;;  %v12660_v46 = vld [vmem:[%s18841_s2 + $0x30] sm:$0xff]  ;;  %v12661_v47 = vld [vmem:[%s18841_s2 + $0x38] sm:$0xff]  ;;  %v12666_v50 = vld [vmem:[%s18841_s2 + $0x60] sm:$0xff] }
  0x63   :  { %15117 = vmatpush3.bf16.msra.mxu1 %v16824_v23  ;;  %15111 = vmatpush3.bf16.msra.mxu0 %v15108_v15  ;;  %v16862_v42 = vpack.c.bf16 %v12659_v37, %v12658_v36  ;;  %v16884_v48 = vpack.c.bf16 %v12665_v44, %v12664_v43  ;;  %v16888_v49 = vpack.c.bf16 %v12661_v47, %v12660_v46  ;;  %v12667_v51 = vld [vmem:[%s18841_s2 + $0x68] sm:$0xff]  ;;  %v12668_v53 = vld [vmem:[%s18841_s2 + $0x70] sm:$0xff]  ;;  %v12669_v54 = vld [vmem:[%s18841_s2 + $0x78] sm:$0xff] }
  0x64   :  { %v16855_v39 = vcombine.low %v152_v33, %v159_v34  ;;  %15124 = vmatprep.subr.bf16.mxu1 %v16618_v0  ;;  %15118 = vmatprep.subr.bf16.mxu0 %v16618_v0  ;;  %v16872_v45 = vcombine.low %v169_v38, %v176_v40  ;;  %v16903_v52 = vpack.c.bf16 %v12667_v51, %v12666_v50  ;;  %v12655_v58 = vld [vmem:[%s18842_s3] ss:$0 sm:$0xff]  ;;  %s16624_s3 = smov 96  }
  0x65   :  { %v16917_v55 = vpack.c.bf16 %v12669_v54, %v12668_v53 }
  0x66   :  { %13609 = vmatprep.mubr.msk.f32.mxu0 %vm178_vm1, %v16855_v39  ;;  %13621 = vmatmul.mubr.f32.vlgmr.msra.gmra.mrb[0].mxu1 %v16620_v1 }
  0x67   :  { %13610 = vmatmul.mubr.msk.f32.vlgmr.msra.gmra.mrb[0].mxu0 %vm178_vm1, %v16872_v45  ;;  %15126 = vmatpush3.bf16.msra.mxu1 %v16858_v41 }
  0x68   :  { %15120 = vmatpush3.bf16.msra.mxu0 %v16862_v42  ;;  %15127 = vmatprep.subr.bf16.mxu1 %v16618_v0 }
  0x69   :  { %15121 = vmatprep.subr.bf16.mxu0 %v16618_v0  ;;  %13642 = vmatprep.mubr.msk.f32.mxu1 %vm16619_vm0, %v16620_v1 }
  0x6a   :  { %13631 = vmatprep.mubr.msk.f32.mxu0 %vm16619_vm0, %v16620_v1 }
  0x6b   :  { %15129 = vmatpush3.bf16.msra.mxu1 %v16884_v48 }
  0x6c   :  { %15123 = vmatpush3.bf16.msra.mxu0 %v16888_v49  ;;  %15136 = vmatprep.subr.bf16.mxu1 %v16618_v0 }
  0x6d   :  { %15130 = vmatprep.subr.bf16.mxu0 %v16618_v0 }
  0x6e   :  { %13643 = vmatmul.mubr.f32.vlgmr.msra.gmra.mrb[2].mxu1 %v16620_v1 }
  0x6f   :  { %13632 = vmatmul.mubr.f32.vlgmr.msra.gmra.mrb[2].mxu0 %v16620_v1  ;;  %15138 = vmatpush3.bf16.msra.mxu1 %v16801_v14 }
  0x70   :  { %15132 = vmatpush3.bf16.msra.mxu0 %v16903_v52  ;;  %13653 = vmatprep.mubr.msk.f32.mxu0 %vm16619_vm0, %v16620_v1 }
  0x71   :  { %15133 = vmatprep.subr.bf16.mxu0 %v16618_v0  ;;  %15139 = vmatprep.subr.bf16.mxu1 %v16618_v0 }
  0x72   :  { %13664 = vmatprep.mubr.msk.f32.mxu1 %vm16619_vm0, %v16620_v1 }
  0x73   :  { %15141 = vmatpush3.bf16.msra.mxu1 %v16824_v23 }
  0x74   :  { %15135 = vmatpush3.bf16.msra.mxu0 %v16917_v55  ;;  %15148 = vmatprep.subr.bf16.mxu1 %v16618_v0 }
  0x75   :  { %15142 = vmatprep.subr.bf16.mxu0 %v16618_v0 }
  0x77   :  { %13654 = vmatmul.mubr.f32.vlgmr.msra.gmra.mrb[4].mxu0 %v16620_v1 }
  0x78   :  { %15144 = vmatpush3.bf16.msra.mxu0 %v16862_v42  ;;  %13675 = vmatprep.mubr.msk.f32.mxu0 %vm16619_vm0, %v16620_v1 }
  0x79   :  { %15145 = vmatprep.subr.bf16.mxu0 %v16618_v0 }
  0x7c   :  { %15147 = vmatpush3.bf16.msra.mxu0 %v16888_v49 }
  0x7d   :  { %15154 = vmatprep.subr.bf16.mxu0 %v16618_v0 }
 0x139   :  { %v390_v56 = vpop.f32.mrb[0].mxu1 }
 0x13a   :  { %v13611_v57 = vpop.f32.mrb[0].mxu0  ;;  %v13622_v59 = vpop.f32.mrb[1].mxu1 }
 0x13b   :  { %v16939_v60 = vadd.f32 %v13611_v57, %v12655_v58  ;;  %v249_v61 = vpop.f32.mrb[1].mxu0 }
 0x13c   :  { %v16945_v8 = vadd.f32 %v12655_v58, %v249_v61 }
 0x13e   :  { %v16949_v9 = vrot.slane %v16945_v8, %v16812_v19 }
 0x140   :  { %v394_v15 = vadd.f32 %v390_v56, %v16949_v9 }
 0x141   :  { %v555_v62 = vpop.f32.mrb[2].mxu1 }
 0x142   :  { %v566_v63 = vrot.slane %v555_v62, %v16812_v19  ;;  %v467_v2 = vpop.f32.mrb[2].mxu0  ;;  %v13644_v3 = vpop.f32.mrb[3].mxu1  ;;  %v12670_v16 = vmul.f32 -1.442695, %v394_v15 }
 0x143   :  { %v478_v4 = vrot.slane %v467_v2, %v16812_v19  ;;  %v13633_v5 = vpop.f32.mrb[3].mxu0  ;;  %v275_v2 = vcombine.high %v16949_v9, %v16949_v9 }
 0x144   :  { %567 = vrot.lane.b32.xlu0 %v566_v63, %s16622_s28 }
 0x145   :  { %479 = vrot.lane.b32.xlu1 %v478_v4, %s16623_s11 }
 0x14a   :  { %v638_v6 = vpop.f32.mrb[4].mxu0 }
 0x14b   :  { %v13655_v7 = vpop.f32.mrb[5].mxu0  ;;  %v649_v13 = vrot.slane %v638_v6, %v16812_v19 }
 0x1b6   :  { %v568_v10 = vpop.permute.xlu0 %567 }
 0x1b7   :  { %v570_v11 = vadd.f32 %v568_v10, %v16949_v9  ;;  %v480_v24 = vpop.permute.xlu1 %479 }
 0x1b8   :  { %v482_v25 = vadd.f32 %v480_v24, %v16949_v9 }
 0x1b9   :  { %15959 = vtanh.f32 %v570_v11 }
 0x1ba   :  { %15961 = vpow2.f32 %v12670_v16  ;;  %v12671_v26 = vmul.f32 -1.442695, %v482_v25 }
 0x1c3   :  { %v15960_v12 = vpop.eup %15959 }
 0x1c4   :  { %662 = vrot.lane.b32.xlu0 %v15960_v12, %s16622_s28  ;;  %v15962_v17 = vpop.eup %15961 }
 0x1c5   :  { %v398_v18 = vadd.f32 1.0, %v15962_v17 }
 0x1c7   :  { %15963 = vrcp.f32 %v398_v18 }
 0x1c8   :  { %650 = vrot.lane.b32.xlu0 %v649_v13, %s16624_s3  ;;  %15965 = vpow2.f32 %v12671_v26 }
 0x1d1   :  { %v15964_v20 = vpop.eup %15963 }
 0x1d2   :  { %v15966_v27 = vpop.eup %15965 }
 0x1d3   :  { %v486_v28 = vadd.f32 1.0, %v15966_v27 }
 0x1d5   :  { %15967 = vrcp.f32 %v486_v28 }
 0x1df   :  { %v15968_v29 = vpop.eup %15967 }
 0x1e0   :  { %v660_v30 = vmul.f32 0.0, %v15968_v29 }
 0x236   :  { %v663_v21 = vpop.permute.xlu0 %662 }
 0x237   :  { %v665_v22 = vmul.f32 %v15964_v20, %v663_v21 }
 0x239   :  { %667 = vrot.lane.b32.xlu1 %v665_v22, %s16623_s11 }
 0x23a   :  { %v651_v34 = vpop.permute.xlu0 %650 }
 0x23b   :  { %v653_v35 = vadd.f32 %v651_v34, %v16949_v9 }
 0x23d   :  { %v12672_v36 = vmul.f32 -1.442695, %v653_v35 }
 0x2ab   :  { %v668_v31 = vpop.permute.xlu1 %667 }
 0x2ac   :  { %v16958_v32 = vadd.f32 %v668_v31, %v660_v30 }
 0x2ae   :  { %15969 = vtanh.f32 %v16958_v32 }
 0x2af   :  { %15971 = vpow2.f32 %v12672_v36 }
 0x2b8   :  { %v15970_v33 = vpop.eup %15969 }
 0x2b9   :  { %673 = vrot.lane.b32.xlu1 %v15970_v33, %s16622_s28  ;;  %v15972_v37 = vpop.eup %15971 }
 0x2ba   :  { %v657_v38 = vadd.f32 1.0, %v15972_v37 }
 0x2bc   :  { %15973 = vrcp.f32 %v657_v38 }
 0x2c6   :  { %v15974_v40 = vpop.eup %15973 }
 0x32b   :  { %v674_v43 = vpop.permute.xlu1 %673 }
 0x32c   :  { %v676_v44 = vmul.f32 %v15974_v40, %v674_v43 }
 0x32e   :  { %v684_v46 = vrot.slane %v676_v44, %v16812_v19 }
 0x330   :  { %685 = vrot.lane.b32.xlu0 %v684_v46, %s16623_s11 }
 0x3a2   :  { %v16965_v47 = vpop.permute.xlu0 %685 }
 0x3a3   :  { %13665 = vmatmul.mubr.msk.f32.vlgmr.msra.gmra.mrb[4].mxu1 %vm178_vm1, %v16965_v47  ;;  %13676 = vmatmul.mubr.msk.f32.vlgmr.msra.gmra.mrb[6].mxu0 %vm178_vm1, %v16965_v47 }
 0x3a4   :  { %15150 = vmatpush3.bf16.msra.mxu1 %v16858_v41  ;;  %15156 = vmatpush3.bf16.msra.mxu0 %v16903_v52 }
 0x3a5   :  { %15151 = vmatprep.subr.bf16.mxu1 %v16618_v0  ;;  %15157 = vmatprep.subr.bf16.mxu0 %v16618_v0 }
 0x3a6   :  { %13686 = vmatprep.mubr.msk.f32.mxu1 %vm16619_vm0, %v16620_v1  ;;  %13697 = vmatprep.mubr.msk.f32.mxu0 %vm16619_vm0, %v16620_v1 }
 0x3a8   :  { %15153 = vmatpush3.bf16.msra.mxu1 %v16884_v48  ;;  %15159 = vmatpush3.bf16.msra.mxu0 %v16917_v55 }
 0x3a9   :  { %15160 = vmatprep.subr.bf16.mxu1 %v16618_v0  ;;  %15166 = vmatprep.subr.bf16.mxu0 %v16618_v0 }
 0x3ab   :  { %13687 = vmatmul.mubr.msk.f32.vlgmr.msra.gmra.mrb[6].mxu1 %vm178_vm1, %v16965_v47  ;;  %13698 = vmatmul.mubr.msk.f32.vlgmr.msra.gmra.mrb[8].mxu0 %vm178_vm1, %v16965_v47 }
 0x3ac   :  { %15162 = vmatpush3.bf16.msra.mxu1 %v16801_v14  ;;  %15168 = vmatpush3.bf16.msra.mxu0 %v16862_v42 }
 0x3ad   :  { %15163 = vmatprep.subr.bf16.mxu1 %v16618_v0  ;;  %15169 = vmatprep.subr.bf16.mxu0 %v16618_v0 }
 0x3ae   :  { %13708 = vmatprep.mubr.msk.f32.mxu1 %vm16619_vm0, %v16620_v1  ;;  %13719 = vmatprep.mubr.msk.f32.mxu0 %vm16619_vm0, %v16620_v1 }
 0x3b0   :  { %15165 = vmatpush3.bf16.msra.mxu1 %v16824_v23  ;;  %15171 = vmatpush3.bf16.msra.mxu0 %v16888_v49 }
 0x3b1   :  { %15172 = vmatprep.subr.bf16.mxu1 %v16618_v0  ;;  %15178 = vmatprep.subr.bf16.mxu0 %v16618_v0 }
 0x476   :  { %v755_v50 = vpop.f32.mrb[4].mxu1  ;;  %v832_v51 = vpop.f32.mrb[6].mxu0 }
 0x477   :  { %v13666_v53 = vpop.f32.mrb[5].mxu1  ;;  %v13677_v54 = vpop.f32.mrb[7].mxu0  ;;  %v843_v62 = vrot.slane %v832_v51, %v16812_v19  ;;  %v759_v6 = vadd.f32 %v755_v50, %v275_v2 }
 0x479   :  { %v12674_v7 = vmul.f32 -1.442695, %v759_v6 }
 0x47e   :  { %v920_v56 = vpop.f32.mrb[6].mxu1  ;;  %v1003_v57 = vpop.f32.mrb[8].mxu0 }
 0x47f   :  { %v931_v58 = vrot.slane %v920_v56, %v16812_v19  ;;  %v13688_v59 = vpop.f32.mrb[7].mxu1  ;;  %v13699_v61 = vpop.f32.mrb[9].mxu0  ;;  %v1014_v63 = vrot.slane %v1003_v57, %v16812_v19  ;;  %v260_v57 = vcombine.high %v16945_v8, %v16945_v8 }
 0x481   :  { %932 = vrot.lane.b32.xlu1 %v931_v58, %s16622_s28  ;;  %v17059_v58 = vrot.slane %v260_v57, %v16812_v19 }
 0x485   :  { %844 = vrot.lane.b32.xlu1 %v843_v62, %s16623_s11 }
 0x489   :  { %1015 = vrot.lane.b32.xlu1 %v1014_v63, %s16624_s3 }
 0x4f3   :  { %v933_v3 = vpop.permute.xlu1 %932 }
 0x4f4   :  { %v935_v4 = vadd.f32 %v933_v3, %v275_v2 }
 0x4f6   :  { %15975 = vtanh.f32 %v935_v4 }
 0x4f7   :  { %15977 = vpow2.f32 %v12674_v7  ;;  %v845_v16 = vpop.permute.xlu1 %844 }
 0x4f8   :  { %v847_v17 = vadd.f32 %v845_v16, %v275_v2 }
 0x4fa   :  { %v12676_v9 = vmul.f32 -1.442695, %v847_v17 }
 0x4fb   :  { %v1016_v27 = vpop.permute.xlu1 %1015 }
 0x4fc   :  { %v1018_v28 = vadd.f32 %v1016_v27, %v275_v2 }
 0x4fe   :  { %v12679_v29 = vmul.f32 -1.442695, %v1018_v28 }
 0x500   :  { %v15976_v5 = vpop.eup %15975 }
 0x501   :  { %1027 = vrot.lane.b32.xlu0 %v15976_v5, %s16622_s28  ;;  %v15978_v10 = vpop.eup %15977 }
 0x502   :  { %v763_v11 = vadd.f32 1.0, %v15978_v10 }
 0x504   :  { %15979 = vrcp.f32 %v763_v11 }
 0x505   :  { %15981 = vpow2.f32 %v12676_v9 }
 0x50e   :  { %v15980_v12 = vpop.eup %15979 }
 0x50f   :  { %v15982_v18 = vpop.eup %15981 }
 0x510   :  { %v851_v20 = vadd.f32 1.0, %v15982_v18 }
 0x512   :  { %15983 = vrcp.f32 %v851_v20 }
 0x51c   :  { %v15984_v21 = vpop.eup %15983 }
 0x51d   :  { %v1025_v22 = vmul.f32 %v15984_v21, %v16958_v32 }
 0x573   :  { %v1028_v13 = vpop.permute.xlu0 %1027 }
 0x574   :  { %v1030_v15 = vmul.f32 %v15980_v12, %v1028_v13 }
 0x576   :  { %1032 = vrot.lane.b32.xlu0 %v1030_v15, %s16623_s11 }
 0x5e8   :  { %v1033_v24 = vpop.permute.xlu0 %1032 }
 0x5e9   :  { %v17010_v25 = vadd.f32 %v1033_v24, %v1025_v22 }
 0x5eb   :  { %15985 = vtanh.f32 %v17010_v25 }
 0x5ec   :  { %15987 = vpow2.f32 %v12679_v29 }
 0x5f5   :  { %v15986_v26 = vpop.eup %15985 }
 0x5f6   :  { %1038 = vrot.lane.b32.xlu0 %v15986_v26, %s16622_s28  ;;  %v15988_v30 = vpop.eup %15987 }
 0x5f7   :  { %v1022_v31 = vadd.f32 1.0, %v15988_v30 }
 0x5f9   :  { %15989 = vrcp.f32 %v1022_v31 }
 0x603   :  { %v15990_v33 = vpop.eup %15989 }
 0x668   :  { %v1039_v34 = vpop.permute.xlu0 %1038 }
 0x669   :  { %v1041_v35 = vmul.f32 %v15990_v33, %v1039_v34 }
 0x66b   :  { %v1049_v32 = vrot.slane %v1041_v35, %v16812_v19 }
 0x66d   :  { %1050 = vrot.lane.b32.xlu1 %v1049_v32, %s16623_s11 }
 0x6df   :  { %v17016_v36 = vpop.permute.xlu1 %1050 }
 0x6e0   :  { %13709 = vmatmul.mubr.msk.f32.vlgmr.msra.gmra.mrb[8].mxu1 %vm178_vm1, %v17016_v36  ;;  %13720 = vmatmul.mubr.msk.f32.vlgmr.msra.gmra.mrb[10].mxu0 %vm178_vm1, %v17016_v36 }
 0x6e1   :  { %15174 = vmatpush3.bf16.msra.mxu1 %v16858_v41  ;;  %15180 = vmatpush3.bf16.msra.mxu0 %v16903_v52 }
 0x6e2   :  { %15175 = vmatprep.subr.bf16.mxu1 %v16618_v0  ;;  %15181 = vmatprep.subr.bf16.mxu0 %v16618_v0 }
 0x6e3   :  { %13730 = vmatprep.mubr.msk.f32.mxu1 %vm16619_vm0, %v16620_v1  ;;  %13741 = vmatprep.mubr.msk.f32.mxu0 %vm16619_vm0, %v16620_v1 }
 0x6e5   :  { %15177 = vmatpush3.bf16.msra.mxu1 %v16884_v48  ;;  %15183 = vmatpush3.bf16.msra.mxu0 %v16917_v55 }
 0x6e6   :  { %15184 = vmatprep.subr.bf16.mxu1 %v16618_v0  ;;  %15190 = vmatprep.subr.bf16.mxu0 %v16618_v0 }
 0x6e8   :  { %13731 = vmatmul.mubr.msk.f32.vlgmr.msra.gmra.mrb[10].mxu1 %vm178_vm1, %v17016_v36  ;;  %13742 = vmatmul.mubr.msk.f32.vlgmr.msra.gmra.mrb[12].mxu0 %vm178_vm1, %v17016_v36 }
 0x6e9   :  { %15186 = vmatpush3.bf16.msra.mxu1 %v16801_v14  ;;  %15192 = vmatpush3.bf16.msra.mxu0 %v16862_v42 }
 0x6ea   :  { %15187 = vmatprep.subr.bf16.mxu1 %v16618_v0  ;;  %15193 = vmatprep.subr.bf16.mxu0 %v16618_v0 }
 0x6eb   :  { %13752 = vmatprep.mubr.msk.f32.mxu1 %vm16619_vm0, %v16620_v1  ;;  %13763 = vmatprep.mubr.msk.f32.mxu0 %vm16619_vm0, %v16620_v1 }
 0x6ed   :  { %15189 = vmatpush3.bf16.msra.mxu1 %v16824_v23  ;;  %15195 = vmatpush3.bf16.msra.mxu0 %v16888_v49 }
 0x6ee   :  { %15196 = vmatprep.subr.bf16.mxu1 %v16618_v0  ;;  %15202 = vmatprep.subr.bf16.mxu0 %v16618_v0 }
 0x7b3   :  { %v1120_v37 = vpop.f32.mrb[8].mxu1  ;;  %v1197_v38 = vpop.f32.mrb[10].mxu0 }
 0x7b4   :  { %v13710_v40 = vpop.f32.mrb[9].mxu1  ;;  %v13721_v43 = vpop.f32.mrb[11].mxu0  ;;  %v1208_v54 = vrot.slane %v1197_v38, %v16812_v19  ;;  %v1124_v63 = vadd.f32 %v1120_v37, %v17059_v58 }
 0x7b6   :  { %v12681_v2 = vmul.f32 -1.442695, %v1124_v63 }
 0x7bb   :  { %v1285_v44 = vpop.f32.mrb[10].mxu1  ;;  %v1368_v46 = vpop.f32.mrb[12].mxu0 }
 0x7bc   :  { %v1296_v50 = vrot.slane %v1285_v44, %v16812_v19  ;;  %v13732_v51 = vpop.f32.mrb[11].mxu1  ;;  %v13743_v53 = vpop.f32.mrb[13].mxu0  ;;  %v1379_v56 = vrot.slane %v1368_v46, %v16812_v19 }
 0x7be   :  { %1297 = vrot.lane.b32.xlu0 %v1296_v50, %s16622_s28  ;;  %v276_v50 = vcombine.high %v17059_v58, %v17059_v58 }
 0x7c2   :  { %1209 = vrot.lane.b32.xlu0 %v1208_v54, %s16623_s11 }
 0x7c6   :  { %1380 = vrot.lane.b32.xlu0 %v1379_v56, %s16624_s3 }
 0x830   :  { %v1298_v59 = vpop.permute.xlu0 %1297 }
 0x831   :  { %v1300_v61 = vadd.f32 %v1298_v59, %v17059_v58 }
 0x833   :  { %15991 = vtanh.f32 %v1300_v61 }
 0x834   :  { %15993 = vpow2.f32 %v12681_v2  ;;  %v1210_v7 = vpop.permute.xlu0 %1209 }
 0x835   :  { %v1212_v10 = vadd.f32 %v1210_v7, %v17059_v58 }
 0x837   :  { %v12683_v11 = vmul.f32 -1.442695, %v1212_v10 }
 0x838   :  { %v1381_v20 = vpop.permute.xlu0 %1380 }
 0x839   :  { %v1383_v21 = vadd.f32 %v1381_v20, %v17059_v58 }
 0x83b   :  { %v12686_v22 = vmul.f32 -1.442695, %v1383_v21 }
 0x83d   :  { %v15992_v62 = vpop.eup %15991 }
 0x83e   :  { %1392 = vrot.lane.b32.xlu1 %v15992_v62, %s16622_s28  ;;  %v15994_v3 = vpop.eup %15993 }
 0x83f   :  { %v1128_v4 = vadd.f32 1.0, %v15994_v3 }
 0x841   :  { %15995 = vrcp.f32 %v1128_v4 }
 0x842   :  { %15997 = vpow2.f32 %v12683_v11 }
 0x84b   :  { %v15996_v5 = vpop.eup %15995 }
 0x84c   :  { %v15998_v12 = vpop.eup %15997 }
 0x84d   :  { %v1216_v13 = vadd.f32 1.0, %v15998_v12 }
 0x84f   :  { %15999 = vrcp.f32 %v1216_v13 }
 0x859   :  { %v16000_v15 = vpop.eup %15999 }
 0x85a   :  { %v1390_v16 = vmul.f32 %v16000_v15, %v17010_v25 }
 0x8b0   :  { %v1393_v6 = vpop.permute.xlu1 %1392 }
 0x8b1   :  { %v1395_v8 = vmul.f32 %v15996_v5, %v1393_v6 }
 0x8b3   :  { %1397 = vrot.lane.b32.xlu1 %v1395_v8, %s16623_s11 }
 0x925   :  { %v1398_v17 = vpop.permute.xlu1 %1397 }
 0x926   :  { %v17067_v9 = vadd.f32 %v1398_v17, %v1390_v16 }
 0x928   :  { %16001 = vtanh.f32 %v17067_v9 }
 0x929   :  { %16003 = vpow2.f32 %v12686_v22 }
 0x932   :  { %v16002_v18 = vpop.eup %16001 }
 0x933   :  { %1403 = vrot.lane.b32.xlu1 %v16002_v18, %s16622_s28  ;;  %v16004_v24 = vpop.eup %16003 }
 0x934   :  { %v1387_v26 = vadd.f32 1.0, %v16004_v24 }
 0x936   :  { %16005 = vrcp.f32 %v1387_v26 }
 0x940   :  { %v16006_v27 = vpop.eup %16005 }
 0x9a5   :  { %v1404_v28 = vpop.permute.xlu1 %1403 }
 0x9a6   :  { %v1406_v29 = vmul.f32 %v16006_v27, %v1404_v28 }
 0x9a8   :  { %v1414_v25 = vrot.slane %v1406_v29, %v16812_v19 }
 0x9aa   :  { %1415 = vrot.lane.b32.xlu0 %v1414_v25, %s16623_s11 }
 0xa1c   :  { %v17074_v30 = vpop.permute.xlu0 %1415 }
 0xa1d   :  { %13753 = vmatmul.mubr.msk.f32.vlgmr.msra.gmra.mrb[12].mxu1 %vm178_vm1, %v17074_v30  ;;  %13764 = vmatmul.mubr.msk.f32.vlgmr.msra.gmra.mrb[14].mxu0 %vm178_vm1, %v17074_v30 }
 0xa1e   :  { %15198 = vmatpush3.bf16.msra.mxu1 %v16858_v41  ;;  %15204 = vmatpush3.bf16.msra.mxu0 %v16903_v52 }
 0xa1f   :  { %15199 = vmatprep.subr.bf16.mxu1 %v16618_v0  ;;  %15205 = vmatprep.subr.bf16.mxu0 %v16618_v0 }
 0xa20   :  { %13774 = vmatprep.mubr.msk.f32.mxu1 %vm16619_vm0, %v16620_v1  ;;  %13785 = vmatprep.mubr.msk.f32.mxu0 %vm16619_vm0, %v16620_v1 }
 0xa22   :  { %15201 = vmatpush3.bf16.msra.mxu1 %v16884_v48  ;;  %15207 = vmatpush3.bf16.msra.mxu0 %v16917_v55 }
 0xa23   :  { %15208 = vmatprep.subr.bf16.mxu1 %v16618_v0  ;;  %15214 = vmatprep.subr.bf16.mxu0 %v16618_v0 }
 0xa25   :  { %13775 = vmatmul.mubr.msk.f32.vlgmr.msra.gmra.mrb[14].mxu1 %vm178_vm1, %v17074_v30  ;;  %13786 = vmatmul.mubr.msk.f32.vlgmr.msra.gmra.mrb[16].mxu0 %vm178_vm1, %v17074_v30 }
 0xa26   :  { %15210 = vmatpush3.bf16.msra.mxu1 %v16801_v14  ;;  %15216 = vmatpush3.bf16.msra.mxu0 %v16862_v42 }
 0xa27   :  { %15211 = vmatprep.subr.bf16.mxu1 %v16618_v0  ;;  %15217 = vmatprep.subr.bf16.mxu0 %v16618_v0 }
 0xa28   :  { %13796 = vmatprep.mubr.msk.f32.mxu1 %vm16619_vm0, %v16620_v1  ;;  %13807 = vmatprep.mubr.msk.f32.mxu0 %vm16619_vm0, %v16620_v1 }
 0xa2a   :  { %15213 = vmatpush3.bf16.msra.mxu1 %v16824_v23  ;;  %15219 = vmatpush3.bf16.msra.mxu0 %v16888_v49 }
 0xa2b   :  { %15220 = vmatprep.subr.bf16.mxu1 %v16618_v0  ;;  %15226 = vmatprep.subr.bf16.mxu0 %v16618_v0 }
 0xaf0   :  { %v1485_v31 = vpop.f32.mrb[12].mxu1  ;;  %v1562_v33 = vpop.f32.mrb[14].mxu0 }
 0xaf1   :  { %v13754_v34 = vpop.f32.mrb[13].mxu1  ;;  %v13765_v35 = vpop.f32.mrb[15].mxu0  ;;  %v1573_v44 = vrot.slane %v1562_v33, %v16812_v19  ;;  %v1489_v56 = vadd.f32 %v1485_v31, %v276_v50 }
 0xaf3   :  { %v12688_v57 = vmul.f32 -1.442695, %v1489_v56 }
 0xaf8   :  { %v1650_v32 = vpop.f32.mrb[14].mxu1  ;;  %v1733_v37 = vpop.f32.mrb[16].mxu0 }
 0xaf9   :  { %v1661_v38 = vrot.slane %v1650_v32, %v16812_v19  ;;  %v13776_v40 = vpop.f32.mrb[15].mxu1  ;;  %v13787_v43 = vpop.f32.mrb[17].mxu0  ;;  %v1744_v46 = vrot.slane %v1733_v37, %v16812_v19 }
 0xafb   :  { %1662 = vrot.lane.b32.xlu1 %v1661_v38, %s16622_s28  ;;  %v17167_v38 = vrot.slane %v16939_v60, %v16812_v19 }
 0xaff   :  { %1574 = vrot.lane.b32.xlu1 %v1573_v44, %s16623_s11 }
 0xb03   :  { %1745 = vrot.lane.b32.xlu1 %v1744_v46, %s16624_s3 }
 0xb6d   :  { %v1663_v51 = vpop.permute.xlu1 %1662 }
 0xb6e   :  { %v1665_v53 = vadd.f32 %v1663_v51, %v276_v50 }
 0xb70   :  { %16007 = vtanh.f32 %v1665_v53 }
 0xb71   :  { %16009 = vpow2.f32 %v12688_v57  ;;  %v1575_v3 = vpop.permute.xlu1 %1574 }
 0xb72   :  { %v1577_v4 = vadd.f32 %v1575_v3, %v276_v50 }
 0xb74   :  { %v12690_v58 = vmul.f32 -1.442695, %v1577_v4 }
 0xb75   :  { %v1746_v13 = vpop.permute.xlu1 %1745 }
 0xb76   :  { %v1748_v15 = vadd.f32 %v1746_v13, %v276_v50 }
 0xb78   :  { %v12693_v16 = vmul.f32 -1.442695, %v1748_v15 }
 0xb7a   :  { %v16008_v54 = vpop.eup %16007 }
 0xb7b   :  { %1757 = vrot.lane.b32.xlu0 %v16008_v54, %s16622_s28  ;;  %v16010_v59 = vpop.eup %16009 }
 0xb7c   :  { %v1493_v61 = vadd.f32 1.0, %v16010_v59 }
 0xb7e   :  { %16011 = vrcp.f32 %v1493_v61 }
 0xb7f   :  { %16013 = vpow2.f32 %v12690_v58 }
 0xb88   :  { %v16012_v62 = vpop.eup %16011 }
 0xb89   :  { %v16014_v5 = vpop.eup %16013 }
 0xb8a   :  { %v1581_v6 = vadd.f32 1.0, %v16014_v5 }
 0xb8c   :  { %16015 = vrcp.f32 %v1581_v6 }
 0xb96   :  { %v16016_v8 = vpop.eup %16015 }
 0xb97   :  { %v1755_v7 = vmul.f32 %v16016_v8, %v17067_v9 }
 0xbed   :  { %v1758_v63 = vpop.permute.xlu0 %1757 }
 0xbee   :  { %v1760_v2 = vmul.f32 %v16012_v62, %v1758_v63 }
 0xbf0   :  { %1762 = vrot.lane.b32.xlu0 %v1760_v2, %s16623_s11 }
 0xc62   :  { %v1763_v10 = vpop.permute.xlu0 %1762 }
 0xc63   :  { %v17119_v11 = vadd.f32 %v1763_v10, %v1755_v7 }
 0xc65   :  { %16017 = vtanh.f32 %v17119_v11 }
 0xc66   :  { %16019 = vpow2.f32 %v12693_v16 }
 0xc6f   :  { %v16018_v12 = vpop.eup %16017 }
 0xc70   :  { %1768 = vrot.lane.b32.xlu0 %v16018_v12, %s16622_s28  ;;  %v16020_v17 = vpop.eup %16019 }
 0xc71   :  { %v1752_v18 = vadd.f32 1.0, %v16020_v17 }
 0xc73   :  { %16021 = vrcp.f32 %v1752_v18 }
 0xc7d   :  { %v16022_v20 = vpop.eup %16021 }
 0xce2   :  { %v1769_v21 = vpop.permute.xlu0 %1768 }
 0xce3   :  { %v1771_v22 = vmul.f32 %v16022_v20, %v1769_v21 }
 0xce5   :  { %v1779_v9 = vrot.slane %v1771_v22, %v16812_v19 }
 0xce7   :  { %1780 = vrot.lane.b32.xlu1 %v1779_v9, %s16623_s11 }
 0xd59   :  { %v17125_v24 = vpop.permute.xlu1 %1780 }
 0xd5a   :  { %13797 = vmatmul.mubr.msk.f32.vlgmr.msra.gmra.mrb[16].mxu1 %vm178_vm1, %v17125_v24  ;;  %13808 = vmatmul.mubr.msk.f32.vlgmr.msra.gmra.mrb[18].mxu0 %vm178_vm1, %v17125_v24 }
 0xd5b   :  { %15222 = vmatpush3.bf16.msra.mxu1 %v16858_v41  ;;  %15228 = vmatpush3.bf16.msra.mxu0 %v16903_v52 }
 0xd5c   :  { %15223 = vmatprep.subr.bf16.mxu1 %v16618_v0  ;;  %15229 = vmatprep.subr.bf16.mxu0 %v16618_v0 }
 0xd5d   :  { %13818 = vmatprep.mubr.msk.f32.mxu1 %vm16619_vm0, %v16620_v1  ;;  %13829 = vmatprep.mubr.msk.f32.mxu0 %vm16619_vm0, %v16620_v1 }
 0xd5f   :  { %15225 = vmatpush3.bf16.msra.mxu1 %v16884_v48  ;;  %15231 = vmatpush3.bf16.msra.mxu0 %v16917_v55 }
 0xd60   :  { %15232 = vmatprep.subr.bf16.mxu1 %v16618_v0  ;;  %15238 = vmatprep.subr.bf16.mxu0 %v16618_v0 }
 0xd62   :  { %13819 = vmatmul.mubr.msk.f32.vlgmr.msra.gmra.mrb[18].mxu1 %vm178_vm1, %v17125_v24  ;;  %13830 = vmatmul.mubr.msk.f32.vlgmr.msra.gmra.mrb[20].mxu0 %vm178_vm1, %v17125_v24 }
 0xd63   :  { %15234 = vmatpush3.bf16.msra.mxu1 %v16801_v14  ;;  %15240 = vmatpush3.bf16.msra.mxu0 %v16862_v42 }
 0xd64   :  { %15235 = vmatprep.subr.bf16.mxu1 %v16618_v0  ;;  %15241 = vmatprep.subr.bf16.mxu0 %v16618_v0 }
 0xd65   :  { %13840 = vmatprep.mubr.msk.f32.mxu1 %vm16619_vm0, %v16620_v1  ;;  %13851 = vmatprep.mubr.msk.f32.mxu0 %vm16619_vm0, %v16620_v1 }
 0xd67   :  { %15237 = vmatpush3.bf16.msra.mxu1 %v16824_v23  ;;  %15243 = vmatpush3.bf16.msra.mxu0 %v16888_v49 }
 0xd68   :  { %15244 = vmatprep.subr.bf16.mxu1 %v16618_v0  ;;  %15250 = vmatprep.subr.bf16.mxu0 %v16618_v0 }
 0xe2d   :  { %v1850_v26 = vpop.f32.mrb[16].mxu1  ;;  %v1927_v27 = vpop.f32.mrb[18].mxu0 }
 0xe2e   :  { %v13798_v28 = vpop.f32.mrb[17].mxu1  ;;  %v13809_v29 = vpop.f32.mrb[19].mxu0  ;;  %v1938_v32 = vrot.slane %v1927_v27, %v16812_v19  ;;  %v1854_v46 = vadd.f32 %v1850_v26, %v17167_v38 }
 0xe30   :  { %v12695_v50 = vmul.f32 -1.442695, %v1854_v46 }
 0xe35   :  { %v2015_v25 = vpop.f32.mrb[18].mxu1  ;;  %v2098_v31 = vpop.f32.mrb[20].mxu0 }
 0xe36   :  { %v2026_v33 = vrot.slane %v2015_v25, %v16812_v19  ;;  %v13820_v34 = vpop.f32.mrb[19].mxu1  ;;  %v13831_v35 = vpop.f32.mrb[21].mxu0  ;;  %v2109_v37 = vrot.slane %v2098_v31, %v16812_v19 }
 0xe37   :  { %v292_v34 = vcombine.high %v17167_v38, %v17167_v38 }
 0xe38   :  { %2027 = vrot.lane.b32.xlu0 %v2026_v33, %s16622_s28 }
 0xe3c   :  { %1939 = vrot.lane.b32.xlu0 %v1938_v32, %s16623_s11 }
 0xe40   :  { %2110 = vrot.lane.b32.xlu0 %v2109_v37, %s16624_s3 }
 0xeaa   :  { %v2028_v40 = vpop.permute.xlu0 %2027 }
 0xeab   :  { %v2030_v43 = vadd.f32 %v2028_v40, %v17167_v38 }
 0xead   :  { %16023 = vtanh.f32 %v2030_v43 }
 0xeae   :  { %16025 = vpow2.f32 %v12695_v50  ;;  %v1940_v59 = vpop.permute.xlu0 %1939 }
 0xeaf   :  { %v1942_v61 = vadd.f32 %v1940_v59, %v17167_v38 }
 0xeb1   :  { %v12697_v62 = vmul.f32 -1.442695, %v1942_v61 }
 0xeb2   :  { %v2111_v8 = vpop.permute.xlu0 %2110 }
 0xeb3   :  { %v2113_v7 = vadd.f32 %v2111_v8, %v17167_v38 }
 0xeb5   :  { %v12700_v10 = vmul.f32 -1.442695, %v2113_v7 }
 0xeb7   :  { %v16024_v44 = vpop.eup %16023 }
 0xeb8   :  { %2122 = vrot.lane.b32.xlu1 %v16024_v44, %s16622_s28  ;;  %v16026_v51 = vpop.eup %16025 }
 0xeb9   :  { %v1858_v53 = vadd.f32 1.0, %v16026_v51 }
 0xebb   :  { %16027 = vrcp.f32 %v1858_v53 }
 0xebc   :  { %16029 = vpow2.f32 %v12697_v62 }
 0xec5   :  { %v16028_v54 = vpop.eup %16027 }
 0xec6   :  { %v16030_v63 = vpop.eup %16029 }
 0xec7   :  { %v1946_v2 = vadd.f32 1.0, %v16030_v63 }
 0xec9   :  { %16031 = vrcp.f32 %v1946_v2 }
 0xed3   :  { %v16032_v3 = vpop.eup %16031 }
 0xed4   :  { %v2120_v4 = vmul.f32 %v16032_v3, %v17119_v11 }
 0xf2a   :  { %v2123_v56 = vpop.permute.xlu1 %2122 }
 0xf2b   :  { %v2125_v57 = vmul.f32 %v16028_v54, %v2123_v56 }
 0xf2d   :  { %2127 = vrot.lane.b32.xlu1 %v2125_v57, %s16623_s11 }
 0xf9f   :  { %v2128_v58 = vpop.permute.xlu1 %2127 }
 0xfa0   :  { %v17175_v5 = vadd.f32 %v2128_v58, %v2120_v4 }
 0xfa2   :  { %16033 = vtanh.f32 %v17175_v5 }
 0xfa3   :  { %16035 = vpow2.f32 %v12700_v10 }
 0xfac   :  { %v16034_v6 = vpop.eup %16033 }
 0xfad   :  { %2133 = vrot.lane.b32.xlu1 %v16034_v6, %s16622_s28  ;;  %v16036_v12 = vpop.eup %16035 }
 0xfae   :  { %v2117_v13 = vadd.f32 1.0, %v16036_v12 }
 0xfb0   :  { %16037 = vrcp.f32 %v2117_v13 }
 0xfba   :  { %v16038_v15 = vpop.eup %16037 }
0x101f   :  { %v2134_v16 = vpop.permute.xlu1 %2133 }
0x1020   :  { %v2136_v17 = vmul.f32 %v16038_v15, %v2134_v16 }
0x1022   :  { %v2144_v11 = vrot.slane %v2136_v17, %v16812_v19 }
0x1024   :  { %2145 = vrot.lane.b32.xlu0 %v2144_v11, %s16623_s11 }
0x1096   :  { %v17182_v18 = vpop.permute.xlu0 %2145 }
0x1097   :  { %13841 = vmatmul.mubr.msk.f32.vlgmr.msra.gmra.mrb[20].mxu1 %vm178_vm1, %v17182_v18  ;;  %13852 = vmatmul.mubr.msk.f32.vlgmr.msra.gmra.mrb[22].mxu0 %vm178_vm1, %v17182_v18 }
0x1098   :  { %15246 = vmatpush3.bf16.msra.mxu1 %v16858_v41  ;;  %15252 = vmatpush3.bf16.msra.mxu0 %v16903_v52 }
0x1099   :  { %15247 = vmatprep.subr.bf16.mxu1 %v16618_v0  ;;  %15253 = vmatprep.subr.bf16.mxu0 %v16618_v0 }
0x109a   :  { %13862 = vmatprep.mubr.msk.f32.mxu1 %vm16619_vm0, %v16620_v1  ;;  %13873 = vmatprep.mubr.msk.f32.mxu0 %vm16619_vm0, %v16620_v1 }
0x109c   :  { %15249 = vmatpush3.bf16.msra.mxu1 %v16884_v48  ;;  %15255 = vmatpush3.bf16.msra.mxu0 %v16917_v55 }
0x109d   :  { %15256 = vmatprep.subr.bf16.mxu1 %v16618_v0  ;;  %15262 = vmatprep.subr.bf16.mxu0 %v16618_v0 }
0x109f   :  { %13863 = vmatmul.mubr.msk.f32.vlgmr.msra.gmra.mrb[22].mxu1 %vm178_vm1, %v17182_v18  ;;  %13874 = vmatmul.mubr.msk.f32.vlgmr.msra.gmra.mrb[24].mxu0 %vm178_vm1, %v17182_v18 }
0x10a0   :  { %15258 = vmatpush3.bf16.msra.mxu1 %v16801_v14  ;;  %15264 = vmatpush3.bf16.msra.mxu0 %v16862_v42 }
0x10a1   :  { %15259 = vmatprep.subr.bf16.mxu1 %v16618_v0  ;;  %15265 = vmatprep.subr.bf16.mxu0 %v16618_v0 }
0x10a2   :  { %13884 = vmatprep.mubr.msk.f32.mxu1 %vm16619_vm0, %v16620_v1  ;;  %13895 = vmatprep.mubr.msk.f32.mxu0 %vm16619_vm0, %v16620_v1 }
0x10a4   :  { %15261 = vmatpush3.bf16.msra.mxu1 %v16824_v23  ;;  %15267 = vmatpush3.bf16.msra.mxu0 %v16888_v49 }
0x10a5   :  { %15268 = vmatprep.subr.bf16.mxu1 %v16618_v0  ;;  %15274 = vmatprep.subr.bf16.mxu0 %v16618_v0 }
0x116a   :  { %v2215_v20 = vpop.f32.mrb[20].mxu1  ;;  %v2292_v21 = vpop.f32.mrb[22].mxu0 }
0x116b   :  { %v13842_v22 = vpop.f32.mrb[21].mxu1  ;;  %v13853_v9 = vpop.f32.mrb[23].mxu0  ;;  %v2303_v31 = vrot.slane %v2292_v21, %v16812_v19  ;;  %v2219_v40 = vadd.f32 %v2215_v20, %v292_v34 }
0x116d   :  { %v12702_v43 = vmul.f32 -1.442695, %v2219_v40 }
0x1172   :  { %v2380_v26 = vpop.f32.mrb[22].mxu1  ;;  %v2463_v27 = vpop.f32.mrb[24].mxu0 }
0x1173   :  { %v2391_v28 = vrot.slane %v2380_v26, %v16812_v19  ;;  %v13864_v29 = vpop.f32.mrb[23].mxu1  ;;  %v13875_v25 = vpop.f32.mrb[25].mxu0  ;;  %v2474_v33 = vrot.slane %v2463_v27, %v16812_v19  ;;  %v277_v26 = vcombine.high %v16939_v60, %v16939_v60 }
0x1175   :  { %2392 = vrot.lane.b32.xlu1 %v2391_v28, %s16622_s28  ;;  %v17276_v27 = vrot.slane %v277_v26, %v16812_v19 }
0x1179   :  { %2304 = vrot.lane.b32.xlu1 %v2303_v31, %s16623_s11 }
0x117d   :  { %2475 = vrot.lane.b32.xlu1 %v2474_v33, %s16624_s3 }
0x11e7   :  { %v2393_v35 = vpop.permute.xlu1 %2392 }
0x11e8   :  { %v2395_v32 = vadd.f32 %v2393_v35, %v292_v34 }
0x11ea   :  { %16039 = vtanh.f32 %v2395_v32 }
0x11eb   :  { %16041 = vpow2.f32 %v12702_v43  ;;  %v2305_v54 = vpop.permute.xlu1 %2304 }
0x11ec   :  { %v2307_v56 = vadd.f32 %v2305_v54, %v292_v34 }
0x11ee   :  { %v12704_v38 = vmul.f32 -1.442695, %v2307_v56 }
0x11ef   :  { %v2476_v4 = vpop.permute.xlu1 %2475 }
0x11f0   :  { %v2478_v58 = vadd.f32 %v2476_v4, %v292_v34 }
0x11f2   :  { %v12707_v6 = vmul.f32 -1.442695, %v2478_v58 }
0x11f4   :  { %v16040_v37 = vpop.eup %16039 }
0x11f5   :  { %2487 = vrot.lane.b32.xlu0 %v16040_v37, %s16622_s28  ;;  %v16042_v44 = vpop.eup %16041 }
0x11f6   :  { %v2223_v46 = vadd.f32 1.0, %v16042_v44 }
0x11f8   :  { %16043 = vrcp.f32 %v2223_v46 }
0x11f9   :  { %16045 = vpow2.f32 %v12704_v38 }
0x1202   :  { %v16044_v50 = vpop.eup %16043 }
0x1203   :  { %v16046_v57 = vpop.eup %16045 }
0x1204   :  { %v2311_v59 = vadd.f32 1.0, %v16046_v57 }
0x1206   :  { %16047 = vrcp.f32 %v2311_v59 }
0x1210   :  { %v16048_v61 = vpop.eup %16047 }
0x1211   :  { %v2485_v62 = vmul.f32 %v16048_v61, %v17175_v5 }
0x1267   :  { %v2488_v51 = vpop.permute.xlu0 %2487 }
0x1268   :  { %v2490_v53 = vmul.f32 %v16044_v50, %v2488_v51 }
0x126a   :  { %2492 = vrot.lane.b32.xlu0 %v2490_v53, %s16623_s11 }
0x12dc   :  { %v2493_v63 = vpop.permute.xlu0 %2492 }
0x12dd   :  { %v17227_v2 = vadd.f32 %v2493_v63, %v2485_v62 }
0x12df   :  { %16049 = vtanh.f32 %v17227_v2 }
0x12e0   :  { %16051 = vpow2.f32 %v12707_v6 }
0x12e9   :  { %v16050_v3 = vpop.eup %16049 }
0x12ea   :  { %2498 = vrot.lane.b32.xlu0 %v16050_v3, %s16622_s28  ;;  %v16052_v8 = vpop.eup %16051 }
0x12eb   :  { %v2482_v7 = vadd.f32 1.0, %v16052_v8  ;;  %v3232_v8 = vld [vmem:[#allocation5] sm:$0xff] }
0x12ed   :  { %16053 = vrcp.f32 %v2482_v7  ;;  %v3233_v7 = vld [vmem:[#allocation5 + $0x8] sm:$0xff] }
0x12f7   :  { %v16054_v10 = vpop.eup %16053 }
0x135c   :  { %v2499_v12 = vpop.permute.xlu0 %2498 }
0x135d   :  { %v2501_v13 = vmul.f32 %v16054_v10, %v2499_v12  ;;  %v15304_v10 = vpack.c.bf16 %v3233_v7, %v3232_v8  ;;  %v3362_v12 = vld [vmem:[%s18844_s5] sm:$0xff] }
0x135f   :  { %v2509_v5 = vrot.slane %v2501_v13, %v16812_v19  ;;  %v3363_v13 = vld [vmem:[%s18844_s5 + $0x8] sm:$0xff] }
0x1361   :  { %2510 = vrot.lane.b32.xlu1 %v2509_v5, %s16623_s11  ;;  %v17313_v5 = vpack.c.bf16 %v3363_v13, %v3362_v12 }
0x13d3   :  { %v17233_v15 = vpop.permute.xlu1 %2510 }
0x13d4   :  { %13885 = vmatmul.mubr.msk.f32.vlgmr.msra.gmra.mrb[24].mxu1 %vm178_vm1, %v17233_v15  ;;  %13896 = vmatmul.mubr.msk.f32.vlgmr.msra.gmra.mrb[26].mxu0 %vm178_vm1, %v17233_v15 }
0x13d5   :  { %15270 = vmatpush3.bf16.msra.mxu1 %v16858_v41  ;;  %15276 = vmatpush3.bf16.msra.mxu0 %v16903_v52 }
0x13d6   :  { %15271 = vmatprep.subr.bf16.mxu1 %v16618_v0  ;;  %15277 = vmatprep.subr.bf16.mxu0 %v16618_v0 }
0x13d7   :  { %13906 = vmatprep.mubr.msk.f32.mxu1 %vm16619_vm0, %v16620_v1  ;;  %13917 = vmatprep.mubr.msk.f32.mxu0 %vm16619_vm0, %v16620_v1 }
0x13d9   :  { %15273 = vmatpush3.bf16.msra.mxu1 %v16884_v48  ;;  %15279 = vmatpush3.bf16.msra.mxu0 %v16917_v55 }
0x13da   :  { %15280 = vmatprep.subr.bf16.mxu1 %v16618_v0  ;;  %15286 = vmatprep.subr.bf16.mxu0 %v16618_v0 }
0x13dc   :  { %13907 = vmatmul.mubr.msk.f32.vlgmr.msra.gmra.mrb[26].mxu1 %vm178_vm1, %v17233_v15  ;;  %13918 = vmatmul.mubr.msk.f32.vlgmr.msra.gmra.mrb[28].mxu0 %vm178_vm1, %v17233_v15 }
0x13dd   :  { %15282 = vmatpush3.bf16.msra.mxu1 %v16801_v14  ;;  %15288 = vmatpush3.bf16.msra.mxu0 %v16862_v42 }
0x13de   :  { %15283 = vmatprep.subr.bf16.mxu1 %v16618_v0  ;;  %15289 = vmatprep.subr.bf16.mxu0 %v16618_v0 }
0x13df   :  { %13928 = vmatprep.mubr.msk.f32.mxu1 %vm16619_vm0, %v16620_v1  ;;  %13939 = vmatprep.mubr.msk.f32.mxu0 %vm16619_vm0, %v16620_v1 }
0x13e1   :  { %15285 = vmatpush3.bf16.msra.mxu1 %v16824_v23  ;;  %15291 = vmatpush3.bf16.msra.mxu0 %v16888_v49 }
0x13e2   :  { %15292 = vmatprep.subr.bf16.mxu1 %v16618_v0  ;;  %15298 = vmatprep.subr.bf16.mxu0 %v16618_v0 }
0x14a7   :  { %v2580_v14 = vpop.f32.mrb[24].mxu1  ;;  %v2657_v42 = vpop.f32.mrb[26].mxu0 }
0x14a8   :  { %v13886_v16 = vpop.f32.mrb[25].mxu1  ;;  %v13897_v17 = vpop.f32.mrb[27].mxu0  ;;  %v2668_v23 = vrot.slane %v2657_v42, %v16812_v19  ;;  %v2584_v31 = vadd.f32 %v2580_v14, %v17276_v27  ;;  %v3364_v42 = vld [vmem:[%s18844_s5 + $0x10] sm:$0xff] }
0x14a9   :  { %v3365_v16 = vld [vmem:[%s18844_s5 + $0x18] sm:$0xff]  ;;  %v12726_v17 = vld [vmem:[%s18844_s5 + $0x28] sm:$0xff] }
0x14aa   :  { %v12709_v33 = vmul.f32 -1.442695, %v2584_v31  ;;  %v12735_v31 = vld [vmem:[%s18844_s5 + $0x70] sm:$0xff] }
0x14af   :  { %v2745_v11 = vpop.f32.mrb[26].mxu1  ;;  %v2828_v20 = vpop.f32.mrb[28].mxu0 }
0x14b0   :  { %v2756_v21 = vrot.slane %v2745_v11, %v16812_v19  ;;  %v13908_v22 = vpop.f32.mrb[27].mxu1  ;;  %v13919_v9 = vpop.f32.mrb[29].mxu0  ;;  %v2839_v49 = vrot.slane %v2828_v20, %v16812_v19  ;;  %v12729_v11 = vld [vmem:[%s18844_s5 + $0x40] sm:$0xff]  ;;  %v12730_v20 = vld [vmem:[%s18844_s5 + $0x48] sm:$0xff] }
0x14b1   :  { %v17349_v22 = vpack.c.bf16 %v12730_v20, %v12729_v11  ;;  %v12727_v9 = vld [vmem:[%s18844_s5 + $0x30] sm:$0xff] }
0x14b2   :  { %2757 = vrot.lane.b32.xlu0 %v2756_v21, %s16622_s28 }
0x14b6   :  { %2669 = vrot.lane.b32.xlu0 %v2668_v23, %s16623_s11  ;;  %v12731_v23 = vld [vmem:[%s18844_s5 + $0x50] sm:$0xff] }
0x14ba   :  { %2840 = vrot.lane.b32.xlu0 %v2839_v49, %s16624_s3  ;;  %v12732_v49 = vld [vmem:[%s18844_s5 + $0x58] sm:$0xff] }
0x1524   :  { %v2758_v28 = vpop.permute.xlu0 %2757 }
0x1525   :  { %v2760_v29 = vadd.f32 %v2758_v28, %v17276_v27  ;;  %v17372_v28 = vpack.c.bf16 %v12732_v49, %v12731_v23 }
0x1527   :  { %16055 = vtanh.f32 %v2760_v29  ;;  %v12733_v29 = vld [vmem:[%s18844_s5 + $0x60] sm:$0xff] }
0x1528   :  { %16057 = vpow2.f32 %v12709_v33  ;;  %v2670_v40 = vpop.permute.xlu0 %2669  ;;  %v12736_v33 = vld [vmem:[%s18844_s5 + $0x78] sm:$0xff] }
0x1529   :  { %v2672_v43 = vadd.f32 %v2670_v40, %v17276_v27 }
0x152b   :  { %v12711_v44 = vmul.f32 -1.442695, %v2672_v43 }
0x152c   :  { %v2841_v57 = vpop.permute.xlu0 %2840 }
0x152d   :  { %v2843_v59 = vadd.f32 %v2841_v57, %v17276_v27 }
0x152f   :  { %v12714_v61 = vmul.f32 -1.442695, %v2843_v59 }
0x1531   :  { %v16056_v25 = vpop.eup %16055 }
0x1532   :  { %2852 = vrot.lane.b32.xlu1 %v16056_v25, %s16622_s28  ;;  %v16058_v34 = vpop.eup %16057 }
0x1533   :  { %v2588_v35 = vadd.f32 1.0, %v16058_v34  ;;  %v17401_v34 = vpack.c.bf16 %v12736_v33, %v12735_v31 }
0x1535   :  { %16059 = vrcp.f32 %v2588_v35 }
0x1536   :  { %16061 = vpow2.f32 %v12711_v44 }
0x153f   :  { %v16060_v32 = vpop.eup %16059 }
0x1540   :  { %v16062_v46 = vpop.eup %16061 }
0x1541   :  { %v2676_v50 = vadd.f32 1.0, %v16062_v46 }
0x1543   :  { %16063 = vrcp.f32 %v2676_v50 }
0x154d   :  { %v16064_v51 = vpop.eup %16063 }
0x154e   :  { %v2850_v53 = vmul.f32 %v16064_v51, %v17227_v2 }
0x15a4   :  { %v2853_v37 = vpop.permute.xlu1 %2852 }
0x15a5   :  { %v2855_v60 = vmul.f32 %v16060_v32, %v2853_v37 }
0x15a7   :  { %2857 = vrot.lane.b32.xlu1 %v2855_v60, %s16623_s11 }
0x1619   :  { %v2858_v54 = vpop.permute.xlu1 %2857 }
0x161a   :  { %v17284_v56 = vadd.f32 %v2858_v54, %v2850_v53  ;;  %v12722_v53 = vld [vmem:[%s18845_s6] ss:$0 sm:$0xff] }
0x161c   :  { %16065 = vtanh.f32 %v17284_v56 }
0x161d   :  { %16067 = vpow2.f32 %v12714_v61 }
0x1626   :  { %v16066_v38 = vpop.eup %16065 }
0x1627   :  { %2863 = vrot.lane.b32.xlu1 %v16066_v38, %s16622_s28  ;;  %v16068_v62 = vpop.eup %16067 }
0x1628   :  { %v2847_v63 = vadd.f32 1.0, %v16068_v62 }
0x162a   :  { %16069 = vrcp.f32 %v2847_v63 }
0x1634   :  { %v16070_v3 = vpop.eup %16069 }
0x1699   :  { %v2864_v4 = vpop.permute.xlu1 %2863 }
0x169a   :  { %v2866_v58 = vmul.f32 %v16070_v3, %v2864_v4 }
0x169c   :  { %v2874_v2 = vrot.slane %v2866_v58, %v16812_v19 }
0x169e   :  { %2875 = vrot.lane.b32.xlu0 %v2874_v2, %s16623_s11 }
0x1710   :  { %v17291_v6 = vpop.permute.xlu0 %2875 }
0x1711   :  { %13929 = vmatmul.mubr.msk.f32.vlgmr.msra.gmra.mrb[28].mxu1 %vm178_vm1, %v17291_v6  ;;  %13940 = vmatmul.mubr.msk.f32.vlgmr.msra.gmra.mrb[30].mxu0 %vm178_vm1, %v17291_v6 }
0x1712   :  { %15294 = vmatpush3.bf16.msra.mxu1 %v16858_v41  ;;  %15300 = vmatpush3.bf16.msra.mxu0 %v16903_v52  ;;  %v3234_v41 = vld [vmem:[#allocation5 + $0x10] sm:$0xff]  ;;  %v3235_v52 = vld [vmem:[#allocation5 + $0x18] sm:$0xff] }
0x1713   :  { %15295 = vmatprep.subr.bf16.mxu1 %v16618_v0  ;;  %15301 = vmatprep.subr.bf16.mxu0 %v16618_v0  ;;  %v15308_v14 = vpack.c.bf16 %v3235_v52, %v3234_v41 }
0x1714   :  { %13950 = vmatprep.mubr.msk.f32.mxu1 %vm16619_vm0, %v16620_v1  ;;  %13961 = vmatprep.mubr.msk.f32.mxu0 %vm16619_vm0, %v16620_v1 }
0x1716   :  { %15297 = vmatpush3.bf16.msra.mxu1 %v16884_v48  ;;  %15303 = vmatpush3.bf16.msra.mxu0 %v16917_v55  ;;  %v17327_v48 = vpack.c.bf16 %v3365_v16, %v3364_v42  ;;  %v12725_v55 = vld [vmem:[%s18844_s5 + $0x20] sm:$0xff] }
0x1717   :  { %15305 = vmatprep.subr.bf16.mxu1 %v15304_v10  ;;  %15312 = vmatprep.subr.bf16.mxu0 %v16618_v0  ;;  %v17347_v21 = vpack.c.bf16 %v12726_v17, %v12725_v55 }
0x1719   :  { %13951 = vmatmul.mubr.msk.f32.vlgmr.msra.gmra.mrb[30].mxu1 %vm178_vm1, %v17291_v6  ;;  %13962 = vmatmul.mubr.msk.f32.vlgmr.msra.gmra.mrb[32].mxu0 %vm178_vm1, %v17291_v6 }
0x171a   :  { %15307 = vmatpush3.bf16.msra.mxu1 %v15304_v10  ;;  %15314 = vmatpush3.bf16.msra.mxu0 %v17313_v5 }
0x171b   :  { %15309 = vmatprep.subr.bf16.mxu1 %v15308_v14  ;;  %15315 = vmatprep.subr.bf16.mxu0 %v16618_v0 }
0x171c   :  { %13972 = vmatprep.mubr.msk.f32.mxu1 %vm178_vm1, %v16855_v39  ;;  %13983 = vmatprep.mubr.msk.f32.mxu0 %vm16619_vm0, %v16620_v1  ;;  %v12728_v39 = vld [vmem:[%s18844_s5 + $0x38] sm:$0xff] }
0x171d   :  { %v17370_v26 = vpack.c.bf16 %v12728_v39, %v12727_v9 }
0x171e   :  { %15311 = vmatpush3.bf16.msra.mxu1 %v15308_v14  ;;  %15317 = vmatpush3.bf16.msra.mxu0 %v17327_v48 }
0x171f   :  { %15318 = vmatprep.subr.bf16.mxu1 %v16618_v0  ;;  %15324 = vmatprep.subr.bf16.mxu0 %v16618_v0 }
0x1721   :  { %13973 = vmatmul.mubr.msk.f32.vlgmr.msra.gmra.mrb[32].mxu1 %vm178_vm1, %v16872_v45  ;;  %13984 = vmatmul.mubr.f32.vlgmr.msra.gmra.mrb[34].mxu0 %v16620_v1  ;;  %v12734_v45 = vld [vmem:[%s18844_s5 + $0x68] sm:$0xff] }
0x1722   :  { %15320 = vmatpush3.bf16.msra.mxu1 %v17347_v21  ;;  %15326 = vmatpush3.bf16.msra.mxu0 %v17349_v22  ;;  %v17388_v25 = vpack.c.bf16 %v12734_v45, %v12733_v29 }
0x1723   :  { %15321 = vmatprep.subr.bf16.mxu1 %v16618_v0  ;;  %15327 = vmatprep.subr.bf16.mxu0 %v16618_v0 }
0x1724   :  { %14005 = vmatprep.mubr.msk.f32.mxu0 %vm16619_vm0, %v16620_v1  ;;  %13994 = vmatprep.mubr.msk.f32.mxu1 %vm16619_vm0, %v16620_v1 }
0x1726   :  { %15323 = vmatpush3.bf16.msra.mxu1 %v17370_v26  ;;  %15329 = vmatpush3.bf16.msra.mxu0 %v17372_v28 }
0x1727   :  { %15330 = vmatprep.subr.bf16.mxu1 %v16618_v0  ;;  %15336 = vmatprep.subr.bf16.mxu0 %v16618_v0 }
0x1729   :  { %14006 = vmatmul.mubr.f32.vlgmr.msra.gmra.mrb[36].mxu0 %v16620_v1  ;;  %13995 = vmatmul.mubr.f32.vlgmr.msra.gmra.mrb[34].mxu1 %v16620_v1 }
0x172a   :  { %15332 = vmatpush3.bf16.msra.mxu1 %v17388_v25  ;;  %14016 = vmatprep.mubr.msk.f32.mxu1 %vm16619_vm0, %v16620_v1 }
0x172b   :  { %15333 = vmatprep.subr.bf16.mxu1 %v16618_v0  ;;  %15338 = vmatpush3.bf16.msra.mxu0 %v17313_v5 }
0x172c   :  { %15339 = vmatprep.subr.bf16.mxu0 %v16618_v0  ;;  %14027 = vmatprep.mubr.msk.f32.mxu0 %vm16619_vm0, %v16620_v1 }
0x172e   :  { %15335 = vmatpush3.bf16.msra.mxu1 %v17401_v34 }
0x172f   :  { %15342 = vmatprep.subr.bf16.mxu1 %v16618_v0  ;;  %15341 = vmatpush3.bf16.msra.mxu0 %v17327_v48 }
0x1730   :  { %15348 = vmatprep.subr.bf16.mxu0 %v16618_v0 }
0x1731   :  { %14017 = vmatmul.mubr.f32.vlgmr.msra.gmra.mrb[36].mxu1 %v16620_v1 }
0x1732   :  { %15344 = vmatpush3.bf16.msra.mxu1 %v17347_v21  ;;  %14038 = vmatprep.mubr.msk.f32.mxu1 %vm16619_vm0, %v16620_v1 }
0x1733   :  { %15345 = vmatprep.subr.bf16.mxu1 %v16618_v0 }
0x1736   :  { %15347 = vmatpush3.bf16.msra.mxu1 %v17370_v26 }
0x1737   :  { %15354 = vmatprep.subr.bf16.mxu1 %v16618_v0 }
0x17e4   :  { %v17421_v35 = vpop.f32.mrb[28].mxu1  ;;  %v17423_v32 = vpop.f32.mrb[30].mxu0 }
0x17e5   :  { %v13930_v37 = vpop.f32.mrb[29].mxu1  ;;  %v13941_v60 = vpop.f32.mrb[31].mxu0 }
0x17ec   :  { %v17425_v40 = vpop.f32.mrb[30].mxu1  ;;  %v17427_v43 = vpop.f32.mrb[32].mxu0 }
0x17ed   :  { %v13952_v44 = vpop.f32.mrb[31].mxu1  ;;  %v13963_v46 = vpop.f32.mrb[33].mxu0 }
0x17f4   :  { %v13974_v50 = vpop.f32.mrb[32].mxu1  ;;  %v3447_v51 = vpop.f32.mrb[34].mxu0 }
0x17f5   :  { %v13985_v54 = vpop.f32.mrb[35].mxu0  ;;  %v3309_v38 = vpop.f32.mrb[33].mxu1  ;;  %v17440_v7 = vadd.f32 %v13974_v50, %v12722_v53 }
0x17f6   :  { %v17432_v57 = vadd.f32 %v12722_v53, %v3309_v38 }
0x17f7   :  { %v3337_v10 = vcombine.high %v17440_v7, %v17440_v7 }
0x17f9   :  { %v17445_v12 = vrot.slane %v3337_v10, %v16812_v19 }
0x17fb   :  { %v3353_v13 = vcombine.high %v17445_v12, %v17445_v12 }
0x17fc   :  { %v3612_v59 = vpop.f32.mrb[36].mxu0  ;;  %v3524_v61 = vpop.f32.mrb[34].mxu1 }
0x17fd   :  { %v3623_v62 = vrot.slane %v3612_v59, %v16812_v19  ;;  %v14007_v63 = vpop.f32.mrb[37].mxu0  ;;  %v13996_v3 = vpop.f32.mrb[35].mxu1  ;;  %v3535_v4 = vrot.slane %v3524_v61, %v16812_v19  ;;  %v3451_v42 = vadd.f32 %v3447_v51, %v3353_v13 }
0x17ff   :  { %3624 = vrot.lane.b32.xlu1 %v3623_v62, %s16622_s28  ;;  %v12737_v16 = vmul.f32 -1.442695, %v3451_v42 }
0x1803   :  { %3536 = vrot.lane.b32.xlu1 %v3535_v4, %s16623_s11 }
0x1804   :  { %v3695_v58 = vpop.f32.mrb[36].mxu1 }
0x1805   :  { %v3706_v2 = vrot.slane %v3695_v58, %v16812_v19  ;;  %v14018_v8 = vpop.f32.mrb[37].mxu1 }
0x1807   :  { %3707 = vrot.lane.b32.xlu1 %v3706_v2, %s16624_s3 }
0x1871   :  { %v3625_v41 = vpop.permute.xlu1 %3624 }
0x1872   :  { %v3627_v52 = vadd.f32 %v3625_v41, %v3353_v13 }
0x1874   :  { %16071 = vtanh.f32 %v3627_v52 }
0x1875   :  { %16073 = vpow2.f32 %v12737_v16  ;;  %v3537_v39 = vpop.permute.xlu1 %3536 }
0x1876   :  { %v3539_v23 = vadd.f32 %v3537_v39, %v3353_v13 }
0x1878   :  { %v12738_v49 = vmul.f32 -1.442695, %v3539_v23 }
0x1879   :  { %v3708_v46 = vpop.permute.xlu1 %3707 }
0x187a   :  { %v3710_v50 = vadd.f32 %v3708_v46, %v3353_v13 }
0x187c   :  { %v12739_v51 = vmul.f32 -1.442695, %v3710_v50 }
0x187e   :  { %v16072_v14 = vpop.eup %16071 }
0x187f   :  { %3719 = vrot.lane.b32.xlu0 %v16072_v14, %s16622_s28  ;;  %v16074_v55 = vpop.eup %16073 }
0x1880   :  { %v3455_v17 = vadd.f32 1.0, %v16074_v55 }
0x1882   :  { %16075 = vrcp.f32 %v3455_v17 }
0x1883   :  { %16077 = vpow2.f32 %v12738_v49 }
0x188c   :  { %v16076_v11 = vpop.eup %16075 }
0x188d   :  { %v16078_v29 = vpop.eup %16077 }
0x188e   :  { %v3543_v45 = vadd.f32 1.0, %v16078_v29 }
0x1890   :  { %16079 = vrcp.f32 %v3543_v45 }
0x189a   :  { %v16080_v31 = vpop.eup %16079 }
0x189b   :  { %v3717_v33 = vmul.f32 0.0, %v16080_v31 }
0x18f1   :  { %v3720_v20 = vpop.permute.xlu0 %3719 }
0x18f2   :  { %v3722_v9 = vmul.f32 %v16076_v11, %v3720_v20 }
0x18f4   :  { %3724 = vrot.lane.b32.xlu0 %v3722_v9, %s16623_s11 }
0x1966   :  { %v3725_v37 = vpop.permute.xlu0 %3724 }
0x1967   :  { %v17451_v60 = vadd.f32 %v3725_v37, %v3717_v33 }
0x1969   :  { %16081 = vtanh.f32 %v17451_v60 }
0x196a   :  { %16083 = vpow2.f32 %v12739_v51 }
0x1973   :  { %v16082_v44 = vpop.eup %16081 }
0x1974   :  { %3730 = vrot.lane.b32.xlu0 %v16082_v44, %s16622_s28  ;;  %v16084_v53 = vpop.eup %16083 }
0x1975   :  { %v3714_v54 = vadd.f32 1.0, %v16084_v53 }
0x1977   :  { %16085 = vrcp.f32 %v3714_v54 }
0x1981   :  { %v16086_v38 = vpop.eup %16085 }
0x19e6   :  { %v3731_v59 = vpop.permute.xlu0 %3730 }
0x19e7   :  { %v3733_v61 = vmul.f32 %v16086_v38, %v3731_v59 }
0x19e9   :  { %v17456_v62 = vrot.slane %v3733_v61, %v16812_v19 }
0x19eb   :  { %3742 = vrot.lane.b32.xlu1 %v17456_v62, %s16623_s11 }
0x1a5d   :  { %v3743_v63 = vpop.permute.xlu1 %3742 }
0x1a5e   :  { %14028 = vmatmul.mubr.msk.f32.vlgmr.msra.gmra.mrb[38].mxu0 %vm178_vm1, %v3743_v63  ;;  %14039 = vmatmul.mubr.msk.f32.vlgmr.msra.gmra.mrb[38].mxu1 %vm178_vm1, %v3743_v63 }
0x1a5f   :  { %15350 = vmatpush3.bf16.msra.mxu0 %v17349_v22  ;;  %15356 = vmatpush3.bf16.msra.mxu1 %v17388_v25 }
0x1a60   :  { %15351 = vmatprep.subr.bf16.mxu0 %v16618_v0  ;;  %15357 = vmatprep.subr.bf16.mxu1 %v16618_v0 }
0x1a61   :  { %14049 = vmatprep.mubr.msk.f32.mxu0 %vm16619_vm0, %v16620_v1  ;;  %14060 = vmatprep.mubr.msk.f32.mxu1 %vm16619_vm0, %v16620_v1 }
0x1a63   :  { %15353 = vmatpush3.bf16.msra.mxu0 %v17372_v28  ;;  %15359 = vmatpush3.bf16.msra.mxu1 %v17401_v34 }
0x1a64   :  { %15360 = vmatprep.subr.bf16.mxu0 %v16618_v0  ;;  %15366 = vmatprep.subr.bf16.mxu1 %v16618_v0 }
0x1a66   :  { %14050 = vmatmul.mubr.msk.f32.vlgmr.msra.gmra.mrb[40].mxu0 %vm178_vm1, %v3743_v63  ;;  %14061 = vmatmul.mubr.msk.f32.vlgmr.msra.gmra.mrb[40].mxu1 %vm178_vm1, %v3743_v63 }
0x1a67   :  { %15362 = vmatpush3.bf16.msra.mxu0 %v17313_v5  ;;  %15368 = vmatpush3.bf16.msra.mxu1 %v17347_v21 }
0x1a68   :  { %15363 = vmatprep.subr.bf16.mxu0 %v16618_v0  ;;  %15369 = vmatprep.subr.bf16.mxu1 %v16618_v0 }
0x1a69   :  { %14071 = vmatprep.mubr.msk.f32.mxu0 %vm16619_vm0, %v16620_v1  ;;  %14082 = vmatprep.mubr.msk.f32.mxu1 %vm16619_vm0, %v16620_v1 }
0x1a6b   :  { %15365 = vmatpush3.bf16.msra.mxu0 %v17327_v48  ;;  %15371 = vmatpush3.bf16.msra.mxu1 %v17370_v26 }
0x1a6c   :  { %15372 = vmatprep.subr.bf16.mxu0 %v16618_v0  ;;  %15378 = vmatprep.subr.bf16.mxu1 %v16618_v0 }
0x1b31   :  { %v3812_v3 = vpop.f32.mrb[38].mxu0  ;;  %v3889_v4 = vpop.f32.mrb[38].mxu1 }
0x1b32   :  { %v14029_v58 = vpop.f32.mrb[39].mxu0  ;;  %v14040_v2 = vpop.f32.mrb[39].mxu1  ;;  %v3900_v14 = vrot.slane %v3889_v4, %v16812_v19  ;;  %v3816_v11 = vadd.f32 %v3812_v3, %v17445_v12 }
0x1b34   :  { %v12741_v20 = vmul.f32 -1.442695, %v3816_v11 }
0x1b39   :  { %v3977_v8 = vpop.f32.mrb[40].mxu0  ;;  %v4060_v10 = vpop.f32.mrb[40].mxu1 }
0x1b3a   :  { %v3988_v13 = vrot.slane %v3977_v8, %v16812_v19  ;;  %v14051_v41 = vpop.f32.mrb[41].mxu0  ;;  %v14062_v52 = vpop.f32.mrb[41].mxu1  ;;  %v4071_v42 = vrot.slane %v4060_v10, %v16812_v19 }
0x1b3c   :  { %3989 = vrot.lane.b32.xlu0 %v3988_v13, %s16622_s28 }
0x1b40   :  { %3901 = vrot.lane.b32.xlu0 %v3900_v14, %s16623_s11 }
0x1b44   :  { %4072 = vrot.lane.b32.xlu0 %v4071_v42, %s16624_s3 }
0x1bae   :  { %v3990_v16 = vpop.permute.xlu0 %3989 }
0x1baf   :  { %v3992_v55 = vadd.f32 %v3990_v16, %v17445_v12 }
0x1bb1   :  { %16087 = vtanh.f32 %v3992_v55 }
0x1bb2   :  { %16089 = vpow2.f32 %v12741_v20  ;;  %v3902_v45 = vpop.permute.xlu0 %3901  ;;  %v17546_v20 = vrot.slane %v17440_v7, %v16812_v19 }
0x1bb3   :  { %v3904_v31 = vadd.f32 %v3902_v45, %v17445_v12 }
0x1bb5   :  { %v12743_v33 = vmul.f32 -1.442695, %v3904_v31 }
0x1bb6   :  { %v4073_v38 = vpop.permute.xlu0 %4072 }
0x1bb7   :  { %v4075_v59 = vadd.f32 %v4073_v38, %v17445_v12 }
0x1bb9   :  { %v12746_v61 = vmul.f32 -1.442695, %v4075_v59 }
0x1bbb   :  { %v16088_v17 = vpop.eup %16087 }
0x1bbc   :  { %4084 = vrot.lane.b32.xlu1 %v16088_v17, %s16622_s28  ;;  %v16090_v9 = vpop.eup %16089 }
0x1bbd   :  { %v3820_v39 = vadd.f32 1.0, %v16090_v9  ;;  %v3352_v9 = vcombine.high %v17546_v20, %v17546_v20 }
0x1bbf   :  { %16091 = vrcp.f32 %v3820_v39 }
0x1bc0   :  { %16093 = vpow2.f32 %v12743_v33 }
0x1bc9   :  { %v16092_v23 = vpop.eup %16091 }
0x1bca   :  { %v16094_v37 = vpop.eup %16093 }
0x1bcb   :  { %v3908_v44 = vadd.f32 1.0, %v16094_v37 }
0x1bcd   :  { %16095 = vrcp.f32 %v3908_v44 }
0x1bd7   :  { %v16096_v46 = vpop.eup %16095 }
0x1bd8   :  { %v4082_v50 = vmul.f32 %v16096_v46, %v17451_v60 }
0x1c2e   :  { %v4085_v49 = vpop.permute.xlu1 %4084 }
0x1c2f   :  { %v4087_v29 = vmul.f32 %v16092_v23, %v4085_v49 }
0x1c31   :  { %4089 = vrot.lane.b32.xlu1 %v4087_v29, %s16623_s11 }
0x1ca3   :  { %v4090_v51 = vpop.permute.xlu1 %4089 }
0x1ca4   :  { %v17500_v53 = vadd.f32 %v4090_v51, %v4082_v50 }
0x1ca6   :  { %16097 = vtanh.f32 %v17500_v53 }
0x1ca7   :  { %16099 = vpow2.f32 %v12746_v61 }
0x1cb0   :  { %v16098_v54 = vpop.eup %16097 }
0x1cb1   :  { %4095 = vrot.lane.b32.xlu1 %v16098_v54, %s16622_s28  ;;  %v16100_v63 = vpop.eup %16099 }
0x1cb2   :  { %v4079_v3 = vadd.f32 1.0, %v16100_v63 }
0x1cb4   :  { %16101 = vrcp.f32 %v4079_v3 }
0x1cbe   :  { %v16102_v4 = vpop.eup %16101 }
0x1d23   :  { %v4096_v58 = vpop.permute.xlu1 %4095 }
0x1d24   :  { %v4098_v2 = vmul.f32 %v16102_v4, %v4096_v58 }
0x1d26   :  { %v17506_v60 = vrot.slane %v4098_v2, %v16812_v19 }
0x1d28   :  { %4107 = vrot.lane.b32.xlu0 %v17506_v60, %s16623_s11 }
0x1d9a   :  { %v4108_v8 = vpop.permute.xlu0 %4107 }
0x1d9b   :  { %14072 = vmatmul.mubr.msk.f32.vlgmr.msra.gmra.mrb[42].mxu0 %vm178_vm1, %v4108_v8  ;;  %14083 = vmatmul.mubr.msk.f32.vlgmr.msra.gmra.mrb[42].mxu1 %vm178_vm1, %v4108_v8 }
0x1d9c   :  { %15374 = vmatpush3.bf16.msra.mxu0 %v17349_v22  ;;  %15380 = vmatpush3.bf16.msra.mxu1 %v17388_v25 }
0x1d9d   :  { %15375 = vmatprep.subr.bf16.mxu0 %v16618_v0  ;;  %15381 = vmatprep.subr.bf16.mxu1 %v16618_v0 }
0x1d9e   :  { %14093 = vmatprep.mubr.msk.f32.mxu0 %vm16619_vm0, %v16620_v1  ;;  %14104 = vmatprep.mubr.msk.f32.mxu1 %vm16619_vm0, %v16620_v1 }
0x1da0   :  { %15377 = vmatpush3.bf16.msra.mxu0 %v17372_v28  ;;  %15383 = vmatpush3.bf16.msra.mxu1 %v17401_v34 }
0x1da1   :  { %15384 = vmatprep.subr.bf16.mxu0 %v16618_v0  ;;  %15390 = vmatprep.subr.bf16.mxu1 %v16618_v0 }
0x1da3   :  { %14094 = vmatmul.mubr.msk.f32.vlgmr.msra.gmra.mrb[44].mxu0 %vm178_vm1, %v4108_v8  ;;  %14105 = vmatmul.mubr.msk.f32.vlgmr.msra.gmra.mrb[44].mxu1 %vm178_vm1, %v4108_v8 }
0x1da4   :  { %15386 = vmatpush3.bf16.msra.mxu0 %v17313_v5  ;;  %15392 = vmatpush3.bf16.msra.mxu1 %v17347_v21 }
0x1da5   :  { %15387 = vmatprep.subr.bf16.mxu0 %v16618_v0  ;;  %15393 = vmatprep.subr.bf16.mxu1 %v16618_v0 }
0x1da6   :  { %14115 = vmatprep.mubr.msk.f32.mxu0 %vm16619_vm0, %v16620_v1  ;;  %14126 = vmatprep.mubr.msk.f32.mxu1 %vm16619_vm0, %v16620_v1 }
0x1da8   :  { %15389 = vmatpush3.bf16.msra.mxu0 %v17327_v48  ;;  %15395 = vmatpush3.bf16.msra.mxu1 %v17370_v26 }
0x1da9   :  { %15396 = vmatprep.subr.bf16.mxu0 %v16618_v0  ;;  %15402 = vmatprep.subr.bf16.mxu1 %v16618_v0 }
0x1e6e   :  { %v4177_v12 = vpop.f32.mrb[42].mxu0  ;;  %v4254_v10 = vpop.f32.mrb[42].mxu1 }
0x1e6f   :  { %v14073_v13 = vpop.f32.mrb[43].mxu0  ;;  %v14084_v41 = vpop.f32.mrb[43].mxu1  ;;  %v4265_v17 = vrot.slane %v4254_v10, %v16812_v19  ;;  %v4181_v29 = vadd.f32 %v4177_v12, %v3352_v9 }
0x1e71   :  { %v12748_v45 = vmul.f32 -1.442695, %v4181_v29 }
0x1e76   :  { %v4342_v52 = vpop.f32.mrb[44].mxu0  ;;  %v4425_v14 = vpop.f32.mrb[44].mxu1 }
0x1e77   :  { %v4353_v42 = vrot.slane %v4342_v52, %v16812_v19  ;;  %v14095_v16 = vpop.f32.mrb[45].mxu0  ;;  %v14106_v55 = vpop.f32.mrb[45].mxu1  ;;  %v4436_v11 = vrot.slane %v4425_v14, %v16812_v19 }
0x1e79   :  { %4354 = vrot.lane.b32.xlu1 %v4353_v42, %s16622_s28 }
0x1e7d   :  { %4266 = vrot.lane.b32.xlu1 %v4265_v17, %s16623_s11 }
0x1e81   :  { %4437 = vrot.lane.b32.xlu1 %v4436_v11, %s16624_s3 }
0x1eeb   :  { %v4355_v39 = vpop.permute.xlu1 %4354 }
0x1eec   :  { %v4357_v23 = vadd.f32 %v4355_v39, %v3352_v9 }
0x1eee   :  { %16103 = vtanh.f32 %v4357_v23 }
0x1eef   :  { %16105 = vpow2.f32 %v12748_v45  ;;  %v4267_v7 = vpop.permute.xlu1 %4266 }
0x1ef0   :  { %v4269_v50 = vadd.f32 %v4267_v7, %v3352_v9 }
0x1ef2   :  { %v12750_v51 = vmul.f32 -1.442695, %v4269_v50 }
0x1ef3   :  { %v4438_v58 = vpop.permute.xlu1 %4437 }
0x1ef4   :  { %v4440_v2 = vadd.f32 %v4438_v58, %v3352_v9 }
0x1ef6   :  { %v12753_v8 = vmul.f32 -1.442695, %v4440_v2 }
0x1ef8   :  { %v16104_v49 = vpop.eup %16103 }
0x1ef9   :  { %4449 = vrot.lane.b32.xlu0 %v16104_v49, %s16622_s28  ;;  %v16106_v31 = vpop.eup %16105 }
0x1efa   :  { %v4185_v33 = vadd.f32 1.0, %v16106_v31 }
0x1efc   :  { %16107 = vrcp.f32 %v4185_v33 }
0x1efd   :  { %16109 = vpow2.f32 %v12750_v51 }
0x1f06   :  { %v16108_v37 = vpop.eup %16107 }
0x1f07   :  { %v16110_v54 = vpop.eup %16109 }
0x1f08   :  { %v4273_v38 = vadd.f32 1.0, %v16110_v54 }
0x1f0a   :  { %16111 = vrcp.f32 %v4273_v38 }
0x1f14   :  { %v16112_v59 = vpop.eup %16111 }
0x1f15   :  { %v4447_v61 = vmul.f32 %v16112_v59, %v17500_v53 }
0x1f6b   :  { %v4450_v44 = vpop.permute.xlu0 %4449 }
0x1f6c   :  { %v4452_v46 = vmul.f32 %v16108_v37, %v4450_v44 }
0x1f6e   :  { %4454 = vrot.lane.b32.xlu0 %v4452_v46, %s16623_s11 }
0x1fe0   :  { %v4455_v63 = vpop.permute.xlu0 %4454 }
0x1fe1   :  { %v17553_v3 = vadd.f32 %v4455_v63, %v4447_v61 }
0x1fe3   :  { %16113 = vtanh.f32 %v17553_v3 }
0x1fe4   :  { %16115 = vpow2.f32 %v12753_v8 }
0x1fed   :  { %v16114_v4 = vpop.eup %16113 }
0x1fee   :  { %4460 = vrot.lane.b32.xlu0 %v16114_v4, %s16622_s28  ;;  %v16116_v12 = vpop.eup %16115 }
0x1fef   :  { %v4444_v10 = vadd.f32 1.0, %v16116_v12 }
0x1ff1   :  { %16117 = vrcp.f32 %v4444_v10 }
0x1ffb   :  { %v16118_v13 = vpop.eup %16117 }
0x2060   :  { %v4461_v41 = vpop.permute.xlu0 %4460 }
0x2061   :  { %v4463_v52 = vmul.f32 %v16118_v13, %v4461_v41 }
0x2063   :  { %v17558_v53 = vrot.slane %v4463_v52, %v16812_v19 }
0x2065   :  { %4472 = vrot.lane.b32.xlu1 %v17558_v53, %s16623_s11 }
0x20d7   :  { %v4473_v14 = vpop.permute.xlu1 %4472 }
0x20d8   :  { %14116 = vmatmul.mubr.msk.f32.vlgmr.msra.gmra.mrb[46].mxu0 %vm178_vm1, %v4473_v14  ;;  %14127 = vmatmul.mubr.msk.f32.vlgmr.msra.gmra.mrb[46].mxu1 %vm178_vm1, %v4473_v14 }
0x20d9   :  { %15398 = vmatpush3.bf16.msra.mxu0 %v17349_v22  ;;  %15404 = vmatpush3.bf16.msra.mxu1 %v17388_v25 }
0x20da   :  { %15399 = vmatprep.subr.bf16.mxu0 %v16618_v0  ;;  %15405 = vmatprep.subr.bf16.mxu1 %v16618_v0 }
0x20db   :  { %14137 = vmatprep.mubr.msk.f32.mxu0 %vm16619_vm0, %v16620_v1  ;;  %14148 = vmatprep.mubr.msk.f32.mxu1 %vm16619_vm0, %v16620_v1 }
0x20dd   :  { %15401 = vmatpush3.bf16.msra.mxu0 %v17372_v28  ;;  %15407 = vmatpush3.bf16.msra.mxu1 %v17401_v34 }
0x20de   :  { %15408 = vmatprep.subr.bf16.mxu0 %v16618_v0  ;;  %15414 = vmatprep.subr.bf16.mxu1 %v16618_v0 }
0x20e0   :  { %14138 = vmatmul.mubr.msk.f32.vlgmr.msra.gmra.mrb[48].mxu0 %vm178_vm1, %v4473_v14  ;;  %14149 = vmatmul.mubr.msk.f32.vlgmr.msra.gmra.mrb[48].mxu1 %vm178_vm1, %v4473_v14 }
0x20e1   :  { %15410 = vmatpush3.bf16.msra.mxu0 %v17313_v5  ;;  %15416 = vmatpush3.bf16.msra.mxu1 %v17347_v21 }
0x20e2   :  { %15411 = vmatprep.subr.bf16.mxu0 %v16618_v0  ;;  %15417 = vmatprep.subr.bf16.mxu1 %v16618_v0 }
0x20e3   :  { %14159 = vmatprep.mubr.msk.f32.mxu0 %vm16619_vm0, %v16620_v1  ;;  %14170 = vmatprep.mubr.msk.f32.mxu1 %vm16619_vm0, %v16620_v1 }
0x20e5   :  { %15413 = vmatpush3.bf16.msra.mxu0 %v17327_v48  ;;  %15419 = vmatpush3.bf16.msra.mxu1 %v17370_v26 }
0x20e6   :  { %15420 = vmatprep.subr.bf16.mxu0 %v16618_v0  ;;  %15426 = vmatprep.subr.bf16.mxu1 %v16618_v0 }
0x21ab   :  { %v4542_v42 = vpop.f32.mrb[46].mxu0  ;;  %v4619_v16 = vpop.f32.mrb[46].mxu1 }
0x21ac   :  { %v14117_v55 = vpop.f32.mrb[47].mxu0  ;;  %v14128_v17 = vpop.f32.mrb[47].mxu1  ;;  %v4630_v29 = vrot.slane %v4619_v16, %v16812_v19  ;;  %v4546_v44 = vadd.f32 %v4542_v42, %v17546_v20 }
0x21ae   :  { %v12755_v46 = vmul.f32 -1.442695, %v4546_v44 }
0x21b3   :  { %v4707_v11 = vpop.f32.mrb[48].mxu0  ;;  %v4790_v9 = vpop.f32.mrb[48].mxu1 }
0x21b4   :  { %v4718_v39 = vrot.slane %v4707_v11, %v16812_v19  ;;  %v14139_v23 = vpop.f32.mrb[49].mxu0  ;;  %v14150_v49 = vpop.f32.mrb[49].mxu1  ;;  %v4801_v45 = vrot.slane %v4790_v9, %v16812_v19 }
0x21b6   :  { %4719 = vrot.lane.b32.xlu0 %v4718_v39, %s16622_s28 }
0x21ba   :  { %4631 = vrot.lane.b32.xlu0 %v4630_v29, %s16623_s11 }
0x21be   :  { %4802 = vrot.lane.b32.xlu0 %v4801_v45, %s16624_s3 }
0x2228   :  { %v4720_v31 = vpop.permute.xlu0 %4719 }
0x2229   :  { %v4722_v33 = vadd.f32 %v4720_v31, %v17546_v20 }
0x222b   :  { %16119 = vtanh.f32 %v4722_v33 }
0x222c   :  { %16121 = vpow2.f32 %v12755_v46  ;;  %v4632_v59 = vpop.permute.xlu0 %4631 }
0x222d   :  { %v4634_v61 = vadd.f32 %v4632_v59, %v17546_v20 }
0x222f   :  { %v12757_v63 = vmul.f32 -1.442695, %v4634_v61 }
0x2230   :  { %v4803_v41 = vpop.permute.xlu0 %4802 }
0x2231   :  { %v4805_v52 = vadd.f32 %v4803_v41, %v17546_v20 }
0x2233   :  { %v12760_v14 = vmul.f32 -1.442695, %v4805_v52 }
0x2235   :  { %v16120_v37 = vpop.eup %16119 }
0x2236   :  { %4814 = vrot.lane.b32.xlu1 %v16120_v37, %s16622_s28  ;;  %v16122_v7 = vpop.eup %16121 }
0x2237   :  { %v4550_v50 = vadd.f32 1.0, %v16122_v7  ;;  %v3320_v7 = vcombine.high %v17432_v57, %v17432_v57 }
0x2239   :  { %16123 = vrcp.f32 %v4550_v50  ;;  %v17649_v50 = vrot.slane %v3320_v7, %v16812_v19 }
0x223a   :  { %16125 = vpow2.f32 %v12757_v63 }
0x2243   :  { %v16124_v51 = vpop.eup %16123 }
0x2244   :  { %v16126_v4 = vpop.eup %16125 }
0x2245   :  { %v4638_v58 = vadd.f32 1.0, %v16126_v4 }
0x2247   :  { %16127 = vrcp.f32 %v4638_v58 }
0x2251   :  { %v16128_v2 = vpop.eup %16127 }
0x2252   :  { %v4812_v8 = vmul.f32 %v16128_v2, %v17553_v3 }
0x22a8   :  { %v4815_v54 = vpop.permute.xlu1 %4814 }
0x22a9   :  { %v4817_v38 = vmul.f32 %v16124_v51, %v4815_v54  ;;  %v3336_v51 = vcombine.high %v17649_v50, %v17649_v50 }
0x22ab   :  { %4819 = vrot.lane.b32.xlu1 %v4817_v38, %s16623_s11 }
0x231d   :  { %v4820_v12 = vpop.permute.xlu1 %4819 }
0x231e   :  { %v17602_v10 = vadd.f32 %v4820_v12, %v4812_v8 }
0x2320   :  { %16129 = vtanh.f32 %v17602_v10 }
0x2321   :  { %16131 = vpow2.f32 %v12760_v14 }
0x232a   :  { %v16130_v13 = vpop.eup %16129 }
0x232b   :  { %4825 = vrot.lane.b32.xlu1 %v16130_v13, %s16622_s28  ;;  %v16132_v42 = vpop.eup %16131 }
0x232c   :  { %v4809_v16 = vadd.f32 1.0, %v16132_v42 }
0x232e   :  { %16133 = vrcp.f32 %v4809_v16 }
0x2338   :  { %v16134_v55 = vpop.eup %16133 }
0x239d   :  { %v4826_v17 = vpop.permute.xlu1 %4825 }
0x239e   :  { %v4828_v11 = vmul.f32 %v16134_v55, %v4826_v17 }
0x23a0   :  { %v17608_v3 = vrot.slane %v4828_v11, %v16812_v19 }
0x23a2   :  { %4837 = vrot.lane.b32.xlu0 %v17608_v3, %s16623_s11 }
0x2414   :  { %v4838_v9 = vpop.permute.xlu0 %4837 }
0x2415   :  { %14160 = vmatmul.mubr.msk.f32.vlgmr.msra.gmra.mrb[50].mxu0 %vm178_vm1, %v4838_v9  ;;  %14171 = vmatmul.mubr.msk.f32.vlgmr.msra.gmra.mrb[50].mxu1 %vm178_vm1, %v4838_v9 }
0x2416   :  { %15422 = vmatpush3.bf16.msra.mxu0 %v17349_v22  ;;  %15428 = vmatpush3.bf16.msra.mxu1 %v17388_v25 }
0x2417   :  { %15423 = vmatprep.subr.bf16.mxu0 %v16618_v0  ;;  %15429 = vmatprep.subr.bf16.mxu1 %v16618_v0 }
0x2418   :  { %14181 = vmatprep.mubr.msk.f32.mxu0 %vm16619_vm0, %v16620_v1  ;;  %14192 = vmatprep.mubr.msk.f32.mxu1 %vm16619_vm0, %v16620_v1 }
0x241a   :  { %15425 = vmatpush3.bf16.msra.mxu0 %v17372_v28  ;;  %15431 = vmatpush3.bf16.msra.mxu1 %v17401_v34 }
0x241b   :  { %15432 = vmatprep.subr.bf16.mxu0 %v16618_v0  ;;  %15438 = vmatprep.subr.bf16.mxu1 %v16618_v0 }
0x241d   :  { %14182 = vmatmul.mubr.msk.f32.vlgmr.msra.gmra.mrb[52].mxu0 %vm178_vm1, %v4838_v9  ;;  %14193 = vmatmul.mubr.msk.f32.vlgmr.msra.gmra.mrb[52].mxu1 %vm178_vm1, %v4838_v9 }
0x241e   :  { %15434 = vmatpush3.bf16.msra.mxu0 %v17313_v5  ;;  %15440 = vmatpush3.bf16.msra.mxu1 %v17347_v21 }
0x241f   :  { %15435 = vmatprep.subr.bf16.mxu0 %v16618_v0  ;;  %15441 = vmatprep.subr.bf16.mxu1 %v16618_v0 }
0x2420   :  { %14203 = vmatprep.mubr.msk.f32.mxu0 %vm16619_vm0, %v16620_v1  ;;  %14214 = vmatprep.mubr.msk.f32.mxu1 %vm16619_vm0, %v16620_v1 }
0x2422   :  { %15437 = vmatpush3.bf16.msra.mxu0 %v17327_v48  ;;  %15443 = vmatpush3.bf16.msra.mxu1 %v17370_v26 }
0x2423   :  { %15444 = vmatprep.subr.bf16.mxu0 %v16618_v0  ;;  %15450 = vmatprep.subr.bf16.mxu1 %v16618_v0 }
0x24e8   :  { %v4907_v20 = vpop.f32.mrb[50].mxu0  ;;  %v4984_v39 = vpop.f32.mrb[50].mxu1 }
0x24e9   :  { %v14161_v23 = vpop.f32.mrb[51].mxu0  ;;  %v14172_v49 = vpop.f32.mrb[51].mxu1  ;;  %v4995_v44 = vrot.slane %v4984_v39, %v16812_v19  ;;  %v4911_v61 = vadd.f32 %v4907_v20, %v3336_v51 }
0x24eb   :  { %v12762_v63 = vmul.f32 -1.442695, %v4911_v61 }
0x24f0   :  { %v5072_v29 = vpop.f32.mrb[52].mxu0  ;;  %v5155_v45 = vpop.f32.mrb[52].mxu1 }
0x24f1   :  { %v5083_v31 = vrot.slane %v5072_v29, %v16812_v19  ;;  %v14183_v33 = vpop.f32.mrb[53].mxu0  ;;  %v14194_v37 = vpop.f32.mrb[53].mxu1  ;;  %v5166_v46 = vrot.slane %v5155_v45, %v16812_v19 }
0x24f3   :  { %5084 = vrot.lane.b32.xlu1 %v5083_v31, %s16622_s28 }
0x24f7   :  { %4996 = vrot.lane.b32.xlu1 %v4995_v44, %s16623_s11 }
0x24fb   :  { %5167 = vrot.lane.b32.xlu1 %v5166_v46, %s16624_s3 }
0x2565   :  { %v5085_v54 = vpop.permute.xlu1 %5084 }
0x2566   :  { %v5087_v38 = vadd.f32 %v5085_v54, %v3336_v51 }
0x2568   :  { %16135 = vtanh.f32 %v5087_v38 }
0x2569   :  { %16137 = vpow2.f32 %v12762_v63  ;;  %v4997_v13 = vpop.permute.xlu1 %4996 }
0x256a   :  { %v4999_v41 = vadd.f32 %v4997_v13, %v3336_v51 }
0x256c   :  { %v12764_v52 = vmul.f32 -1.442695, %v4999_v41 }
0x256d   :  { %v5168_v20 = vpop.permute.xlu1 %5167 }
0x256e   :  { %v5170_v39 = vadd.f32 %v5168_v20, %v3336_v51 }
0x2570   :  { %v12767_v23 = vmul.f32 -1.442695, %v5170_v39 }
0x2572   :  { %v16136_v59 = vpop.eup %16135 }
0x2573   :  { %5179 = vrot.lane.b32.xlu0 %v16136_v59, %s16622_s28  ;;  %v16138_v4 = vpop.eup %16137 }
0x2574   :  { %v4915_v58 = vadd.f32 1.0, %v16138_v4 }
0x2576   :  { %16139 = vrcp.f32 %v4915_v58 }
0x2577   :  { %16141 = vpow2.f32 %v12764_v52 }
0x2580   :  { %v16140_v2 = vpop.eup %16139 }
0x2581   :  { %v16142_v14 = vpop.eup %16141 }
0x2582   :  { %v5003_v42 = vadd.f32 1.0, %v16142_v14 }
0x2584   :  { %16143 = vrcp.f32 %v5003_v42 }
0x258e   :  { %v16144_v16 = vpop.eup %16143 }
0x258f   :  { %v5177_v55 = vmul.f32 %v16144_v16, %v17602_v10 }
0x25e5   :  { %v5180_v8 = vpop.permute.xlu0 %5179 }
0x25e6   :  { %v5182_v12 = vmul.f32 %v16140_v2, %v5180_v8 }
0x25e8   :  { %5184 = vrot.lane.b32.xlu0 %v5182_v12, %s16623_s11 }
0x265a   :  { %v5185_v17 = vpop.permute.xlu0 %5184 }
0x265b   :  { %v17656_v11 = vadd.f32 %v5185_v17, %v5177_v55 }
0x265d   :  { %16145 = vtanh.f32 %v17656_v11 }
0x265e   :  { %16147 = vpow2.f32 %v12767_v23 }
0x2667   :  { %v16146_v9 = vpop.eup %16145 }
0x2668   :  { %5190 = vrot.lane.b32.xlu0 %v16146_v9, %s16622_s28  ;;  %v16148_v49 = vpop.eup %16147 }
0x2669   :  { %v5174_v29 = vadd.f32 1.0, %v16148_v49 }
0x266b   :  { %16149 = vrcp.f32 %v5174_v29 }
0x2675   :  { %v16150_v45 = vpop.eup %16149 }
0x26da   :  { %v5191_v31 = vpop.permute.xlu0 %5190 }
0x26db   :  { %v5193_v33 = vmul.f32 %v16150_v45, %v5191_v31 }
0x26dd   :  { %v17661_v10 = vrot.slane %v5193_v33, %v16812_v19 }
0x26df   :  { %5202 = vrot.lane.b32.xlu1 %v17661_v10, %s16623_s11 }
0x2751   :  { %v5203_v37 = vpop.permute.xlu1 %5202 }
0x2752   :  { %14204 = vmatmul.mubr.msk.f32.vlgmr.msra.gmra.mrb[54].mxu0 %vm178_vm1, %v5203_v37  ;;  %14215 = vmatmul.mubr.msk.f32.vlgmr.msra.gmra.mrb[54].mxu1 %vm178_vm1, %v5203_v37 }
0x2753   :  { %15446 = vmatpush3.bf16.msra.mxu0 %v17349_v22  ;;  %15452 = vmatpush3.bf16.msra.mxu1 %v17388_v25 }
0x2754   :  { %15447 = vmatprep.subr.bf16.mxu0 %v16618_v0  ;;  %15453 = vmatprep.subr.bf16.mxu1 %v16618_v0 }
0x2755   :  { %14225 = vmatprep.mubr.msk.f32.mxu0 %vm16619_vm0, %v16620_v1  ;;  %14236 = vmatprep.mubr.msk.f32.mxu1 %vm16619_vm0, %v16620_v1 }
0x2757   :  { %15449 = vmatpush3.bf16.msra.mxu0 %v17372_v28  ;;  %15455 = vmatpush3.bf16.msra.mxu1 %v17401_v34 }
0x2758   :  { %15456 = vmatprep.subr.bf16.mxu0 %v16618_v0  ;;  %15462 = vmatprep.subr.bf16.mxu1 %v16618_v0 }
0x275a   :  { %14226 = vmatmul.mubr.msk.f32.vlgmr.msra.gmra.mrb[56].mxu0 %vm178_vm1, %v5203_v37  ;;  %14237 = vmatmul.mubr.msk.f32.vlgmr.msra.gmra.mrb[56].mxu1 %vm178_vm1, %v5203_v37 }
0x275b   :  { %15458 = vmatpush3.bf16.msra.mxu0 %v17313_v5  ;;  %15464 = vmatpush3.bf16.msra.mxu1 %v17347_v21 }
0x275c   :  { %15459 = vmatprep.subr.bf16.mxu0 %v16618_v0  ;;  %15465 = vmatprep.subr.bf16.mxu1 %v16618_v0 }
0x275d   :  { %14247 = vmatprep.mubr.msk.f32.mxu0 %vm16619_vm0, %v16620_v1  ;;  %14258 = vmatprep.mubr.msk.f32.mxu1 %vm16619_vm0, %v16620_v1 }
0x275f   :  { %15461 = vmatpush3.bf16.msra.mxu0 %v17327_v48  ;;  %15467 = vmatpush3.bf16.msra.mxu1 %v17370_v26 }
0x2760   :  { %15468 = vmatprep.subr.bf16.mxu0 %v16618_v0  ;;  %15474 = vmatprep.subr.bf16.mxu1 %v16618_v0 }
0x2825   :  { %v5272_v44 = vpop.f32.mrb[54].mxu0  ;;  %v5349_v46 = vpop.f32.mrb[54].mxu1 }
0x2826   :  { %v14205_v7 = vpop.f32.mrb[55].mxu0  ;;  %v14216_v51 = vpop.f32.mrb[55].mxu1  ;;  %v5360_v4 = vrot.slane %v5349_v46, %v16812_v19  ;;  %v5276_v13 = vadd.f32 %v5272_v44, %v17649_v50 }
0x2828   :  { %v12769_v41 = vmul.f32 -1.442695, %v5276_v13  ;;  %v17751_v13 = vrot.slane %v17432_v57, %v16812_v19 }
0x282d   :  { %v5437_v54 = vpop.f32.mrb[56].mxu0  ;;  %v5520_v38 = vpop.f32.mrb[56].mxu1 }
0x282e   :  { %v5448_v59 = vrot.slane %v5437_v54, %v16812_v19  ;;  %v14227_v61 = vpop.f32.mrb[57].mxu0  ;;  %v14238_v63 = vpop.f32.mrb[57].mxu1  ;;  %v5531_v58 = vrot.slane %v5520_v38, %v16812_v19 }
0x2830   :  { %5449 = vrot.lane.b32.xlu0 %v5448_v59, %s16622_s28 }
0x2834   :  { %5361 = vrot.lane.b32.xlu0 %v5360_v4, %s16623_s11 }
0x2838   :  { %5532 = vrot.lane.b32.xlu0 %v5531_v58, %s16624_s3 }
0x28a2   :  { %v5450_v2 = vpop.permute.xlu0 %5449 }
0x28a3   :  { %v5452_v8 = vadd.f32 %v5450_v2, %v17649_v50 }
0x28a5   :  { %16151 = vtanh.f32 %v5452_v8 }
0x28a6   :  { %16153 = vpow2.f32 %v12769_v41  ;;  %v5362_v17 = vpop.permute.xlu0 %5361  ;;  %v3335_v41 = vcombine.high %v17751_v13, %v17751_v13 }
0x28a7   :  { %v5364_v9 = vadd.f32 %v5362_v17, %v17649_v50 }
0x28a9   :  { %v12771_v20 = vmul.f32 -1.442695, %v5364_v9 }
0x28aa   :  { %v5533_v37 = vpop.permute.xlu0 %5532 }
0x28ab   :  { %v5535_v44 = vadd.f32 %v5533_v37, %v17649_v50 }
0x28ad   :  { %v12774_v46 = vmul.f32 -1.442695, %v5535_v44 }
0x28af   :  { %v16152_v12 = vpop.eup %16151 }
0x28b0   :  { %5544 = vrot.lane.b32.xlu1 %v16152_v12, %s16622_s28  ;;  %v16154_v52 = vpop.eup %16153 }
0x28b1   :  { %v5280_v14 = vadd.f32 1.0, %v16154_v52 }
0x28b3   :  { %16155 = vrcp.f32 %v5280_v14 }
0x28b4   :  { %16157 = vpow2.f32 %v12771_v20 }
0x28bd   :  { %v16156_v42 = vpop.eup %16155 }
0x28be   :  { %v16158_v39 = vpop.eup %16157 }
0x28bf   :  { %v5368_v23 = vadd.f32 1.0, %v16158_v39 }
0x28c1   :  { %16159 = vrcp.f32 %v5368_v23 }
0x28cb   :  { %v16160_v49 = vpop.eup %16159 }
0x28cc   :  { %v5542_v29 = vmul.f32 %v16160_v49, %v17656_v11 }
0x2922   :  { %v5545_v16 = vpop.permute.xlu1 %5544 }
0x2923   :  { %v5547_v55 = vmul.f32 %v16156_v42, %v5545_v16 }
0x2925   :  { %5549 = vrot.lane.b32.xlu1 %v5547_v55, %s16623_s11 }
0x2997   :  { %v5550_v45 = vpop.permute.xlu1 %5549 }
0x2998   :  { %v17705_v31 = vadd.f32 %v5550_v45, %v5542_v29 }
0x299a   :  { %16161 = vtanh.f32 %v17705_v31 }
0x299b   :  { %16163 = vpow2.f32 %v12774_v46 }
0x29a4   :  { %v16162_v33 = vpop.eup %16161 }
0x29a5   :  { %5555 = vrot.lane.b32.xlu1 %v16162_v33, %s16622_s28  ;;  %v16164_v7 = vpop.eup %16163 }
0x29a6   :  { %v5539_v51 = vadd.f32 1.0, %v16164_v7 }
0x29a8   :  { %16165 = vrcp.f32 %v5539_v51 }
0x29b2   :  { %v16166_v54 = vpop.eup %16165 }
0x2a17   :  { %v5556_v38 = vpop.permute.xlu1 %5555 }
0x2a18   :  { %v5558_v59 = vmul.f32 %v16166_v54, %v5556_v38 }
0x2a1a   :  { %v17711_v11 = vrot.slane %v5558_v59, %v16812_v19 }
0x2a1c   :  { %5567 = vrot.lane.b32.xlu0 %v17711_v11, %s16623_s11 }
0x2a8e   :  { %v5568_v61 = vpop.permute.xlu0 %5567 }
0x2a8f   :  { %14248 = vmatmul.mubr.msk.f32.vlgmr.msra.gmra.mrb[58].mxu0 %vm178_vm1, %v5568_v61  ;;  %14259 = vmatmul.mubr.msk.f32.vlgmr.msra.gmra.mrb[58].mxu1 %vm178_vm1, %v5568_v61 }
0x2a90   :  { %15470 = vmatpush3.bf16.msra.mxu0 %v17349_v22  ;;  %15476 = vmatpush3.bf16.msra.mxu1 %v17388_v25 }
0x2a91   :  { %15471 = vmatprep.subr.bf16.mxu0 %v16618_v0  ;;  %15477 = vmatprep.subr.bf16.mxu1 %v16618_v0 }
0x2a92   :  { %14269 = vmatprep.mubr.msk.f32.mxu0 %vm16619_vm0, %v16620_v1  ;;  %14280 = vmatprep.mubr.msk.f32.mxu1 %vm16619_vm0, %v16620_v1 }
0x2a94   :  { %15473 = vmatpush3.bf16.msra.mxu0 %v17372_v28  ;;  %15479 = vmatpush3.bf16.msra.mxu1 %v17401_v34 }
0x2a95   :  { %15480 = vmatprep.subr.bf16.mxu0 %v16618_v0  ;;  %15486 = vmatprep.subr.bf16.mxu1 %v16618_v0 }
0x2a97   :  { %14270 = vmatmul.mubr.msk.f32.vlgmr.msra.gmra.mrb[60].mxu0 %vm178_vm1, %v5568_v61  ;;  %14281 = vmatmul.mubr.msk.f32.vlgmr.msra.gmra.mrb[60].mxu1 %vm178_vm1, %v5568_v61 }
0x2a98   :  { %15482 = vmatpush3.bf16.msra.mxu0 %v17313_v5  ;;  %15488 = vmatpush3.bf16.msra.mxu1 %v17347_v21 }
0x2a99   :  { %15483 = vmatprep.subr.bf16.mxu0 %v16618_v0  ;;  %15489 = vmatprep.subr.bf16.mxu1 %v16618_v0 }
0x2a9a   :  { %14291 = vmatprep.mubr.msk.f32.mxu0 %vm16619_vm0, %v16620_v1  ;;  %14302 = vmatprep.mubr.msk.f32.mxu1 %vm16619_vm0, %v16620_v1 }
0x2a9c   :  { %15485 = vmatpush3.bf16.msra.mxu0 %v17327_v48  ;;  %15491 = vmatpush3.bf16.msra.mxu1 %v17370_v26 }
0x2a9d   :  { %15492 = vmatprep.subr.bf16.mxu0 %v16618_v0  ;;  %15498 = vmatprep.subr.bf16.mxu1 %v16618_v0 }
0x2b62   :  { %v5637_v5 = vpop.f32.mrb[58].mxu0  ;;  %v5714_v21 = vpop.f32.mrb[58].mxu1 }
0x2b63   :  { %v14249_v50 = vpop.f32.mrb[59].mxu0  ;;  %v14260_v63 = vpop.f32.mrb[59].mxu1  ;;  %v5725_v48 = vrot.slane %v5714_v21, %v16812_v19  ;;  %v5641_v16 = vadd.f32 %v5637_v5, %v3335_v41 }
0x2b65   :  { %v12776_v55 = vmul.f32 -1.442695, %v5641_v16 }
0x2b6a   :  { %v5802_v4 = vpop.f32.mrb[60].mxu0  ;;  %v5885_v58 = vpop.f32.mrb[60].mxu1 }
0x2b6b   :  { %v5813_v2 = vrot.slane %v5802_v4, %v16812_v19  ;;  %v14271_v8 = vpop.f32.mrb[61].mxu0  ;;  %v14282_v12 = vpop.f32.mrb[61].mxu1  ;;  %v5896_v26 = vrot.slane %v5885_v58, %v16812_v19  ;;  %v3121_v4 = vrot.slane %v17425_v40, %v16812_v19 }
0x2b6d   :  { %5814 = vrot.lane.b32.xlu1 %v5813_v2, %s16622_s28  ;;  %v17773_v2 = vcombine.high %v17276_v27, %v17276_v27 }
0x2b71   :  { %5726 = vrot.lane.b32.xlu1 %v5725_v48, %s16623_s11 }
0x2b75   :  { %5897 = vrot.lane.b32.xlu1 %v5896_v26, %s16624_s3 }
0x2bdf   :  { %v5815_v52 = vpop.permute.xlu1 %5814 }
0x2be0   :  { %v5817_v14 = vadd.f32 %v5815_v52, %v3335_v41  ;;  %v3204_v52 = vrot.slane %v17427_v43, %v16812_v19 }
0x2be2   :  { %16167 = vtanh.f32 %v5817_v14 }
0x2be3   :  { %16169 = vpow2.f32 %v12776_v55  ;;  %v5727_v57 = vpop.permute.xlu1 %5726 }
0x2be4   :  { %v5729_v49 = vadd.f32 %v5727_v57, %v3335_v41 }
0x2be6   :  { %v12778_v29 = vmul.f32 -1.442695, %v5729_v49 }
0x2be7   :  { %v5898_v54 = vpop.permute.xlu1 %5897 }
0x2be8   :  { %v5900_v38 = vadd.f32 %v5898_v54, %v3335_v41 }
0x2bea   :  { %v12781_v59 = vmul.f32 -1.442695, %v5900_v38 }
0x2bec   :  { %v16168_v42 = vpop.eup %16167 }
0x2bed   :  { %5909 = vrot.lane.b32.xlu0 %v16168_v42, %s16622_s28  ;;  %v16170_v17 = vpop.eup %16169 }
0x2bee   :  { %v5645_v9 = vadd.f32 1.0, %v16170_v17 }
0x2bf0   :  { %16171 = vrcp.f32 %v5645_v9 }
0x2bf1   :  { %16173 = vpow2.f32 %v12778_v29 }
0x2bfa   :  { %v16172_v20 = vpop.eup %16171 }
0x2bfb   :  { %v16174_v45 = vpop.eup %16173 }
0x2bfc   :  { %v5733_v33 = vadd.f32 1.0, %v16174_v45 }
0x2bfe   :  { %16175 = vrcp.f32 %v5733_v33 }
0x2c08   :  { %v16176_v37 = vpop.eup %16175 }
0x2c09   :  { %v5907_v44 = vmul.f32 %v16176_v37, %v17705_v31 }
0x2c5f   :  { %v5910_v39 = vpop.permute.xlu0 %5909 }
0x2c60   :  { %v5912_v23 = vmul.f32 %v16172_v20, %v5910_v39 }
0x2c62   :  { %5914 = vrot.lane.b32.xlu0 %v5912_v23, %s16623_s11 }
0x2cd4   :  { %v5915_v46 = vpop.permute.xlu0 %5914 }
0x2cd5   :  { %v17758_v7 = vadd.f32 %v5915_v46, %v5907_v44 }
0x2cd7   :  { %16177 = vtanh.f32 %v17758_v7 }
0x2cd8   :  { %16179 = vpow2.f32 %v12781_v59 }
0x2ce1   :  { %v16178_v51 = vpop.eup %16177 }
0x2ce2   :  { %5920 = vrot.lane.b32.xlu0 %v16178_v51, %s16622_s28  ;;  %v16180_v61 = vpop.eup %16179 }
0x2ce3   :  { %v5904_v5 = vadd.f32 1.0, %v16180_v61 }
0x2ce5   :  { %16181 = vrcp.f32 %v5904_v5 }
0x2cef   :  { %v16182_v21 = vpop.eup %16181 }
0x2d54   :  { %v5921_v50 = vpop.permute.xlu0 %5920 }
0x2d55   :  { %v5923_v63 = vmul.f32 %v16182_v21, %v5921_v50 }
0x2d57   :  { %v5931_v31 = vrot.slane %v5923_v63, %v16812_v19 }
0x2d59   :  { %5932 = vrot.lane.b32.xlu1 %v5931_v31, %s16623_s11 }
0x2d5d   :  { %3122 = vrot.lane.b32.xlu1 %v3121_v4, %s16622_s28 }
0x2dcb   :  { %v5933_v58 = vpop.permute.xlu1 %5932 }
0x2dcc   :  { %14292 = vmatmul.mubr.msk.f32.vlgmr.msra.gmra.mrb[62].mxu0 %vm178_vm1, %v5933_v58  ;;  %14303 = vmatmul.mubr.msk.f32.vlgmr.msra.gmra.mrb[62].mxu1 %vm178_vm1, %v5933_v58 }
0x2dcd   :  { %15494 = vmatpush3.bf16.msra.mxu0 %v17349_v22  ;;  %15500 = vmatpush3.bf16.msra.mxu1 %v17388_v25  ;;  %v3033_v22 = vrot.slane %v17423_v32, %v16812_v19 }
0x2dce   :  { %15495 = vmatprep.subr.bf16.mxu0 %v16618_v0  ;;  %15501 = vmatprep.subr.bf16.mxu1 %v16618_v0 }
0x2dcf   :  { %v3123_v40 = vpop.permute.xlu1 %3122  ;;  %14313 = vmatprep.mubr.msk.f32.mxu0 %vm16619_vm0, %v16620_v1  ;;  %14324 = vmatprep.mubr.msk.f32.mxu1 %vm16619_vm0, %v16620_v1 }
0x2dd0   :  { %v3125_v8 = vadd.f32 %v3123_v40, %v17773_v2 }
0x2dd1   :  { %15497 = vmatpush3.bf16.msra.mxu0 %v17372_v28  ;;  %15503 = vmatpush3.bf16.msra.mxu1 %v17401_v34  ;;  %v2949_v28 = vadd.f32 %v17421_v35, %v17773_v2 }
0x2dd2   :  { %16183 = vtanh.f32 %v3125_v8  ;;  %15532 = vmatprep.subr.bf16.mxu0 %v16618_v0 }
0x2dd3   :  { %v12716_v25 = vmul.f32 -1.442695, %v2949_v28 }
0x2dd4   :  { %14314 = vmatmul.mubr.msk.f32.vlgmr.msra.gmra.mrb[64].mxu0 %vm178_vm1, %v5933_v58  ;;  %14325 = vmatmul.mubr.msk.f32.vlgmr.msra.gmra.mrb[64].mxu1 %vm178_vm1, %v5933_v58 }
0x2dd5   :  { %14376 = vmatprep.mubr.msk.f32.mxu0 %vm16619_vm0, %v16620_v1  ;;  %16185 = vpow2.f32 %v12716_v25 }
0x2ddc   :  { %v16184_v27 = vpop.eup %16183 }
0x2ddd   :  { %3217 = vrot.lane.b32.xlu1 %v16184_v27, %s16622_s28 }
0x2ddf   :  { %v16186_v34 = vpop.eup %16185 }
0x2de0   :  { %v2953_v12 = vadd.f32 1.0, %v16186_v34 }
0x2de1   :  { %3034 = vrot.lane.b32.xlu1 %v3033_v22, %s16623_s11 }
0x2de2   :  { %16187 = vrcp.f32 %v2953_v12 }
0x2dec   :  { %v16188_v48 = vpop.eup %16187 }
0x2e4f   :  { %v3218_v26 = vpop.permute.xlu1 %3217 }
0x2e50   :  { %v3220_v41 = vmul.f32 %v16188_v48, %v3218_v26  ;;  %v12796_v26 = vld [vmem:[%s18847_s8 + $0x40] sm:$0xff] }
0x2e52   :  { %3222 = vrot.lane.b32.xlu1 %v3220_v41, %s16623_s11 }
0x2e53   :  { %v3035_v32 = vpop.permute.xlu1 %3034 }
0x2e54   :  { %v3037_v14 = vadd.f32 %v3035_v32, %v17773_v2 }
0x2e56   :  { %3205 = vrot.lane.b32.xlu1 %v3204_v52, %s16624_s3  ;;  %v12718_v17 = vmul.f32 -1.442695, %v3037_v14  ;;  %v12799_v52 = vld [vmem:[%s18847_s8 + $0x58] sm:$0xff] }
0x2e58   :  { %16189 = vpow2.f32 %v12718_v17  ;;  %v6348_v17 = vld [vmem:[#allocation7 + $0x8] sm:$0xff] }
0x2e62   :  { %v16190_v43 = vpop.eup %16189 }
0x2e63   :  { %v3041_v49 = vadd.f32 1.0, %v16190_v43 }
0x2e65   :  { %16191 = vrcp.f32 %v3041_v49 }
0x2e6f   :  { %v16192_v29 = vpop.eup %16191 }
0x2e70   :  { %v3215_v45 = vmul.f32 %v16192_v29, %v17284_v56 }
0x2e9f   :  { %v6002_v42 = vpop.f32.mrb[62].mxu0  ;;  %v6079_v35 = vpop.f32.mrb[62].mxu1 }
0x2ea0   :  { %v14293_v16 = vpop.f32.mrb[63].mxu0  ;;  %v14304_v55 = vpop.f32.mrb[63].mxu1  ;;  %v6090_v54 = vrot.slane %v6079_v35, %v16812_v19  ;;  %v6006_v38 = vadd.f32 %v6002_v42, %v17751_v13 }
0x2ea1   :  { %v6347_v55 = vld [vmem:[#allocation7] sm:$0xff] }
0x2ea7   :  { %v6167_v9 = vpop.f32.mrb[64].mxu0  ;;  %v6250_v20 = vpop.f32.mrb[64].mxu1 }
0x2ea8   :  { %v6178_v39 = vrot.slane %v6167_v9, %v16812_v19  ;;  %v14315_v23 = vpop.f32.mrb[65].mxu0  ;;  %v14326_v57 = vpop.f32.mrb[65].mxu1  ;;  %v6261_v21 = vrot.slane %v6250_v20, %v16812_v19  ;;  %v6349_v9 = vld [vmem:[#allocation7 + $0x10] sm:$0xff]  ;;  %v15504_v20 = vpack.c.bf16 %v6348_v17, %v6347_v55  ;;  %v12793_v55 = vld [vmem:[%s18847_s8 + $0x28] sm:$0xff] }
0x2eaa   :  { %6179 = vrot.lane.b32.xlu0 %v6178_v39, %s16622_s28  ;;  %v6350_v39 = vld [vmem:[#allocation7 + $0x18] sm:$0xff]  ;;  %15505 = vmatprep.subr.bf16.mxu1 %v15504_v20 }
0x2eab   :  { %v15508_v23 = vpack.c.bf16 %v6350_v39, %v6349_v9  ;;  %15507 = vmatpush3.bf16.msra.mxu1 %v15504_v20  ;;  %v12794_v9 = vld [vmem:[%s18847_s8 + $0x30] sm:$0xff]  ;;  %v12795_v20 = vld [vmem:[%s18847_s8 + $0x38] sm:$0xff] }
0x2eac   :  { %v17929_v39 = vpack.c.bf16 %v12795_v20, %v12794_v9 }
0x2ead   :  { %15509 = vmatprep.subr.bf16.mxu1 %v15508_v23 }
0x2eaf   :  { %15511 = vmatpush3.bf16.msra.mxu1 %v15508_v23  ;;  %v12800_v23 = vld [vmem:[%s18847_s8 + $0x60] sm:$0xff] }
0x2ec4   :  { %v3223_v33 = vpop.permute.xlu1 %3222 }
0x2ec5   :  { %v3225_v37 = vadd.f32 %v3223_v33, %v3215_v45  ;;  %v6351_v33 = vld [vmem:[#allocation7 + $0x20] sm:$0xff] }
0x2ec7   :  { %16193 = vtanh.f32 %v3225_v37  ;;  %v6352_v37 = vld [vmem:[#allocation7 + $0x28] sm:$0xff] }
0x2ec8   :  { %v3206_v4 = vpop.permute.xlu1 %3205 }
0x2ec9   :  { %v3208_v40 = vadd.f32 %v3206_v4, %v17773_v2  ;;  %v12797_v2 = vld [vmem:[%s18847_s8 + $0x48] sm:$0xff] }
0x2eca   :  { %v17828_v41 = vpack.c.bf16 %v12797_v2, %v12796_v26 }
0x2ecb   :  { %v12721_v27 = vmul.f32 -1.442695, %v3208_v40 }
0x2ecc   :  { %15534 = vmatpush3.bf16.msra.mxu0 %v17828_v41 }
0x2ecd   :  { %15535 = vmatprep.subr.bf16.mxu0 %v16618_v0 }
0x2ed1   :  { %v16194_v44 = vpop.eup %16193 }
0x2ed2   :  { %3228 = vrot.lane.b32.xlu1 %v16194_v44, %s16622_s28  ;;  %v15512_v44 = vpack.c.bf16 %v6352_v37, %v6351_v33 }
0x2ed4   :  { %15513 = vmatprep.subr.bf16.mxu1 %v15512_v44 }
0x2ed5   :  { %15515 = vmatpush3.bf16.msra.mxu1 %v15512_v44 }
0x2ed6   :  { %6317 = vrot.lane.b32.xlu1 %v5931_v31, %s16622_s28 }
0x2eda   :  { %6321 = vrot.lane.b32.xlu1 %v17661_v10, %s16622_s28  ;;  %v12783_v10 = vmul.f32 -1.442695, %v6006_v38  ;;  %v6529_v38 = vld [vmem:[%s18847_s8 + $0x8] sm:$0xff] }
0x2ede   :  { %6323 = vrot.lane.b32.xlu1 %v17608_v3, %s16622_s28 }
0x2ee2   :  { %6327 = vrot.lane.b32.xlu1 %v17506_v60, %s16622_s28 }
0x2f1c   :  { %v6180_v46 = vpop.permute.xlu0 %6179 }
0x2f1d   :  { %v6182_v56 = vadd.f32 %v6180_v46, %v17751_v13  ;;  %v6353_v46 = vld [vmem:[#allocation7 + $0x30] sm:$0xff] }
0x2f1f   :  { %16195 = vtanh.f32 %v6182_v56  ;;  %v6354_v56 = vld [vmem:[#allocation7 + $0x38] sm:$0xff] }
0x2f20   :  { %16197 = vpow2.f32 %v12783_v10 }
0x2f29   :  { %v16196_v51 = vpop.eup %16195 }
0x2f2a   :  { %6274 = vrot.lane.b32.xlu0 %v16196_v51, %s16622_s28  ;;  %v16198_v59 = vpop.eup %16197  ;;  %v15516_v51 = vpack.c.bf16 %v6354_v56, %v6353_v46 }
0x2f2b   :  { %v6010_v3 = vadd.f32 1.0, %v16198_v59 }
0x2f2c   :  { %15517 = vmatprep.subr.bf16.mxu1 %v15516_v51 }
0x2f2d   :  { %16199 = vrcp.f32 %v6010_v3  ;;  %15519 = vmatpush3.bf16.msra.mxu1 %v15516_v51 }
0x2f2e   :  { %6091 = vrot.lane.b32.xlu0 %v6090_v54, %s16623_s11  ;;  %15520 = vmatprep.subr.bf16.mxu1 %v16618_v0 }
0x2f37   :  { %v16200_v61 = vpop.eup %16199 }
0x2f44   :  { %v3229_v14 = vpop.permute.xlu1 %3228 }
0x2f9c   :  { %v6275_v60 = vpop.permute.xlu0 %6274 }
0x2f9d   :  { %v6277_v5 = vmul.f32 %v16200_v61, %v6275_v60  ;;  %v6530_v61 = vld [vmem:[%s18847_s8 + $0x10] sm:$0xff]  ;;  %v6531_v60 = vld [vmem:[%s18847_s8 + $0x18] sm:$0xff] }
0x2f9f   :  { %6279 = vrot.lane.b32.xlu0 %v6277_v5, %s16623_s11  ;;  %v17872_v5 = vpack.c.bf16 %v6531_v60, %v6530_v61 }
0x2fa0   :  { %v6092_v50 = vpop.permute.xlu0 %6091 }
0x2fa1   :  { %v6094_v63 = vadd.f32 %v6092_v50, %v17751_v13 }
0x2fa3   :  { %6262 = vrot.lane.b32.xlu0 %v6261_v21, %s16624_s3  ;;  %v12785_v31 = vmul.f32 -1.442695, %v6094_v63 }
0x2fa5   :  { %16201 = vpow2.f32 %v12785_v31  ;;  %v6318_v31 = vpop.permute.xlu1 %6317 }
0x2faf   :  { %v16202_v58 = vpop.eup %16201 }
0x2fb0   :  { %v6098_v8 = vadd.f32 1.0, %v16202_v58  ;;  %v6322_v58 = vpop.permute.xlu1 %6321 }
0x2fb2   :  { %16203 = vrcp.f32 %v6098_v8 }
0x2fb3   :  { %16205 = vpow2.f32 %v12721_v27 }
0x2fb4   :  { %v6324_v8 = vpop.permute.xlu1 %6323 }
0x2fb8   :  { %v6328_v26 = vpop.permute.xlu1 %6327 }
0x2fbc   :  { %v16204_v22 = vpop.eup %16203 }
0x2fbd   :  { %v16206_v28 = vpop.eup %16205  ;;  %v6272_v25 = vmul.f32 %v16204_v22, %v17758_v7  ;;  %v12798_v7 = vld [vmem:[%s18847_s8 + $0x50] sm:$0xff] }
0x2fbe   :  { %v3212_v12 = vadd.f32 1.0, %v16206_v28  ;;  %v17838_v42 = vpack.c.bf16 %v12799_v52, %v12798_v7  ;;  %v6343_v7 = vsel %vm178_vm1, %v17182_v18, %v6324_v8 }
0x2fc0   :  { %15537 = vmatpush3.bf16.msra.mxu0 %v17838_v42 }
0x2fc1   :  { %15544 = vmatprep.subr.bf16.mxu0 %v16618_v0 }
0x2fc3   :  { %14377 = vmatmul.mubr.f32.vlgmr.msra.gmra.mrb[66].mxu0 %v16620_v1 }
0x2fc4   :  { %14398 = vmatprep.mubr.msk.f32.mxu0 %vm16619_vm0, %v16620_v1 }
0x3011   :  { %v6280_v34 = vpop.permute.xlu0 %6279 }
0x3012   :  { %v6282_v48 = vadd.f32 %v6280_v34, %v6272_v25  ;;  %v6340_v34 = vsel %vm178_vm1, %v17016_v36, %v6318_v31  ;;  %v6345_v36 = vsel %vm178_vm1, %v17291_v6, %v6328_v26  ;;  %v12792_v6 = vld [vmem:[%s18847_s8 + $0x20] sm:$0xff] }
0x3013   :  { %v17918_v17 = vpack.c.bf16 %v12793_v55, %v12792_v6 }
0x3014   :  { %16207 = vtanh.f32 %v6282_v48 }
0x3015   :  { %16209 = vrcp.f32 %v3212_v12  ;;  %v6263_v43 = vpop.permute.xlu0 %6262 }
0x301e   :  { %v16208_v32 = vpop.eup %16207 }
0x301f   :  { %6285 = vrot.lane.b32.xlu0 %v16208_v32, %s16622_s28  ;;  %v16210_v35 = vpop.eup %16209 }
0x3020   :  { %v3231_v16 = vmul.f32 %v16210_v35, %v3229_v14 }
0x3022   :  { %v6296_v57 = vrot.slane %v3231_v16, %v16812_v19 }
0x3023   :  { %6319 = vrot.lane.b32.xlu0 %v17711_v11, %s16622_s28  ;;  %v6265_v11 = vadd.f32 %v6263_v43, %v17751_v13  ;;  %v6528_v13 = vld [vmem:[%s18847_s8] sm:$0xff] }
0x3024   :  { %v17860_v59 = vpack.c.bf16 %v6529_v38, %v6528_v13 }
0x3025   :  { %v12788_v49 = vmul.f32 -1.442695, %v6265_v11  ;;  %v12802_v11 = vld [vmem:[%s18847_s8 + $0x70] sm:$0xff] }
0x3026   :  { %15546 = vmatpush3.bf16.msra.mxu0 %v17860_v59 }
0x3027   :  { %6297 = vrot.lane.b32.xlu0 %v6296_v57, %s16623_s11  ;;  %16211 = vpow2.f32 %v12788_v49  ;;  %15547 = vmatprep.subr.bf16.mxu0 %v16618_v0  ;;  %v12801_v57 = vld [vmem:[%s18847_s8 + $0x68] sm:$0xff]  ;;  %v12803_v49 = vld [vmem:[%s18847_s8 + $0x78] sm:$0xff] }
0x3028   :  { %v17941_v43 = vpack.c.bf16 %v12801_v57, %v12800_v23 }
0x302a   :  { %15549 = vmatpush3.bf16.msra.mxu0 %v17872_v5 }
0x302b   :  { %6325 = vrot.lane.b32.xlu0 %v17558_v53, %s16622_s28  ;;  %15556 = vmatprep.subr.bf16.mxu0 %v16618_v0 }
0x3031   :  { %v16212_v29 = vpop.eup %16211 }
0x3032   :  { %v6269_v45 = vadd.f32 1.0, %v16212_v29  ;;  %v17952_v29 = vpack.c.bf16 %v12803_v49, %v12802_v11 }
0x3034   :  { %16213 = vrcp.f32 %v6269_v45  ;;  %v12789_v45 = vld [vmem:[%s18848_s9] ss:$0 sm:$0xff] }
0x303e   :  { %v16214_v54 = vpop.eup %16213 }
0x3091   :  { %v6286_v53 = vpop.permute.xlu0 %6285 }
0x3092   :  { %v6288_v10 = vmul.f32 %v16214_v54, %v6286_v53 }
0x3094   :  { %v6314_v3 = vrot.slane %v6288_v10, %v16812_v19 }
0x3095   :  { %v6320_v4 = vpop.permute.xlu0 %6319 }
0x3096   :  { %6315 = vrot.lane.b32.xlu0 %v6314_v3, %s16622_s28  ;;  %v6778_v21 = vpop.f32.mrb[66].mxu0  ;;  %v6341_v22 = vsel %vm178_vm1, %v17074_v30, %v6320_v4 }
0x3097   :  { %v6789_v50 = vrot.slane %v6778_v21, %v16812_v19  ;;  %v14378_v63 = vpop.f32.mrb[67].mxu0 }
0x3099   :  { %6790 = vrot.lane.b32.xlu1 %v6789_v50, %s16622_s28  ;;  %v6298_v40 = vpop.permute.xlu0 %6297 }
0x309a   :  { %6329 = vrot.lane.b32.xlu0 %v17456_v62, %s16622_s28  ;;  %v6342_v62 = vsel %vm178_vm1, %v17125_v24, %v6322_v58 }
0x309b   :  { %v6371_v28 = vcombine.low %v6341_v22, %v6342_v62 }
0x309d   :  { %v6326_v27 = vpop.permute.xlu0 %6325  ;;  %v6385_v30 = vrot.slane %v6371_v28, %v16812_v19 }
0x309e   :  { %v6344_v12 = vsel %vm178_vm1, %v17233_v15, %v6326_v27 }
0x309f   :  { %v6387_v52 = vcombine.low %v6343_v7, %v6344_v12 }
0x30a1   :  { %v6395_v35 = vrot.slane %v6387_v52, %v16812_v19 }
0x3108   :  { %v6316_v25 = vpop.permute.xlu0 %6315 }
0x3109   :  { %v6339_v48 = vsel %vm178_vm1, %v16965_v47, %v6316_v25 }
0x310a   :  { %v6370_v2 = vcombine.low %v6339_v48, %v6340_v34 }
0x310b   :  { %v6791_v56 = vpop.permute.xlu1 %6790 }
0x310c   :  { %v6378_v24 = vrot.slane %v6370_v2, %v16812_v19  ;;  %v6330_v32 = vpop.permute.xlu0 %6329 }
0x310d   :  { %v6346_v14 = vsel %vm178_vm1, %v6298_v40, %v6330_v32 }
0x310e   :  { %v17897_v15 = vcombine.low %v6378_v24, %v6385_v30  ;;  %v6388_v47 = vcombine.low %v6345_v36, %v6346_v14 }
0x3110   :  { %v6402_v16 = vrot.slane %v6388_v47, %v16812_v19  ;;  %14343 = vmatprep.mubr.msk.f32.mxu1 %vm6404_vm2, %v17897_v15 }
0x3112   :  { %v17903_v18 = vcombine.low %v6395_v35, %v6402_v16 }
0x3114   :  { %14344 = vmatmul.mubr.msk.f32.vlgmr.msra.gmra.mrb[66].mxu1 %vm6404_vm2, %v17903_v18 }
0x3115   :  { %15522 = vmatpush3.bf16.msra.mxu1 %v17860_v59  ;;  %14354 = vmatprep.mubr.msk.f32.mxu1 %vm16619_vm0, %v16620_v1 }
0x3116   :  { %15523 = vmatprep.subr.bf16.mxu1 %v16618_v0 }
0x3119   :  { %15525 = vmatpush3.bf16.msra.mxu1 %v17872_v5 }
0x311a   :  { %15526 = vmatprep.subr.bf16.mxu1 %v16618_v0 }
0x311c   :  { %14355 = vmatmul.mubr.f32.vlgmr.msra.gmra.mrb[68].mxu1 %v16620_v1 }
0x311d   :  { %15528 = vmatpush3.bf16.msra.mxu1 %v17918_v17  ;;  %14365 = vmatprep.mubr.msk.f32.mxu1 %vm16619_vm0, %v16620_v1 }
0x311e   :  { %15529 = vmatprep.subr.bf16.mxu1 %v16618_v0 }
0x3121   :  { %15531 = vmatpush3.bf16.msra.mxu1 %v17929_v39 }
0x3122   :  { %15538 = vmatprep.subr.bf16.mxu1 %v16618_v0 }
0x3124   :  { %14366 = vmatmul.mubr.f32.vlgmr.msra.gmra.mrb[70].mxu1 %v16620_v1 }
0x3125   :  { %15540 = vmatpush3.bf16.msra.mxu1 %v17941_v43  ;;  %14387 = vmatprep.mubr.msk.f32.mxu1 %vm16619_vm0, %v16620_v1 }
0x3126   :  { %15541 = vmatprep.subr.bf16.mxu1 %v16618_v0 }
0x3129   :  { %15543 = vmatpush3.bf16.msra.mxu1 %v17952_v29 }
0x312a   :  { %15550 = vmatprep.subr.bf16.mxu1 %v16618_v0 }
0x312c   :  { %14388 = vmatmul.mubr.f32.vlgmr.msra.gmra.mrb[72].mxu1 %v16620_v1 }
0x312d   :  { %15552 = vmatpush3.bf16.msra.mxu1 %v17918_v17  ;;  %14409 = vmatprep.mubr.msk.f32.mxu1 %vm16619_vm0, %v16620_v1 }
0x312e   :  { %15553 = vmatprep.subr.bf16.mxu1 %v16618_v0 }
0x3131   :  { %15555 = vmatpush3.bf16.msra.mxu1 %v17929_v39 }
0x3132   :  { %15562 = vmatprep.subr.bf16.mxu1 %v16618_v0 }
0x31e7   :  { %v14345_v33 = vpop.f32.mrb[66].mxu1 }
0x31e8   :  { %v17969_v37 = vadd.f32 %v14345_v33, %v12789_v45  ;;  %v6475_v44 = vpop.f32.mrb[67].mxu1 }
0x31e9   :  { %v17971_v46 = vadd.f32 %v12789_v45, %v6475_v44 }
0x31eb   :  { %v17975_v51 = vrot.slane %v17971_v46, %v16812_v19 }
0x31ed   :  { %v6793_v54 = vadd.f32 %v6791_v56, %v17975_v51 }
0x31ef   :  { %16215 = vtanh.f32 %v6793_v54  ;;  %v6613_v53 = vpop.f32.mrb[68].mxu1  ;;  %v6501_v54 = vcombine.high %v17975_v51, %v17975_v51 }
0x31f0   :  { %v14356_v13 = vpop.f32.mrb[69].mxu1  ;;  %v6617_v63 = vadd.f32 %v6613_v53, %v17975_v51 }
0x31f2   :  { %v12804_v31 = vmul.f32 -1.442695, %v6617_v63 }
0x31f4   :  { %16217 = vpow2.f32 %v12804_v31 }
0x31f7   :  { %v6690_v38 = vpop.f32.mrb[70].mxu1 }
0x31f8   :  { %v6701_v10 = vrot.slane %v6690_v38, %v16812_v19  ;;  %v14367_v3 = vpop.f32.mrb[71].mxu1 }
0x31f9   :  { %v16216_v61 = vpop.eup %16215 }
0x31fa   :  { %6702 = vrot.lane.b32.xlu1 %v6701_v10, %s16623_s11  ;;  %6885 = vrot.lane.b32.xlu0 %v16216_v61, %s16622_s28 }
0x31fe   :  { %v16218_v4 = vpop.eup %16217 }
0x31ff   :  { %v6861_v60 = vpop.f32.mrb[72].mxu1  ;;  %v6621_v58 = vadd.f32 1.0, %v16218_v4 }
0x3200   :  { %v6872_v21 = vrot.slane %v6861_v60, %v16812_v19  ;;  %v14389_v50 = vpop.f32.mrb[73].mxu1 }
0x3201   :  { %16219 = vrcp.f32 %v6621_v58 }
0x3202   :  { %6873 = vrot.lane.b32.xlu1 %v6872_v21, %s16624_s3 }
0x320b   :  { %v16220_v40 = vpop.eup %16219 }
0x326c   :  { %v6886_v8 = vpop.permute.xlu0 %6885  ;;  %v6703_v22 = vpop.permute.xlu1 %6702 }
0x326d   :  { %v6888_v27 = vmul.f32 %v16220_v40, %v6886_v8  ;;  %v6705_v62 = vadd.f32 %v6703_v22, %v17975_v51 }
0x326f   :  { %6890 = vrot.lane.b32.xlu0 %v6888_v27, %s16623_s11  ;;  %v12805_v28 = vmul.f32 -1.442695, %v6705_v62 }
0x3271   :  { %16221 = vpow2.f32 %v12805_v28 }
0x3274   :  { %v6874_v30 = vpop.permute.xlu1 %6873 }
0x3275   :  { %v6876_v52 = vadd.f32 %v6874_v30, %v17975_v51 }
0x3277   :  { %v12806_v24 = vmul.f32 -1.442695, %v6876_v52 }
0x327b   :  { %v16222_v25 = vpop.eup %16221 }
0x327c   :  { %v6709_v34 = vadd.f32 1.0, %v16222_v25 }
0x327e   :  { %16223 = vrcp.f32 %v6709_v34 }
0x3288   :  { %v16224_v12 = vpop.eup %16223 }
0x3289   :  { %v6883_v48 = vmul.f32 0.0, %v16224_v12 }
0x32e1   :  { %v6891_v26 = vpop.permute.xlu0 %6890 }
0x32e2   :  { %v17986_v2 = vadd.f32 %v6891_v26, %v6883_v48 }
0x32e4   :  { %16225 = vtanh.f32 %v17986_v2 }
0x32e5   :  { %16227 = vpow2.f32 %v12806_v24 }
0x32ee   :  { %v16226_v7 = vpop.eup %16225 }
0x32ef   :  { %6896 = vrot.lane.b32.xlu0 %v16226_v7, %s16622_s28  ;;  %v16228_v32 = vpop.eup %16227 }
0x32f0   :  { %v6880_v36 = vadd.f32 1.0, %v16228_v32 }
0x32f2   :  { %16229 = vrcp.f32 %v6880_v36 }
0x32fc   :  { %v16230_v14 = vpop.eup %16229 }
0x3361   :  { %v6897_v47 = vpop.permute.xlu0 %6896 }
0x3362   :  { %v6899_v35 = vmul.f32 %v16230_v14, %v6897_v47 }
0x3364   :  { %v6907_v16 = vrot.slane %v6899_v35, %v16812_v19 }
0x3366   :  { %6908 = vrot.lane.b32.xlu1 %v6907_v16, %s16623_s11 }
0x33d8   :  { %v17993_v6 = vpop.permute.xlu1 %6908 }
0x33d9   :  { %14399 = vmatmul.mubr.msk.f32.vlgmr.msra.gmra.mrb[68].mxu0 %vm178_vm1, %v17993_v6  ;;  %14410 = vmatmul.mubr.msk.f32.vlgmr.msra.gmra.mrb[74].mxu1 %vm178_vm1, %v17993_v6 }
0x33da   :  { %15558 = vmatpush3.bf16.msra.mxu0 %v17828_v41  ;;  %15564 = vmatpush3.bf16.msra.mxu1 %v17941_v43 }
0x33db   :  { %15559 = vmatprep.subr.bf16.mxu0 %v16618_v0  ;;  %15565 = vmatprep.subr.bf16.mxu1 %v16618_v0 }
0x33dc   :  { %14420 = vmatprep.mubr.msk.f32.mxu0 %vm16619_vm0, %v16620_v1  ;;  %14431 = vmatprep.mubr.msk.f32.mxu1 %vm16619_vm0, %v16620_v1 }
0x33de   :  { %15561 = vmatpush3.bf16.msra.mxu0 %v17838_v42  ;;  %15567 = vmatpush3.bf16.msra.mxu1 %v17952_v29 }
0x33df   :  { %15568 = vmatprep.subr.bf16.mxu0 %v16618_v0  ;;  %15574 = vmatprep.subr.bf16.mxu1 %v16618_v0 }
0x33e1   :  { %14421 = vmatmul.mubr.msk.f32.vlgmr.msra.gmra.mrb[70].mxu0 %vm178_vm1, %v17993_v6  ;;  %14432 = vmatmul.mubr.msk.f32.vlgmr.msra.gmra.mrb[76].mxu1 %vm178_vm1, %v17993_v6 }
0x33e2   :  { %15570 = vmatpush3.bf16.msra.mxu0 %v17860_v59  ;;  %15576 = vmatpush3.bf16.msra.mxu1 %v17918_v17 }
0x33e3   :  { %15571 = vmatprep.subr.bf16.mxu0 %v16618_v0  ;;  %15577 = vmatprep.subr.bf16.mxu1 %v16618_v0 }
0x33e4   :  { %14442 = vmatprep.mubr.msk.f32.mxu0 %vm16619_vm0, %v16620_v1  ;;  %14453 = vmatprep.mubr.msk.f32.mxu1 %vm16619_vm0, %v16620_v1 }
0x33e6   :  { %15573 = vmatpush3.bf16.msra.mxu0 %v17872_v5  ;;  %15579 = vmatpush3.bf16.msra.mxu1 %v17929_v39 }
0x33e7   :  { %15580 = vmatprep.subr.bf16.mxu0 %v16618_v0  ;;  %15586 = vmatprep.subr.bf16.mxu1 %v16618_v0 }
0x34ac   :  { %v6978_v55 = vpop.f32.mrb[68].mxu0  ;;  %v7055_v9 = vpop.f32.mrb[74].mxu1 }
0x34ad   :  { %v14400_v20 = vpop.f32.mrb[69].mxu0  ;;  %v14411_v23 = vpop.f32.mrb[75].mxu1  ;;  %v7066_v44 = vrot.slane %v7055_v9, %v16812_v19  ;;  %v6982_v10 = vadd.f32 %v6978_v55, %v6501_v54 }
0x34af   :  { %v12808_v3 = vmul.f32 -1.442695, %v6982_v10 }
0x34b4   :  { %v7143_v57 = vpop.f32.mrb[70].mxu0  ;;  %v7226_v11 = vpop.f32.mrb[76].mxu1 }
0x34b5   :  { %v7154_v49 = vrot.slane %v7143_v57, %v16812_v19  ;;  %v14422_v45 = vpop.f32.mrb[71].mxu0  ;;  %v14433_v33 = vpop.f32.mrb[77].mxu1  ;;  %v7237_v56 = vrot.slane %v7226_v11, %v16812_v19  ;;  %v6486_v11 = vcombine.high %v17971_v46, %v17971_v46 }
0x34b7   :  { %7155 = vrot.lane.b32.xlu0 %v7154_v49, %s16622_s28  ;;  %v18081_v49 = vrot.slane %v6486_v11, %v16812_v19 }
0x34bb   :  { %7067 = vrot.lane.b32.xlu0 %v7066_v44, %s16623_s11 }
0x34bf   :  { %7238 = vrot.lane.b32.xlu0 %v7237_v56, %s16624_s3 }
0x3529   :  { %v7156_v53 = vpop.permute.xlu0 %7155 }
0x352a   :  { %v7158_v13 = vadd.f32 %v7156_v53, %v6501_v54 }
0x352c   :  { %16231 = vtanh.f32 %v7158_v13 }
0x352d   :  { %16233 = vpow2.f32 %v12808_v3  ;;  %v7068_v31 = vpop.permute.xlu0 %7067 }
0x352e   :  { %v7070_v4 = vadd.f32 %v7068_v31, %v6501_v54 }
0x3530   :  { %v12810_v51 = vmul.f32 -1.442695, %v7070_v4 }
0x3531   :  { %v7239_v25 = vpop.permute.xlu0 %7238 }
0x3532   :  { %v7241_v34 = vadd.f32 %v7239_v25, %v6501_v54 }
0x3534   :  { %v12813_v12 = vmul.f32 -1.442695, %v7241_v34 }
0x3536   :  { %v16232_v38 = vpop.eup %16231 }
0x3537   :  { %7250 = vrot.lane.b32.xlu1 %v16232_v38, %s16622_s28  ;;  %v16234_v61 = vpop.eup %16233 }
0x3538   :  { %v6986_v60 = vadd.f32 1.0, %v16234_v61 }
0x353a   :  { %16235 = vrcp.f32 %v6986_v60 }
0x353b   :  { %16237 = vpow2.f32 %v12810_v51 }
0x3544   :  { %v16236_v21 = vpop.eup %16235 }
0x3545   :  { %v16238_v58 = vpop.eup %16237 }
0x3546   :  { %v7074_v40 = vadd.f32 1.0, %v16238_v58 }
0x3548   :  { %16239 = vrcp.f32 %v7074_v40 }
0x3552   :  { %v16240_v8 = vpop.eup %16239 }
0x3553   :  { %v7248_v27 = vmul.f32 %v16240_v8, %v17986_v2 }
0x35a9   :  { %v7251_v50 = vpop.permute.xlu1 %7250 }
0x35aa   :  { %v7253_v63 = vmul.f32 %v16236_v21, %v7251_v50 }
0x35ac   :  { %7255 = vrot.lane.b32.xlu1 %v7253_v63, %s16623_s11 }
0x361e   :  { %v7256_v22 = vpop.permute.xlu1 %7255 }
0x361f   :  { %v18038_v62 = vadd.f32 %v7256_v22, %v7248_v27 }
0x3621   :  { %16241 = vtanh.f32 %v18038_v62 }
0x3622   :  { %16243 = vpow2.f32 %v12813_v12 }
0x362b   :  { %v16242_v28 = vpop.eup %16241 }
0x362c   :  { %7261 = vrot.lane.b32.xlu1 %v16242_v28, %s16622_s28  ;;  %v16244_v48 = vpop.eup %16243 }
0x362d   :  { %v7245_v26 = vadd.f32 1.0, %v16244_v48 }
0x362f   :  { %16245 = vrcp.f32 %v7245_v26 }
0x3639   :  { %v16246_v7 = vpop.eup %16245 }
0x369e   :  { %v7262_v30 = vpop.permute.xlu1 %7261 }
0x369f   :  { %v7264_v52 = vmul.f32 %v16246_v7, %v7262_v30 }
0x36a1   :  { %v7272_v2 = vrot.slane %v7264_v52, %v16812_v19 }
0x36a3   :  { %7273 = vrot.lane.b32.xlu0 %v7272_v2, %s16623_s11 }
0x3715   :  { %v7274_v24 = vpop.permute.xlu0 %7273 }
0x3716   :  { %14443 = vmatmul.mubr.msk.f32.vlgmr.msra.gmra.mrb[72].mxu0 %vm178_vm1, %v7274_v24  ;;  %14454 = vmatmul.mubr.msk.f32.vlgmr.msra.gmra.mrb[78].mxu1 %vm178_vm1, %v7274_v24 }
0x3717   :  { %15582 = vmatpush3.bf16.msra.mxu0 %v17828_v41  ;;  %15588 = vmatpush3.bf16.msra.mxu1 %v17941_v43 }
0x3718   :  { %15583 = vmatprep.subr.bf16.mxu0 %v16618_v0  ;;  %15589 = vmatprep.subr.bf16.mxu1 %v16618_v0 }
0x3719   :  { %14464 = vmatprep.mubr.msk.f32.mxu0 %vm16619_vm0, %v16620_v1  ;;  %14475 = vmatprep.mubr.msk.f32.mxu1 %vm16619_vm0, %v16620_v1 }
0x371b   :  { %15585 = vmatpush3.bf16.msra.mxu0 %v17838_v42  ;;  %15591 = vmatpush3.bf16.msra.mxu1 %v17952_v29 }
0x371c   :  { %15592 = vmatprep.subr.bf16.mxu0 %v16618_v0  ;;  %15598 = vmatprep.subr.bf16.mxu1 %v16618_v0 }
0x371e   :  { %14465 = vmatmul.mubr.msk.f32.vlgmr.msra.gmra.mrb[74].mxu0 %vm178_vm1, %v7274_v24  ;;  %14476 = vmatmul.mubr.msk.f32.vlgmr.msra.gmra.mrb[80].mxu1 %vm178_vm1, %v7274_v24 }
0x371f   :  { %15594 = vmatpush3.bf16.msra.mxu0 %v17860_v59  ;;  %15600 = vmatpush3.bf16.msra.mxu1 %v17918_v17 }
0x3720   :  { %15595 = vmatprep.subr.bf16.mxu0 %v16618_v0  ;;  %15601 = vmatprep.subr.bf16.mxu1 %v16618_v0 }
0x3721   :  { %14486 = vmatprep.mubr.msk.f32.mxu0 %vm16619_vm0, %v16620_v1  ;;  %14497 = vmatprep.mubr.msk.f32.mxu1 %vm16619_vm0, %v16620_v1 }
0x3723   :  { %15597 = vmatpush3.bf16.msra.mxu0 %v17872_v5  ;;  %15603 = vmatpush3.bf16.msra.mxu1 %v17929_v39 }
0x3724   :  { %15604 = vmatprep.subr.bf16.mxu0 %v16618_v0  ;;  %15610 = vmatprep.subr.bf16.mxu1 %v16618_v0 }
0x37e9   :  { %v7343_v32 = vpop.f32.mrb[72].mxu0  ;;  %v7420_v36 = vpop.f32.mrb[78].mxu1 }
0x37ea   :  { %v14444_v14 = vpop.f32.mrb[73].mxu0  ;;  %v14455_v47 = vpop.f32.mrb[79].mxu1  ;;  %v7431_v23 = vrot.slane %v7420_v36, %v16812_v19  ;;  %v7347_v56 = vadd.f32 %v7343_v32, %v18081_v49 }
0x37ec   :  { %v12815_v54 = vmul.f32 -1.442695, %v7347_v56 }
0x37f1   :  { %v7508_v35 = vpop.f32.mrb[74].mxu0  ;;  %v7591_v16 = vpop.f32.mrb[80].mxu1 }
0x37f2   :  { %v7519_v55 = vrot.slane %v7508_v35, %v16812_v19  ;;  %v14466_v9 = vpop.f32.mrb[75].mxu0  ;;  %v14477_v20 = vpop.f32.mrb[81].mxu1  ;;  %v7602_v57 = vrot.slane %v7591_v16, %v16812_v19  ;;  %v6502_v16 = vcombine.high %v18081_v49, %v18081_v49 }
0x37f4   :  { %7520 = vrot.lane.b32.xlu1 %v7519_v55, %s16622_s28 }
0x37f8   :  { %7432 = vrot.lane.b32.xlu1 %v7431_v23, %s16623_s11 }
0x37fc   :  { %7603 = vrot.lane.b32.xlu1 %v7602_v57, %s16624_s3 }
0x3866   :  { %v7521_v45 = vpop.permute.xlu1 %7520 }
0x3867   :  { %v7523_v33 = vadd.f32 %v7521_v45, %v18081_v49 }
0x3869   :  { %16247 = vtanh.f32 %v7523_v33 }
0x386a   :  { %16249 = vpow2.f32 %v12815_v54  ;;  %v7433_v3 = vpop.permute.xlu1 %7432 }
0x386b   :  { %v7435_v61 = vadd.f32 %v7433_v3, %v18081_v49 }
0x386d   :  { %v12817_v60 = vmul.f32 -1.442695, %v7435_v61 }
0x386e   :  { %v7604_v40 = vpop.permute.xlu1 %7603 }
0x386f   :  { %v7606_v8 = vadd.f32 %v7604_v40, %v18081_v49 }
0x3871   :  { %v12820_v27 = vmul.f32 -1.442695, %v7606_v8 }
0x3873   :  { %v16248_v44 = vpop.eup %16247 }
0x3874   :  { %7615 = vrot.lane.b32.xlu0 %v16248_v44, %s16622_s28  ;;  %v16250_v53 = vpop.eup %16249 }
0x3875   :  { %v7351_v13 = vadd.f32 1.0, %v16250_v53 }
0x3877   :  { %16251 = vrcp.f32 %v7351_v13 }
0x3878   :  { %16253 = vpow2.f32 %v12817_v60 }
0x3881   :  { %v16252_v38 = vpop.eup %16251 }
0x3882   :  { %v16254_v21 = vpop.eup %16253 }
0x3883   :  { %v7439_v50 = vadd.f32 1.0, %v16254_v21 }
0x3885   :  { %16255 = vrcp.f32 %v7439_v50 }
0x388f   :  { %v16256_v63 = vpop.eup %16255 }
0x3890   :  { %v7613_v31 = vmul.f32 %v16256_v63, %v18038_v62 }
0x38e6   :  { %v7616_v10 = vpop.permute.xlu0 %7615 }
0x38e7   :  { %v7618_v46 = vmul.f32 %v16252_v38, %v7616_v10 }
0x38e9   :  { %7620 = vrot.lane.b32.xlu0 %v7618_v46, %s16623_s11 }
0x395b   :  { %v7621_v4 = vpop.permute.xlu0 %7620 }
0x395c   :  { %v18089_v51 = vadd.f32 %v7621_v4, %v7613_v31 }
0x395e   :  { %16257 = vtanh.f32 %v18089_v51 }
0x395f   :  { %16259 = vpow2.f32 %v12820_v27 }
0x3968   :  { %v16258_v58 = vpop.eup %16257 }
0x3969   :  { %7626 = vrot.lane.b32.xlu0 %v16258_v58, %s16622_s28  ;;  %v16260_v22 = vpop.eup %16259 }
0x396a   :  { %v7610_v28 = vadd.f32 1.0, %v16260_v22 }
0x396c   :  { %16261 = vrcp.f32 %v7610_v28 }
0x3976   :  { %v16262_v25 = vpop.eup %16261 }
0x39db   :  { %v7627_v34 = vpop.permute.xlu0 %7626 }
0x39dc   :  { %v7629_v12 = vmul.f32 %v16262_v25, %v7627_v34 }
0x39de   :  { %v7637_v62 = vrot.slane %v7629_v12, %v16812_v19 }
0x39e0   :  { %7638 = vrot.lane.b32.xlu1 %v7637_v62, %s16623_s11 }
0x3a52   :  { %v7639_v48 = vpop.permute.xlu1 %7638 }
0x3a53   :  { %14487 = vmatmul.mubr.msk.f32.vlgmr.msra.gmra.mrb[76].mxu0 %vm178_vm1, %v7639_v48  ;;  %14498 = vmatmul.mubr.msk.f32.vlgmr.msra.gmra.mrb[82].mxu1 %vm178_vm1, %v7639_v48 }
0x3a54   :  { %15606 = vmatpush3.bf16.msra.mxu0 %v17828_v41  ;;  %15612 = vmatpush3.bf16.msra.mxu1 %v17941_v43 }
0x3a55   :  { %15607 = vmatprep.subr.bf16.mxu0 %v16618_v0  ;;  %15613 = vmatprep.subr.bf16.mxu1 %v16618_v0 }
0x3a56   :  { %14508 = vmatprep.mubr.msk.f32.mxu0 %vm16619_vm0, %v16620_v1  ;;  %14519 = vmatprep.mubr.msk.f32.mxu1 %vm16619_vm0, %v16620_v1 }
0x3a58   :  { %15609 = vmatpush3.bf16.msra.mxu0 %v17838_v42  ;;  %15615 = vmatpush3.bf16.msra.mxu1 %v17952_v29 }
0x3a59   :  { %15616 = vmatprep.subr.bf16.mxu0 %v16618_v0  ;;  %15622 = vmatprep.subr.bf16.mxu1 %v16618_v0 }
0x3a5b   :  { %14509 = vmatmul.mubr.msk.f32.vlgmr.msra.gmra.mrb[78].mxu0 %vm178_vm1, %v7639_v48  ;;  %14520 = vmatmul.mubr.msk.f32.vlgmr.msra.gmra.mrb[84].mxu1 %vm178_vm1, %v7639_v48 }
0x3a5c   :  { %15618 = vmatpush3.bf16.msra.mxu0 %v17860_v59  ;;  %15624 = vmatpush3.bf16.msra.mxu1 %v17918_v17 }
0x3a5d   :  { %15619 = vmatprep.subr.bf16.mxu0 %v16618_v0  ;;  %15625 = vmatprep.subr.bf16.mxu1 %v16618_v0 }
0x3a5e   :  { %14530 = vmatprep.mubr.msk.f32.mxu0 %vm16619_vm0, %v16620_v1  ;;  %14541 = vmatprep.mubr.msk.f32.mxu1 %vm16619_vm0, %v16620_v1 }
0x3a60   :  { %15621 = vmatpush3.bf16.msra.mxu0 %v17872_v5  ;;  %15627 = vmatpush3.bf16.msra.mxu1 %v17929_v39 }
0x3a61   :  { %15628 = vmatprep.subr.bf16.mxu0 %v16618_v0  ;;  %15634 = vmatprep.subr.bf16.mxu1 %v16618_v0 }
0x3b26   :  { %v7708_v26 = vpop.f32.mrb[76].mxu0  ;;  %v7785_v7 = vpop.f32.mrb[82].mxu1 }
0x3b27   :  { %v14488_v30 = vpop.f32.mrb[77].mxu0  ;;  %v14499_v52 = vpop.f32.mrb[83].mxu1  ;;  %v7796_v47 = vrot.slane %v7785_v7, %v16812_v19  ;;  %v7712_v23 = vadd.f32 %v7708_v26, %v6502_v16 }
0x3b29   :  { %v12822_v57 = vmul.f32 -1.442695, %v7712_v23 }
0x3b2e   :  { %v7873_v2 = vpop.f32.mrb[78].mxu0  ;;  %v7956_v24 = vpop.f32.mrb[84].mxu1 }
0x3b2f   :  { %v7884_v32 = vrot.slane %v7873_v2, %v16812_v19  ;;  %v14510_v36 = vpop.f32.mrb[79].mxu0  ;;  %v14521_v14 = vpop.f32.mrb[85].mxu1  ;;  %v7967_v35 = vrot.slane %v7956_v24, %v16812_v19  ;;  %v18177_v2 = vrot.slane %v17969_v37, %v16812_v19 }
0x3b31   :  { %7885 = vrot.lane.b32.xlu0 %v7884_v32, %s16622_s28 }
0x3b35   :  { %7797 = vrot.lane.b32.xlu0 %v7796_v47, %s16623_s11 }
0x3b39   :  { %7968 = vrot.lane.b32.xlu0 %v7967_v35, %s16624_s3 }
0x3ba3   :  { %v7886_v55 = vpop.permute.xlu0 %7885 }
0x3ba4   :  { %v7888_v9 = vadd.f32 %v7886_v55, %v6502_v16 }
0x3ba6   :  { %16263 = vtanh.f32 %v7888_v9 }
0x3ba7   :  { %16265 = vpow2.f32 %v12822_v57  ;;  %v7798_v54 = vpop.permute.xlu0 %7797 }
0x3ba8   :  { %v7800_v53 = vadd.f32 %v7798_v54, %v6502_v16 }
0x3baa   :  { %v12824_v49 = vmul.f32 -1.442695, %v7800_v53 }
0x3bab   :  { %v7969_v21 = vpop.permute.xlu0 %7968 }
0x3bac   :  { %v7971_v50 = vadd.f32 %v7969_v21, %v6502_v16 }
0x3bae   :  { %v12827_v63 = vmul.f32 -1.442695, %v7971_v50 }
0x3bb0   :  { %v16264_v20 = vpop.eup %16263 }
0x3bb1   :  { %7980 = vrot.lane.b32.xlu1 %v16264_v20, %s16622_s28  ;;  %v16266_v11 = vpop.eup %16265 }
0x3bb2   :  { %v7716_v45 = vadd.f32 1.0, %v16266_v11 }
0x3bb4   :  { %16267 = vrcp.f32 %v7716_v45 }
0x3bb5   :  { %16269 = vpow2.f32 %v12824_v49 }
0x3bbe   :  { %v16268_v33 = vpop.eup %16267 }
0x3bbf   :  { %v16270_v13 = vpop.eup %16269 }
0x3bc0   :  { %v7804_v38 = vadd.f32 1.0, %v16270_v13 }
0x3bc2   :  { %16271 = vrcp.f32 %v7804_v38 }
0x3bcc   :  { %v16272_v10 = vpop.eup %16271 }
0x3bcd   :  { %v7978_v46 = vmul.f32 %v16272_v10, %v18089_v51 }
0x3c23   :  { %v7981_v44 = vpop.permute.xlu1 %7980 }
0x3c24   :  { %v7983_v56 = vmul.f32 %v16268_v33, %v7981_v44 }
0x3c26   :  { %7985 = vrot.lane.b32.xlu1 %v7983_v56, %s16623_s11 }
0x3c98   :  { %v7986_v3 = vpop.permute.xlu1 %7985 }
0x3c99   :  { %v18135_v61 = vadd.f32 %v7986_v3, %v7978_v46 }
0x3c9b   :  { %16273 = vtanh.f32 %v18135_v61 }
0x3c9c   :  { %16275 = vpow2.f32 %v12827_v63 }
0x3ca5   :  { %v16274_v60 = vpop.eup %16273 }
0x3ca6   :  { %7991 = vrot.lane.b32.xlu1 %v16274_v60, %s16622_s28  ;;  %v16276_v31 = vpop.eup %16275 }
0x3ca7   :  { %v7975_v4 = vadd.f32 1.0, %v16276_v31 }
0x3ca9   :  { %16277 = vrcp.f32 %v7975_v4 }
0x3cb3   :  { %v16278_v58 = vpop.eup %16277 }
0x3d18   :  { %v7992_v40 = vpop.permute.xlu1 %7991 }
0x3d19   :  { %v7994_v8 = vmul.f32 %v16278_v58, %v7992_v40 }
0x3d1b   :  { %v8002_v51 = vrot.slane %v7994_v8, %v16812_v19 }
0x3d1d   :  { %8003 = vrot.lane.b32.xlu0 %v8002_v51, %s16623_s11 }
0x3d8f   :  { %v8004_v27 = vpop.permute.xlu0 %8003 }
0x3d90   :  { %14531 = vmatmul.mubr.msk.f32.vlgmr.msra.gmra.mrb[80].mxu0 %vm178_vm1, %v8004_v27  ;;  %14542 = vmatmul.mubr.msk.f32.vlgmr.msra.gmra.mrb[86].mxu1 %vm178_vm1, %v8004_v27 }
0x3d91   :  { %15630 = vmatpush3.bf16.msra.mxu0 %v17828_v41  ;;  %15636 = vmatpush3.bf16.msra.mxu1 %v17941_v43 }
0x3d92   :  { %15631 = vmatprep.subr.bf16.mxu0 %v16618_v0  ;;  %15637 = vmatprep.subr.bf16.mxu1 %v16618_v0 }
0x3d93   :  { %14552 = vmatprep.mubr.msk.f32.mxu0 %vm16619_vm0, %v16620_v1  ;;  %14563 = vmatprep.mubr.msk.f32.mxu1 %vm16619_vm0, %v16620_v1 }
0x3d95   :  { %15633 = vmatpush3.bf16.msra.mxu0 %v17838_v42  ;;  %15639 = vmatpush3.bf16.msra.mxu1 %v17952_v29 }
0x3d96   :  { %15640 = vmatprep.subr.bf16.mxu0 %v16618_v0  ;;  %15646 = vmatprep.subr.bf16.mxu1 %v16618_v0 }
0x3d98   :  { %14553 = vmatmul.mubr.msk.f32.vlgmr.msra.gmra.mrb[82].mxu0 %vm178_vm1, %v8004_v27  ;;  %14564 = vmatmul.mubr.msk.f32.vlgmr.msra.gmra.mrb[88].mxu1 %vm178_vm1, %v8004_v27 }
0x3d99   :  { %15642 = vmatpush3.bf16.msra.mxu0 %v17860_v59  ;;  %15648 = vmatpush3.bf16.msra.mxu1 %v17918_v17 }
0x3d9a   :  { %15643 = vmatprep.subr.bf16.mxu0 %v16618_v0  ;;  %15649 = vmatprep.subr.bf16.mxu1 %v16618_v0 }
0x3d9b   :  { %14574 = vmatprep.mubr.msk.f32.mxu0 %vm16619_vm0, %v16620_v1  ;;  %14585 = vmatprep.mubr.msk.f32.mxu1 %vm16619_vm0, %v16620_v1 }
0x3d9d   :  { %15645 = vmatpush3.bf16.msra.mxu0 %v17872_v5  ;;  %15651 = vmatpush3.bf16.msra.mxu1 %v17929_v39 }
0x3d9e   :  { %15652 = vmatprep.subr.bf16.mxu0 %v16618_v0  ;;  %15658 = vmatprep.subr.bf16.mxu1 %v16618_v0 }
0x3e63   :  { %v8073_v22 = vpop.f32.mrb[80].mxu0  ;;  %v8150_v28 = vpop.f32.mrb[86].mxu1 }
0x3e64   :  { %v14532_v25 = vpop.f32.mrb[81].mxu0  ;;  %v14543_v34 = vpop.f32.mrb[87].mxu1  ;;  %v8161_v30 = vrot.slane %v8150_v28, %v16812_v19  ;;  %v8077_v14 = vadd.f32 %v8073_v22, %v18177_v2 }
0x3e66   :  { %v12829_v47 = vmul.f32 -1.442695, %v8077_v14 }
0x3e6b   :  { %v8238_v12 = vpop.f32.mrb[82].mxu0  ;;  %v8321_v62 = vpop.f32.mrb[88].mxu1 }
0x3e6c   :  { %v8249_v48 = vrot.slane %v8238_v12, %v16812_v19  ;;  %v14554_v26 = vpop.f32.mrb[83].mxu0  ;;  %v14565_v7 = vpop.f32.mrb[89].mxu1  ;;  %v8332_v52 = vrot.slane %v8321_v62, %v16812_v19  ;;  %v6518_v12 = vcombine.high %v18177_v2, %v18177_v2 }
0x3e6e   :  { %8250 = vrot.lane.b32.xlu1 %v8249_v48, %s16622_s28 }
0x3e72   :  { %8162 = vrot.lane.b32.xlu1 %v8161_v30, %s16623_s11 }
0x3e76   :  { %8333 = vrot.lane.b32.xlu1 %v8332_v52, %s16624_s3 }
0x3ee0   :  { %v8251_v24 = vpop.permute.xlu1 %8250 }
0x3ee1   :  { %v8253_v32 = vadd.f32 %v8251_v24, %v18177_v2 }
0x3ee3   :  { %16279 = vtanh.f32 %v8253_v32 }
0x3ee4   :  { %16281 = vpow2.f32 %v12829_v47  ;;  %v8163_v23 = vpop.permute.xlu1 %8162 }
0x3ee5   :  { %v8165_v57 = vadd.f32 %v8163_v23, %v18177_v2 }
0x3ee7   :  { %v12831_v11 = vmul.f32 -1.442695, %v8165_v57 }
0x3ee8   :  { %v8334_v13 = vpop.permute.xlu1 %8333 }
0x3ee9   :  { %v8336_v38 = vadd.f32 %v8334_v13, %v18177_v2 }
0x3eeb   :  { %v12834_v10 = vmul.f32 -1.442695, %v8336_v38 }
0x3eed   :  { %v16280_v36 = vpop.eup %16279 }
0x3eee   :  { %8345 = vrot.lane.b32.xlu0 %v16280_v36, %s16622_s28  ;;  %v16282_v35 = vpop.eup %16281 }
0x3eef   :  { %v8081_v16 = vadd.f32 1.0, %v16282_v35 }
0x3ef1   :  { %16283 = vrcp.f32 %v8081_v16 }
0x3ef2   :  { %16285 = vpow2.f32 %v12831_v11 }
0x3efb   :  { %v16284_v55 = vpop.eup %16283 }
0x3efc   :  { %v16286_v45 = vpop.eup %16285 }
0x3efd   :  { %v8169_v33 = vadd.f32 1.0, %v16286_v45 }
0x3eff   :  { %16287 = vrcp.f32 %v8169_v33 }
0x3f09   :  { %v16288_v44 = vpop.eup %16287 }
0x3f0a   :  { %v8343_v56 = vmul.f32 %v16288_v44, %v18135_v61 }
0x3f60   :  { %v8346_v9 = vpop.permute.xlu0 %8345 }
0x3f61   :  { %v8348_v20 = vmul.f32 %v16284_v55, %v8346_v9 }
0x3f63   :  { %8350 = vrot.lane.b32.xlu0 %v8348_v20, %s16623_s11 }
0x3fd5   :  { %v8351_v54 = vpop.permute.xlu0 %8350 }
0x3fd6   :  { %v18185_v53 = vadd.f32 %v8351_v54, %v8343_v56 }
0x3fd8   :  { %16289 = vtanh.f32 %v18185_v53 }
0x3fd9   :  { %16291 = vpow2.f32 %v12834_v10 }
0x3fe2   :  { %v16290_v49 = vpop.eup %16289 }
0x3fe3   :  { %8356 = vrot.lane.b32.xlu0 %v16290_v49, %s16622_s28  ;;  %v16292_v46 = vpop.eup %16291 }
0x3fe4   :  { %v8340_v3 = vadd.f32 1.0, %v16292_v46 }
0x3fe6   :  { %16293 = vrcp.f32 %v8340_v3 }
0x3ff0   :  { %v16294_v60 = vpop.eup %16293 }
0x4055   :  { %v8357_v21 = vpop.permute.xlu0 %8356 }
0x4056   :  { %v8359_v50 = vmul.f32 %v16294_v60, %v8357_v21 }
0x4058   :  { %v8367_v61 = vrot.slane %v8359_v50, %v16812_v19 }
0x405a   :  { %8368 = vrot.lane.b32.xlu1 %v8367_v61, %s16623_s11 }
0x40cc   :  { %v8369_v63 = vpop.permute.xlu1 %8368 }
0x40cd   :  { %14575 = vmatmul.mubr.msk.f32.vlgmr.msra.gmra.mrb[84].mxu0 %vm178_vm1, %v8369_v63  ;;  %14586 = vmatmul.mubr.msk.f32.vlgmr.msra.gmra.mrb[90].mxu1 %vm178_vm1, %v8369_v63 }
0x40ce   :  { %15654 = vmatpush3.bf16.msra.mxu0 %v17828_v41  ;;  %15660 = vmatpush3.bf16.msra.mxu1 %v17941_v43 }
0x40cf   :  { %15655 = vmatprep.subr.bf16.mxu0 %v16618_v0  ;;  %15661 = vmatprep.subr.bf16.mxu1 %v16618_v0 }
0x40d0   :  { %14596 = vmatprep.mubr.msk.f32.mxu0 %vm16619_vm0, %v16620_v1  ;;  %14607 = vmatprep.mubr.msk.f32.mxu1 %vm16619_vm0, %v16620_v1 }
0x40d2   :  { %15657 = vmatpush3.bf16.msra.mxu0 %v17838_v42  ;;  %15663 = vmatpush3.bf16.msra.mxu1 %v17952_v29 }
0x40d3   :  { %15664 = vmatprep.subr.bf16.mxu0 %v16618_v0  ;;  %15670 = vmatprep.subr.bf16.mxu1 %v16618_v0 }
0x40d5   :  { %14597 = vmatmul.mubr.msk.f32.vlgmr.msra.gmra.mrb[86].mxu0 %vm178_vm1, %v8369_v63  ;;  %14608 = vmatmul.mubr.msk.f32.vlgmr.msra.gmra.mrb[92].mxu1 %vm178_vm1, %v8369_v63 }
0x40d6   :  { %15666 = vmatpush3.bf16.msra.mxu0 %v17860_v59  ;;  %15672 = vmatpush3.bf16.msra.mxu1 %v17918_v17 }
0x40d7   :  { %15667 = vmatprep.subr.bf16.mxu0 %v16618_v0  ;;  %15673 = vmatprep.subr.bf16.mxu1 %v16618_v0 }
0x40d8   :  { %14618 = vmatprep.mubr.msk.f32.mxu0 %vm16619_vm0, %v16620_v1  ;;  %14629 = vmatprep.mubr.msk.f32.mxu1 %vm16619_vm0, %v16620_v1 }
0x40da   :  { %15669 = vmatpush3.bf16.msra.mxu0 %v17872_v5  ;;  %15675 = vmatpush3.bf16.msra.mxu1 %v17929_v39 }
0x40db   :  { %15676 = vmatprep.subr.bf16.mxu0 %v16618_v0  ;;  %15682 = vmatprep.subr.bf16.mxu1 %v16618_v0 }
0x41a0   :  { %v8438_v31 = vpop.f32.mrb[84].mxu0  ;;  %v8515_v4 = vpop.f32.mrb[90].mxu1 }
0x41a1   :  { %v14576_v58 = vpop.f32.mrb[85].mxu0  ;;  %v14587_v40 = vpop.f32.mrb[91].mxu1  ;;  %v8526_v25 = vrot.slane %v8515_v4, %v16812_v19  ;;  %v8442_v7 = vadd.f32 %v8438_v31, %v6518_v12  ;;  %v6503_v31 = vcombine.high %v17969_v37, %v17969_v37 }
0x41a3   :  { %v12836_v30 = vmul.f32 -1.442695, %v8442_v7  ;;  %v18274_v4 = vrot.slane %v6503_v31, %v16812_v19  ;;  %v9605_v31 = vld [vmem:[#allocation8 + $0x68] sm:$0xff] }
0x41a8   :  { %v8603_v8 = vpop.f32.mrb[86].mxu0  ;;  %v8686_v51 = vpop.f32.mrb[92].mxu1 }
0x41a9   :  { %v8614_v27 = vrot.slane %v8603_v8, %v16812_v19  ;;  %v14598_v22 = vpop.f32.mrb[87].mxu0  ;;  %v14609_v28 = vpop.f32.mrb[93].mxu1  ;;  %v8697_v34 = vrot.slane %v8686_v51, %v16812_v19 }
0x41ab   :  { %8615 = vrot.lane.b32.xlu0 %v8614_v27, %s16622_s28 }
0x41af   :  { %8527 = vrot.lane.b32.xlu0 %v8526_v25, %s16623_s11 }
0x41b3   :  { %8698 = vrot.lane.b32.xlu0 %v8697_v34, %s16624_s3 }
0x421d   :  { %v8616_v62 = vpop.permute.xlu0 %8615 }
0x421e   :  { %v8618_v48 = vadd.f32 %v8616_v62, %v6518_v12 }
0x4220   :  { %16295 = vtanh.f32 %v8618_v48 }
0x4221   :  { %16297 = vpow2.f32 %v12836_v30  ;;  %v8528_v47 = vpop.permute.xlu0 %8527 }
0x4222   :  { %v8530_v35 = vadd.f32 %v8528_v47, %v6518_v12 }
0x4224   :  { %v12838_v2 = vmul.f32 -1.442695, %v8530_v35 }
0x4225   :  { %v8699_v45 = vpop.permute.xlu0 %8698 }
0x4226   :  { %v8701_v33 = vadd.f32 %v8699_v45, %v6518_v12  ;;  %v9456_v45 = vld [vmem:[%s18849_s10 + $0x8] sm:$0xff] }
0x4228   :  { %v12841_v44 = vmul.f32 -1.442695, %v8701_v33 }
0x422a   :  { %v16296_v26 = vpop.eup %16295 }
0x422b   :  { %8710 = vrot.lane.b32.xlu1 %v16296_v26, %s16622_s28  ;;  %v16298_v52 = vpop.eup %16297 }
0x422c   :  { %v8446_v24 = vadd.f32 1.0, %v16298_v52 }
0x422e   :  { %16299 = vrcp.f32 %v8446_v24 }
0x422f   :  { %16301 = vpow2.f32 %v12838_v2 }
0x4238   :  { %v16300_v32 = vpop.eup %16299 }
0x4239   :  { %v16302_v16 = vpop.eup %16301 }
0x423a   :  { %v8534_v55 = vadd.f32 1.0, %v16302_v16 }
0x423c   :  { %16303 = vrcp.f32 %v8534_v55 }
0x4246   :  { %v16304_v9 = vpop.eup %16303 }
0x4247   :  { %v8708_v20 = vmul.f32 %v16304_v9, %v18185_v53 }
0x429d   :  { %v8711_v36 = vpop.permute.xlu1 %8710 }
0x429e   :  { %v8713_v14 = vmul.f32 %v16300_v32, %v8711_v36 }
0x42a0   :  { %8715 = vrot.lane.b32.xlu1 %v8713_v14, %s16623_s11 }
0x4312   :  { %v8716_v23 = vpop.permute.xlu1 %8715 }
0x4313   :  { %v18231_v57 = vadd.f32 %v8716_v23, %v8708_v20 }
0x4315   :  { %16305 = vtanh.f32 %v18231_v57 }
0x4316   :  { %16307 = vpow2.f32 %v12841_v44  ;;  %v9457_v44 = vld [vmem:[%s18849_s10 + $0x10] sm:$0xff] }
0x431f   :  { %v16306_v11 = vpop.eup %16305 }
0x4320   :  { %8721 = vrot.lane.b32.xlu1 %v16306_v11, %s16622_s28  ;;  %v16308_v56 = vpop.eup %16307  ;;  %v9455_v11 = vld [vmem:[%s18849_s10] sm:$0xff] }
0x4321   :  { %v8705_v54 = vadd.f32 1.0, %v16308_v56  ;;  %v15712_v33 = vpack.c.bf16 %v9456_v45, %v9455_v11  ;;  %v9590_v56 = vld [vmem:[#allocation8 + $0x8] sm:$0xff] }
0x4323   :  { %16309 = vrcp.f32 %v8705_v54 }
0x432d   :  { %v16310_v49 = vpop.eup %16309 }
0x4392   :  { %v8722_v13 = vpop.permute.xlu1 %8721 }
0x4393   :  { %v8724_v38 = vmul.f32 %v16310_v49, %v8722_v13  ;;  %v9459_v49 = vld [vmem:[%s18849_s10 + $0x20] sm:$0xff] }
0x4395   :  { %v8732_v53 = vrot.slane %v8724_v38, %v16812_v19  ;;  %v9460_v38 = vld [vmem:[%s18849_s10 + $0x28] sm:$0xff] }
0x4397   :  { %8733 = vrot.lane.b32.xlu0 %v8732_v53, %s16623_s11  ;;  %v9591_v53 = vld [vmem:[#allocation8 + $0x10] sm:$0xff] }
0x4409   :  { %v8734_v10 = vpop.permute.xlu0 %8733 }
0x440a   :  { %14619 = vmatmul.mubr.msk.f32.vlgmr.msra.gmra.mrb[88].mxu0 %vm178_vm1, %v8734_v10  ;;  %14630 = vmatmul.mubr.msk.f32.vlgmr.msra.gmra.mrb[94].mxu1 %vm178_vm1, %v8734_v10 }
0x440b   :  { %15678 = vmatpush3.bf16.msra.mxu0 %v17828_v41  ;;  %15684 = vmatpush3.bf16.msra.mxu1 %v17941_v43 }
0x440c   :  { %15679 = vmatprep.subr.bf16.mxu0 %v16618_v0  ;;  %15685 = vmatprep.subr.bf16.mxu1 %v16618_v0 }
0x440d   :  { %14640 = vmatprep.mubr.msk.f32.mxu0 %vm16619_vm0, %v16620_v1  ;;  %14651 = vmatprep.mubr.msk.f32.mxu1 %vm16619_vm0, %v16620_v1 }
0x440f   :  { %15681 = vmatpush3.bf16.msra.mxu0 %v17838_v42  ;;  %15687 = vmatpush3.bf16.msra.mxu1 %v17952_v29 }
0x4410   :  { %15688 = vmatprep.subr.bf16.mxu0 %v16618_v0  ;;  %15694 = vmatprep.subr.bf16.mxu1 %v16618_v0 }
0x4412   :  { %14641 = vmatmul.mubr.msk.f32.vlgmr.msra.gmra.mrb[90].mxu0 %vm178_vm1, %v8734_v10  ;;  %14652 = vmatmul.mubr.msk.f32.vlgmr.msra.gmra.mrb[96].mxu1 %vm178_vm1, %v8734_v10  ;;  %v9592_v10 = vld [vmem:[#allocation8 + $0x18] sm:$0xff] }
0x4413   :  { %15690 = vmatpush3.bf16.msra.mxu0 %v17860_v59  ;;  %15696 = vmatpush3.bf16.msra.mxu1 %v17918_v17 }
0x4414   :  { %15691 = vmatprep.subr.bf16.mxu0 %v16618_v0  ;;  %15697 = vmatprep.subr.bf16.mxu1 %v16618_v0 }
0x4415   :  { %14662 = vmatprep.mubr.msk.f32.mxu0 %vm16619_vm0, %v16620_v1  ;;  %14673 = vmatprep.mubr.msk.f32.mxu1 %vm16619_vm0, %v16620_v1 }
0x4417   :  { %15693 = vmatpush3.bf16.msra.mxu0 %v17872_v5  ;;  %15699 = vmatpush3.bf16.msra.mxu1 %v17929_v39 }
0x4418   :  { %15700 = vmatprep.subr.bf16.mxu0 %v16618_v0  ;;  %15706 = vmatprep.subr.bf16.mxu1 %v16618_v0 }
0x44dd   :  { %v8803_v59 = vpop.f32.mrb[88].mxu0  ;;  %v8880_v17 = vpop.f32.mrb[94].mxu1 }
0x44de   :  { %v14620_v46 = vpop.f32.mrb[89].mxu0  ;;  %v14631_v3 = vpop.f32.mrb[95].mxu1  ;;  %v8891_v5 = vrot.slane %v8880_v17, %v16812_v19  ;;  %v8807_v51 = vadd.f32 %v8803_v59, %v18274_v4  ;;  %v18330_v59 = vpack.c.bf16 %v9592_v10, %v9591_v53  ;;  %v9462_v17 = vld [vmem:[%s18849_s10 + $0x38] sm:$0xff] }
0x44df   :  { %v9595_v46 = vld [vmem:[#allocation8 + $0x28] sm:$0xff] }
0x44e0   :  { %v12843_v27 = vmul.f32 -1.442695, %v8807_v51 }
0x44e5   :  { %v8968_v60 = vpop.f32.mrb[90].mxu0  ;;  %v9051_v21 = vpop.f32.mrb[96].mxu1 }
0x44e6   :  { %v8979_v50 = vrot.slane %v8968_v60, %v16812_v19  ;;  %v14642_v61 = vpop.f32.mrb[91].mxu0  ;;  %v14653_v63 = vpop.f32.mrb[97].mxu1  ;;  %v9062_v39 = vrot.slane %v9051_v21, %v16812_v19  ;;  %v9596_v21 = vld [vmem:[#allocation8 + $0x30] sm:$0xff] }
0x44e7   :  { %v9599_v61 = vld [vmem:[#allocation8 + $0x40] sm:$0xff]  ;;  %v9600_v63 = vld [vmem:[#allocation8 + $0x48] sm:$0xff] }
0x44e8   :  { %8980 = vrot.lane.b32.xlu1 %v8979_v50, %s16622_s28  ;;  %v9597_v50 = vld [vmem:[#allocation8 + $0x38] sm:$0xff] }
0x44ec   :  { %8892 = vrot.lane.b32.xlu1 %v8891_v5, %s16623_s11  ;;  %v18344_v5 = vpack.c.bf16 %v9597_v50, %v9596_v21 }
0x44f0   :  { %9063 = vrot.lane.b32.xlu1 %v9062_v39, %s16624_s3  ;;  %v9604_v39 = vld [vmem:[#allocation8 + $0x60] sm:$0xff] }
0x44f1   :  { %v18354_v51 = vpack.c.bf16 %v9605_v31, %v9604_v39 }
0x455a   :  { %v8981_v58 = vpop.permute.xlu1 %8980 }
0x455b   :  { %v8983_v40 = vadd.f32 %v8981_v58, %v18274_v4  ;;  %v18349_v58 = vpack.c.bf16 %v9600_v63, %v9599_v61 }
0x455d   :  { %16311 = vtanh.f32 %v8983_v40  ;;  %v9601_v40 = vld [vmem:[#allocation8 + $0x50] sm:$0xff] }
0x455e   :  { %16313 = vpow2.f32 %v12843_v27  ;;  %v8893_v12 = vpop.permute.xlu1 %8892  ;;  %v9606_v27 = vld [vmem:[#allocation8 + $0x70] sm:$0xff] }
0x455f   :  { %v8895_v62 = vadd.f32 %v8893_v12, %v18274_v4 }
0x4561   :  { %v12845_v48 = vmul.f32 -1.442695, %v8895_v62 }
0x4562   :  { %v9064_v14 = vpop.permute.xlu1 %9063 }
0x4563   :  { %v9066_v47 = vadd.f32 %v9064_v14, %v18274_v4 }
0x4565   :  { %v12848_v35 = vmul.f32 -1.442695, %v9066_v47 }
0x4567   :  { %v16312_v8 = vpop.eup %16311 }
0x4568   :  { %9075 = vrot.lane.b32.xlu0 %v16312_v8, %s16622_s28  ;;  %v16314_v22 = vpop.eup %16313  ;;  %v9602_v8 = vld [vmem:[#allocation8 + $0x58] sm:$0xff] }
0x4569   :  { %v8811_v28 = vadd.f32 1.0, %v16314_v22  ;;  %v9607_v22 = vld [vmem:[#allocation8 + $0x78] sm:$0xff] }
0x456b   :  { %16315 = vrcp.f32 %v8811_v28  ;;  %v18359_v28 = vpack.c.bf16 %v9602_v8, %v9601_v40 }
0x456c   :  { %16317 = vpow2.f32 %v12845_v48 }
0x4575   :  { %v16316_v25 = vpop.eup %16315 }
0x4576   :  { %v16318_v26 = vpop.eup %16317 }
0x4577   :  { %v8899_v7 = vadd.f32 1.0, %v16318_v26 }
0x4579   :  { %16319 = vrcp.f32 %v8899_v7 }
0x4583   :  { %v16320_v30 = vpop.eup %16319 }
0x4584   :  { %v9073_v52 = vmul.f32 %v16320_v30, %v18231_v57 }
0x45da   :  { %v9076_v34 = vpop.permute.xlu0 %9075 }
0x45db   :  { %v9078_v37 = vmul.f32 %v16316_v25, %v9076_v34  ;;  %v18366_v25 = vpack.c.bf16 %v9607_v22, %v9606_v27 }
0x45dd   :  { %9080 = vrot.lane.b32.xlu0 %v9078_v37, %s16623_s11 }
0x464f   :  { %v9081_v24 = vpop.permute.xlu0 %9080 }
0x4650   :  { %v18282_v32 = vadd.f32 %v9081_v24, %v9073_v52  ;;  %v12856_v24 = vld [vmem:[%s18851_s12] ss:$0 sm:$0xff] }
0x4652   :  { %16321 = vtanh.f32 %v18282_v32 }
0x4653   :  { %16323 = vpow2.f32 %v12848_v35 }
0x465c   :  { %v16322_v36 = vpop.eup %16321 }
0x465d   :  { %9086 = vrot.lane.b32.xlu0 %v16322_v36, %s16622_s28  ;;  %v16324_v2 = vpop.eup %16323 }
0x465e   :  { %v9070_v16 = vadd.f32 1.0, %v16324_v2 }
0x4660   :  { %16325 = vrcp.f32 %v9070_v16 }
0x466a   :  { %v16326_v55 = vpop.eup %16325 }
0x46cf   :  { %v9087_v9 = vpop.permute.xlu0 %9086 }
0x46d0   :  { %v9089_v20 = vmul.f32 %v16326_v55, %v9087_v9 }
0x46d2   :  { %v9097_v23 = vrot.slane %v9089_v20, %v16812_v19 }
0x46d4   :  { %9098 = vrot.lane.b32.xlu1 %v9097_v23, %s16623_s11 }
0x4746   :  { %v9099_v57 = vpop.permute.xlu1 %9098 }
0x4747   :  { %14663 = vmatmul.mubr.msk.f32.vlgmr.msra.gmra.mrb[92].mxu0 %vm178_vm1, %v9099_v57  ;;  %14674 = vmatmul.mubr.msk.f32.vlgmr.msra.gmra.mrb[98].mxu1 %vm178_vm1, %v9099_v57 }
0x4748   :  { %15702 = vmatpush3.bf16.msra.mxu0 %v17828_v41  ;;  %15708 = vmatpush3.bf16.msra.mxu1 %v17941_v43  ;;  %v9458_v41 = vld [vmem:[%s18849_s10 + $0x18] sm:$0xff]  ;;  %v9589_v43 = vld [vmem:[#allocation8] sm:$0xff] }
0x4749   :  { %15703 = vmatprep.subr.bf16.mxu0 %v16618_v0  ;;  %15709 = vmatprep.subr.bf16.mxu1 %v16618_v0  ;;  %v15716_v54 = vpack.c.bf16 %v9458_v41, %v9457_v44  ;;  %v18317_v13 = vpack.c.bf16 %v9590_v56, %v9589_v43 }
0x474a   :  { %14684 = vmatprep.mubr.msk.f32.mxu0 %vm16619_vm0, %v16620_v1  ;;  %14695 = vmatprep.mubr.msk.f32.mxu1 %vm16619_vm0, %v16620_v1 }
0x474c   :  { %15705 = vmatpush3.bf16.msra.mxu0 %v17838_v42  ;;  %15711 = vmatpush3.bf16.msra.mxu1 %v17952_v29  ;;  %v15720_v42 = vpack.c.bf16 %v9460_v38, %v9459_v49  ;;  %v9461_v29 = vld [vmem:[%s18849_s10 + $0x30] sm:$0xff] }
0x474d   :  { %15713 = vmatprep.subr.bf16.mxu0 %v15712_v33  ;;  %15728 = vmatprep.subr.bf16.mxu1 %v16618_v0  ;;  %v15724_v3 = vpack.c.bf16 %v9462_v17, %v9461_v29 }
0x474f   :  { %14685 = vmatmul.mubr.msk.f32.vlgmr.msra.gmra.mrb[94].mxu0 %vm178_vm1, %v9099_v57  ;;  %14696 = vmatmul.mubr.msk.f32.vlgmr.msra.gmra.mrb[100].mxu1 %vm178_vm1, %v9099_v57 }
0x4750   :  { %15715 = vmatpush3.bf16.msra.mxu0 %v15712_v33  ;;  %14714 = vmatprep.mubr.msk.f32.mxu0 %vm6404_vm2, %v17897_v15  ;;  %v9594_v15 = vld [vmem:[#allocation8 + $0x20] sm:$0xff] }
0x4751   :  { %15717 = vmatprep.subr.bf16.mxu0 %v15716_v54  ;;  %15730 = vmatpush3.bf16.msra.mxu1 %v18317_v13  ;;  %v18339_v60 = vpack.c.bf16 %v9595_v46, %v9594_v15 }
0x4752   :  { %15731 = vmatprep.subr.bf16.mxu1 %v16618_v0  ;;  %14725 = vmatprep.mubr.msk.f32.mxu1 %vm16619_vm0, %v16620_v1 }
0x4754   :  { %15719 = vmatpush3.bf16.msra.mxu0 %v15716_v54 }
0x4755   :  { %15721 = vmatprep.subr.bf16.mxu0 %v15720_v42  ;;  %15733 = vmatpush3.bf16.msra.mxu1 %v18330_v59 }
0x4756   :  { %15734 = vmatprep.subr.bf16.mxu1 %v16618_v0 }
0x4758   :  { %15723 = vmatpush3.bf16.msra.mxu0 %v15720_v42  ;;  %14726 = vmatmul.mubr.f32.vlgmr.msra.gmra.mrb[102].mxu1 %v16620_v1 }
0x4759   :  { %15725 = vmatprep.subr.bf16.mxu0 %v15724_v3  ;;  %15736 = vmatpush3.bf16.msra.mxu1 %v18339_v60 }
0x475a   :  { %15737 = vmatprep.subr.bf16.mxu1 %v16618_v0  ;;  %14736 = vmatprep.mubr.msk.f32.mxu1 %vm16619_vm0, %v16620_v1 }
0x475c   :  { %15727 = vmatpush3.bf16.msra.mxu0 %v15724_v3 }
0x475d   :  { %15740 = vmatprep.subr.bf16.mxu0 %v16618_v0  ;;  %15739 = vmatpush3.bf16.msra.mxu1 %v18344_v5 }
0x475e   :  { %15746 = vmatprep.subr.bf16.mxu1 %v16618_v0 }
0x475f   :  { %14715 = vmatmul.mubr.msk.f32.vlgmr.msra.gmra.mrb[96].mxu0 %vm6404_vm2, %v17903_v18 }
0x4760   :  { %15742 = vmatpush3.bf16.msra.mxu0 %v18349_v58  ;;  %14747 = vmatprep.mubr.msk.f32.mxu0 %vm16619_vm0, %v16620_v1 }
0x4761   :  { %15743 = vmatprep.subr.bf16.mxu0 %v16618_v0  ;;  %14737 = vmatmul.mubr.f32.vlgmr.msra.gmra.mrb[104].mxu1 %v16620_v1 }
0x4762   :  { %15748 = vmatpush3.bf16.msra.mxu1 %v18354_v51  ;;  %14758 = vmatprep.mubr.msk.f32.mxu1 %vm16619_vm0, %v16620_v1 }
0x4763   :  { %15749 = vmatprep.subr.bf16.mxu1 %v16618_v0 }
0x4764   :  { %15745 = vmatpush3.bf16.msra.mxu0 %v18359_v28 }
0x4765   :  { %15752 = vmatprep.subr.bf16.mxu0 %v16618_v0 }
0x4766   :  { %15751 = vmatpush3.bf16.msra.mxu1 %v18366_v25 }
0x4767   :  { %14748 = vmatmul.mubr.f32.vlgmr.msra.gmra.mrb[98].mxu0 %v16620_v1  ;;  %15758 = vmatprep.subr.bf16.mxu1 %v16618_v0 }
0x4768   :  { %15754 = vmatpush3.bf16.msra.mxu0 %v18317_v13  ;;  %14769 = vmatprep.mubr.msk.f32.mxu0 %vm16619_vm0, %v16620_v1 }
0x4769   :  { %14759 = vmatmul.mubr.f32.vlgmr.msra.gmra.mrb[106].mxu1 %v16620_v1  ;;  %15755 = vmatprep.subr.bf16.mxu0 %v16618_v0 }
0x476a   :  { %15760 = vmatpush3.bf16.msra.mxu1 %v18339_v60  ;;  %14780 = vmatprep.mubr.msk.f32.mxu1 %vm16619_vm0, %v16620_v1 }
0x476b   :  { %15761 = vmatprep.subr.bf16.mxu1 %v16618_v0 }
0x476c   :  { %15757 = vmatpush3.bf16.msra.mxu0 %v18330_v59 }
0x476d   :  { %15764 = vmatprep.subr.bf16.mxu0 %v16618_v0 }
0x476e   :  { %15763 = vmatpush3.bf16.msra.mxu1 %v18344_v5 }
0x476f   :  { %15770 = vmatprep.subr.bf16.mxu1 %v16618_v0 }
0x481a   :  { %v18389_v18 = vpop.f32.mrb[92].mxu0  ;;  %v18391_v34 = vpop.f32.mrb[98].mxu1 }
0x481b   :  { %v14664_v37 = vpop.f32.mrb[93].mxu0  ;;  %v14675_v12 = vpop.f32.mrb[99].mxu1 }
0x4822   :  { %v18393_v62 = vpop.f32.mrb[94].mxu0  ;;  %v18395_v48 = vpop.f32.mrb[100].mxu1 }
0x4823   :  { %v14686_v26 = vpop.f32.mrb[95].mxu0  ;;  %v14697_v7 = vpop.f32.mrb[101].mxu1 }
0x482b   :  { %v9674_v30 = vpop.f32.mrb[102].mxu1 }
0x482c   :  { %v14727_v52 = vpop.f32.mrb[103].mxu1 }
0x4832   :  { %v14716_v36 = vpop.f32.mrb[96].mxu0 }
0x4833   :  { %v9536_v14 = vpop.f32.mrb[97].mxu0  ;;  %v18408_v45 = vadd.f32 %v14716_v36, %v12856_v24 }
0x4834   :  { %v18400_v47 = vadd.f32 %v12856_v24, %v9536_v14  ;;  %v9751_v35 = vpop.f32.mrb[104].mxu1 }
0x4835   :  { %v14738_v2 = vpop.f32.mrb[105].mxu1  ;;  %v9762_v23 = vrot.slane %v9751_v35, %v16812_v19  ;;  %v9564_v33 = vcombine.high %v18408_v45, %v18408_v45 }
0x4837   :  { %v18413_v44 = vrot.slane %v9564_v33, %v16812_v19 }
0x4839   :  { %v9580_v41 = vcombine.high %v18413_v44, %v18413_v44 }
0x483a   :  { %v9839_v16 = vpop.f32.mrb[98].mxu0 }
0x483b   :  { %v9850_v55 = vrot.slane %v9839_v16, %v16812_v19  ;;  %v14749_v9 = vpop.f32.mrb[99].mxu0  ;;  %v9678_v49 = vadd.f32 %v9674_v30, %v9580_v41 }
0x483c   :  { %v9922_v20 = vpop.f32.mrb[106].mxu1 }
0x483d   :  { %9851 = vrot.lane.b32.xlu0 %v9850_v55, %s16622_s28  ;;  %v14760_v57 = vpop.f32.mrb[107].mxu1  ;;  %v9933_v11 = vrot.slane %v9922_v20, %v16812_v19  ;;  %v12859_v38 = vmul.f32 -1.442695, %v9678_v49 }
0x4841   :  { %9763 = vrot.lane.b32.xlu0 %v9762_v23, %s16623_s11 }
0x4845   :  { %9934 = vrot.lane.b32.xlu0 %v9933_v11, %s16624_s3 }
0x48af   :  { %v9852_v43 = vpop.permute.xlu0 %9851 }
0x48b0   :  { %v9854_v56 = vadd.f32 %v9852_v43, %v9580_v41 }
0x48b2   :  { %16327 = vtanh.f32 %v9854_v56 }
0x48b3   :  { %16329 = vpow2.f32 %v12859_v38  ;;  %v9764_v15 = vpop.permute.xlu0 %9763 }
0x48b4   :  { %v9766_v46 = vadd.f32 %v9764_v15, %v9580_v41 }
0x48b6   :  { %v12860_v3 = vmul.f32 -1.442695, %v9766_v46 }
0x48b7   :  { %v9935_v8 = vpop.permute.xlu0 %9934 }
0x48b8   :  { %v9937_v27 = vadd.f32 %v9935_v8, %v9580_v41 }
0x48ba   :  { %v12861_v22 = vmul.f32 -1.442695, %v9937_v27 }
0x48bc   :  { %v16328_v54 = vpop.eup %16327 }
0x48bd   :  { %9946 = vrot.lane.b32.xlu1 %v16328_v54, %s16622_s28  ;;  %v16330_v53 = vpop.eup %16329 }
0x48be   :  { %v9682_v10 = vadd.f32 1.0, %v16330_v53 }
0x48c0   :  { %16331 = vrcp.f32 %v9682_v10 }
0x48c1   :  { %16333 = vpow2.f32 %v12860_v3 }
0x48ca   :  { %v16332_v42 = vpop.eup %16331 }
0x48cb   :  { %v16334_v21 = vpop.eup %16333 }
0x48cc   :  { %v9770_v50 = vadd.f32 1.0, %v16334_v21 }
0x48ce   :  { %16335 = vrcp.f32 %v9770_v50 }
0x48d8   :  { %v16336_v61 = vpop.eup %16335 }
0x48d9   :  { %v9944_v63 = vmul.f32 0.0, %v16336_v61 }
0x492f   :  { %v9947_v29 = vpop.permute.xlu1 %9946 }
0x4930   :  { %v9949_v17 = vmul.f32 %v16332_v42, %v9947_v29 }
0x4932   :  { %9951 = vrot.lane.b32.xlu1 %v9949_v17, %s16623_s11 }
0x49a4   :  { %v9952_v39 = vpop.permute.xlu1 %9951 }
0x49a5   :  { %v18419_v31 = vadd.f32 %v9952_v39, %v9944_v63 }
0x49a7   :  { %16337 = vtanh.f32 %v18419_v31 }
0x49a8   :  { %16339 = vpow2.f32 %v12861_v22 }
0x49b1   :  { %v16338_v40 = vpop.eup %16337 }
0x49b2   :  { %9957 = vrot.lane.b32.xlu1 %v16338_v40, %s16622_s28  ;;  %v16340_v37 = vpop.eup %16339 }
0x49b3   :  { %v9941_v12 = vadd.f32 1.0, %v16340_v37 }
0x49b5   :  { %16341 = vrcp.f32 %v9941_v12 }
0x49bf   :  { %v16342_v26 = vpop.eup %16341 }
0x4a24   :  { %v9958_v7 = vpop.permute.xlu1 %9957 }
0x4a25   :  { %v18423_v30 = vmul.f32 %v16342_v26, %v9958_v7 }
0x4a27   :  { %v9968_v52 = vrot.slane %v18423_v30, %v16812_v19 }
0x4a29   :  { %9969 = vrot.lane.b32.xlu0 %v9968_v52, %s16623_s11 }
0x4a9b   :  { %v9970_v24 = vpop.permute.xlu0 %9969 }
0x4a9c   :  { %14770 = vmatmul.mubr.msk.f32.vlgmr.msra.gmra.mrb[100].mxu0 %vm178_vm1, %v9970_v24  ;;  %14781 = vmatmul.mubr.msk.f32.vlgmr.msra.gmra.mrb[108].mxu1 %vm178_vm1, %v9970_v24 }
0x4a9d   :  { %15766 = vmatpush3.bf16.msra.mxu0 %v18349_v58  ;;  %15772 = vmatpush3.bf16.msra.mxu1 %v18354_v51 }
0x4a9e   :  { %15767 = vmatprep.subr.bf16.mxu0 %v16618_v0  ;;  %15773 = vmatprep.subr.bf16.mxu1 %v16618_v0 }
0x4a9f   :  { %14791 = vmatprep.mubr.msk.f32.mxu0 %vm16619_vm0, %v16620_v1  ;;  %14802 = vmatprep.mubr.msk.f32.mxu1 %vm16619_vm0, %v16620_v1 }
0x4aa1   :  { %15769 = vmatpush3.bf16.msra.mxu0 %v18359_v28  ;;  %15775 = vmatpush3.bf16.msra.mxu1 %v18366_v25 }
0x4aa2   :  { %15776 = vmatprep.subr.bf16.mxu0 %v16618_v0  ;;  %15782 = vmatprep.subr.bf16.mxu1 %v16618_v0 }
0x4aa4   :  { %14792 = vmatmul.mubr.msk.f32.vlgmr.msra.gmra.mrb[102].mxu0 %vm178_vm1, %v9970_v24  ;;  %14803 = vmatmul.mubr.msk.f32.vlgmr.msra.gmra.mrb[110].mxu1 %vm178_vm1, %v9970_v24 }
0x4aa5   :  { %15778 = vmatpush3.bf16.msra.mxu0 %v18317_v13  ;;  %15784 = vmatpush3.bf16.msra.mxu1 %v18339_v60 }
0x4aa6   :  { %15779 = vmatprep.subr.bf16.mxu0 %v16618_v0  ;;  %15785 = vmatprep.subr.bf16.mxu1 %v16618_v0 }
0x4aa7   :  { %14813 = vmatprep.mubr.msk.f32.mxu0 %vm16619_vm0, %v16620_v1  ;;  %14824 = vmatprep.mubr.msk.f32.mxu1 %vm16619_vm0, %v16620_v1 }
0x4aa9   :  { %15781 = vmatpush3.bf16.msra.mxu0 %v18330_v59  ;;  %15787 = vmatpush3.bf16.msra.mxu1 %v18344_v5 }
0x4aaa   :  { %15788 = vmatprep.subr.bf16.mxu0 %v16618_v0  ;;  %15794 = vmatprep.subr.bf16.mxu1 %v16618_v0 }
0x4b6f   :  { %v10039_v36 = vpop.f32.mrb[100].mxu0  ;;  %v10116_v14 = vpop.f32.mrb[108].mxu1 }
0x4b70   :  { %v14771_v35 = vpop.f32.mrb[101].mxu0  ;;  %v14782_v2 = vpop.f32.mrb[109].mxu1  ;;  %v10127_v57 = vrot.slane %v10116_v14, %v16812_v19  ;;  %v10043_v56 = vadd.f32 %v10039_v36, %v18413_v44 }
0x4b72   :  { %v12863_v54 = vmul.f32 -1.442695, %v10043_v56 }
0x4b77   :  { %v10204_v16 = vpop.f32.mrb[102].mxu0  ;;  %v10287_v55 = vpop.f32.mrb[110].mxu1 }
0x4b78   :  { %v10215_v9 = vrot.slane %v10204_v16, %v16812_v19  ;;  %v14793_v20 = vpop.f32.mrb[103].mxu0  ;;  %v14804_v23 = vpop.f32.mrb[111].mxu1  ;;  %v10298_v11 = vrot.slane %v10287_v55, %v16812_v19 }
0x4b7a   :  { %10216 = vrot.lane.b32.xlu1 %v10215_v9, %s16622_s28 }
0x4b7e   :  { %10128 = vrot.lane.b32.xlu1 %v10127_v57, %s16623_s11  ;;  %v18511_v57 = vrot.slane %v18408_v45, %v16812_v19 }
0x4b82   :  { %10299 = vrot.lane.b32.xlu1 %v10298_v11, %s16624_s3  ;;  %v9579_v11 = vcombine.high %v18511_v57, %v18511_v57 }
0x4bec   :  { %v10217_v33 = vpop.permute.xlu1 %10216 }
0x4bed   :  { %v10219_v41 = vadd.f32 %v10217_v33, %v18413_v44 }
0x4bef   :  { %16343 = vtanh.f32 %v10219_v41 }
0x4bf0   :  { %16345 = vpow2.f32 %v12863_v54  ;;  %v10129_v29 = vpop.permute.xlu1 %10128 }
0x4bf1   :  { %v10131_v17 = vadd.f32 %v10129_v29, %v18413_v44 }
0x4bf3   :  { %v12865_v15 = vmul.f32 -1.442695, %v10131_v17 }
0x4bf4   :  { %v10300_v40 = vpop.permute.xlu1 %10299 }
0x4bf5   :  { %v10302_v8 = vadd.f32 %v10300_v40, %v18413_v44 }
0x4bf7   :  { %v12868_v27 = vmul.f32 -1.442695, %v10302_v8 }
0x4bf9   :  { %v16344_v43 = vpop.eup %16343 }
0x4bfa   :  { %10311 = vrot.lane.b32.xlu0 %v16344_v43, %s16622_s28  ;;  %v16346_v49 = vpop.eup %16345 }
0x4bfb   :  { %v10047_v38 = vadd.f32 1.0, %v16346_v49 }
0x4bfd   :  { %16347 = vrcp.f32 %v10047_v38 }
0x4bfe   :  { %16349 = vpow2.f32 %v12865_v15 }
0x4c07   :  { %v16348_v53 = vpop.eup %16347 }
0x4c08   :  { %v16350_v46 = vpop.eup %16349 }
0x4c09   :  { %v10135_v3 = vadd.f32 1.0, %v16350_v46 }
0x4c0b   :  { %16351 = vrcp.f32 %v10135_v3 }
0x4c15   :  { %v16352_v21 = vpop.eup %16351 }
0x4c16   :  { %v10309_v50 = vmul.f32 %v16352_v21, %v18419_v31 }
0x4c6c   :  { %v10312_v10 = vpop.permute.xlu0 %10311 }
0x4c6d   :  { %v10314_v42 = vmul.f32 %v16348_v53, %v10312_v10 }
0x4c6f   :  { %10316 = vrot.lane.b32.xlu0 %v10314_v42, %s16623_s11 }
0x4ce1   :  { %v10317_v61 = vpop.permute.xlu0 %10316 }
0x4ce2   :  { %v18468_v63 = vadd.f32 %v10317_v61, %v10309_v50 }
0x4ce4   :  { %16353 = vtanh.f32 %v18468_v63 }
0x4ce5   :  { %16355 = vpow2.f32 %v12868_v27 }
0x4cee   :  { %v16354_v39 = vpop.eup %16353 }
0x4cef   :  { %10322 = vrot.lane.b32.xlu0 %v16354_v39, %s16622_s28  ;;  %v16356_v22 = vpop.eup %16355 }
0x4cf0   :  { %v10306_v37 = vadd.f32 1.0, %v16356_v22 }
0x4cf2   :  { %16357 = vrcp.f32 %v10306_v37 }
0x4cfc   :  { %v16358_v12 = vpop.eup %16357 }
0x4d61   :  { %v10323_v26 = vpop.permute.xlu0 %10322 }
0x4d62   :  { %v10325_v7 = vmul.f32 %v16358_v12, %v10323_v26 }
0x4d64   :  { %v10333_v31 = vrot.slane %v10325_v7, %v16812_v19 }
0x4d66   :  { %10334 = vrot.lane.b32.xlu1 %v10333_v31, %s16623_s11 }
0x4dd8   :  { %v10335_v52 = vpop.permute.xlu1 %10334 }
0x4dd9   :  { %14814 = vmatmul.mubr.msk.f32.vlgmr.msra.gmra.mrb[104].mxu0 %vm178_vm1, %v10335_v52  ;;  %14825 = vmatmul.mubr.msk.f32.vlgmr.msra.gmra.mrb[112].mxu1 %vm178_vm1, %v10335_v52 }
0x4dda   :  { %15790 = vmatpush3.bf16.msra.mxu0 %v18349_v58  ;;  %15796 = vmatpush3.bf16.msra.mxu1 %v18354_v51 }
0x4ddb   :  { %15791 = vmatprep.subr.bf16.mxu0 %v16618_v0  ;;  %15797 = vmatprep.subr.bf16.mxu1 %v16618_v0 }
0x4ddc   :  { %14835 = vmatprep.mubr.msk.f32.mxu0 %vm16619_vm0, %v16620_v1  ;;  %14846 = vmatprep.mubr.msk.f32.mxu1 %vm16619_vm0, %v16620_v1 }
0x4dde   :  { %15793 = vmatpush3.bf16.msra.mxu0 %v18359_v28  ;;  %15799 = vmatpush3.bf16.msra.mxu1 %v18366_v25 }
0x4ddf   :  { %15800 = vmatprep.subr.bf16.mxu0 %v16618_v0  ;;  %15806 = vmatprep.subr.bf16.mxu1 %v16618_v0 }
0x4de1   :  { %14836 = vmatmul.mubr.msk.f32.vlgmr.msra.gmra.mrb[106].mxu0 %vm178_vm1, %v10335_v52  ;;  %14847 = vmatmul.mubr.msk.f32.vlgmr.msra.gmra.mrb[114].mxu1 %vm178_vm1, %v10335_v52 }
0x4de2   :  { %15802 = vmatpush3.bf16.msra.mxu0 %v18317_v13  ;;  %15808 = vmatpush3.bf16.msra.mxu1 %v18339_v60 }
0x4de3   :  { %15803 = vmatprep.subr.bf16.mxu0 %v16618_v0  ;;  %15809 = vmatprep.subr.bf16.mxu1 %v16618_v0 }
0x4de4   :  { %14857 = vmatprep.mubr.msk.f32.mxu0 %vm16619_vm0, %v16620_v1  ;;  %14868 = vmatprep.mubr.msk.f32.mxu1 %vm16619_vm0, %v16620_v1 }
0x4de6   :  { %15805 = vmatpush3.bf16.msra.mxu0 %v18330_v59  ;;  %15811 = vmatpush3.bf16.msra.mxu1 %v18344_v5 }
0x4de7   :  { %15812 = vmatprep.subr.bf16.mxu0 %v16618_v0  ;;  %15818 = vmatprep.subr.bf16.mxu1 %v16618_v0 }
0x4eac   :  { %v10404_v44 = vpop.f32.mrb[104].mxu0  ;;  %v10481_v24 = vpop.f32.mrb[112].mxu1 }
0x4ead   :  { %v14815_v36 = vpop.f32.mrb[105].mxu0  ;;  %v14826_v14 = vpop.f32.mrb[113].mxu1  ;;  %v10492_v20 = vrot.slane %v10481_v24, %v16812_v19  ;;  %v10408_v56 = vadd.f32 %v10404_v44, %v9579_v11 }
0x4eaf   :  { %v12870_v54 = vmul.f32 -1.442695, %v10408_v56 }
0x4eb4   :  { %v10569_v35 = vpop.f32.mrb[106].mxu0  ;;  %v10652_v2 = vpop.f32.mrb[114].mxu1 }
0x4eb5   :  { %v10580_v16 = vrot.slane %v10569_v35, %v16812_v19  ;;  %v14837_v55 = vpop.f32.mrb[107].mxu0  ;;  %v14848_v9 = vpop.f32.mrb[115].mxu1  ;;  %v10663_v23 = vrot.slane %v10652_v2, %v16812_v19 }
0x4eb7   :  { %10581 = vrot.lane.b32.xlu0 %v10580_v16, %s16622_s28 }
0x4ebb   :  { %10493 = vrot.lane.b32.xlu0 %v10492_v20, %s16623_s11 }
0x4ebf   :  { %10664 = vrot.lane.b32.xlu0 %v10663_v23, %s16624_s3 }
0x4f29   :  { %v10582_v33 = vpop.permute.xlu0 %10581 }
0x4f2a   :  { %v10584_v41 = vadd.f32 %v10582_v33, %v9579_v11 }
0x4f2c   :  { %16359 = vtanh.f32 %v10584_v41 }
0x4f2d   :  { %16361 = vpow2.f32 %v12870_v54  ;;  %v10494_v45 = vpop.permute.xlu0 %10493 }
0x4f2e   :  { %v10496_v29 = vadd.f32 %v10494_v45, %v9579_v11 }
0x4f30   :  { %v12872_v17 = vmul.f32 -1.442695, %v10496_v29 }
0x4f31   :  { %v10665_v40 = vpop.permute.xlu0 %10664 }
0x4f32   :  { %v10667_v8 = vadd.f32 %v10665_v40, %v9579_v11 }
0x4f34   :  { %v12875_v27 = vmul.f32 -1.442695, %v10667_v8 }
0x4f36   :  { %v16360_v43 = vpop.eup %16359 }
0x4f37   :  { %10676 = vrot.lane.b32.xlu1 %v16360_v43, %s16622_s28  ;;  %v16362_v49 = vpop.eup %16361 }
0x4f38   :  { %v10412_v38 = vadd.f32 1.0, %v16362_v49 }
0x4f3a   :  { %16363 = vrcp.f32 %v10412_v38 }
0x4f3b   :  { %16365 = vpow2.f32 %v12872_v17 }
0x4f44   :  { %v16364_v53 = vpop.eup %16363 }
0x4f45   :  { %v16366_v15 = vpop.eup %16365 }
0x4f46   :  { %v10500_v46 = vadd.f32 1.0, %v16366_v15 }
0x4f48   :  { %16367 = vrcp.f32 %v10500_v46 }
0x4f52   :  { %v16368_v3 = vpop.eup %16367 }
0x4f53   :  { %v10674_v21 = vmul.f32 %v16368_v3, %v18468_v63 }
0x4fa9   :  { %v10677_v10 = vpop.permute.xlu1 %10676 }
0x4faa   :  { %v10679_v42 = vmul.f32 %v16364_v53, %v10677_v10 }
0x4fac   :  { %10681 = vrot.lane.b32.xlu1 %v10679_v42, %s16623_s11 }
0x501e   :  { %v10682_v50 = vpop.permute.xlu1 %10681 }
0x501f   :  { %v18518_v61 = vadd.f32 %v10682_v50, %v10674_v21 }
0x5021   :  { %16369 = vtanh.f32 %v18518_v61 }
0x5022   :  { %16371 = vpow2.f32 %v12875_v27 }
0x502b   :  { %v16370_v39 = vpop.eup %16369 }
0x502c   :  { %10687 = vrot.lane.b32.xlu1 %v16370_v39, %s16622_s28  ;;  %v16372_v22 = vpop.eup %16371 }
0x502d   :  { %v10671_v37 = vadd.f32 1.0, %v16372_v22 }
0x502f   :  { %16373 = vrcp.f32 %v10671_v37 }
0x5039   :  { %v16374_v12 = vpop.eup %16373 }
0x509e   :  { %v10688_v26 = vpop.permute.xlu1 %10687 }
0x509f   :  { %v10690_v7 = vmul.f32 %v16374_v12, %v10688_v26 }
0x50a1   :  { %v10698_v63 = vrot.slane %v10690_v7, %v16812_v19 }
0x50a3   :  { %10699 = vrot.lane.b32.xlu0 %v10698_v63, %s16623_s11 }
0x5115   :  { %v10700_v31 = vpop.permute.xlu0 %10699 }
0x5116   :  { %14858 = vmatmul.mubr.msk.f32.vlgmr.msra.gmra.mrb[108].mxu0 %vm178_vm1, %v10700_v31  ;;  %14869 = vmatmul.mubr.msk.f32.vlgmr.msra.gmra.mrb[116].mxu1 %vm178_vm1, %v10700_v31 }
0x5117   :  { %15814 = vmatpush3.bf16.msra.mxu0 %v18349_v58  ;;  %15820 = vmatpush3.bf16.msra.mxu1 %v18354_v51 }
0x5118   :  { %15815 = vmatprep.subr.bf16.mxu0 %v16618_v0  ;;  %15821 = vmatprep.subr.bf16.mxu1 %v16618_v0 }
0x5119   :  { %14879 = vmatprep.mubr.msk.f32.mxu0 %vm16619_vm0, %v16620_v1  ;;  %14890 = vmatprep.mubr.msk.f32.mxu1 %vm16619_vm0, %v16620_v1 }
0x511b   :  { %15817 = vmatpush3.bf16.msra.mxu0 %v18359_v28  ;;  %15823 = vmatpush3.bf16.msra.mxu1 %v18366_v25 }
0x511c   :  { %15824 = vmatprep.subr.bf16.mxu0 %v16618_v0  ;;  %15830 = vmatprep.subr.bf16.mxu1 %v16618_v0 }
0x511e   :  { %14880 = vmatmul.mubr.msk.f32.vlgmr.msra.gmra.mrb[110].mxu0 %vm178_vm1, %v10700_v31  ;;  %14891 = vmatmul.mubr.msk.f32.vlgmr.msra.gmra.mrb[118].mxu1 %vm178_vm1, %v10700_v31 }
0x511f   :  { %15826 = vmatpush3.bf16.msra.mxu0 %v18317_v13  ;;  %15832 = vmatpush3.bf16.msra.mxu1 %v18339_v60 }
0x5120   :  { %15827 = vmatprep.subr.bf16.mxu0 %v16618_v0  ;;  %15833 = vmatprep.subr.bf16.mxu1 %v16618_v0 }
0x5121   :  { %14901 = vmatprep.mubr.msk.f32.mxu0 %vm16619_vm0, %v16620_v1  ;;  %14912 = vmatprep.mubr.msk.f32.mxu1 %vm16619_vm0, %v16620_v1 }
0x5123   :  { %15829 = vmatpush3.bf16.msra.mxu0 %v18330_v59  ;;  %15835 = vmatpush3.bf16.msra.mxu1 %v18344_v5 }
0x5124   :  { %15836 = vmatprep.subr.bf16.mxu0 %v16618_v0  ;;  %15842 = vmatprep.subr.bf16.mxu1 %v16618_v0 }
0x51e9   :  { %v10769_v52 = vpop.f32.mrb[108].mxu0  ;;  %v10846_v44 = vpop.f32.mrb[116].mxu1 }
0x51ea   :  { %v14859_v24 = vpop.f32.mrb[109].mxu0  ;;  %v14870_v36 = vpop.f32.mrb[117].mxu1  ;;  %v10857_v9 = vrot.slane %v10846_v44, %v16812_v19  ;;  %v10773_v41 = vadd.f32 %v10769_v52, %v18511_v57 }
0x51ec   :  { %v12877_v43 = vmul.f32 -1.442695, %v10773_v41 }
0x51f1   :  { %v10934_v14 = vpop.f32.mrb[110].mxu0  ;;  %v11017_v35 = vpop.f32.mrb[118].mxu1 }
0x51f2   :  { %v10945_v2 = vrot.slane %v10934_v14, %v16812_v19  ;;  %v14881_v16 = vpop.f32.mrb[111].mxu0  ;;  %v14892_v55 = vpop.f32.mrb[119].mxu1  ;;  %v11028_v20 = vrot.slane %v11017_v35, %v16812_v19 }
0x51f3   :  { %v9547_v55 = vcombine.high %v18400_v47, %v18400_v47 }
0x51f4   :  { %10946 = vrot.lane.b32.xlu1 %v10945_v2, %s16622_s28 }
0x51f8   :  { %10858 = vrot.lane.b32.xlu1 %v10857_v9, %s16623_s11  ;;  %v18608_v9 = vrot.slane %v9547_v55, %v16812_v19 }
0x51fc   :  { %11029 = vrot.lane.b32.xlu1 %v11028_v20, %s16624_s3  ;;  %v9563_v20 = vcombine.high %v18608_v9, %v18608_v9 }
0x5266   :  { %v10947_v23 = vpop.permute.xlu1 %10946 }
0x5267   :  { %v10949_v11 = vadd.f32 %v10947_v23, %v18511_v57 }
0x5269   :  { %16375 = vtanh.f32 %v10949_v11 }
0x526a   :  { %16377 = vpow2.f32 %v12877_v43  ;;  %v10859_v10 = vpop.permute.xlu1 %10858 }
0x526b   :  { %v10861_v42 = vadd.f32 %v10859_v10, %v18511_v57 }
0x526d   :  { %v12879_v45 = vmul.f32 -1.442695, %v10861_v42 }
0x526e   :  { %v11030_v39 = vpop.permute.xlu1 %11029 }
0x526f   :  { %v11032_v40 = vadd.f32 %v11030_v39, %v18511_v57 }
0x5271   :  { %v12882_v8 = vmul.f32 -1.442695, %v11032_v40 }
0x5273   :  { %v16376_v33 = vpop.eup %16375 }
0x5274   :  { %11041 = vrot.lane.b32.xlu0 %v16376_v33, %s16622_s28  ;;  %v16378_v56 = vpop.eup %16377 }
0x5275   :  { %v10777_v54 = vadd.f32 1.0, %v16378_v56 }
0x5277   :  { %16379 = vrcp.f32 %v10777_v54 }
0x5278   :  { %16381 = vpow2.f32 %v12879_v45 }
0x5281   :  { %v16380_v49 = vpop.eup %16379 }
0x5282   :  { %v16382_v29 = vpop.eup %16381 }
0x5283   :  { %v10865_v17 = vadd.f32 1.0, %v16382_v29 }
0x5285   :  { %16383 = vrcp.f32 %v10865_v17 }
0x528f   :  { %v16384_v15 = vpop.eup %16383 }
0x5290   :  { %v11039_v46 = vmul.f32 %v16384_v15, %v18518_v61 }
0x52e6   :  { %v11042_v38 = vpop.permute.xlu0 %11041 }
0x52e7   :  { %v11044_v53 = vmul.f32 %v16380_v49, %v11042_v38 }
0x52e9   :  { %11046 = vrot.lane.b32.xlu0 %v11044_v53, %s16623_s11 }
0x535b   :  { %v11047_v3 = vpop.permute.xlu0 %11046 }
0x535c   :  { %v18564_v21 = vadd.f32 %v11047_v3, %v11039_v46 }
0x535e   :  { %16385 = vtanh.f32 %v18564_v21 }
0x535f   :  { %16387 = vpow2.f32 %v12882_v8 }
0x5368   :  { %v16386_v50 = vpop.eup %16385 }
0x5369   :  { %11052 = vrot.lane.b32.xlu0 %v16386_v50, %s16622_s28  ;;  %v16388_v27 = vpop.eup %16387 }
0x536a   :  { %v11036_v22 = vadd.f32 1.0, %v16388_v27 }
0x536c   :  { %16389 = vrcp.f32 %v11036_v22 }
0x5376   :  { %v16390_v37 = vpop.eup %16389 }
0x53db   :  { %v11053_v12 = vpop.permute.xlu0 %11052 }
0x53dc   :  { %v11055_v26 = vmul.f32 %v16390_v37, %v11053_v12 }
0x53de   :  { %v11063_v61 = vrot.slane %v11055_v26, %v16812_v19 }
0x53e0   :  { %11064 = vrot.lane.b32.xlu1 %v11063_v61, %s16623_s11 }
0x5452   :  { %v11065_v7 = vpop.permute.xlu1 %11064 }
0x5453   :  { %14902 = vmatmul.mubr.msk.f32.vlgmr.msra.gmra.mrb[112].mxu0 %vm178_vm1, %v11065_v7  ;;  %14913 = vmatmul.mubr.msk.f32.vlgmr.msra.gmra.mrb[120].mxu1 %vm178_vm1, %v11065_v7 }
0x5454   :  { %15838 = vmatpush3.bf16.msra.mxu0 %v18349_v58  ;;  %15844 = vmatpush3.bf16.msra.mxu1 %v18354_v51 }
0x5455   :  { %15839 = vmatprep.subr.bf16.mxu0 %v16618_v0  ;;  %15845 = vmatprep.subr.bf16.mxu1 %v16618_v0 }
0x5456   :  { %14923 = vmatprep.mubr.msk.f32.mxu0 %vm16619_vm0, %v16620_v1  ;;  %14934 = vmatprep.mubr.msk.f32.mxu1 %vm16619_vm0, %v16620_v1 }
0x5458   :  { %15841 = vmatpush3.bf16.msra.mxu0 %v18359_v28  ;;  %15847 = vmatpush3.bf16.msra.mxu1 %v18366_v25 }
0x5459   :  { %15848 = vmatprep.subr.bf16.mxu0 %v16618_v0  ;;  %15854 = vmatprep.subr.bf16.mxu1 %v16618_v0 }
0x545b   :  { %14924 = vmatmul.mubr.msk.f32.vlgmr.msra.gmra.mrb[114].mxu0 %vm178_vm1, %v11065_v7  ;;  %14935 = vmatmul.mubr.msk.f32.vlgmr.msra.gmra.mrb[122].mxu1 %vm178_vm1, %v11065_v7 }
0x545c   :  { %15850 = vmatpush3.bf16.msra.mxu0 %v18317_v13  ;;  %15856 = vmatpush3.bf16.msra.mxu1 %v18339_v60 }
0x545d   :  { %15851 = vmatprep.subr.bf16.mxu0 %v16618_v0  ;;  %15857 = vmatprep.subr.bf16.mxu1 %v16618_v0 }
0x545e   :  { %14945 = vmatprep.mubr.msk.f32.mxu0 %vm16619_vm0, %v16620_v1  ;;  %14956 = vmatprep.mubr.msk.f32.mxu1 %vm16619_vm0, %v16620_v1 }
0x5460   :  { %15853 = vmatpush3.bf16.msra.mxu0 %v18330_v59  ;;  %15859 = vmatpush3.bf16.msra.mxu1 %v18344_v5 }
0x5461   :  { %15860 = vmatprep.subr.bf16.mxu0 %v16618_v0  ;;  %15866 = vmatprep.subr.bf16.mxu1 %v16618_v0 }
0x5526   :  { %v11134_v57 = vpop.f32.mrb[112].mxu0  ;;  %v11211_v63 = vpop.f32.mrb[120].mxu1 }
0x5527   :  { %v14903_v31 = vpop.f32.mrb[113].mxu0  ;;  %v14914_v52 = vpop.f32.mrb[121].mxu1  ;;  %v11222_v2 = vrot.slane %v11211_v63, %v16812_v19  ;;  %v11138_v41 = vadd.f32 %v11134_v57, %v9563_v20 }
0x5529   :  { %v12884_v43 = vmul.f32 -1.442695, %v11138_v41 }
0x552e   :  { %v11299_v44 = vpop.f32.mrb[114].mxu0  ;;  %v11382_v24 = vpop.f32.mrb[122].mxu1 }
0x552f   :  { %v11310_v36 = vrot.slane %v11299_v44, %v16812_v19  ;;  %v14925_v14 = vpop.f32.mrb[115].mxu0  ;;  %v14936_v35 = vpop.f32.mrb[123].mxu1  ;;  %v11393_v16 = vrot.slane %v11382_v24, %v16812_v19 }
0x5531   :  { %11311 = vrot.lane.b32.xlu0 %v11310_v36, %s16622_s28 }
0x5535   :  { %11223 = vrot.lane.b32.xlu0 %v11222_v2, %s16623_s11 }
0x5539   :  { %11394 = vrot.lane.b32.xlu0 %v11393_v16, %s16624_s3 }
0x55a3   :  { %v11312_v23 = vpop.permute.xlu0 %11311 }
0x55a4   :  { %v11314_v11 = vadd.f32 %v11312_v23, %v9563_v20 }
0x55a6   :  { %16391 = vtanh.f32 %v11314_v11 }
0x55a7   :  { %16393 = vpow2.f32 %v12884_v43  ;;  %v11224_v10 = vpop.permute.xlu0 %11223 }
0x55a8   :  { %v11226_v42 = vadd.f32 %v11224_v10, %v9563_v20 }
0x55aa   :  { %v12886_v45 = vmul.f32 -1.442695, %v11226_v42 }
0x55ab   :  { %v11395_v40 = vpop.permute.xlu0 %11394 }
0x55ac   :  { %v11397_v8 = vadd.f32 %v11395_v40, %v9563_v20 }
0x55ae   :  { %v12889_v27 = vmul.f32 -1.442695, %v11397_v8 }
0x55b0   :  { %v16392_v33 = vpop.eup %16391 }
0x55b1   :  { %11406 = vrot.lane.b32.xlu1 %v16392_v33, %s16622_s28  ;;  %v16394_v56 = vpop.eup %16393 }
0x55b2   :  { %v11142_v54 = vadd.f32 1.0, %v16394_v56 }
0x55b4   :  { %16395 = vrcp.f32 %v11142_v54 }
0x55b5   :  { %16397 = vpow2.f32 %v12886_v45 }
0x55be   :  { %v16396_v49 = vpop.eup %16395 }
0x55bf   :  { %v16398_v29 = vpop.eup %16397 }
0x55c0   :  { %v11230_v17 = vadd.f32 1.0, %v16398_v29 }
0x55c2   :  { %16399 = vrcp.f32 %v11230_v17 }
0x55cc   :  { %v16400_v15 = vpop.eup %16399 }
0x55cd   :  { %v11404_v46 = vmul.f32 %v16400_v15, %v18564_v21 }
0x5623   :  { %v11407_v38 = vpop.permute.xlu1 %11406 }
0x5624   :  { %v11409_v53 = vmul.f32 %v16396_v49, %v11407_v38 }
0x5626   :  { %11411 = vrot.lane.b32.xlu1 %v11409_v53, %s16623_s11 }
0x5698   :  { %v11412_v3 = vpop.permute.xlu1 %11411 }
0x5699   :  { %v18615_v50 = vadd.f32 %v11412_v3, %v11404_v46 }
0x569b   :  { %16401 = vtanh.f32 %v18615_v50 }
0x569c   :  { %16403 = vpow2.f32 %v12889_v27 }
0x56a5   :  { %v16402_v39 = vpop.eup %16401 }
0x56a6   :  { %11417 = vrot.lane.b32.xlu1 %v16402_v39, %s16622_s28  ;;  %v16404_v22 = vpop.eup %16403 }
0x56a7   :  { %v11401_v37 = vadd.f32 1.0, %v16404_v22 }
0x56a9   :  { %16405 = vrcp.f32 %v11401_v37 }
0x56b3   :  { %v16406_v12 = vpop.eup %16405 }
0x5718   :  { %v11418_v26 = vpop.permute.xlu1 %11417 }
0x5719   :  { %v11420_v61 = vmul.f32 %v16406_v12, %v11418_v26 }
0x571b   :  { %v11428_v21 = vrot.slane %v11420_v61, %v16812_v19 }
0x571d   :  { %11429 = vrot.lane.b32.xlu0 %v11428_v21, %s16623_s11 }
0x578f   :  { %v11430_v7 = vpop.permute.xlu0 %11429 }
0x5790   :  { %14946 = vmatmul.mubr.msk.f32.vlgmr.msra.gmra.mrb[116].mxu0 %vm178_vm1, %v11430_v7  ;;  %14957 = vmatmul.mubr.msk.f32.vlgmr.msra.gmra.mrb[124].mxu1 %vm178_vm1, %v11430_v7 }
0x5791   :  { %15862 = vmatpush3.bf16.msra.mxu0 %v18349_v58  ;;  %15868 = vmatpush3.bf16.msra.mxu1 %v18354_v51 }
0x5792   :  { %15863 = vmatprep.subr.bf16.mxu0 %v16618_v0  ;;  %15869 = vmatprep.subr.bf16.mxu1 %v16618_v0 }
0x5793   :  { %14967 = vmatprep.mubr.msk.f32.mxu0 %vm16619_vm0, %v16620_v1  ;;  %14978 = vmatprep.mubr.msk.f32.mxu1 %vm16619_vm0, %v16620_v1 }
0x5795   :  { %15865 = vmatpush3.bf16.msra.mxu0 %v18359_v28  ;;  %15871 = vmatpush3.bf16.msra.mxu1 %v18366_v25 }
0x5796   :  { %15872 = vmatprep.subr.bf16.mxu0 %v16618_v0  ;;  %15878 = vmatprep.subr.bf16.mxu1 %v16618_v0 }
0x5798   :  { %14968 = vmatmul.mubr.msk.f32.vlgmr.msra.gmra.mrb[118].mxu0 %vm178_vm1, %v11430_v7  ;;  %14979 = vmatmul.mubr.msk.f32.vlgmr.msra.gmra.mrb[126].mxu1 %vm178_vm1, %v11430_v7 }
0x5799   :  { %15874 = vmatpush3.bf16.msra.mxu0 %v18317_v13  ;;  %15880 = vmatpush3.bf16.msra.mxu1 %v18339_v60 }
0x579a   :  { %15875 = vmatprep.subr.bf16.mxu0 %v16618_v0  ;;  %15881 = vmatprep.subr.bf16.mxu1 %v16618_v0 }
0x579b   :  { %14989 = vmatprep.mubr.msk.f32.mxu0 %vm16619_vm0, %v16620_v1  ;;  %15000 = vmatprep.mubr.msk.f32.mxu1 %vm16619_vm0, %v16620_v1 }
0x579d   :  { %15877 = vmatpush3.bf16.msra.mxu0 %v18330_v59  ;;  %15883 = vmatpush3.bf16.msra.mxu1 %v18344_v5 }
0x579e   :  { %15884 = vmatprep.subr.bf16.mxu0 %v16618_v0  ;;  %15890 = vmatprep.subr.bf16.mxu1 %v16618_v0 }
0x5863   :  { %v11499_v57 = vpop.f32.mrb[116].mxu0  ;;  %v11576_v63 = vpop.f32.mrb[124].mxu1 }
0x5864   :  { %v14947_v31 = vpop.f32.mrb[117].mxu0  ;;  %v14958_v52 = vpop.f32.mrb[125].mxu1  ;;  %v11587_v2 = vrot.slane %v11576_v63, %v16812_v19  ;;  %v11503_v11 = vadd.f32 %v11499_v57, %v18608_v9 }
0x5866   :  { %v12891_v33 = vmul.f32 -1.442695, %v11503_v11 }
0x586b   :  { %v11664_v44 = vpop.f32.mrb[118].mxu0  ;;  %v11747_v24 = vpop.f32.mrb[126].mxu1 }
0x586c   :  { %v11675_v36 = vrot.slane %v11664_v44, %v16812_v19  ;;  %v14969_v14 = vpop.f32.mrb[119].mxu0  ;;  %v14980_v35 = vpop.f32.mrb[127].mxu1  ;;  %v11758_v16 = vrot.slane %v11747_v24, %v16812_v19  ;;  %v18704_v44 = vrot.slane %v18400_v47, %v16812_v19 }
0x586e   :  { %11676 = vrot.lane.b32.xlu1 %v11675_v36, %s16622_s28  ;;  %v9562_v24 = vcombine.high %v18704_v44, %v18704_v44 }
0x5872   :  { %11588 = vrot.lane.b32.xlu1 %v11587_v2, %s16623_s11 }
0x5876   :  { %11759 = vrot.lane.b32.xlu1 %v11758_v16, %s16624_s3 }
0x58e0   :  { %v11677_v55 = vpop.permute.xlu1 %11676 }
0x58e1   :  { %v11679_v20 = vadd.f32 %v11677_v55, %v18608_v9 }
0x58e3   :  { %16407 = vtanh.f32 %v11679_v20 }
0x58e4   :  { %16409 = vpow2.f32 %v12891_v33  ;;  %v11589_v38 = vpop.permute.xlu1 %11588 }
0x58e5   :  { %v11591_v53 = vadd.f32 %v11589_v38, %v18608_v9 }
0x58e7   :  { %v12893_v10 = vmul.f32 -1.442695, %v11591_v53 }
0x58e8   :  { %v11760_v39 = vpop.permute.xlu1 %11759 }
0x58e9   :  { %v11762_v40 = vadd.f32 %v11760_v39, %v18608_v9 }
0x58eb   :  { %v12896_v8 = vmul.f32 -1.442695, %v11762_v40 }
0x58ed   :  { %v16408_v23 = vpop.eup %16407 }
0x58ee   :  { %11771 = vrot.lane.b32.xlu0 %v16408_v23, %s16622_s28  ;;  %v16410_v41 = vpop.eup %16409 }
0x58ef   :  { %v11507_v43 = vadd.f32 1.0, %v16410_v41 }
0x58f1   :  { %16411 = vrcp.f32 %v11507_v43 }
0x58f2   :  { %16413 = vpow2.f32 %v12893_v10 }
0x58fb   :  { %v16412_v56 = vpop.eup %16411 }
0x58fc   :  { %v16414_v42 = vpop.eup %16413 }
0x58fd   :  { %v11595_v45 = vadd.f32 1.0, %v16414_v42 }
0x58ff   :  { %16415 = vrcp.f32 %v11595_v45 }
0x5909   :  { %v16416_v29 = vpop.eup %16415 }
0x590a   :  { %v11769_v17 = vmul.f32 %v16416_v29, %v18615_v50 }
0x5960   :  { %v11772_v54 = vpop.permute.xlu0 %11771 }
0x5961   :  { %v11774_v49 = vmul.f32 %v16412_v56, %v11772_v54 }
0x5963   :  { %11776 = vrot.lane.b32.xlu0 %v11774_v49, %s16623_s11 }
0x59d5   :  { %v11777_v15 = vpop.permute.xlu0 %11776 }
0x59d6   :  { %v18661_v46 = vadd.f32 %v11777_v15, %v11769_v17 }
0x59d8   :  { %16417 = vtanh.f32 %v18661_v46 }
0x59d9   :  { %16419 = vpow2.f32 %v12896_v8 }
0x59e2   :  { %v16418_v3 = vpop.eup %16417 }
0x59e3   :  { %11782 = vrot.lane.b32.xlu0 %v16418_v3, %s16622_s28  ;;  %v16420_v27 = vpop.eup %16419 }
0x59e4   :  { %v11766_v22 = vadd.f32 1.0, %v16420_v27  ;;  %v9344_v27 = vrot.slane %v18393_v62, %v16812_v19 }
0x59e6   :  { %16421 = vrcp.f32 %v11766_v22 }
0x59f0   :  { %v16422_v37 = vpop.eup %16421 }
0x5a55   :  { %v11783_v12 = vpop.permute.xlu0 %11782 }
0x5a56   :  { %v11785_v26 = vmul.f32 %v16422_v37, %v11783_v12  ;;  %v6519_v37 = vcombine.high %v18274_v4, %v18274_v4 }
0x5a58   :  { %v11793_v50 = vrot.slane %v11785_v26, %v16812_v19 }
0x5a5a   :  { %11794 = vrot.lane.b32.xlu1 %v11793_v50, %s16623_s11 }
0x5acc   :  { %v11795_v61 = vpop.permute.xlu1 %11794 }
0x5acd   :  { %14990 = vmatmul.mubr.msk.f32.vlgmr.msra.gmra.mrb[120].mxu0 %vm178_vm1, %v11795_v61  ;;  %15001 = vmatmul.mubr.msk.f32.vlgmr.msra.gmra.mrb[128].mxu1 %vm178_vm1, %v11795_v61 }
0x5ace   :  { %15886 = vmatpush3.bf16.msra.mxu0 %v18349_v58  ;;  %15892 = vmatpush3.bf16.msra.mxu1 %v18354_v51 }
0x5acf   :  { %15887 = vmatprep.subr.bf16.mxu0 %v16618_v0  ;;  %15893 = vmatprep.subr.bf16.mxu1 %v16618_v0 }
0x5ad0   :  { %15011 = vmatprep.mubr.msk.f32.mxu0 %vm16619_vm0, %v16620_v1  ;;  %15022 = vmatprep.mubr.msk.f32.mxu1 %vm16619_vm0, %v16620_v1 }
0x5ad2   :  { %15889 = vmatpush3.bf16.msra.mxu0 %v18359_v28  ;;  %15895 = vmatpush3.bf16.msra.mxu1 %v18366_v25 }
0x5ad3   :  { %15896 = vmatprep.subr.bf16.mxu0 %v16618_v0  ;;  %15902 = vmatprep.subr.bf16.mxu1 %v16618_v0 }
0x5ad5   :  { %15012 = vmatmul.mubr.msk.f32.vlgmr.msra.gmra.mrb[122].mxu0 %vm178_vm1, %v11795_v61  ;;  %15023 = vmatmul.mubr.msk.f32.vlgmr.msra.gmra.mrb[130].mxu1 %vm178_vm1, %v11795_v61 }
0x5ad6   :  { %15898 = vmatpush3.bf16.msra.mxu0 %v18317_v13  ;;  %15904 = vmatpush3.bf16.msra.mxu1 %v18339_v60 }
0x5ad7   :  { %15899 = vmatprep.subr.bf16.mxu0 %v16618_v0  ;;  %15905 = vmatprep.subr.bf16.mxu1 %v16618_v0 }
0x5ad8   :  { %15033 = vmatprep.mubr.msk.f32.mxu0 %vm16619_vm0, %v16620_v1  ;;  %15044 = vmatprep.mubr.msk.f32.mxu1 %vm16619_vm0, %v16620_v1 }
0x5ada   :  { %15901 = vmatpush3.bf16.msra.mxu0 %v18330_v59  ;;  %15907 = vmatpush3.bf16.msra.mxu1 %v18344_v5 }
0x5adb   :  { %15908 = vmatprep.subr.bf16.mxu0 %v16618_v0  ;;  %15914 = vmatprep.subr.bf16.mxu1 %v16618_v0 }
0x5ba0   :  { %v11864_v13 = vpop.f32.mrb[120].mxu0  ;;  %v11941_v60 = vpop.f32.mrb[128].mxu1 }
0x5ba1   :  { %v14991_v9 = vpop.f32.mrb[121].mxu0  ;;  %v15002_v21 = vpop.f32.mrb[129].mxu1  ;;  %v11952_v59 = vrot.slane %v11941_v60, %v16812_v19  ;;  %v11868_v2 = vadd.f32 %v11864_v13, %v9562_v24 }
0x5ba3   :  { %v12898_v16 = vmul.f32 -1.442695, %v11868_v2 }
0x5ba8   :  { %v12029_v7 = vpop.f32.mrb[122].mxu0  ;;  %v12112_v57 = vpop.f32.mrb[130].mxu1 }
0x5ba9   :  { %v12040_v63 = vrot.slane %v12029_v7, %v16812_v19  ;;  %v15013_v31 = vpop.f32.mrb[123].mxu0  ;;  %v15024_v52 = vpop.f32.mrb[131].mxu1  ;;  %v12123_v5 = vrot.slane %v12112_v57, %v16812_v19 }
0x5bab   :  { %12041 = vrot.lane.b32.xlu0 %v12040_v63, %s16622_s28 }
0x5baf   :  { %11953 = vrot.lane.b32.xlu0 %v11952_v59, %s16623_s11 }
0x5bb3   :  { %12124 = vrot.lane.b32.xlu0 %v12123_v5, %s16624_s3 }
0x5c1d   :  { %v12042_v36 = vpop.permute.xlu0 %12041 }
0x5c1e   :  { %v12044_v14 = vadd.f32 %v12042_v36, %v9562_v24 }
0x5c20   :  { %16423 = vtanh.f32 %v12044_v14 }
0x5c21   :  { %16425 = vpow2.f32 %v12898_v16  ;;  %v11954_v47 = vpop.permute.xlu0 %11953 }
0x5c22   :  { %v11956_v41 = vadd.f32 %v11954_v47, %v9562_v24 }
0x5c24   :  { %v12900_v43 = vmul.f32 -1.442695, %v11956_v41 }
0x5c25   :  { %v12125_v45 = vpop.permute.xlu0 %12124 }
0x5c26   :  { %v12127_v29 = vadd.f32 %v12125_v45, %v9562_v24 }
0x5c28   :  { %v12903_v17 = vmul.f32 -1.442695, %v12127_v29 }
0x5c2a   :  { %v16424_v35 = vpop.eup %16423 }
0x5c2b   :  { %12136 = vrot.lane.b32.xlu1 %v16424_v35, %s16622_s28  ;;  %v16426_v55 = vpop.eup %16425 }
0x5c2c   :  { %v11872_v20 = vadd.f32 1.0, %v16426_v55 }
0x5c2e   :  { %16427 = vrcp.f32 %v11872_v20 }
0x5c2f   :  { %16429 = vpow2.f32 %v12900_v43 }
0x5c38   :  { %v16428_v23 = vpop.eup %16427 }
0x5c39   :  { %v16430_v56 = vpop.eup %16429 }
0x5c3a   :  { %v11960_v54 = vadd.f32 1.0, %v16430_v56 }
0x5c3c   :  { %16431 = vrcp.f32 %v11960_v54 }
0x5c46   :  { %v16432_v49 = vpop.eup %16431 }
0x5c47   :  { %v12134_v38 = vmul.f32 %v16432_v49, %v18661_v46 }
0x5c9d   :  { %v12137_v11 = vpop.permute.xlu1 %12136 }
0x5c9e   :  { %v12139_v33 = vmul.f32 %v16428_v23, %v12137_v11 }
0x5ca0   :  { %12141 = vrot.lane.b32.xlu1 %v12139_v33, %s16623_s11 }
0x5d12   :  { %v12142_v53 = vpop.permute.xlu1 %12141 }
0x5d13   :  { %v18711_v10 = vadd.f32 %v12142_v53, %v12134_v38 }
0x5d15   :  { %16433 = vtanh.f32 %v18711_v10 }
0x5d16   :  { %16435 = vpow2.f32 %v12903_v17 }
0x5d1f   :  { %v16434_v42 = vpop.eup %16433 }
0x5d20   :  { %12147 = vrot.lane.b32.xlu1 %v16434_v42, %s16622_s28  ;;  %v16436_v15 = vpop.eup %16435 }
0x5d21   :  { %v12131_v3 = vadd.f32 1.0, %v16436_v15 }
0x5d23   :  { %16437 = vrcp.f32 %v12131_v3 }
0x5d2d   :  { %v16438_v39 = vpop.eup %16437 }
0x5d92   :  { %v12148_v40 = vpop.permute.xlu1 %12147 }
0x5d93   :  { %v12150_v8 = vmul.f32 %v16438_v39, %v12148_v40 }
0x5d95   :  { %v12158_v46 = vrot.slane %v12150_v8, %v16812_v19 }
0x5d97   :  { %12159 = vrot.lane.b32.xlu0 %v12158_v46, %s16623_s11 }
0x5d9b   :  { %9345 = vrot.lane.b32.xlu0 %v9344_v27, %s16622_s28 }
0x5e09   :  { %v12160_v22 = vpop.permute.xlu0 %12159 }
0x5e0a   :  { %15034 = vmatmul.mubr.msk.f32.vlgmr.msra.gmra.mrb[124].mxu0 %vm178_vm1, %v12160_v22  ;;  %15045 = vmatmul.mubr.msk.f32.vlgmr.msra.gmra.mrb[132].mxu1 %vm178_vm1, %v12160_v22 }
0x5e0b   :  { %15910 = vmatpush3.bf16.msra.mxu0 %v18349_v58  ;;  %15916 = vmatpush3.bf16.msra.mxu1 %v18354_v51  ;;  %v9256_v58 = vrot.slane %v18391_v34, %v16812_v19  ;;  %v9172_v51 = vadd.f32 %v18389_v18, %v6519_v37 }
0x5e0c   :  { %15911 = vmatprep.subr.bf16.mxu0 %v16618_v0  ;;  %15917 = vmatprep.subr.bf16.mxu1 %v16618_v0 }
0x5e0d   :  { %v9346_v12 = vpop.permute.xlu0 %9345  ;;  %15055 = vmatprep.mubr.msk.f32.mxu0 %vm16619_vm0, %v16620_v1  ;;  %15066 = vmatprep.mubr.msk.f32.mxu1 %vm16619_vm0, %v16620_v1 }
0x5e0e   :  { %v9348_v62 = vadd.f32 %v9346_v12, %v6519_v37 }
0x5e0f   :  { %15913 = vmatpush3.bf16.msra.mxu0 %v18359_v28  ;;  %15919 = vmatpush3.bf16.msra.mxu1 %v18366_v25  ;;  %v12850_v28 = vmul.f32 -1.442695, %v9172_v51  ;;  %v12544_v51 = vld [vmem:[%s18852_s13 + $0x8] sm:$0xff] }
0x5e10   :  { %16439 = vtanh.f32 %v9348_v62  ;;  %15920 = vmatprep.subr.bf16.mxu0 %v16618_v0 }
0x5e11   :  { %16441 = vpow2.f32 %v12850_v28  ;;  %v12545_v28 = vld [vmem:[%s18852_s13 + $0x10] sm:$0xff] }
0x5e12   :  { %15056 = vmatmul.mubr.msk.f32.vlgmr.msra.gmra.mrb[126].mxu0 %vm178_vm1, %v12160_v22  ;;  %15067 = vmatmul.mubr.msk.f32.vlgmr.msra.gmra.mrb[134].mxu1 %vm178_vm1, %v12160_v22 }
0x5e13   :  { %15101 = vmatprep.mubr.msk.f32.mxu0 %vm16619_vm0, %v16620_v1  ;;  %v9427_v1 = vrot.slane %v18395_v48, %v16812_v19 }
0x5e1a   :  { %v16440_v4 = vpop.eup %16439 }
0x5e1b   :  { %9440 = vrot.lane.b32.xlu0 %v16440_v4, %s16622_s28  ;;  %v16442_v25 = vpop.eup %16441 }
0x5e1c   :  { %v9176_v26 = vadd.f32 1.0, %v16442_v25 }
0x5e1e   :  { %16443 = vrcp.f32 %v9176_v26 }
0x5e1f   :  { %9257 = vrot.lane.b32.xlu0 %v9256_v58, %s16623_s11  ;;  %v12543_v58 = vld [vmem:[%s18852_s13] sm:$0xff] }
0x5e20   :  { %v15921_v25 = vpack.c.bf16 %v12544_v51, %v12543_v58 }
0x5e22   :  { %15922 = vmatpush3.bf16.msra.mxu0 %v15921_v25 }
0x5e23   :  { %15923 = vmatprep.subr.bf16.mxu0 %v16618_v0 }
0x5e28   :  { %v16444_v50 = vpop.eup %16443 }
0x5e8d   :  { %v9441_v61 = vpop.permute.xlu0 %9440 }
0x5e8e   :  { %v9443_v13 = vmul.f32 %v16444_v50, %v9441_v61  ;;  %v12547_v50 = vld [vmem:[%s18852_s13 + $0x20] sm:$0xff]  ;;  %v12548_v61 = vld [vmem:[%s18852_s13 + $0x28] sm:$0xff] }
0x5e90   :  { %9445 = vrot.lane.b32.xlu0 %v9443_v13, %s16623_s11  ;;  %v15927_v13 = vpack.c.bf16 %v12548_v61, %v12547_v50 }
0x5e91   :  { %v9258_v34 = vpop.permute.xlu0 %9257 }
0x5e92   :  { %v9260_v60 = vadd.f32 %v9258_v34, %v6519_v37  ;;  %v12549_v34 = vld [vmem:[%s18852_s13 + $0x30] sm:$0xff] }
0x5e94   :  { %9428 = vrot.lane.b32.xlu0 %v9427_v1, %s16624_s3  ;;  %v12852_v57 = vmul.f32 -1.442695, %v9260_v60  ;;  %v12550_v60 = vld [vmem:[%s18852_s13 + $0x38] sm:$0xff] }
0x5e96   :  { %16445 = vpow2.f32 %v12852_v57  ;;  %v12553_v57 = vld [vmem:[%s18852_s13 + $0x50] sm:$0xff] }
0x5ea0   :  { %v16446_v24 = vpop.eup %16445 }
0x5ea1   :  { %v9264_v48 = vadd.f32 1.0, %v16446_v24 }
0x5ea3   :  { %16447 = vrcp.f32 %v9264_v48 }
0x5ead   :  { %v16448_v36 = vpop.eup %16447 }
0x5eae   :  { %v9438_v14 = vmul.f32 %v16448_v36, %v18282_v32 }
0x5edd   :  { %v12229_v9 = vpop.f32.mrb[124].mxu0  ;;  %v12306_v21 = vpop.f32.mrb[132].mxu1 }
0x5ede   :  { %v15035_v18 = vpop.f32.mrb[125].mxu0  ;;  %v15046_v7 = vpop.f32.mrb[133].mxu1  ;;  %v12317_v41 = vrot.slane %v12306_v21, %v16812_v19  ;;  %v12233_v53 = vadd.f32 %v12229_v9, %v18704_v44  ;;  %v15930_v9 = vpack.c.bf16 %v12550_v60, %v12549_v34  ;;  %v12551_v21 = vld [vmem:[%s18852_s13 + $0x40] sm:$0xff] }
0x5edf   :  { %v12552_v18 = vld [vmem:[%s18852_s13 + $0x48] sm:$0xff] }
0x5ee0   :  { %v12905_v42 = vmul.f32 -1.442695, %v12233_v53  ;;  %v15933_v7 = vpack.c.bf16 %v12552_v18, %v12551_v21 }
0x5ee5   :  { %v12394_v63 = vpop.f32.mrb[126].mxu0  ;;  %v12477_v31 = vpop.f32.mrb[134].mxu1 }
0x5ee6   :  { %v12405_v52 = vrot.slane %v12394_v63, %v16812_v19  ;;  %v15057_v59 = vpop.f32.mrb[127].mxu0  ;;  %v15068_v5 = vpop.f32.mrb[135].mxu1  ;;  %v12488_v39 = vrot.slane %v12477_v31, %v16812_v19  ;;  %v12554_v63 = vld [vmem:[%s18852_s13 + $0x58] sm:$0xff] }
0x5ee7   :  { %v15936_v31 = vpack.c.bf16 %v12554_v63, %v12553_v57  ;;  %v12556_v59 = vld [vmem:[%s18852_s13 + $0x68] sm:$0xff] }
0x5ee8   :  { %12406 = vrot.lane.b32.xlu1 %v12405_v52, %s16622_s28  ;;  %v12555_v52 = vld [vmem:[%s18852_s13 + $0x60] sm:$0xff] }
0x5ee9   :  { %v15939_v5 = vpack.c.bf16 %v12556_v59, %v12555_v52 }
0x5f02   :  { %v9446_v35 = vpop.permute.xlu0 %9445 }
0x5f03   :  { %v9448_v2 = vadd.f32 %v9446_v35, %v9438_v14 }
0x5f05   :  { %16449 = vtanh.f32 %v9448_v2  ;;  %v12557_v2 = vld [vmem:[%s18852_s13 + $0x70] sm:$0xff] }
0x5f06   :  { %v9429_v23 = vpop.permute.xlu0 %9428 }
0x5f07   :  { %v9431_v11 = vadd.f32 %v9429_v23, %v6519_v37 }
0x5f09   :  { %v12855_v33 = vmul.f32 -1.442695, %v9431_v11 }
0x5f0f   :  { %v16450_v16 = vpop.eup %16449 }
0x5f10   :  { %9451 = vrot.lane.b32.xlu0 %v16450_v16, %s16622_s28  ;;  %v12558_v16 = vld [vmem:[%s18852_s13 + $0x78] sm:$0xff] }
0x5f5a   :  { %v12407_v55 = vpop.permute.xlu1 %12406 }
0x5f5b   :  { %v12409_v20 = vadd.f32 %v12407_v55, %v18704_v44  ;;  %v15942_v55 = vpack.c.bf16 %v12558_v16, %v12557_v2 }
0x5f5d   :  { %16451 = vtanh.f32 %v12409_v20 }
0x5f5e   :  { %16453 = vpow2.f32 %v12855_v33 }
0x5f67   :  { %v16452_v47 = vpop.eup %16451 }
0x5f68   :  { %12501 = vrot.lane.b32.xlu1 %v16452_v47, %s16622_s28  ;;  %v16454_v32 = vpop.eup %16453 }
0x5f69   :  { %v9435_v43 = vadd.f32 1.0, %v16454_v32 }
0x5f6b   :  { %16455 = vrcp.f32 %v9435_v43  ;;  %v12911_v43 = vld [vmem:[#allocation10] ss:$0 sm:$0xff] }
0x5f6c   :  { %12318 = vrot.lane.b32.xlu1 %v12317_v41, %s16623_s11  ;;  %16457 = vpow2.f32 %v12905_v42 }
0x5f75   :  { %v16456_v56 = vpop.eup %16455 }
0x5f76   :  { %v16458_v45 = vpop.eup %16457 }
0x5f77   :  { %v12237_v29 = vadd.f32 1.0, %v16458_v45 }
0x5f79   :  { %16459 = vrcp.f32 %v12237_v29 }
0x5f82   :  { %v9452_v54 = vpop.permute.xlu0 %9451 }
0x5f83   :  { %v9454_v49 = vmul.f32 %v16456_v56, %v9452_v54  ;;  %v16460_v17 = vpop.eup %16459 }
0x5f85   :  { %v12535_v38 = vrot.slane %v9454_v49, %v16812_v19 }
0x5f87   :  { %12536 = vrot.lane.b32.xlu0 %v12535_v38, %s16624_s3 }
0x5fda   :  { %v12502_v15 = vpop.permute.xlu1 %12501 }
0x5fdb   :  { %v12504_v3 = vmul.f32 %v16460_v17, %v12502_v15 }
0x5fdd   :  { %12506 = vrot.lane.b32.xlu1 %v12504_v3, %s16623_s11 }
0x5fde   :  { %v12319_v40 = vpop.permute.xlu1 %12318 }
0x5fdf   :  { %v12321_v8 = vadd.f32 %v12319_v40, %v18704_v44 }
0x5fe1   :  { %12489 = vrot.lane.b32.xlu1 %v12488_v39, %s16624_s3  ;;  %v12907_v46 = vmul.f32 -1.442695, %v12321_v8 }
0x5fe3   :  { %16461 = vpow2.f32 %v12907_v46 }
0x5fed   :  { %v16462_v27 = vpop.eup %16461 }
0x5fee   :  { %v12325_v22 = vadd.f32 1.0, %v16462_v27 }
0x5ff0   :  { %16463 = vrcp.f32 %v12325_v22 }
0x5ff9   :  { %v12537_v33 = vpop.permute.xlu0 %12536 }
0x5ffa   :  { %v16464_v37 = vpop.eup %16463 }
0x5ffb   :  { %v12499_v12 = vmul.f32 %v16464_v37, %v18711_v10  ;;  %v12546_v10 = vld [vmem:[%s18852_s13 + $0x18] sm:$0xff]  ;;  %s16625_s13 = smov [#allocation11]  }
0x5ffc   :  { %v15924_v26 = vpack.c.bf16 %v12546_v10, %v12545_v28  ;;  %s12644_s2 = sshll.u32 %s16625_s13, 4  ;;  %s12645_s2 = int_to_ptr.vmem [resolvable:$true] %s12644_s2 }
0x5ffd   :  { %p16586_p13 = scmp.lt.s32.totalorder %s12645_s2, %s12645_s2 }
0x5ffe   :  { %15925 = vmatpush3.bf16.msra.mxu0 %v15924_v26 }
0x5fff   :  { %15926 = vmatprep.subr.bf16.mxu0 %v16618_v0 }
0x6002   :  { %15928 = vmatpush3.bf16.msra.mxu0 %v15927_v13 }
0x6003   :  { %15929 = vmatprep.subr.bf16.mxu0 %v16618_v0 }
0x6006   :  { %15931 = vmatpush3.bf16.msra.mxu0 %v15930_v9 }
0x6007   :  { %15932 = vmatprep.subr.bf16.mxu0 %v16618_v0 }
0x600a   :  { %15934 = vmatpush3.bf16.msra.mxu0 %v15933_v7 }
0x600b   :  { %15935 = vmatprep.subr.bf16.mxu0 %v16618_v0 }
0x600e   :  { %15937 = vmatpush3.bf16.msra.mxu0 %v15936_v31 }
0x600f   :  { %15938 = vmatprep.subr.bf16.mxu0 %v16618_v0 }
0x6012   :  { %15940 = vmatpush3.bf16.msra.mxu0 %v15939_v5 }
0x6013   :  { %15941 = vmatprep.subr.bf16.mxu0 %v16618_v0 }
0x6016   :  { %15943 = vmatpush3.bf16.msra.mxu0 %v15942_v55 }
0x604f   :  { %v12507_v62 = vpop.permute.xlu1 %12506 }
0x6050   :  { %v12509_v4 = vadd.f32 %v12507_v62, %v12499_v12 }
0x6052   :  { %16465 = vtanh.f32 %v12509_v4 }
0x6053   :  { %v12490_v24 = vpop.permute.xlu1 %12489 }
0x6054   :  { %v12492_v48 = vadd.f32 %v12490_v24, %v18704_v44 }
0x6056   :  { %v12910_v36 = vmul.f32 -1.442695, %v12492_v48 }
0x6058   :  { %16467 = vpow2.f32 %v12910_v36 }
0x605c   :  { %v16466_v1 = vpop.eup %16465 }
0x605d   :  { %12512 = vrot.lane.b32.xlu1 %v16466_v1, %s16622_s28 }
0x6062   :  { %v16468_v14 = vpop.eup %16467 }
0x6063   :  { %v12496_v35 = vadd.f32 1.0, %v16468_v14 }
0x6065   :  { %16469 = vrcp.f32 %v12496_v35 }
0x606f   :  { %v16470_v20 = vpop.eup %16469 }
0x60cf   :  { %v12513_v0 = vpop.permute.xlu1 %12512 }
0x60d0   :  { %v12515_v23 = vmul.f32 %v16470_v20, %v12513_v0 }
0x60d2   :  { %v12524_v44 = vrot.slane %v12515_v23, %v16812_v19 }
0x60d4   :  { %12525 = vrot.lane.b32.xlu1 %v12524_v44, %s16622_s28  ;;  %s16581_s28 = scalar_lea.vmem %s12645_s2, 32 }
0x60d5   :  { %p16582_p12 = scmp.ne.s32.totalorder %s12645_s2, %s16581_s28  ;;  %p16587_p0 = scmp.lt.s32.totalorder %s16581_s28, %s16581_s28 }
0x60d7   :  { %p16588_p1 = por %p16587_p0, %p16586_p13 }
0x60d9   :  { %p16589_p2 = pnand %p16588_p1, %p16582_p12 }
0x6146   :  { %v12526_v11 = vpop.permute.xlu1 %12525 }
0x6147   :  { %v12539_v47 = vsel %vm178_vm1, %v17993_v6, %v12526_v11 }
0x6148   :  { %v12540_v41 = vsel %vm6404_vm2, %v12539_v47, %v12537_v33 }
0x6149   :  { %v12542_v32 = vsel %vm12541_vm3, %v12540_v41, %v18423_v30 }
0x614a   :  { %15102 = vmatmul.mubr.f32.vlgmr.msra.gmra.mrb[128].mxu0 %v12542_v32 }
0x621d   :  { %v12632_v56 = vpop.f32.mrb[128].mxu0 }
0x621e   :  { %v12633_v54 = vadd.f32 %v12911_v43, %v12632_v56  ;;  %v15103_v19 = vpop.f32.mrb[129].mxu0 }
0x6220   :  { %12637 = vst.msk [vmem:[#allocation11] sm:$0x3] %vm12636_vm4, %v12633_v54 }
0x6221   :  { %16592 = shalt.err (!%p16589_p2)
}
0x6222   :  { %s16593_s0 = scalar_lea.hbm %s18854_s15, 32 }
0x6223   :  { %p16594_p3 = scmp.ne.s32.totalorder %s18854_s15, %s16593_s0  ;;  %p16597_p4 = scmp.lt.u32.totalorder %s16593_s0, %s18854_s15 }
0x6225   :  { %p16599_p5 = pnand %p16597_p4, %p16594_p3 }
0x6227   :  { %16602 = shalt.err (!%p16599_p5)
}
0x6228   :  { %12647 = dma.vmem_to_hbm [thread:$0]  %s12645_s2, 32, %s18854_s15, [#allocation4]  }
0x6229   :  { %16609 = dma.done.wait [#allocation4], 32  }
0x622a   :  { %16610 = vsyncadd [#allocation4], 4294967264 }
0x622b   :  { %12651 = vsyncpa [#allocation3], 1 }
0x622c   :  { %12652 = vsyncpa [#allocation6], 1 }
0x622d   :  { %12653 = vsyncpa [#allocation9], 1 }
0x622e   :  { %12654 = vsyncpa [#allocation4], 1 }

</bundles_post_ra>
